<compile_context>
chip_gen: v6e
topology: v6e:2x2x1
jax: 0.10.0
libtpu: 0.0.40
codegen_flags: <defaults>
</compile_context>

<pallas_src>
import math
from functools import partial

import jax
import jax.numpy as jnp
from jax.experimental import pallas as pl
from jax.experimental.pallas import tpu as pltpu


def _round_up(v, m):
    return ((v + m - 1) // m) * m


def _make_kernel(*, M, RF, Wpad, Cin, TH, Wb, TC, plan):
    """One grid step: polyphase conv of a (TH x W) spatial tile.

    plan: tuple of ((a, b), dots) output slots, where dots is a tuple of
    (flat_input_shift, weight_row_index) pairs.  All indices are static.
    """

    def kernel(x_ref, w_ref, b_ref, o_ref):
        # Sublane-aligned flatten (Wpad % 8 == 0): every shifted tap operand
        # below is a plain static slice of this one value (no strided copies
        # of a full image).
        xf = x_ref[0, 0].reshape(RF * Wpad, Cin)

        # Bias broadcast hoisted out of the phase loop (JAX does not CSE
        # broadcast_in_dim).
        bias = jnp.broadcast_to(b_ref[...].reshape(1, 1, TC), (TH, Wb, TC))

        shifted = {}
        for (a, b), dots in plan:
            acc = None
            for s, widx in dots:
                if s not in shifted:          # dedup operands shared by slots
                    shifted[s] = xf[s:s + M, :]
                d = jnp.dot(shifted[s], w_ref[widx],
                            preferred_element_type=jnp.float32)
                acc = d if acc is None else acc + d
            res = acc.reshape(TH, Wpad, TC)[:, :Wb, :] + bias
            o_ref[a, b, 0] = res.astype(o_ref.dtype)

    return kernel


def upscale2d_conv2d(x_nchw, weight_oihw, bias, *, res, kernel_size,
                     use_wscale=True, lrmul=1.0, gain=math.sqrt(2.0),
                     fused_scale="auto", factor=2,
                     compute_dtype=jnp.bfloat16):
    """Forward of Upscale2dConv2d (PyTorch semantics, NCHW in / NCHW out)."""
    if fused_scale == "auto":
        fused_scale = (2 ** res) >= 128
    if fused_scale:
        # TODO(synk): fused path (EqualizedSmoothUpsample: smoothed-weight
        # conv_transpose2d stride=2) not implemented as a Pallas kernel.
        raise NotImplementedError("fused_scale path not implemented")
    assert factor == 2, "kernel specialized for the module's factor=2 upscale"

    k = kernel_size
    assert k >= 1 and k % 2 == 1
    N, Cin, H, W = x_nchw.shape
    Cout = weight_oihw.shape[0]
    pad = k // 2
    po = (pad + 1) // 2                 # original-resolution halo
    ksub = (k + 1) // 2                 # per-phase sub-kernel extent
    R_d = 2 * po + 1                    # distinct original-pixel shifts / axis
    out_dtype = x_nchw.dtype
    LANE = 128

    # ---- ConstrainedLayer (use_wscale) folded into weights / bias ----------
    fan_in = Cin * k * k
    weight_mul = (gain * math.sqrt(1.0 / fan_in) * lrmul) if use_wscale else 1.0
    bias_mul = lrmul if use_wscale else 1.0
    w_hwio = (jnp.transpose(weight_oihw, (2, 3, 1, 0)).astype(jnp.float32)
              * weight_mul)                                   # (k, k, Cin, Cout)
    bias_f = bias.astype(jnp.float32) * bias_mul

    def _off0(a):                       # min original-pixel offset of phase a
        return (a - pad) // 2

    # ---- spatial tiling -----------------------------------------------------
    align = 16 if compute_dtype == jnp.bfloat16 else 8   # packed-vreg rows
    Wpad = _round_up(W + 2 * po, align)                  # sublane-aligned width
    Wb = W if W % 8 == 0 else Wpad                       # kernel output width
    target_m = 1024                     # big tiles amortize per-step overhead
    max_th = max(1, target_m // Wpad)
    divs = [d for d in range(1, H + 1) if H % d == 0 and d <= max_th]
    TH = max(divs) if divs else 1
    if N * (H // TH) < 2:               # keep >=2 'parallel' tiles for 2-TC chips
        divs2 = [d for d in divs if H // d >= 2]
        if divs2:
            TH = max(divs2)
    n_th = H // TH
    RF = TH + 2 * po + 1                # input rows per tile (halo + slack row)
    M = TH * Wpad                       # flattened MXU M dimension

    # ---- weights: polyphase sub-kernels + lane packing ----------------------
    packed = Cout <= LANE // 4
    if packed:
        # Pack the 4 output phases onto the lane axis: phase p = 2*a + b
        # occupies lanes [p*32, p*32 + Cout).  One accumulator, R_d^2 dots.
        CPP = LANE // 4
        C_lanes, TC, n_co = LANE, LANE, 1
        S_w = R_d * R_d
        w_eff = jnp.zeros((S_w, Cin, C_lanes), jnp.float32)
        for a in (0, 1):
            for b in (0, 1):
                p = 2 * a + b
                for dh in range(k):
                    dr = po + (a + dh - pad) // 2
                    for dw in range(k):
                        dc = po + (b + dw - pad) // 2
                        w_eff = w_eff.at[dr * R_d + dc, :,
                                         p * CPP:p * CPP + Cout].add(
                            w_hwio[dh, dw])
        b_eff = jnp.tile(jnp.pad(bias_f, (0, CPP - Cout)), 4).reshape(
            1, 1, C_lanes)
        plan = (((0, 0), tuple((dr * Wpad + dc, dr * R_d + dc)
                               for dr in range(R_d) for dc in range(R_d))),)
        PH = 1
    else:
        # General path: 128-lane Cout tiles, one slab per phase in one array.
        C_lanes = _round_up(Cout, LANE)
        TC, n_co = LANE, C_lanes // LANE
        S_w = 4 * ksub * ksub
        w_pad = jnp.pad(w_hwio, ((0, 0), (0, 0), (0, 0), (0, C_lanes - Cout)))
        w_eff = jnp.zeros((S_w, Cin, C_lanes), jnp.float32)
        plan_l = []
        for a in (0, 1):
            for b in (0, 1):
                p = 2 * a + b
                for dh in range(k):
                    r = (a + dh - pad) // 2 - _off0(a)
                    for dw in range(k):
                        c = (b + dw - pad) // 2 - _off0(b)
                        w_eff = w_eff.at[(p * ksub + r) * ksub + c].add(
                            w_pad[dh, dw])
                dots = tuple(
                    ((po + _off0(a) + r) * Wpad + (po + _off0(b) + c),
                     (p * ksub + r) * ksub + c)
                    for r in range(ksub) for c in range(ksub))
                plan_l.append(((a, b), dots))
        b_eff = jnp.pad(bias_f, (0, C_lanes - Cout)).reshape(1, 1, C_lanes)
        plan = tuple(plan_l)
        PH = 2
    w_eff = w_eff.astype(compute_dtype)

    # ---- input: NCHW -> NHWC, original-res zero halo, overlapped row tiles --
    x_nhwc = jnp.transpose(x_nchw, (0, 2, 3, 1)).astype(compute_dtype)
    x_pad = jnp.pad(x_nhwc,
                    ((0, 0), (po, po + 1), (po, Wpad - W - po), (0, 0)))
    # Halo rows duplicated per tile so BlockSpec auto-pipelining double-buffers
    # the input fetch (prefetch of tile t+1 overlaps compute of tile t).
    x_tiles = jnp.stack([x_pad[:, t * TH:t * TH + RF] for t in range(n_th)],
                        axis=1)                     # (N, n_th, RF, Wpad, Cin)

    kernel = _make_kernel(M=M, RF=RF, Wpad=Wpad, Cin=Cin, TH=TH, Wb=Wb, TC=TC,
                          plan=plan)

    out = pl.pallas_call(
        kernel,
        out_shape=jax.ShapeDtypeStruct((PH, PH, N, H, Wb, C_lanes), out_dtype),
        grid_spec=pltpu.PrefetchScalarGridSpec(
            num_scalar_prefetch=0,
            grid=(N, n_th, n_co),
            in_specs=[
                pl.BlockSpec((1, 1, RF, Wpad, Cin),
                             lambda n, t, co: (n, t, 0, 0, 0)),
                pl.BlockSpec((S_w, Cin, TC), lambda n, t, co: (0, 0, co)),
                pl.BlockSpec((1, 1, TC), lambda n, t, co: (0, 0, co)),
            ],
            out_specs=pl.BlockSpec((PH, PH, 1, TH, Wb, TC),
                                   lambda n, t, co: (0, 0, n, t, 0, co)),
        ),
        compiler_params=pltpu.CompilerParams(
            dimension_semantics=("parallel", "parallel", "arbitrary"),
            vmem_limit_bytes=32 * 1024 * 1024,
        ),
    )(x_tiles, w_eff, b_eff)

    # ---- single fused XLA transpose to NCHW (no intermediate stack pass) ----
    if packed:
        o = out[0, 0, :, :, :W, :].reshape(N, H, W, 2, 2, LANE // 4)[..., :Cout]
        y = jnp.transpose(o, (0, 5, 1, 3, 2, 4))      # (N, Cout, H, 2, W, 2)
    else:
        o = out[:, :, :, :, :W, :Cout]
        y = jnp.transpose(o, (2, 5, 3, 0, 4, 1))      # (N, Cout, H, 2, W, 2)
    return y.reshape(N, Cout, 2 * H, 2 * W)


def _reference(x, weight, bias, k, use_wscale=True, gain=math.sqrt(2.0)):
    """Pure-JAX reference: Upscale2d(2) -> equalized conv (f32, high precision)."""
    p = k // 2
    cin = x.shape[1]
    x_up = jnp.repeat(jnp.repeat(x, 2, axis=2), 2, axis=3)
    wmul = (gain * math.sqrt(1.0 / (cin * k * k))) if use_wscale else 1.0
    out = jax.lax.conv_general_dilated(
        x_up, weight, window_strides=(1, 1), padding=((p, p), (p, p)),
        dimension_numbers=("NCHW", "OIHW", "NCHW"),
        precision=jax.lax.Precision.HIGHEST,
    ) * wmul + bias.reshape(1, -1, 1, 1)
    return out


if __name__ == "__main__":
    key = jax.random.PRNGKey(0)
    N, Cin, H, W = 2, 4, 16, 16
    Cout, k = 8, 3
    res = 4  # 2**4 = 16 < 128  ->  non-fused path under 'auto'

    kx, kw = jax.random.split(key)
    x = jax.random.normal(kx, (N, Cin, H, W), dtype=jnp.float32)
    weight = jax.random.normal(kw, (Cout, Cin, k, k), dtype=jnp.float32)
    bias = jnp.zeros((Cout,), dtype=jnp.float32)
    ref = _reference(x, weight, bias, k)

    # default bf16 MXU path (phase-packed lanes, Cout <= 32)
    fwd_bf16 = jax.jit(partial(upscale2d_conv2d, res=res, kernel_size=k,
                               use_wscale=True))
    out = jax.block_until_ready(fwd_bf16(x, weight, bias))
    assert out.shape == (N, Cout, 2 * H, 2 * W)
    assert jnp.allclose(out, ref, rtol=1e-1, atol=1e-1), \
        float(jnp.max(jnp.abs(out - ref)))

    # f32 path (tight check of the polyphase + phase-packing math)
    fwd_f32 = jax.jit(partial(upscale2d_conv2d, res=res, kernel_size=k,
                              use_wscale=True, compute_dtype=jnp.float32))
    out32 = jax.block_until_ready(fwd_f32(x, weight, bias))
    assert jnp.allclose(out32, ref, rtol=2e-3, atol=2e-3), \
        float(jnp.max(jnp.abs(out32 - ref)))

    # odd channel counts, nonzero bias, N=1 (exercises the H-split heuristic)
    x2 = jax.random.normal(jax.random.PRNGKey(1), (1, 3, 8, 8), jnp.float32)
    w2 = jax.random.normal(jax.random.PRNGKey(2), (5, 3, 3, 3), jnp.float32)
    b2 = jax.random.normal(jax.random.PRNGKey(3), (5,), jnp.float32)
    fwd2 = jax.jit(partial(upscale2d_conv2d, res=3, kernel_size=3,
                           use_wscale=True, compute_dtype=jnp.float32))
    out2 = jax.block_until_ready(fwd2(x2, w2, b2))
    ref2 = _reference(x2, w2, b2, 3)
    assert out2.shape == (1, 5, 16, 16)
    assert jnp.allclose(out2, ref2, rtol=2e-3, atol=2e-3), \
        float(jnp.max(jnp.abs(out2 - ref2)))

    # Cout > 32 exercises the unpacked (per-phase lane tile) path
    x3 = jax.random.normal(jax.random.PRNGKey(4), (1, 8, 8, 8), jnp.float32)
    w3 = jax.random.normal(jax.random.PRNGKey(5), (40, 8, 3, 3), jnp.float32)
    b3 = jax.random.normal(jax.random.PRNGKey(6), (40,), jnp.float32)
    fwd3 = jax.jit(partial(upscale2d_conv2d, res=3, kernel_size=3,
                           use_wscale=True, compute_dtype=jnp.float32))
    out3 = jax.block_until_ready(fwd3(x3, w3, b3))
    ref3 = _reference(x3, w3, b3, 3)
    assert out3.shape == (1, 40, 16, 16)
    assert jnp.allclose(out3, ref3, rtol=2e-3, atol=2e-3), \
        float(jnp.max(jnp.abs(out3 - ref3)))

    print("KERNEL_OK")
</pallas_src>

<mosaic_0001>
module attributes {stable_mosaic.version = 11 : i64} {
  func.func @kernel(%arg0: i32, %arg1: i32, %arg2: i32, %arg3: memref<1x1x19x32x4xbf16, #tpu.memory_space<vmem>>, %arg4: memref<9x4x128xbf16, #tpu.memory_space<vmem>>, %arg5: memref<1x1x128xf32, #tpu.memory_space<vmem>>, %arg6: memref<1x1x1x16x16x128xf32, #tpu.memory_space<vmem>>) attributes {dimension_semantics = [#tpu.dimension_semantics<parallel>, #tpu.dimension_semantics<parallel>, #tpu.dimension_semantics<arbitrary>], iteration_bounds = array<i64: 2, 1, 1>, scalar_prefetch = 0 : i64, scratch_operands = 0 : i64, tpu.core_type = #tpu.core_type<tc>, window_params = [{transform_indices = @transform_0, window_bounds = array<i64: 1, 1, 19, 32, 4>}, {transform_indices = @transform_1, window_bounds = array<i64: 9, 4, 128>}, {transform_indices = @transform_2, window_bounds = array<i64: 1, 1, 128>}, {transform_indices = @transform_3, window_bounds = array<i64: 1, 1, 1, 16, 16, 128>}]} {
    %c0 = arith.constant 0 : index
    %c0_0 = arith.constant 0 : index
    %c0_1 = arith.constant 0 : index
    %c0_2 = arith.constant 0 : index
    %c0_3 = arith.constant 0 : index
    %0 = vector.load %arg3[%c0, %c0_0, %c0_1, %c0_2, %c0_3] : memref<1x1x19x32x4xbf16, #tpu.memory_space<vmem>>, vector<1x1x19x32x4xbf16>
    %1 = vector.shape_cast %0 : vector<1x1x19x32x4xbf16> to vector<19x32x4xbf16>
    %2 = vector.shape_cast %1 : vector<19x32x4xbf16> to vector<608x4xbf16>
    %c0_4 = arith.constant 0 : index
    %c0_5 = arith.constant 0 : index
    %c0_6 = arith.constant 0 : index
    %3 = vector.load %arg5[%c0_4, %c0_5, %c0_6] : memref<1x1x128xf32, #tpu.memory_space<vmem>>, vector<1x1x128xf32>
    %4 = vector.shape_cast %3 : vector<1x1x128xf32> to vector<1x1x128xf32>
    %5 = vector.broadcast %4 : vector<1x1x128xf32> to vector<16x16x128xf32>
    %6 = vector.extract_strided_slice %2 {offsets = [0, 0], sizes = [512, 4], strides = [1, 1]} : vector<608x4xbf16> to vector<512x4xbf16>
    %c0_7 = arith.constant 0 : index
    %c0_8 = arith.constant 0 : index
    %c0_9 = arith.constant 0 : index
    %7 = vector.load %arg4[%c0_7, %c0_8, %c0_9] : memref<9x4x128xbf16, #tpu.memory_space<vmem>>, vector<1x4x128xbf16>
    %8 = vector.shape_cast %7 : vector<1x4x128xbf16> to vector<4x128xbf16>
    %cst = arith.constant dense<0.000000e+00> : vector<512x128xf32>
    %9 = tpu.matmul %6, %8, %cst {dimension_numbers = #tpu.dot_dimension_numbers<[1], [0], [0], [1], [0, 0, 1, 1], [], []>} : vector<512x4xbf16>, vector<4x128xbf16>, vector<512x128xf32> -> vector<512x128xf32>
    %10 = vector.extract_strided_slice %2 {offsets = [1, 0], sizes = [512, 4], strides = [1, 1]} : vector<608x4xbf16> to vector<512x4xbf16>
    %c1 = arith.constant 1 : index
    %c0_10 = arith.constant 0 : index
    %c0_11 = arith.constant 0 : index
    %11 = vector.load %arg4[%c1, %c0_10, %c0_11] : memref<9x4x128xbf16, #tpu.memory_space<vmem>>, vector<1x4x128xbf16>
    %12 = vector.shape_cast %11 : vector<1x4x128xbf16> to vector<4x128xbf16>
    %cst_12 = arith.constant dense<0.000000e+00> : vector<512x128xf32>
    %13 = tpu.matmul %10, %12, %cst_12 {dimension_numbers = #tpu.dot_dimension_numbers<[1], [0], [0], [1], [0, 0, 1, 1], [], []>} : vector<512x4xbf16>, vector<4x128xbf16>, vector<512x128xf32> -> vector<512x128xf32>
    %14 = arith.addf %9, %13 : vector<512x128xf32>
    %15 = vector.extract_strided_slice %2 {offsets = [2, 0], sizes = [512, 4], strides = [1, 1]} : vector<608x4xbf16> to vector<512x4xbf16>
    %c2 = arith.constant 2 : index
    %c0_13 = arith.constant 0 : index
    %c0_14 = arith.constant 0 : index
    %16 = vector.load %arg4[%c2, %c0_13, %c0_14] : memref<9x4x128xbf16, #tpu.memory_space<vmem>>, vector<1x4x128xbf16>
    %17 = vector.shape_cast %16 : vector<1x4x128xbf16> to vector<4x128xbf16>
    %cst_15 = arith.constant dense<0.000000e+00> : vector<512x128xf32>
    %18 = tpu.matmul %15, %17, %cst_15 {dimension_numbers = #tpu.dot_dimension_numbers<[1], [0], [0], [1], [0, 0, 1, 1], [], []>} : vector<512x4xbf16>, vector<4x128xbf16>, vector<512x128xf32> -> vector<512x128xf32>
    %19 = arith.addf %14, %18 : vector<512x128xf32>
    %20 = vector.extract_strided_slice %2 {offsets = [32, 0], sizes = [512, 4], strides = [1, 1]} : vector<608x4xbf16> to vector<512x4xbf16>
    %c3 = arith.constant 3 : index
    %c0_16 = arith.constant 0 : index
    %c0_17 = arith.constant 0 : index
    %21 = vector.load %arg4[%c3, %c0_16, %c0_17] : memref<9x4x128xbf16, #tpu.memory_space<vmem>>, vector<1x4x128xbf16>
    %22 = vector.shape_cast %21 : vector<1x4x128xbf16> to vector<4x128xbf16>
    %cst_18 = arith.constant dense<0.000000e+00> : vector<512x128xf32>
    %23 = tpu.matmul %20, %22, %cst_18 {dimension_numbers = #tpu.dot_dimension_numbers<[1], [0], [0], [1], [0, 0, 1, 1], [], []>} : vector<512x4xbf16>, vector<4x128xbf16>, vector<512x128xf32> -> vector<512x128xf32>
    %24 = arith.addf %19, %23 : vector<512x128xf32>
    %25 = vector.extract_strided_slice %2 {offsets = [33, 0], sizes = [512, 4], strides = [1, 1]} : vector<608x4xbf16> to vector<512x4xbf16>
    %c4 = arith.constant 4 : index
    %c0_19 = arith.constant 0 : index
    %c0_20 = arith.constant 0 : index
    %26 = vector.load %arg4[%c4, %c0_19, %c0_20] : memref<9x4x128xbf16, #tpu.memory_space<vmem>>, vector<1x4x128xbf16>
    %27 = vector.shape_cast %26 : vector<1x4x128xbf16> to vector<4x128xbf16>
    %cst_21 = arith.constant dense<0.000000e+00> : vector<512x128xf32>
    %28 = tpu.matmul %25, %27, %cst_21 {dimension_numbers = #tpu.dot_dimension_numbers<[1], [0], [0], [1], [0, 0, 1, 1], [], []>} : vector<512x4xbf16>, vector<4x128xbf16>, vector<512x128xf32> -> vector<512x128xf32>
    %29 = arith.addf %24, %28 : vector<512x128xf32>
    %30 = vector.extract_strided_slice %2 {offsets = [34, 0], sizes = [512, 4], strides = [1, 1]} : vector<608x4xbf16> to vector<512x4xbf16>
    %c5 = arith.constant 5 : index
    %c0_22 = arith.constant 0 : index
    %c0_23 = arith.constant 0 : index
    %31 = vector.load %arg4[%c5, %c0_22, %c0_23] : memref<9x4x128xbf16, #tpu.memory_space<vmem>>, vector<1x4x128xbf16>
    %32 = vector.shape_cast %31 : vector<1x4x128xbf16> to vector<4x128xbf16>
    %cst_24 = arith.constant dense<0.000000e+00> : vector<512x128xf32>
    %33 = tpu.matmul %30, %32, %cst_24 {dimension_numbers = #tpu.dot_dimension_numbers<[1], [0], [0], [1], [0, 0, 1, 1], [], []>} : vector<512x4xbf16>, vector<4x128xbf16>, vector<512x128xf32> -> vector<512x128xf32>
    %34 = arith.addf %29, %33 : vector<512x128xf32>
    %35 = vector.extract_strided_slice %2 {offsets = [64, 0], sizes = [512, 4], strides = [1, 1]} : vector<608x4xbf16> to vector<512x4xbf16>
    %c6 = arith.constant 6 : index
    %c0_25 = arith.constant 0 : index
    %c0_26 = arith.constant 0 : index
    %36 = vector.load %arg4[%c6, %c0_25, %c0_26] : memref<9x4x128xbf16, #tpu.memory_space<vmem>>, vector<1x4x128xbf16>
    %37 = vector.shape_cast %36 : vector<1x4x128xbf16> to vector<4x128xbf16>
    %cst_27 = arith.constant dense<0.000000e+00> : vector<512x128xf32>
    %38 = tpu.matmul %35, %37, %cst_27 {dimension_numbers = #tpu.dot_dimension_numbers<[1], [0], [0], [1], [0, 0, 1, 1], [], []>} : vector<512x4xbf16>, vector<4x128xbf16>, vector<512x128xf32> -> vector<512x128xf32>
    %39 = arith.addf %34, %38 : vector<512x128xf32>
    %40 = vector.extract_strided_slice %2 {offsets = [65, 0], sizes = [512, 4], strides = [1, 1]} : vector<608x4xbf16> to vector<512x4xbf16>
    %c7 = arith.constant 7 : index
    %c0_28 = arith.constant 0 : index
    %c0_29 = arith.constant 0 : index
    %41 = vector.load %arg4[%c7, %c0_28, %c0_29] : memref<9x4x128xbf16, #tpu.memory_space<vmem>>, vector<1x4x128xbf16>
    %42 = vector.shape_cast %41 : vector<1x4x128xbf16> to vector<4x128xbf16>
    %cst_30 = arith.constant dense<0.000000e+00> : vector<512x128xf32>
    %43 = tpu.matmul %40, %42, %cst_30 {dimension_numbers = #tpu.dot_dimension_numbers<[1], [0], [0], [1], [0, 0, 1, 1], [], []>} : vector<512x4xbf16>, vector<4x128xbf16>, vector<512x128xf32> -> vector<512x128xf32>
    %44 = arith.addf %39, %43 : vector<512x128xf32>
    %45 = vector.extract_strided_slice %2 {offsets = [66, 0], sizes = [512, 4], strides = [1, 1]} : vector<608x4xbf16> to vector<512x4xbf16>
    %c8 = arith.constant 8 : index
    %c0_31 = arith.constant 0 : index
    %c0_32 = arith.constant 0 : index
    %46 = vector.load %arg4[%c8, %c0_31, %c0_32] : memref<9x4x128xbf16, #tpu.memory_space<vmem>>, vector<1x4x128xbf16>
    %47 = vector.shape_cast %46 : vector<1x4x128xbf16> to vector<4x128xbf16>
    %cst_33 = arith.constant dense<0.000000e+00> : vector<512x128xf32>
    %48 = tpu.matmul %45, %47, %cst_33 {dimension_numbers = #tpu.dot_dimension_numbers<[1], [0], [0], [1], [0, 0, 1, 1], [], []>} : vector<512x4xbf16>, vector<4x128xbf16>, vector<512x128xf32> -> vector<512x128xf32>
    %49 = arith.addf %44, %48 : vector<512x128xf32>
    %50 = vector.shape_cast %49 : vector<512x128xf32> to vector<16x32x128xf32>
    %51 = vector.extract_strided_slice %50 {offsets = [0, 0, 0], sizes = [16, 16, 128], strides = [1, 1, 1]} : vector<16x32x128xf32> to vector<16x16x128xf32>
    %52 = arith.addf %51, %5 : vector<16x16x128xf32>
    %c0_34 = arith.constant 0 : index
    %c0_35 = arith.constant 0 : index
    %c0_36 = arith.constant 0 : index
    %c0_37 = arith.constant 0 : index
    %c0_38 = arith.constant 0 : index
    %c0_39 = arith.constant 0 : index
    %53 = vector.load %arg6[%c0_34, %c0_35, %c0_36, %c0_37, %c0_38, %c0_39] : memref<1x1x1x16x16x128xf32, #tpu.memory_space<vmem>>, vector<1x1x1x16x16x128xf32>
    %54 = vector.shape_cast %53 : vector<1x1x1x16x16x128xf32> to vector<16x16x128xf32>
    %55 = vector.shape_cast %52 : vector<16x16x128xf32> to vector<1x1x1x16x16x128xf32>
    tpu.vector_store %arg6[%c0_34, %c0_35, %c0_36, %c0_37, %c0_38, %c0_39], %55 {strides = array<i32>} : memref<1x1x1x16x16x128xf32, #tpu.memory_space<vmem>>, vector<1x1x1x16x16x128xf32>,
    return
  }
  func.func @transform_0(%arg0: i32, %arg1: i32, %arg2: i32) -> (i32, i32, i32, i32, i32) {
    %c0_i32 = arith.constant 0 : i32
    %c0_i32_0 = arith.constant 0 : i32
    %c0_i32_1 = arith.constant 0 : i32
    %c0_i32_2 = arith.constant 0 : i32
    return %arg0, %arg1, %c0_i32, %c0_i32_0, %c0_i32_1 : i32, i32, i32, i32, i32
  }
  func.func @transform_1(%arg0: i32, %arg1: i32, %arg2: i32) -> (i32, i32, i32) {
    %c0_i32 = arith.constant 0 : i32
    %c0_i32_0 = arith.constant 0 : i32
    %c0_i32_1 = arith.constant 0 : i32
    return %c0_i32, %c0_i32_0, %arg2 : i32, i32, i32
  }
  func.func @transform_2(%arg0: i32, %arg1: i32, %arg2: i32) -> (i32, i32, i32) {
    %c0_i32 = arith.constant 0 : i32
    %c0_i32_0 = arith.constant 0 : i32
    %c0_i32_1 = arith.constant 0 : i32
    return %c0_i32, %c0_i32_0, %arg2 : i32, i32, i32
  }
  func.func @transform_3(%arg0: i32, %arg1: i32, %arg2: i32) -> (i32, i32, i32, i32, i32, i32) {
    %c0_i32 = arith.constant 0 : i32
    %c0_i32_0 = arith.constant 0 : i32
    %c0_i32_1 = arith.constant 0 : i32
    %c0_i32_2 = arith.constant 0 : i32
    return %c0_i32, %c0_i32_0, %arg0, %arg1, %c0_i32_1, %arg2 : i32, i32, i32, i32, i32, i32
  }
}

</mosaic_0001>

<bundles_post_ra>
// kernel: tile.8
= control target key start
LH: loop header
LB: loop body
LE: loop exit
PB: predicated region body
PF: predicated region fallthrough
CT: control target
= control target key end

     0   :  { %s22_s0 = inlined_call_operand.vmem [shape: f32[32], index: 0, kind: input, shape index: {}]   ;;  %s23_s1 = inlined_call_operand.vmem [shape: f32[4,32], index: 1, kind: output, shape index: {}]  }
   0x1   :  { %v4_v0 = vld [vmem:[%s22_s0] ss:$0 sm:$0xff] }
   0x2   :  { %5 = vst [vmem:[%s23_s1] sm:$0xf] %v4_v0 }

// kernel: tile.9
= control target key start
LH: loop header
LB: loop body
LE: loop exit
PB: predicated region body
PF: predicated region fallthrough
CT: control target
= control target key end

     0   :  { %vm8_vm0 = vcmask 261120   ;;  %s40_s8 = smov 32   ;;  %s41_s9 = smov 64   ;;  %vm14_vm1 = vcmask 1048320   ;;  %vm20_vm2 = vcmask 785920   ;;  %vm26_vm3 = vcmask 523520   ;;  %s58_s0 = inlined_call_operand.vmem [shape: f32[4,32], index: 0, kind: input, shape index: {}]   ;;  %s59_s1 = inlined_call_operand.vmem [shape: f32[1,1,128], index: 1, kind: output, shape index: {}]  }
   0x1   :  { %v5_v0 = vld [vmem:[%s58_s0] sm:$0xf]  ;;  %s39_s0 = smov 96  }
   0x2   :  { %6 = vst [vmem:[#allocation1] sm:$0xf] %v5_v0 }
   0x9   :  { %v11_v1 = vld [vmem:[#allocation1 + $0x3] sm:$0x1]   ;;  %v23_v2 = vld [vmem:[#allocation1 + $0x1] sm:$0x1]   ;;  %v7_v3 = vld [vmem:[#allocation1] sm:$0x1]  }
   0xa   :  { %12 = vrot.lane.b32.xlu0 %v11_v1, %s39_s0  ;;  %24 = vrot.lane.b32.xlu1 %v23_v2, %s40_s8  ;;  %v17_v4 = vld [vmem:[#allocation1 + $0x2] sm:$0x1]   ;;  %9 = vst.msk [vmem:[#allocation0] sm:$0x1] %vm8_vm0, %v7_v3  }
   0xe   :  { %18 = vrot.lane.b32.xlu0 %v17_v4, %s41_s9 }
  0x7c   :  { %v13_v5 = vpop.permute.xlu0 %12   ;;  %v25_v6 = vpop.permute.xlu1 %24  }
  0x7d   :  { %15 = vst.msk [vmem:[#allocation0] sm:$0x1] %vm14_vm1, %v13_v5  }
  0x80   :  { %v19_v7 = vpop.permute.xlu0 %18  }
  0x81   :  { %21 = vst.msk [vmem:[#allocation0] sm:$0x1] %vm20_vm2, %v19_v7  }
  0x82   :  { %27 = vst.msk [vmem:[#allocation0] sm:$0x1] %vm26_vm3, %v25_v6  }
  0x89   :  { %v32_v8 = vld [vmem:[#allocation0] sm:$0x1] }
  0x8a   :  { %35 = vst [vmem:[%s59_s1] sm:$0x1] %v32_v8 }

// kernel: squeeze.73
= control target key start
LH: loop header
LB: loop body
LE: loop exit
PB: predicated region body
PF: predicated region fallthrough
CT: control target
= control target key end

     0   :  { %vm3_vm0 = vcmask 261120   ;;  %s12662_s12 = smov 96   ;;  %s12663_s14 = smov 64   ;;  %s17894_s0 = inlined_call_operand.vmem [shape: f32[1,1,2,16,16,128], index: 0, kind: input, shape index: {}]   ;;  %s17895_s1 = inlined_call_operand.vmem [shape: f32[2,16,16,2,2,32], index: 1, kind: output, shape index: {}]  }
   0x1   :  { %v12678_v0 = vld [vmem:[%s17894_s0 + $0x10] sm:$0xff]   ;;  %v12683_v1 = vld [vmem:[%s17894_s0] sm:$0xff]   ;;  %v12688_v2 = vld [vmem:[%s17894_s0 + $0x18] sm:$0xff]   ;;  %s12664_s29 = smov 32  }
   0x2   :  { %728 = vrot.lane.b32.xlu1 %v12678_v0, %s12662_s12  ;;  %702 = vrot.lane.b32.xlu0 %v12683_v1, %s12662_s12  ;;  %v12697_v3 = vld [vmem:[%s17894_s0 + $0x8] sm:$0xff]   ;;  %23 = vst.msk [vmem:[#allocation0 + $0x100] ss:$16 sm:$0x3] %vm3_vm0, %v12678_v0   ;;  %v12731_v5 = vld [vmem:[%s17894_s0 + $0x20] sm:$0xff]  }
   0x3   :  { %v12702_v4 = vld [vmem:[%s17894_s0 + $0x28] sm:$0xff]   ;;  %25 = vst.msk [vmem:[#allocation0 + $0x100] ss:$16 sm:$0xc] %vm3_vm0, %v12678_v0   ;;  %v12736_v6 = vld [vmem:[%s17894_s0 + $0x38] sm:$0xff]   ;;  %v12741_v7 = vld [vmem:[%s17894_s0 + $0x30] sm:$0xff]  }
   0x4   :  { %27 = vst.msk [vmem:[#allocation0 + $0x100] ss:$16 sm:$0x30] %vm3_vm0, %v12678_v0   ;;  %29 = vst.msk [vmem:[#allocation0 + $0x100] ss:$16 sm:$0xc0] %vm3_vm0, %v12678_v0  }
   0x5   :  { %4 = vst.msk [vmem:[#allocation0] ss:$16 sm:$0x3] %vm3_vm0, %v12683_v1   ;;  %5 = vst.msk [vmem:[#allocation0] ss:$16 sm:$0xc] %vm3_vm0, %v12683_v1  }
   0x6   :  { %6 = vst.msk [vmem:[#allocation0] ss:$16 sm:$0x30] %vm3_vm0, %v12683_v1   ;;  %7 = vst.msk [vmem:[#allocation0] ss:$16 sm:$0xc0] %vm3_vm0, %v12683_v1   ;;  %741 = vrot.lane.b32.xlu1 %v12688_v2, %s12662_s12  ;;  %715 = vrot.lane.b32.xlu0 %v12697_v3, %s12662_s12 }
   0x7   :  { %34 = vst.msk [vmem:[#allocation0 + $0x180] ss:$16 sm:$0x3] %vm3_vm0, %v12688_v2   ;;  %36 = vst.msk [vmem:[#allocation0 + $0x180] ss:$16 sm:$0xc] %vm3_vm0, %v12688_v2  }
   0x8   :  { %38 = vst.msk [vmem:[#allocation0 + $0x180] ss:$16 sm:$0x30] %vm3_vm0, %v12688_v2   ;;  %40 = vst.msk [vmem:[#allocation0 + $0x180] ss:$16 sm:$0xc0] %vm3_vm0, %v12688_v2  }
   0x9   :  { %12 = vst.msk [vmem:[#allocation0 + $0x80] ss:$16 sm:$0x3] %vm3_vm0, %v12697_v3   ;;  %14 = vst.msk [vmem:[#allocation0 + $0x80] ss:$16 sm:$0xc] %vm3_vm0, %v12697_v3  }
   0xa   :  { %16 = vst.msk [vmem:[#allocation0 + $0x80] ss:$16 sm:$0x30] %vm3_vm0, %v12697_v3   ;;  %18 = vst.msk [vmem:[#allocation0 + $0x80] ss:$16 sm:$0xc0] %vm3_vm0, %v12697_v3   ;;  %767 = vrot.lane.b32.xlu1 %v12702_v4, %s12662_s12  ;;  %754 = vrot.lane.b32.xlu0 %v12731_v5, %s12662_s12 }
   0xb   :  { %56 = vst.msk [vmem:[#allocation0 + $0x280] ss:$16 sm:$0x3] %vm3_vm0, %v12702_v4   ;;  %58 = vst.msk [vmem:[#allocation0 + $0x280] ss:$16 sm:$0xc] %vm3_vm0, %v12702_v4  }
   0xc   :  { %60 = vst.msk [vmem:[#allocation0 + $0x280] ss:$16 sm:$0x30] %vm3_vm0, %v12702_v4   ;;  %62 = vst.msk [vmem:[#allocation0 + $0x280] ss:$16 sm:$0xc0] %vm3_vm0, %v12702_v4  }
   0xd   :  { %v11455_v8 = vld [vmem:[%s17894_s0 + $0x48] sm:$0xff]   ;;  %v11454_v9 = vld [vmem:[%s17894_s0 + $0x40] sm:$0xff]   ;;  %v11457_v10 = vld [vmem:[%s17894_s0 + $0x58] sm:$0xff]   ;;  %45 = vst.msk [vmem:[#allocation0 + $0x200] ss:$16 sm:$0x3] %vm3_vm0, %v12731_v5  }
   0xe   :  { %47 = vst.msk [vmem:[#allocation0 + $0x200] ss:$16 sm:$0xc] %vm3_vm0, %v12731_v5   ;;  %49 = vst.msk [vmem:[#allocation0 + $0x200] ss:$16 sm:$0x30] %vm3_vm0, %v12731_v5   ;;  %793 = vrot.lane.b32.xlu1 %v12736_v6, %s12662_s12  ;;  %780 = vrot.lane.b32.xlu0 %v12741_v7, %s12662_s12 }
   0xf   :  { %51 = vst.msk [vmem:[#allocation0 + $0x200] ss:$16 sm:$0xc0] %vm3_vm0, %v12731_v5   ;;  %78 = vst.msk [vmem:[#allocation0 + $0x380] ss:$16 sm:$0x3] %vm3_vm0, %v12736_v6  }
  0x10   :  { %80 = vst.msk [vmem:[#allocation0 + $0x380] ss:$16 sm:$0xc] %vm3_vm0, %v12736_v6   ;;  %82 = vst.msk [vmem:[#allocation0 + $0x380] ss:$16 sm:$0x30] %vm3_vm0, %v12736_v6  }
  0x11   :  { %84 = vst.msk [vmem:[#allocation0 + $0x380] ss:$16 sm:$0xc0] %vm3_vm0, %v12736_v6   ;;  %67 = vst.msk [vmem:[#allocation0 + $0x300] ss:$16 sm:$0x3] %vm3_vm0, %v12741_v7  }
  0x12   :  { %69 = vst.msk [vmem:[#allocation0 + $0x300] ss:$16 sm:$0xc] %vm3_vm0, %v12741_v7   ;;  %71 = vst.msk [vmem:[#allocation0 + $0x300] ss:$16 sm:$0x30] %vm3_vm0, %v12741_v7   ;;  %819 = vrot.lane.b32.xlu1 %v11455_v8, %s12662_s12  ;;  %806 = vrot.lane.b32.xlu0 %v11454_v9, %s12662_s12 }
  0x13   :  { %73 = vst.msk [vmem:[#allocation0 + $0x300] ss:$16 sm:$0xc0] %vm3_vm0, %v12741_v7   ;;  %v11456_v11 = vld [vmem:[%s17894_s0 + $0x50] sm:$0xff]   ;;  %v11459_v12 = vld [vmem:[%s17894_s0 + $0x68] sm:$0xff]   ;;  %v11458_v13 = vld [vmem:[%s17894_s0 + $0x60] sm:$0xff]  }
  0x14   :  { %100 = vst.msk [vmem:[#allocation0 + $0x480] ss:$16 sm:$0x3] %vm3_vm0, %v11455_v8   ;;  %102 = vst.msk [vmem:[#allocation0 + $0x480] ss:$16 sm:$0xc] %vm3_vm0, %v11455_v8  }
  0x15   :  { %104 = vst.msk [vmem:[#allocation0 + $0x480] ss:$16 sm:$0x30] %vm3_vm0, %v11455_v8   ;;  %106 = vst.msk [vmem:[#allocation0 + $0x480] ss:$16 sm:$0xc0] %vm3_vm0, %v11455_v8  }
  0x16   :  { %89 = vst.msk [vmem:[#allocation0 + $0x400] ss:$16 sm:$0x3] %vm3_vm0, %v11454_v9   ;;  %91 = vst.msk [vmem:[#allocation0 + $0x400] ss:$16 sm:$0xc] %vm3_vm0, %v11454_v9   ;;  %845 = vrot.lane.b32.xlu1 %v11457_v10, %s12662_s12  ;;  %832 = vrot.lane.b32.xlu0 %v11456_v11, %s12662_s12 }
  0x17   :  { %93 = vst.msk [vmem:[#allocation0 + $0x400] ss:$16 sm:$0x30] %vm3_vm0, %v11454_v9   ;;  %95 = vst.msk [vmem:[#allocation0 + $0x400] ss:$16 sm:$0xc0] %vm3_vm0, %v11454_v9  }
  0x18   :  { %122 = vst.msk [vmem:[#allocation0 + $0x580] ss:$16 sm:$0x3] %vm3_vm0, %v11457_v10   ;;  %124 = vst.msk [vmem:[#allocation0 + $0x580] ss:$16 sm:$0xc] %vm3_vm0, %v11457_v10  }
  0x19   :  { %126 = vst.msk [vmem:[#allocation0 + $0x580] ss:$16 sm:$0x30] %vm3_vm0, %v11457_v10   ;;  %128 = vst.msk [vmem:[#allocation0 + $0x580] ss:$16 sm:$0xc0] %vm3_vm0, %v11457_v10  }
  0x1a   :  { %v11461_v14 = vld [vmem:[%s17894_s0 + $0x78] sm:$0xff]   ;;  %v11460_v15 = vld [vmem:[%s17894_s0 + $0x70] sm:$0xff]   ;;  %111 = vst.msk [vmem:[#allocation0 + $0x500] ss:$16 sm:$0x3] %vm3_vm0, %v11456_v11   ;;  %871 = vrot.lane.b32.xlu1 %v11459_v12, %s12662_s12  ;;  %858 = vrot.lane.b32.xlu0 %v11458_v13, %s12662_s12 }
  0x1b   :  { %113 = vst.msk [vmem:[#allocation0 + $0x500] ss:$16 sm:$0xc] %vm3_vm0, %v11456_v11   ;;  %115 = vst.msk [vmem:[#allocation0 + $0x500] ss:$16 sm:$0x30] %vm3_vm0, %v11456_v11  }
  0x1c   :  { %117 = vst.msk [vmem:[#allocation0 + $0x500] ss:$16 sm:$0xc0] %vm3_vm0, %v11456_v11   ;;  %144 = vst.msk [vmem:[#allocation0 + $0x680] ss:$16 sm:$0x3] %vm3_vm0, %v11459_v12  }
  0x1d   :  { %146 = vst.msk [vmem:[#allocation0 + $0x680] ss:$16 sm:$0xc] %vm3_vm0, %v11459_v12   ;;  %148 = vst.msk [vmem:[#allocation0 + $0x680] ss:$16 sm:$0x30] %vm3_vm0, %v11459_v12  }
  0x1e   :  { %150 = vst.msk [vmem:[#allocation0 + $0x680] ss:$16 sm:$0xc0] %vm3_vm0, %v11459_v12   ;;  %133 = vst.msk [vmem:[#allocation0 + $0x600] ss:$16 sm:$0x3] %vm3_vm0, %v11458_v13   ;;  %897 = vrot.lane.b32.xlu1 %v11461_v14, %s12662_s12  ;;  %884 = vrot.lane.b32.xlu0 %v11460_v15, %s12662_s12 }
  0x1f   :  { %135 = vst.msk [vmem:[#allocation0 + $0x600] ss:$16 sm:$0xc] %vm3_vm0, %v11458_v13   ;;  %137 = vst.msk [vmem:[#allocation0 + $0x600] ss:$16 sm:$0x30] %vm3_vm0, %v11458_v13  }
  0x20   :  { %139 = vst.msk [vmem:[#allocation0 + $0x600] ss:$16 sm:$0xc0] %vm3_vm0, %v11458_v13   ;;  %166 = vst.msk [vmem:[#allocation0 + $0x780] ss:$16 sm:$0x3] %vm3_vm0, %v11461_v14  }
  0x21   :  { %168 = vst.msk [vmem:[#allocation0 + $0x780] ss:$16 sm:$0xc] %vm3_vm0, %v11461_v14   ;;  %170 = vst.msk [vmem:[#allocation0 + $0x780] ss:$16 sm:$0x30] %vm3_vm0, %v11461_v14  }
  0x22   :  { %172 = vst.msk [vmem:[#allocation0 + $0x780] ss:$16 sm:$0xc0] %vm3_vm0, %v11461_v14   ;;  %155 = vst.msk [vmem:[#allocation0 + $0x700] ss:$16 sm:$0x3] %vm3_vm0, %v11460_v15  }
  0x23   :  { %157 = vst.msk [vmem:[#allocation0 + $0x700] ss:$16 sm:$0xc] %vm3_vm0, %v11460_v15   ;;  %159 = vst.msk [vmem:[#allocation0 + $0x700] ss:$16 sm:$0x30] %vm3_vm0, %v11460_v15  }
  0x24   :  { %161 = vst.msk [vmem:[#allocation0 + $0x700] ss:$16 sm:$0xc0] %vm3_vm0, %v11460_v15   ;;  %v11463_v16 = vld [vmem:[%s17894_s0 + $0x88] sm:$0xff]   ;;  %v11462_v17 = vld [vmem:[%s17894_s0 + $0x80] sm:$0xff]   ;;  %v11465_v20 = vld [vmem:[%s17894_s0 + $0x98] sm:$0xff]  }
  0x25   :  { %923 = vrot.lane.b32.xlu1 %v11463_v16, %s12662_s12  ;;  %910 = vrot.lane.b32.xlu0 %v11462_v17, %s12662_s12  ;;  %v12870_v18 = vld [vmem:[%s17894_s0 + $0x88] sm:$0xff]   ;;  %v12875_v19 = vld [vmem:[%s17894_s0 + $0x80] sm:$0xff]  }
  0x26   :  { %v11464_v21 = vld [vmem:[%s17894_s0 + $0x90] sm:$0xff]   ;;  %188 = vst.msk [vmem:[#allocation0 + $0x880] ss:$16 sm:$0x3] %vm3_vm0, %v12870_v18   ;;  %v11467_v22 = vld [vmem:[%s17894_s0 + $0xa8] sm:$0xff]   ;;  %v11466_v23 = vld [vmem:[%s17894_s0 + $0xa0] sm:$0xff]  }
  0x27   :  { %190 = vst.msk [vmem:[#allocation0 + $0x880] ss:$16 sm:$0xc] %vm3_vm0, %v12870_v18   ;;  %192 = vst.msk [vmem:[#allocation0 + $0x880] ss:$16 sm:$0x30] %vm3_vm0, %v12870_v18  }
  0x28   :  { %194 = vst.msk [vmem:[#allocation0 + $0x880] ss:$16 sm:$0xc0] %vm3_vm0, %v12870_v18   ;;  %177 = vst.msk [vmem:[#allocation0 + $0x800] ss:$16 sm:$0x3] %vm3_vm0, %v12875_v19  }
  0x29   :  { %179 = vst.msk [vmem:[#allocation0 + $0x800] ss:$16 sm:$0xc] %vm3_vm0, %v12875_v19   ;;  %181 = vst.msk [vmem:[#allocation0 + $0x800] ss:$16 sm:$0x30] %vm3_vm0, %v12875_v19   ;;  %949 = vrot.lane.b32.xlu1 %v11465_v20, %s12662_s12  ;;  %936 = vrot.lane.b32.xlu0 %v11464_v21, %s12662_s12 }
  0x2a   :  { %183 = vst.msk [vmem:[#allocation0 + $0x800] ss:$16 sm:$0xc0] %vm3_vm0, %v12875_v19   ;;  %v12910_v24 = vld [vmem:[%s17894_s0 + $0x98] sm:$0xff]   ;;  %v12915_v25 = vld [vmem:[%s17894_s0 + $0x90] sm:$0xff]   ;;  %v12944_v28 = vld [vmem:[%s17894_s0 + $0xa8] sm:$0xff]  }
  0x2b   :  { %210 = vst.msk [vmem:[#allocation0 + $0x980] ss:$16 sm:$0x3] %vm3_vm0, %v12910_v24   ;;  %212 = vst.msk [vmem:[#allocation0 + $0x980] ss:$16 sm:$0xc] %vm3_vm0, %v12910_v24  }
  0x2c   :  { %214 = vst.msk [vmem:[#allocation0 + $0x980] ss:$16 sm:$0x30] %vm3_vm0, %v12910_v24   ;;  %216 = vst.msk [vmem:[#allocation0 + $0x980] ss:$16 sm:$0xc0] %vm3_vm0, %v12910_v24  }
  0x2d   :  { %199 = vst.msk [vmem:[#allocation0 + $0x900] ss:$16 sm:$0x3] %vm3_vm0, %v12915_v25   ;;  %201 = vst.msk [vmem:[#allocation0 + $0x900] ss:$16 sm:$0xc] %vm3_vm0, %v12915_v25   ;;  %975 = vrot.lane.b32.xlu1 %v11467_v22, %s12662_s12  ;;  %962 = vrot.lane.b32.xlu0 %v11466_v23, %s12662_s12 }
  0x2e   :  { %203 = vst.msk [vmem:[#allocation0 + $0x900] ss:$16 sm:$0x30] %vm3_vm0, %v12915_v25   ;;  %205 = vst.msk [vmem:[#allocation0 + $0x900] ss:$16 sm:$0xc0] %vm3_vm0, %v12915_v25  }
  0x2f   :  { %v11469_v26 = vld [vmem:[%s17894_s0 + $0xb8] sm:$0xff]   ;;  %v11468_v27 = vld [vmem:[%s17894_s0 + $0xb0] sm:$0xff]   ;;  %v12949_v29 = vld [vmem:[%s17894_s0 + $0xa0] sm:$0xff]   ;;  %232 = vst.msk [vmem:[#allocation0 + $0xa80] ss:$16 sm:$0x3] %vm3_vm0, %v12944_v28  }
  0x30   :  { %234 = vst.msk [vmem:[#allocation0 + $0xa80] ss:$16 sm:$0xc] %vm3_vm0, %v12944_v28   ;;  %236 = vst.msk [vmem:[#allocation0 + $0xa80] ss:$16 sm:$0x30] %vm3_vm0, %v12944_v28  }
  0x31   :  { %1001 = vrot.lane.b32.xlu1 %v11469_v26, %s12662_s12  ;;  %988 = vrot.lane.b32.xlu0 %v11468_v27, %s12662_s12  ;;  %238 = vst.msk [vmem:[#allocation0 + $0xa80] ss:$16 sm:$0xc0] %vm3_vm0, %v12944_v28   ;;  %221 = vst.msk [vmem:[#allocation0 + $0xa00] ss:$16 sm:$0x3] %vm3_vm0, %v12949_v29  }
  0x32   :  { %223 = vst.msk [vmem:[#allocation0 + $0xa00] ss:$16 sm:$0xc] %vm3_vm0, %v12949_v29   ;;  %225 = vst.msk [vmem:[#allocation0 + $0xa00] ss:$16 sm:$0x30] %vm3_vm0, %v12949_v29  }
  0x33   :  { %227 = vst.msk [vmem:[#allocation0 + $0xa00] ss:$16 sm:$0xc0] %vm3_vm0, %v12949_v29   ;;  %v11471_v30 = vld [vmem:[%s17894_s0 + $0xc8] sm:$0xff]   ;;  %v11470_v31 = vld [vmem:[%s17894_s0 + $0xc0] sm:$0xff]   ;;  %v12980_v32 = vld [vmem:[%s17894_s0 + $0xb8] sm:$0xff]  }
  0x34   :  { %v12985_v33 = vld [vmem:[%s17894_s0 + $0xb0] sm:$0xff]   ;;  %v11473_v34 = vld [vmem:[%s17894_s0 + $0xd8] sm:$0xff]   ;;  %254 = vst.msk [vmem:[#allocation0 + $0xb80] ss:$16 sm:$0x3] %vm3_vm0, %v12980_v32   ;;  %v11475_v36 = vld [vmem:[%s17894_s0 + $0xe8] sm:$0xff]  }
  0x35   :  { %1027 = vrot.lane.b32.xlu1 %v11471_v30, %s12662_s12  ;;  %1014 = vrot.lane.b32.xlu0 %v11470_v31, %s12662_s12  ;;  %v11472_v35 = vld [vmem:[%s17894_s0 + $0xd0] sm:$0xff]   ;;  %256 = vst.msk [vmem:[#allocation0 + $0xb80] ss:$16 sm:$0xc] %vm3_vm0, %v12980_v32   ;;  %v11474_v37 = vld [vmem:[%s17894_s0 + $0xe0] sm:$0xff]  }
  0x36   :  { %258 = vst.msk [vmem:[#allocation0 + $0xb80] ss:$16 sm:$0x30] %vm3_vm0, %v12980_v32   ;;  %260 = vst.msk [vmem:[#allocation0 + $0xb80] ss:$16 sm:$0xc0] %vm3_vm0, %v12980_v32  }
  0x37   :  { %243 = vst.msk [vmem:[#allocation0 + $0xb00] ss:$16 sm:$0x3] %vm3_vm0, %v12985_v33   ;;  %245 = vst.msk [vmem:[#allocation0 + $0xb00] ss:$16 sm:$0xc] %vm3_vm0, %v12985_v33  }
  0x38   :  { %247 = vst.msk [vmem:[#allocation0 + $0xb00] ss:$16 sm:$0x30] %vm3_vm0, %v12985_v33   ;;  %249 = vst.msk [vmem:[#allocation0 + $0xb00] ss:$16 sm:$0xc0] %vm3_vm0, %v12985_v33  }
  0x39   :  { %1053 = vrot.lane.b32.xlu1 %v11473_v34, %s12662_s12  ;;  %1040 = vrot.lane.b32.xlu0 %v11472_v35, %s12662_s12  ;;  %v13020_v38 = vld [vmem:[%s17894_s0 + $0xc8] sm:$0xff]   ;;  %v13025_v39 = vld [vmem:[%s17894_s0 + $0xc0] sm:$0xff]  }
  0x3a   :  { %276 = vst.msk [vmem:[#allocation0 + $0xc80] ss:$16 sm:$0x3] %vm3_vm0, %v13020_v38   ;;  %278 = vst.msk [vmem:[#allocation0 + $0xc80] ss:$16 sm:$0xc] %vm3_vm0, %v13020_v38  }
  0x3b   :  { %280 = vst.msk [vmem:[#allocation0 + $0xc80] ss:$16 sm:$0x30] %vm3_vm0, %v13020_v38   ;;  %282 = vst.msk [vmem:[#allocation0 + $0xc80] ss:$16 sm:$0xc0] %vm3_vm0, %v13020_v38  }
  0x3c   :  { %265 = vst.msk [vmem:[#allocation0 + $0xc00] ss:$16 sm:$0x3] %vm3_vm0, %v13025_v39   ;;  %267 = vst.msk [vmem:[#allocation0 + $0xc00] ss:$16 sm:$0xc] %vm3_vm0, %v13025_v39  }
  0x3d   :  { %269 = vst.msk [vmem:[#allocation0 + $0xc00] ss:$16 sm:$0x30] %vm3_vm0, %v13025_v39   ;;  %271 = vst.msk [vmem:[#allocation0 + $0xc00] ss:$16 sm:$0xc0] %vm3_vm0, %v13025_v39   ;;  %1079 = vrot.lane.b32.xlu1 %v11475_v36, %s12662_s12  ;;  %1066 = vrot.lane.b32.xlu0 %v11474_v37, %s12662_s12 }
  0x3e   :  { %v11477_v40 = vld [vmem:[%s17894_s0 + $0xf8] sm:$0xff]   ;;  %v11476_v41 = vld [vmem:[%s17894_s0 + $0xf0] sm:$0xff]   ;;  %v11479_v44 = vld [vmem:[%s17894_s0 + $0x108] sm:$0xff]  }
  0x3f   :  { %v13054_v42 = vld [vmem:[%s17894_s0 + $0xd8] sm:$0xff]   ;;  %v13059_v43 = vld [vmem:[%s17894_s0 + $0xd0] sm:$0xff]   ;;  %v11478_v45 = vld [vmem:[%s17894_s0 + $0x100] sm:$0xff]  }
  0x40   :  { %298 = vst.msk [vmem:[#allocation0 + $0xd80] ss:$16 sm:$0x3] %vm3_vm0, %v13054_v42   ;;  %300 = vst.msk [vmem:[#allocation0 + $0xd80] ss:$16 sm:$0xc] %vm3_vm0, %v13054_v42  }
  0x41   :  { %1105 = vrot.lane.b32.xlu1 %v11477_v40, %s12662_s12  ;;  %1092 = vrot.lane.b32.xlu0 %v11476_v41, %s12662_s12  ;;  %302 = vst.msk [vmem:[#allocation0 + $0xd80] ss:$16 sm:$0x30] %vm3_vm0, %v13054_v42   ;;  %304 = vst.msk [vmem:[#allocation0 + $0xd80] ss:$16 sm:$0xc0] %vm3_vm0, %v13054_v42  }
  0x42   :  { %287 = vst.msk [vmem:[#allocation0 + $0xd00] ss:$16 sm:$0x3] %vm3_vm0, %v13059_v43   ;;  %289 = vst.msk [vmem:[#allocation0 + $0xd00] ss:$16 sm:$0xc] %vm3_vm0, %v13059_v43  }
  0x43   :  { %291 = vst.msk [vmem:[#allocation0 + $0xd00] ss:$16 sm:$0x30] %vm3_vm0, %v13059_v43   ;;  %293 = vst.msk [vmem:[#allocation0 + $0xd00] ss:$16 sm:$0xc0] %vm3_vm0, %v13059_v43  }
  0x44   :  { %v13090_v46 = vld [vmem:[%s17894_s0 + $0xe8] sm:$0xff]   ;;  %v13095_v47 = vld [vmem:[%s17894_s0 + $0xe0] sm:$0xff]   ;;  %v11481_v48 = vld [vmem:[%s17894_s0 + $0x118] sm:$0xff]  }
  0x45   :  { %1131 = vrot.lane.b32.xlu1 %v11479_v44, %s12662_s12  ;;  %1118 = vrot.lane.b32.xlu0 %v11478_v45, %s12662_s12  ;;  %v11480_v49 = vld [vmem:[%s17894_s0 + $0x110] sm:$0xff]   ;;  %320 = vst.msk [vmem:[#allocation0 + $0xe80] ss:$16 sm:$0x3] %vm3_vm0, %v13090_v46   ;;  %v11483_v50 = vld [vmem:[%s17894_s0 + $0x128] sm:$0xff]  }
  0x46   :  { %322 = vst.msk [vmem:[#allocation0 + $0xe80] ss:$16 sm:$0xc] %vm3_vm0, %v13090_v46   ;;  %324 = vst.msk [vmem:[#allocation0 + $0xe80] ss:$16 sm:$0x30] %vm3_vm0, %v13090_v46  }
  0x47   :  { %326 = vst.msk [vmem:[#allocation0 + $0xe80] ss:$16 sm:$0xc0] %vm3_vm0, %v13090_v46   ;;  %309 = vst.msk [vmem:[#allocation0 + $0xe00] ss:$16 sm:$0x3] %vm3_vm0, %v13095_v47  }
  0x48   :  { %311 = vst.msk [vmem:[#allocation0 + $0xe00] ss:$16 sm:$0xc] %vm3_vm0, %v13095_v47   ;;  %313 = vst.msk [vmem:[#allocation0 + $0xe00] ss:$16 sm:$0x30] %vm3_vm0, %v13095_v47  }
  0x49   :  { %315 = vst.msk [vmem:[#allocation0 + $0xe00] ss:$16 sm:$0xc0] %vm3_vm0, %v13095_v47   ;;  %1157 = vrot.lane.b32.xlu1 %v11481_v48, %s12662_s12  ;;  %1144 = vrot.lane.b32.xlu0 %v11480_v49, %s12662_s12  ;;  %v11482_v51 = vld [vmem:[%s17894_s0 + $0x120] sm:$0xff]   ;;  %v13130_v52 = vld [vmem:[%s17894_s0 + $0xf8] sm:$0xff]  }
  0x4a   :  { %v13135_v53 = vld [vmem:[%s17894_s0 + $0xf0] sm:$0xff]   ;;  %342 = vst.msk [vmem:[#allocation0 + $0xf80] ss:$16 sm:$0x3] %vm3_vm0, %v13130_v52   ;;  %v11485_v54 = vld [vmem:[%s17894_s0 + $0x138] sm:$0xff]   ;;  %v13164_v56 = vld [vmem:[%s17894_s0 + $0x108] sm:$0xff]  }
  0x4b   :  { %344 = vst.msk [vmem:[#allocation0 + $0xf80] ss:$16 sm:$0xc] %vm3_vm0, %v13130_v52   ;;  %346 = vst.msk [vmem:[#allocation0 + $0xf80] ss:$16 sm:$0x30] %vm3_vm0, %v13130_v52  }
  0x4c   :  { %348 = vst.msk [vmem:[#allocation0 + $0xf80] ss:$16 sm:$0xc0] %vm3_vm0, %v13130_v52   ;;  %331 = vst.msk [vmem:[#allocation0 + $0xf00] ss:$16 sm:$0x3] %vm3_vm0, %v13135_v53  }
  0x4d   :  { %333 = vst.msk [vmem:[#allocation0 + $0xf00] ss:$16 sm:$0xc] %vm3_vm0, %v13135_v53   ;;  %335 = vst.msk [vmem:[#allocation0 + $0xf00] ss:$16 sm:$0x30] %vm3_vm0, %v13135_v53   ;;  %1183 = vrot.lane.b32.xlu1 %v11483_v50, %s12662_s12  ;;  %1170 = vrot.lane.b32.xlu0 %v11482_v51, %s12662_s12 }
  0x4e   :  { %337 = vst.msk [vmem:[#allocation0 + $0xf00] ss:$16 sm:$0xc0] %vm3_vm0, %v13135_v53   ;;  %v11484_v55 = vld [vmem:[%s17894_s0 + $0x130] sm:$0xff]   ;;  %v13169_v57 = vld [vmem:[%s17894_s0 + $0x100] sm:$0xff]   ;;  %v11487_v58 = vld [vmem:[%s17894_s0 + $0x148] sm:$0xff]  }
  0x4f   :  { %364 = vst.msk [vmem:[#allocation0 + $0x1080] ss:$16 sm:$0x3] %vm3_vm0, %v13164_v56   ;;  %366 = vst.msk [vmem:[#allocation0 + $0x1080] ss:$16 sm:$0xc] %vm3_vm0, %v13164_v56  }
  0x50   :  { %368 = vst.msk [vmem:[#allocation0 + $0x1080] ss:$16 sm:$0x30] %vm3_vm0, %v13164_v56   ;;  %370 = vst.msk [vmem:[#allocation0 + $0x1080] ss:$16 sm:$0xc0] %vm3_vm0, %v13164_v56  }
  0x51   :  { %1209 = vrot.lane.b32.xlu1 %v11485_v54, %s12662_s12  ;;  %1196 = vrot.lane.b32.xlu0 %v11484_v55, %s12662_s12  ;;  %353 = vst.msk [vmem:[#allocation0 + $0x1000] ss:$16 sm:$0x3] %vm3_vm0, %v13169_v57   ;;  %355 = vst.msk [vmem:[#allocation0 + $0x1000] ss:$16 sm:$0xc] %vm3_vm0, %v13169_v57  }
  0x52   :  { %357 = vst.msk [vmem:[#allocation0 + $0x1000] ss:$16 sm:$0x30] %vm3_vm0, %v13169_v57   ;;  %359 = vst.msk [vmem:[#allocation0 + $0x1000] ss:$16 sm:$0xc0] %vm3_vm0, %v13169_v57  }
  0x53   :  { %v11486_v59 = vld [vmem:[%s17894_s0 + $0x140] sm:$0xff]   ;;  %v13200_v60 = vld [vmem:[%s17894_s0 + $0x118] sm:$0xff]   ;;  %v13205_v61 = vld [vmem:[%s17894_s0 + $0x110] sm:$0xff]  }
  0x54   :  { %v11489_v62 = vld [vmem:[%s17894_s0 + $0x158] sm:$0xff]   ;;  %v11488_v63 = vld [vmem:[%s17894_s0 + $0x150] sm:$0xff]   ;;  %386 = vst.msk [vmem:[#allocation0 + $0x1180] ss:$16 sm:$0x3] %vm3_vm0, %v13200_v60   ;;  %v11491_v8 = vld [vmem:[%s17894_s0 + $0x168] sm:$0xff]  }
  0x55   :  { %1235 = vrot.lane.b32.xlu1 %v11487_v58, %s12662_s12  ;;  %1222 = vrot.lane.b32.xlu0 %v11486_v59, %s12662_s12  ;;  %388 = vst.msk [vmem:[#allocation0 + $0x1180] ss:$16 sm:$0xc] %vm3_vm0, %v13200_v60   ;;  %390 = vst.msk [vmem:[#allocation0 + $0x1180] ss:$16 sm:$0x30] %vm3_vm0, %v13200_v60  }
  0x56   :  { %392 = vst.msk [vmem:[#allocation0 + $0x1180] ss:$16 sm:$0xc0] %vm3_vm0, %v13200_v60   ;;  %375 = vst.msk [vmem:[#allocation0 + $0x1100] ss:$16 sm:$0x3] %vm3_vm0, %v13205_v61  }
  0x57   :  { %377 = vst.msk [vmem:[#allocation0 + $0x1100] ss:$16 sm:$0xc] %vm3_vm0, %v13205_v61   ;;  %379 = vst.msk [vmem:[#allocation0 + $0x1100] ss:$16 sm:$0x30] %vm3_vm0, %v13205_v61  }
  0x58   :  { %381 = vst.msk [vmem:[#allocation0 + $0x1100] ss:$16 sm:$0xc0] %vm3_vm0, %v13205_v61   ;;  %v11490_v9 = vld [vmem:[%s17894_s0 + $0x160] sm:$0xff]   ;;  %v13240_v10 = vld [vmem:[%s17894_s0 + $0x128] sm:$0xff]   ;;  %v11493_v12 = vld [vmem:[%s17894_s0 + $0x178] sm:$0xff]  }
  0x59   :  { %1261 = vrot.lane.b32.xlu1 %v11489_v62, %s12662_s12  ;;  %1248 = vrot.lane.b32.xlu0 %v11488_v63, %s12662_s12  ;;  %v13245_v11 = vld [vmem:[%s17894_s0 + $0x120] sm:$0xff]   ;;  %408 = vst.msk [vmem:[#allocation0 + $0x1280] ss:$16 sm:$0x3] %vm3_vm0, %v13240_v10   ;;  %v11492_v13 = vld [vmem:[%s17894_s0 + $0x170] sm:$0xff]  }
  0x5a   :  { %410 = vst.msk [vmem:[#allocation0 + $0x1280] ss:$16 sm:$0xc] %vm3_vm0, %v13240_v10   ;;  %412 = vst.msk [vmem:[#allocation0 + $0x1280] ss:$16 sm:$0x30] %vm3_vm0, %v13240_v10  }
  0x5b   :  { %414 = vst.msk [vmem:[#allocation0 + $0x1280] ss:$16 sm:$0xc0] %vm3_vm0, %v13240_v10   ;;  %397 = vst.msk [vmem:[#allocation0 + $0x1200] ss:$16 sm:$0x3] %vm3_vm0, %v13245_v11  }
  0x5c   :  { %399 = vst.msk [vmem:[#allocation0 + $0x1200] ss:$16 sm:$0xc] %vm3_vm0, %v13245_v11   ;;  %401 = vst.msk [vmem:[#allocation0 + $0x1200] ss:$16 sm:$0x30] %vm3_vm0, %v13245_v11  }
  0x5d   :  { %403 = vst.msk [vmem:[#allocation0 + $0x1200] ss:$16 sm:$0xc0] %vm3_vm0, %v13245_v11   ;;  %1287 = vrot.lane.b32.xlu1 %v11491_v8, %s12662_s12  ;;  %1274 = vrot.lane.b32.xlu0 %v11490_v9, %s12662_s12  ;;  %v13274_v14 = vld [vmem:[%s17894_s0 + $0x138] sm:$0xff]   ;;  %v13279_v15 = vld [vmem:[%s17894_s0 + $0x130] sm:$0xff]  }
  0x5e   :  { %430 = vst.msk [vmem:[#allocation0 + $0x1380] ss:$16 sm:$0x3] %vm3_vm0, %v13274_v14   ;;  %432 = vst.msk [vmem:[#allocation0 + $0x1380] ss:$16 sm:$0xc] %vm3_vm0, %v13274_v14  }
  0x5f   :  { %434 = vst.msk [vmem:[#allocation0 + $0x1380] ss:$16 sm:$0x30] %vm3_vm0, %v13274_v14   ;;  %436 = vst.msk [vmem:[#allocation0 + $0x1380] ss:$16 sm:$0xc0] %vm3_vm0, %v13274_v14  }
  0x60   :  { %419 = vst.msk [vmem:[#allocation0 + $0x1300] ss:$16 sm:$0x3] %vm3_vm0, %v13279_v15   ;;  %421 = vst.msk [vmem:[#allocation0 + $0x1300] ss:$16 sm:$0xc] %vm3_vm0, %v13279_v15  }
  0x61   :  { %1313 = vrot.lane.b32.xlu1 %v11493_v12, %s12662_s12  ;;  %1300 = vrot.lane.b32.xlu0 %v11492_v13, %s12662_s12  ;;  %423 = vst.msk [vmem:[#allocation0 + $0x1300] ss:$16 sm:$0x30] %vm3_vm0, %v13279_v15   ;;  %425 = vst.msk [vmem:[#allocation0 + $0x1300] ss:$16 sm:$0xc0] %vm3_vm0, %v13279_v15  }
  0x62   :  { %v11495_v16 = vld [vmem:[%s17894_s0 + $0x188] sm:$0xff]   ;;  %v11494_v17 = vld [vmem:[%s17894_s0 + $0x180] sm:$0xff]   ;;  %v11497_v22 = vld [vmem:[%s17894_s0 + $0x198] sm:$0xff]  }
  0x63   :  { %v13310_v20 = vld [vmem:[%s17894_s0 + $0x148] sm:$0xff]   ;;  %v13315_v21 = vld [vmem:[%s17894_s0 + $0x140] sm:$0xff]   ;;  %v11496_v23 = vld [vmem:[%s17894_s0 + $0x190] sm:$0xff]  }
  0x64   :  { %452 = vst.msk [vmem:[#allocation0 + $0x1480] ss:$16 sm:$0x3] %vm3_vm0, %v13310_v20   ;;  %454 = vst.msk [vmem:[#allocation0 + $0x1480] ss:$16 sm:$0xc] %vm3_vm0, %v13310_v20  }
  0x65   :  { %1339 = vrot.lane.b32.xlu1 %v11495_v16, %s12662_s12  ;;  %1326 = vrot.lane.b32.xlu0 %v11494_v17, %s12662_s12  ;;  %456 = vst.msk [vmem:[#allocation0 + $0x1480] ss:$16 sm:$0x30] %vm3_vm0, %v13310_v20   ;;  %458 = vst.msk [vmem:[#allocation0 + $0x1480] ss:$16 sm:$0xc0] %vm3_vm0, %v13310_v20  }
  0x66   :  { %441 = vst.msk [vmem:[#allocation0 + $0x1400] ss:$16 sm:$0x3] %vm3_vm0, %v13315_v21   ;;  %443 = vst.msk [vmem:[#allocation0 + $0x1400] ss:$16 sm:$0xc] %vm3_vm0, %v13315_v21  }
  0x67   :  { %445 = vst.msk [vmem:[#allocation0 + $0x1400] ss:$16 sm:$0x30] %vm3_vm0, %v13315_v21   ;;  %447 = vst.msk [vmem:[#allocation0 + $0x1400] ss:$16 sm:$0xc0] %vm3_vm0, %v13315_v21  }
  0x68   :  { %v11499_v26 = vld [vmem:[%s17894_s0 + $0x1a8] sm:$0xff]   ;;  %v11498_v27 = vld [vmem:[%s17894_s0 + $0x1a0] sm:$0xff]   ;;  %v13350_v30 = vld [vmem:[%s17894_s0 + $0x158] sm:$0xff]  }
  0x69   :  { %1365 = vrot.lane.b32.xlu1 %v11497_v22, %s12662_s12  ;;  %1352 = vrot.lane.b32.xlu0 %v11496_v23, %s12662_s12  ;;  %v13355_v31 = vld [vmem:[%s17894_s0 + $0x150] sm:$0xff]   ;;  %474 = vst.msk [vmem:[#allocation0 + $0x1580] ss:$16 sm:$0x3] %vm3_vm0, %v13350_v30   ;;  %v11501_v34 = vld [vmem:[%s17894_s0 + $0x1b8] sm:$0xff]  }
  0x6a   :  { %476 = vst.msk [vmem:[#allocation0 + $0x1580] ss:$16 sm:$0xc] %vm3_vm0, %v13350_v30   ;;  %478 = vst.msk [vmem:[#allocation0 + $0x1580] ss:$16 sm:$0x30] %vm3_vm0, %v13350_v30  }
  0x6b   :  { %480 = vst.msk [vmem:[#allocation0 + $0x1580] ss:$16 sm:$0xc0] %vm3_vm0, %v13350_v30   ;;  %463 = vst.msk [vmem:[#allocation0 + $0x1500] ss:$16 sm:$0x3] %vm3_vm0, %v13355_v31  }
  0x6c   :  { %465 = vst.msk [vmem:[#allocation0 + $0x1500] ss:$16 sm:$0xc] %vm3_vm0, %v13355_v31   ;;  %467 = vst.msk [vmem:[#allocation0 + $0x1500] ss:$16 sm:$0x30] %vm3_vm0, %v13355_v31  }
  0x6d   :  { %469 = vst.msk [vmem:[#allocation0 + $0x1500] ss:$16 sm:$0xc0] %vm3_vm0, %v13355_v31   ;;  %1391 = vrot.lane.b32.xlu1 %v11499_v26, %s12662_s12  ;;  %1378 = vrot.lane.b32.xlu0 %v11498_v27, %s12662_s12  ;;  %v11500_v35 = vld [vmem:[%s17894_s0 + $0x1b0] sm:$0xff]   ;;  %v13384_v36 = vld [vmem:[%s17894_s0 + $0x168] sm:$0xff]  }
  0x6e   :  { %v13389_v37 = vld [vmem:[%s17894_s0 + $0x160] sm:$0xff]   ;;  %496 = vst.msk [vmem:[#allocation0 + $0x1680] ss:$16 sm:$0x3] %vm3_vm0, %v13384_v36   ;;  %v11503_v40 = vld [vmem:[%s17894_s0 + $0x1c8] sm:$0xff]   ;;  %v13420_v44 = vld [vmem:[%s17894_s0 + $0x178] sm:$0xff]  }
  0x6f   :  { %498 = vst.msk [vmem:[#allocation0 + $0x1680] ss:$16 sm:$0xc] %vm3_vm0, %v13384_v36   ;;  %500 = vst.msk [vmem:[#allocation0 + $0x1680] ss:$16 sm:$0x30] %vm3_vm0, %v13384_v36  }
  0x70   :  { %502 = vst.msk [vmem:[#allocation0 + $0x1680] ss:$16 sm:$0xc0] %vm3_vm0, %v13384_v36   ;;  %485 = vst.msk [vmem:[#allocation0 + $0x1600] ss:$16 sm:$0x3] %vm3_vm0, %v13389_v37  }
  0x71   :  { %1417 = vrot.lane.b32.xlu1 %v11501_v34, %s12662_s12  ;;  %1404 = vrot.lane.b32.xlu0 %v11500_v35, %s12662_s12  ;;  %487 = vst.msk [vmem:[#allocation0 + $0x1600] ss:$16 sm:$0xc] %vm3_vm0, %v13389_v37   ;;  %489 = vst.msk [vmem:[#allocation0 + $0x1600] ss:$16 sm:$0x30] %vm3_vm0, %v13389_v37  }
  0x72   :  { %491 = vst.msk [vmem:[#allocation0 + $0x1600] ss:$16 sm:$0xc0] %vm3_vm0, %v13389_v37   ;;  %v11502_v41 = vld [vmem:[%s17894_s0 + $0x1c0] sm:$0xff]   ;;  %v13425_v45 = vld [vmem:[%s17894_s0 + $0x170] sm:$0xff]   ;;  %v11505_v48 = vld [vmem:[%s17894_s0 + $0x1d8] sm:$0xff]  }
  0x73   :  { %v11504_v49 = vld [vmem:[%s17894_s0 + $0x1d0] sm:$0xff]   ;;  %518 = vst.msk [vmem:[#allocation0 + $0x1780] ss:$16 sm:$0x3] %vm3_vm0, %v13420_v44   ;;  %v11507_v54 = vld [vmem:[%s17894_s0 + $0x1e8] sm:$0xff]   ;;  %v11506_v55 = vld [vmem:[%s17894_s0 + $0x1e0] sm:$0xff]  }
  0x74   :  { %520 = vst.msk [vmem:[#allocation0 + $0x1780] ss:$16 sm:$0xc] %vm3_vm0, %v13420_v44   ;;  %522 = vst.msk [vmem:[#allocation0 + $0x1780] ss:$16 sm:$0x30] %vm3_vm0, %v13420_v44   ;;  %v729_v50 = vpop.permute.xlu1 %728   ;;  %v703_v51 = vpop.permute.xlu0 %702  }
  0x75   :  { %1443 = vrot.lane.b32.xlu1 %v11503_v40, %s12662_s12  ;;  %1430 = vrot.lane.b32.xlu0 %v11502_v41, %s12662_s12  ;;  %524 = vst.msk [vmem:[#allocation0 + $0x1780] ss:$16 sm:$0xc0] %vm3_vm0, %v13420_v44   ;;  %507 = vst.msk [vmem:[#allocation0 + $0x1700] ss:$16 sm:$0x3] %vm3_vm0, %v13425_v45  }
  0x76   :  { %509 = vst.msk [vmem:[#allocation0 + $0x1700] ss:$16 sm:$0xc] %vm3_vm0, %v13425_v45   ;;  %511 = vst.msk [vmem:[#allocation0 + $0x1700] ss:$16 sm:$0x30] %vm3_vm0, %v13425_v45  }
  0x77   :  { %513 = vst.msk [vmem:[#allocation0 + $0x1700] ss:$16 sm:$0xc0] %vm3_vm0, %v13425_v45   ;;  %732 = vst.msk [vmem:[#allocation0 + $0x101] ss:$16 sm:$0x3] %vm3_vm0, %v729_v50  }
  0x78   :  { %734 = vst.msk [vmem:[#allocation0 + $0x101] ss:$16 sm:$0xc] %vm3_vm0, %v729_v50   ;;  %736 = vst.msk [vmem:[#allocation0 + $0x101] ss:$16 sm:$0x30] %vm3_vm0, %v729_v50   ;;  %v742_v62 = vpop.permute.xlu1 %741   ;;  %v716_v63 = vpop.permute.xlu0 %715  }
  0x79   :  { %738 = vst.msk [vmem:[#allocation0 + $0x101] ss:$16 sm:$0xc0] %vm3_vm0, %v729_v50   ;;  %706 = vst.msk [vmem:[#allocation0 + $0x1] ss:$16 sm:$0x3] %vm3_vm0, %v703_v51   ;;  %1469 = vrot.lane.b32.xlu1 %v11505_v48, %s12662_s12  ;;  %1456 = vrot.lane.b32.xlu0 %v11504_v49, %s12662_s12 }
  0x7a   :  { %708 = vst.msk [vmem:[#allocation0 + $0x1] ss:$16 sm:$0xc] %vm3_vm0, %v703_v51   ;;  %710 = vst.msk [vmem:[#allocation0 + $0x1] ss:$16 sm:$0x30] %vm3_vm0, %v703_v51  }
  0x7b   :  { %712 = vst.msk [vmem:[#allocation0 + $0x1] ss:$16 sm:$0xc0] %vm3_vm0, %v703_v51   ;;  %v13468_v58 = vld [vmem:[%s17894_s0 + $0x188] sm:$0xff]   ;;  %v13473_v59 = vld [vmem:[%s17894_s0 + $0x180] sm:$0xff]   ;;  %v11509_v8 = vld [vmem:[%s17894_s0 + $0x1f8] sm:$0xff]  }
  0x7c   :  { %540 = vst.msk [vmem:[#allocation0 + $0x1880] ss:$16 sm:$0x3] %vm3_vm0, %v13468_v58   ;;  %542 = vst.msk [vmem:[#allocation0 + $0x1880] ss:$16 sm:$0xc] %vm3_vm0, %v13468_v58   ;;  %v768_v17 = vpop.permute.xlu1 %767   ;;  %v755_v22 = vpop.permute.xlu0 %754  }
  0x7d   :  { %544 = vst.msk [vmem:[#allocation0 + $0x1880] ss:$16 sm:$0x30] %vm3_vm0, %v13468_v58   ;;  %546 = vst.msk [vmem:[#allocation0 + $0x1880] ss:$16 sm:$0xc0] %vm3_vm0, %v13468_v58   ;;  %1495 = vrot.lane.b32.xlu1 %v11507_v54, %s12662_s12  ;;  %1482 = vrot.lane.b32.xlu0 %v11506_v55, %s12662_s12 }
  0x7e   :  { %529 = vst.msk [vmem:[#allocation0 + $0x1800] ss:$16 sm:$0x3] %vm3_vm0, %v13473_v59   ;;  %531 = vst.msk [vmem:[#allocation0 + $0x1800] ss:$16 sm:$0xc] %vm3_vm0, %v13473_v59  }
  0x7f   :  { %533 = vst.msk [vmem:[#allocation0 + $0x1800] ss:$16 sm:$0x30] %vm3_vm0, %v13473_v59   ;;  %535 = vst.msk [vmem:[#allocation0 + $0x1800] ss:$16 sm:$0xc0] %vm3_vm0, %v13473_v59  }
  0x80   :  { %745 = vst.msk [vmem:[#allocation0 + $0x181] ss:$16 sm:$0x3] %vm3_vm0, %v742_v62   ;;  %747 = vst.msk [vmem:[#allocation0 + $0x181] ss:$16 sm:$0xc] %vm3_vm0, %v742_v62   ;;  %v794_v55 = vpop.permute.xlu1 %793  }
  0x81   :  { %749 = vst.msk [vmem:[#allocation0 + $0x181] ss:$16 sm:$0x30] %vm3_vm0, %v742_v62   ;;  %751 = vst.msk [vmem:[#allocation0 + $0x181] ss:$16 sm:$0xc0] %vm3_vm0, %v742_v62   ;;  %1521 = vrot.lane.b32.xlu1 %v11509_v8, %s12662_s12  ;;  %v781_v62 = vpop.permute.xlu0 %780  }
  0x82   :  { %719 = vst.msk [vmem:[#allocation0 + $0x81] ss:$16 sm:$0x3] %vm3_vm0, %v716_v63   ;;  %721 = vst.msk [vmem:[#allocation0 + $0x81] ss:$16 sm:$0xc] %vm3_vm0, %v716_v63  }
  0x83   :  { %723 = vst.msk [vmem:[#allocation0 + $0x81] ss:$16 sm:$0x30] %vm3_vm0, %v716_v63   ;;  %725 = vst.msk [vmem:[#allocation0 + $0x81] ss:$16 sm:$0xc0] %vm3_vm0, %v716_v63  }
  0x84   :  { %v11508_v9 = vld [vmem:[%s17894_s0 + $0x1f0] sm:$0xff]   ;;  %v3419_v12 = vld [vmem:[#allocation0 + $0x100] sm:$0x3]  ;;  %771 = vst.msk [vmem:[#allocation0 + $0x281] ss:$16 sm:$0x3] %vm3_vm0, %v768_v17  }
  0x85   :  { %v3433_v13 = vld [vmem:[#allocation0 + $0x110] sm:$0x3]  ;;  %v3447_v16 = vld [vmem:[#allocation0 + $0x120] sm:$0x3]  ;;  %11667 = vst [vmem:[%s17895_s1 + $0x40] sm:$0x3] %v3419_v12  ;;  %1508 = vrot.lane.b32.xlu0 %v11508_v9, %s12662_s12  ;;  %1546 = vrot.lane.b32.xlu1 %v12697_v3, %s12663_s14 }
  0x86   :  { %11669 = vst [vmem:[%s17895_s1 + $0x44] sm:$0x3] %v3433_v13  ;;  %11671 = vst [vmem:[%s17895_s1 + $0x48] sm:$0x3] %v3447_v16  ;;  %v3461_v23 = vld [vmem:[#allocation0 + $0x130] sm:$0x3] }
  0x87   :  { %v3475_v26 = vld [vmem:[#allocation0 + $0x140] sm:$0x3]  ;;  %v3489_v27 = vld [vmem:[#allocation0 + $0x150] sm:$0x3]  ;;  %11673 = vst [vmem:[%s17895_s1 + $0x4c] sm:$0x3] %v3461_v23 }
  0x88   :  { %773 = vst.msk [vmem:[#allocation0 + $0x281] ss:$16 sm:$0xc] %vm3_vm0, %v768_v17   ;;  %775 = vst.msk [vmem:[#allocation0 + $0x281] ss:$16 sm:$0x30] %vm3_vm0, %v768_v17  }
  0x89   :  { %777 = vst.msk [vmem:[#allocation0 + $0x281] ss:$16 sm:$0xc0] %vm3_vm0, %v768_v17   ;;  %758 = vst.msk [vmem:[#allocation0 + $0x201] ss:$16 sm:$0x3] %vm3_vm0, %v755_v22   ;;  %1533 = vrot.lane.b32.xlu0 %v12683_v1, %s12663_s14  ;;  %1572 = vrot.lane.b32.xlu1 %v12688_v2, %s12663_s14 }
  0x8a   :  { %760 = vst.msk [vmem:[#allocation0 + $0x201] ss:$16 sm:$0xc] %vm3_vm0, %v755_v22   ;;  %762 = vst.msk [vmem:[#allocation0 + $0x201] ss:$16 sm:$0x30] %vm3_vm0, %v755_v22  }
  0x8b   :  { %764 = vst.msk [vmem:[#allocation0 + $0x201] ss:$16 sm:$0xc0] %vm3_vm0, %v755_v22   ;;  %11675 = vst [vmem:[%s17895_s1 + $0x50] sm:$0x3] %v3475_v26 }
  0x8c   :  { %11677 = vst [vmem:[%s17895_s1 + $0x54] sm:$0x3] %v3489_v27  ;;  %v3503_v34 = vld [vmem:[#allocation0 + $0x160] sm:$0x3]  ;;  %v3517_v35 = vld [vmem:[#allocation0 + $0x170] sm:$0x3]  ;;  %v820_v27 = vpop.permute.xlu1 %819  }
  0x8d   :  { %v3198_v40 = vld [vmem:[#allocation0] sm:$0x3]  ;;  %11679 = vst [vmem:[%s17895_s1 + $0x58] sm:$0x3] %v3503_v34  ;;  %11681 = vst [vmem:[%s17895_s1 + $0x5c] sm:$0x3] %v3517_v35  ;;  %v807_v34 = vpop.permute.xlu0 %806   ;;  %1559 = vrot.lane.b32.xlu0 %v12678_v0, %s12663_s14  ;;  %1598 = vrot.lane.b32.xlu1 %v12702_v4, %s12663_s14 }
  0x8e   :  { %3201 = vst [vmem:[%s17895_s1] sm:$0x3] %v3198_v40  ;;  %v3209_v41 = vld [vmem:[#allocation0 + $0x10] sm:$0x3]  ;;  %v3223_v48 = vld [vmem:[#allocation0 + $0x20] sm:$0x3] }
  0x8f   :  { %v3237_v49 = vld [vmem:[#allocation0 + $0x30] sm:$0x3]  ;;  %11637 = vst [vmem:[%s17895_s1 + $0x4] sm:$0x3] %v3209_v41  ;;  %11639 = vst [vmem:[%s17895_s1 + $0x8] sm:$0x3] %v3223_v48 }
  0x90   :  { %11641 = vst [vmem:[%s17895_s1 + $0xc] sm:$0x3] %v3237_v49  ;;  %v3251_v50 = vld [vmem:[#allocation0 + $0x40] sm:$0x3]  ;;  %v3265_v51 = vld [vmem:[#allocation0 + $0x50] sm:$0x3] }
  0x91   :  { %v3279_v54 = vld [vmem:[#allocation0 + $0x60] sm:$0x3]  ;;  %11643 = vst [vmem:[%s17895_s1 + $0x10] sm:$0x3] %v3251_v50  ;;  %11645 = vst [vmem:[%s17895_s1 + $0x14] sm:$0x3] %v3265_v51  ;;  %1585 = vrot.lane.b32.xlu0 %v12731_v5, %s12663_s14  ;;  %1624 = vrot.lane.b32.xlu1 %v12736_v6, %s12663_s14 }
  0x92   :  { %11647 = vst [vmem:[%s17895_s1 + $0x18] sm:$0x3] %v3279_v54  ;;  %v3293_v63 = vld [vmem:[#allocation0 + $0x70] sm:$0x3]  ;;  %v3531_v8 = vld [vmem:[#allocation0 + $0x180] sm:$0x3] }
  0x93   :  { %v3545_v9 = vld [vmem:[#allocation0 + $0x190] sm:$0x3]  ;;  %797 = vst.msk [vmem:[#allocation0 + $0x381] ss:$16 sm:$0x3] %vm3_vm0, %v794_v55  }
  0x94   :  { %799 = vst.msk [vmem:[#allocation0 + $0x381] ss:$16 sm:$0xc] %vm3_vm0, %v794_v55   ;;  %801 = vst.msk [vmem:[#allocation0 + $0x381] ss:$16 sm:$0x30] %vm3_vm0, %v794_v55  }
  0x95   :  { %803 = vst.msk [vmem:[#allocation0 + $0x381] ss:$16 sm:$0xc0] %vm3_vm0, %v794_v55   ;;  %784 = vst.msk [vmem:[#allocation0 + $0x301] ss:$16 sm:$0x3] %vm3_vm0, %v781_v62   ;;  %1611 = vrot.lane.b32.xlu0 %v12741_v7, %s12663_s14 }
  0x96   :  { %786 = vst.msk [vmem:[#allocation0 + $0x301] ss:$16 sm:$0xc] %vm3_vm0, %v781_v62   ;;  %788 = vst.msk [vmem:[#allocation0 + $0x301] ss:$16 sm:$0x30] %vm3_vm0, %v781_v62  }
  0x97   :  { %790 = vst.msk [vmem:[#allocation0 + $0x301] ss:$16 sm:$0xc0] %vm3_vm0, %v781_v62   ;;  %11649 = vst [vmem:[%s17895_s1 + $0x1c] sm:$0x3] %v3293_v63  ;;  %v846_v63 = vpop.permute.xlu1 %845  }
  0x98   :  { %11683 = vst [vmem:[%s17895_s1 + $0x60] sm:$0x3] %v3531_v8  ;;  %11685 = vst [vmem:[%s17895_s1 + $0x64] sm:$0x3] %v3545_v9  ;;  %v3559_v12 = vld [vmem:[#allocation0 + $0x1a0] sm:$0x3]  ;;  %v833_v8 = vpop.permute.xlu0 %832  }
  0x99   :  { %v3573_v13 = vld [vmem:[#allocation0 + $0x1b0] sm:$0x3]  ;;  %v3587_v16 = vld [vmem:[#allocation0 + $0x1c0] sm:$0x3]  ;;  %11687 = vst [vmem:[%s17895_s1 + $0x68] sm:$0x3] %v3559_v12 }
  0x9a   :  { %11689 = vst [vmem:[%s17895_s1 + $0x6c] sm:$0x3] %v3573_v13  ;;  %11691 = vst [vmem:[%s17895_s1 + $0x70] sm:$0x3] %v3587_v16  ;;  %v3601_v1 = vld [vmem:[#allocation0 + $0x1d0] sm:$0x3] }
  0x9b   :  { %v3615_v3 = vld [vmem:[#allocation0 + $0x1e0] sm:$0x3]  ;;  %v3629_v17 = vld [vmem:[#allocation0 + $0x1f0] sm:$0x3]  ;;  %11693 = vst [vmem:[%s17895_s1 + $0x74] sm:$0x3] %v3601_v1 }
  0x9c   :  { %11695 = vst [vmem:[%s17895_s1 + $0x78] sm:$0x3] %v3615_v3  ;;  %11697 = vst [vmem:[%s17895_s1 + $0x7c] sm:$0x3] %v3629_v17  ;;  %v3307_v22 = vld [vmem:[#allocation0 + $0x80] sm:$0x3] }
  0x9d   :  { %v3321_v23 = vld [vmem:[#allocation0 + $0x90] sm:$0x3]  ;;  %v3335_v26 = vld [vmem:[#allocation0 + $0xa0] sm:$0x3]  ;;  %11651 = vst [vmem:[%s17895_s1 + $0x20] sm:$0x3] %v3307_v22 }
  0x9e   :  { %11653 = vst [vmem:[%s17895_s1 + $0x24] sm:$0x3] %v3321_v23  ;;  %11655 = vst [vmem:[%s17895_s1 + $0x28] sm:$0x3] %v3335_v26  ;;  %v3349_v35 = vld [vmem:[#allocation0 + $0xb0] sm:$0x3] }
  0x9f   :  { %v3363_v40 = vld [vmem:[#allocation0 + $0xc0] sm:$0x3]  ;;  %v3377_v41 = vld [vmem:[#allocation0 + $0xd0] sm:$0x3]  ;;  %11657 = vst [vmem:[%s17895_s1 + $0x2c] sm:$0x3] %v3349_v35 }
  0xa0   :  { %823 = vst.msk [vmem:[#allocation0 + $0x481] ss:$16 sm:$0x3] %vm3_vm0, %v820_v27   ;;  %825 = vst.msk [vmem:[#allocation0 + $0x481] ss:$16 sm:$0xc] %vm3_vm0, %v820_v27  }
  0xa1   :  { %827 = vst.msk [vmem:[#allocation0 + $0x481] ss:$16 sm:$0x30] %vm3_vm0, %v820_v27   ;;  %829 = vst.msk [vmem:[#allocation0 + $0x481] ss:$16 sm:$0xc0] %vm3_vm0, %v820_v27   ;;  %v872_v27 = vpop.permute.xlu1 %871  }
  0xa2   :  { %810 = vst.msk [vmem:[#allocation0 + $0x401] ss:$16 sm:$0x3] %vm3_vm0, %v807_v34   ;;  %812 = vst.msk [vmem:[#allocation0 + $0x401] ss:$16 sm:$0xc] %vm3_vm0, %v807_v34  }
  0xa3   :  { %814 = vst.msk [vmem:[#allocation0 + $0x401] ss:$16 sm:$0x30] %vm3_vm0, %v807_v34   ;;  %816 = vst.msk [vmem:[#allocation0 + $0x401] ss:$16 sm:$0xc0] %vm3_vm0, %v807_v34   ;;  %v859_v34 = vpop.permute.xlu0 %858  }
  0xa4   :  { %11659 = vst [vmem:[%s17895_s1 + $0x30] sm:$0x3] %v3363_v40  ;;  %11661 = vst [vmem:[%s17895_s1 + $0x34] sm:$0x3] %v3377_v41  ;;  %v3391_v48 = vld [vmem:[#allocation0 + $0xe0] sm:$0x3] }
  0xa5   :  { %v3405_v49 = vld [vmem:[#allocation0 + $0xf0] sm:$0x3]  ;;  %v3755_v50 = vld [vmem:[#allocation0 + $0x280] sm:$0x3]  ;;  %11663 = vst [vmem:[%s17895_s1 + $0x38] sm:$0x3] %v3391_v48 }
  0xa6   :  { %11665 = vst [vmem:[%s17895_s1 + $0x3c] sm:$0x3] %v3405_v49  ;;  %11715 = vst [vmem:[%s17895_s1 + $0xa0] sm:$0x3] %v3755_v50  ;;  %v3769_v0 = vld [vmem:[#allocation0 + $0x290] sm:$0x3] }
  0xa7   :  { %v3783_v2 = vld [vmem:[#allocation0 + $0x2a0] sm:$0x3]  ;;  %v3797_v51 = vld [vmem:[#allocation0 + $0x2b0] sm:$0x3]  ;;  %11717 = vst [vmem:[%s17895_s1 + $0xa4] sm:$0x3] %v3769_v0 }
  0xa8   :  { %11719 = vst [vmem:[%s17895_s1 + $0xa8] sm:$0x3] %v3783_v2  ;;  %11721 = vst [vmem:[%s17895_s1 + $0xac] sm:$0x3] %v3797_v51  ;;  %v3811_v54 = vld [vmem:[#allocation0 + $0x2c0] sm:$0x3] }
  0xa9   :  { %v3825_v55 = vld [vmem:[#allocation0 + $0x2d0] sm:$0x3]  ;;  %v3839_v62 = vld [vmem:[#allocation0 + $0x2e0] sm:$0x3]  ;;  %11723 = vst [vmem:[%s17895_s1 + $0xb0] sm:$0x3] %v3811_v54 }
  0xaa   :  { %11725 = vst [vmem:[%s17895_s1 + $0xb4] sm:$0x3] %v3825_v55  ;;  %11727 = vst [vmem:[%s17895_s1 + $0xb8] sm:$0x3] %v3839_v62  ;;  %v3853_v9 = vld [vmem:[#allocation0 + $0x2f0] sm:$0x3] }
  0xab   :  { %v3643_v12 = vld [vmem:[#allocation0 + $0x200] sm:$0x3]  ;;  %v3657_v13 = vld [vmem:[#allocation0 + $0x210] sm:$0x3]  ;;  %11729 = vst [vmem:[%s17895_s1 + $0xbc] sm:$0x3] %v3853_v9 }
  0xac   :  { %849 = vst.msk [vmem:[#allocation0 + $0x581] ss:$16 sm:$0x3] %vm3_vm0, %v846_v63   ;;  %851 = vst.msk [vmem:[#allocation0 + $0x581] ss:$16 sm:$0xc] %vm3_vm0, %v846_v63  }
  0xad   :  { %853 = vst.msk [vmem:[#allocation0 + $0x581] ss:$16 sm:$0x30] %vm3_vm0, %v846_v63   ;;  %855 = vst.msk [vmem:[#allocation0 + $0x581] ss:$16 sm:$0xc0] %vm3_vm0, %v846_v63   ;;  %v898_v63 = vpop.permute.xlu1 %897  }
  0xae   :  { %836 = vst.msk [vmem:[#allocation0 + $0x501] ss:$16 sm:$0x3] %vm3_vm0, %v833_v8   ;;  %838 = vst.msk [vmem:[#allocation0 + $0x501] ss:$16 sm:$0xc] %vm3_vm0, %v833_v8  }
  0xaf   :  { %840 = vst.msk [vmem:[#allocation0 + $0x501] ss:$16 sm:$0x30] %vm3_vm0, %v833_v8   ;;  %842 = vst.msk [vmem:[#allocation0 + $0x501] ss:$16 sm:$0xc0] %vm3_vm0, %v833_v8   ;;  %v885_v8 = vpop.permute.xlu0 %884  }
  0xb0   :  { %11699 = vst [vmem:[%s17895_s1 + $0x80] sm:$0x3] %v3643_v12  ;;  %11701 = vst [vmem:[%s17895_s1 + $0x84] sm:$0x3] %v3657_v13  ;;  %v3671_v16 = vld [vmem:[#allocation0 + $0x220] sm:$0x3] }
  0xb1   :  { %v3685_v1 = vld [vmem:[#allocation0 + $0x230] sm:$0x3]  ;;  %v3699_v3 = vld [vmem:[#allocation0 + $0x240] sm:$0x3]  ;;  %11703 = vst [vmem:[%s17895_s1 + $0x88] sm:$0x3] %v3671_v16 }
  0xb2   :  { %11705 = vst [vmem:[%s17895_s1 + $0x8c] sm:$0x3] %v3685_v1  ;;  %11707 = vst [vmem:[%s17895_s1 + $0x90] sm:$0x3] %v3699_v3  ;;  %v3713_v4 = vld [vmem:[#allocation0 + $0x250] sm:$0x3] }
  0xb3   :  { %v3727_v5 = vld [vmem:[#allocation0 + $0x260] sm:$0x3]  ;;  %v3741_v17 = vld [vmem:[#allocation0 + $0x270] sm:$0x3]  ;;  %11709 = vst [vmem:[%s17895_s1 + $0x94] sm:$0x3] %v3713_v4 }
  0xb4   :  { %11711 = vst [vmem:[%s17895_s1 + $0x98] sm:$0x3] %v3727_v5  ;;  %11713 = vst [vmem:[%s17895_s1 + $0x9c] sm:$0x3] %v3741_v17  ;;  %v3979_v22 = vld [vmem:[#allocation0 + $0x380] sm:$0x3] }
  0xb5   :  { %v3993_v23 = vld [vmem:[#allocation0 + $0x390] sm:$0x3]  ;;  %v4007_v26 = vld [vmem:[#allocation0 + $0x3a0] sm:$0x3]  ;;  %11747 = vst [vmem:[%s17895_s1 + $0xe0] sm:$0x3] %v3979_v22 }
  0xb6   :  { %11749 = vst [vmem:[%s17895_s1 + $0xe4] sm:$0x3] %v3993_v23  ;;  %11751 = vst [vmem:[%s17895_s1 + $0xe8] sm:$0x3] %v4007_v26  ;;  %v4021_v35 = vld [vmem:[#allocation0 + $0x3b0] sm:$0x3] }
  0xb7   :  { %v4035_v40 = vld [vmem:[#allocation0 + $0x3c0] sm:$0x3]  ;;  %v4049_v41 = vld [vmem:[#allocation0 + $0x3d0] sm:$0x3]  ;;  %v11518_v48 = vld [vmem:[%s17894_s0 + $0x48] sm:$0xff]  }
  0xb8   :  { %875 = vst.msk [vmem:[#allocation0 + $0x681] ss:$16 sm:$0x3] %vm3_vm0, %v872_v27   ;;  %877 = vst.msk [vmem:[#allocation0 + $0x681] ss:$16 sm:$0xc] %vm3_vm0, %v872_v27   ;;  %1650 = vrot.lane.b32.xlu1 %v11518_v48, %s12663_s14 }
  0xb9   :  { %879 = vst.msk [vmem:[#allocation0 + $0x681] ss:$16 sm:$0x30] %vm3_vm0, %v872_v27   ;;  %881 = vst.msk [vmem:[#allocation0 + $0x681] ss:$16 sm:$0xc0] %vm3_vm0, %v872_v27  }
  0xba   :  { %862 = vst.msk [vmem:[#allocation0 + $0x601] ss:$16 sm:$0x3] %vm3_vm0, %v859_v34   ;;  %864 = vst.msk [vmem:[#allocation0 + $0x601] ss:$16 sm:$0xc] %vm3_vm0, %v859_v34  }
  0xbb   :  { %866 = vst.msk [vmem:[#allocation0 + $0x601] ss:$16 sm:$0x30] %vm3_vm0, %v859_v34   ;;  %868 = vst.msk [vmem:[#allocation0 + $0x601] ss:$16 sm:$0xc0] %vm3_vm0, %v859_v34  }
  0xbc   :  { %v11517_v49 = vld [vmem:[%s17894_s0 + $0x40] sm:$0xff]   ;;  %11753 = vst [vmem:[%s17895_s1 + $0xec] sm:$0x3] %v4021_v35  ;;  %11755 = vst [vmem:[%s17895_s1 + $0xf0] sm:$0x3] %v4035_v40  ;;  %v11520_v16 = vld [vmem:[%s17894_s0 + $0x58] sm:$0xff]   ;;  %v924_v35 = vpop.permute.xlu1 %923   ;;  %v911_v40 = vpop.permute.xlu0 %910  }
  0xbd   :  { %11757 = vst [vmem:[%s17895_s1 + $0xf4] sm:$0x3] %v4049_v41  ;;  %v4063_v50 = vld [vmem:[#allocation0 + $0x3e0] sm:$0x3]  ;;  %v4077_v0 = vld [vmem:[#allocation0 + $0x3f0] sm:$0x3]  ;;  %1637 = vrot.lane.b32.xlu0 %v11517_v49, %s12663_s14  ;;  %1676 = vrot.lane.b32.xlu1 %v11520_v16, %s12663_s14 }
  0xbe   :  { %v3867_v2 = vld [vmem:[#allocation0 + $0x300] sm:$0x3]  ;;  %11759 = vst [vmem:[%s17895_s1 + $0xf8] sm:$0x3] %v4063_v50  ;;  %11761 = vst [vmem:[%s17895_s1 + $0xfc] sm:$0x3] %v4077_v0 }
  0xbf   :  { %11731 = vst [vmem:[%s17895_s1 + $0xc0] sm:$0x3] %v3867_v2  ;;  %v3881_v6 = vld [vmem:[#allocation0 + $0x310] sm:$0x3]  ;;  %v3895_v7 = vld [vmem:[#allocation0 + $0x320] sm:$0x3] }
  0xc0   :  { %v3909_v51 = vld [vmem:[#allocation0 + $0x330] sm:$0x3]  ;;  %11733 = vst [vmem:[%s17895_s1 + $0xc4] sm:$0x3] %v3881_v6  ;;  %11735 = vst [vmem:[%s17895_s1 + $0xc8] sm:$0x3] %v3895_v7 }
  0xc1   :  { %11737 = vst [vmem:[%s17895_s1 + $0xcc] sm:$0x3] %v3909_v51  ;;  %v3923_v54 = vld [vmem:[#allocation0 + $0x340] sm:$0x3]  ;;  %v3937_v55 = vld [vmem:[#allocation0 + $0x350] sm:$0x3] }
  0xc2   :  { %v3951_v62 = vld [vmem:[#allocation0 + $0x360] sm:$0x3]  ;;  %11739 = vst [vmem:[%s17895_s1 + $0xd0] sm:$0x3] %v3923_v54  ;;  %11741 = vst [vmem:[%s17895_s1 + $0xd4] sm:$0x3] %v3937_v55 }
  0xc3   :  { %11743 = vst [vmem:[%s17895_s1 + $0xd8] sm:$0x3] %v3951_v62  ;;  %v3965_v9 = vld [vmem:[#allocation0 + $0x370] sm:$0x3]  ;;  %v4203_v12 = vld [vmem:[#allocation0 + $0x480] sm:$0x3] }
  0xc4   :  { %v4217_v13 = vld [vmem:[#allocation0 + $0x490] sm:$0x3]  ;;  %901 = vst.msk [vmem:[#allocation0 + $0x781] ss:$16 sm:$0x3] %vm3_vm0, %v898_v63   ;;  %v11522_v50 = vld [vmem:[%s17894_s0 + $0x68] sm:$0xff]  }
  0xc5   :  { %903 = vst.msk [vmem:[#allocation0 + $0x781] ss:$16 sm:$0xc] %vm3_vm0, %v898_v63   ;;  %905 = vst.msk [vmem:[#allocation0 + $0x781] ss:$16 sm:$0x30] %vm3_vm0, %v898_v63   ;;  %1702 = vrot.lane.b32.xlu1 %v11522_v50, %s12663_s14 }
  0xc6   :  { %907 = vst.msk [vmem:[#allocation0 + $0x781] ss:$16 sm:$0xc0] %vm3_vm0, %v898_v63   ;;  %888 = vst.msk [vmem:[#allocation0 + $0x701] ss:$16 sm:$0x3] %vm3_vm0, %v885_v8  }
  0xc7   :  { %890 = vst.msk [vmem:[#allocation0 + $0x701] ss:$16 sm:$0xc] %vm3_vm0, %v885_v8   ;;  %892 = vst.msk [vmem:[#allocation0 + $0x701] ss:$16 sm:$0x30] %vm3_vm0, %v885_v8  }
  0xc8   :  { %894 = vst.msk [vmem:[#allocation0 + $0x701] ss:$16 sm:$0xc0] %vm3_vm0, %v885_v8   ;;  %v11519_v1 = vld [vmem:[%s17894_s0 + $0x50] sm:$0xff]   ;;  %11745 = vst [vmem:[%s17895_s1 + $0xdc] sm:$0x3] %v3965_v9  ;;  %v950_v9 = vpop.permute.xlu1 %949  }
  0xc9   :  { %11779 = vst [vmem:[%s17895_s1 + $0x120] sm:$0x3] %v4203_v12  ;;  %11781 = vst [vmem:[%s17895_s1 + $0x124] sm:$0x3] %v4217_v13  ;;  %v4231_v3 = vld [vmem:[#allocation0 + $0x4a0] sm:$0x3]  ;;  %1663 = vrot.lane.b32.xlu0 %v11519_v1, %s12663_s14  ;;  %v937_v12 = vpop.permute.xlu0 %936  }
  0xca   :  { %v4245_v4 = vld [vmem:[#allocation0 + $0x4b0] sm:$0x3]  ;;  %v4259_v5 = vld [vmem:[#allocation0 + $0x4c0] sm:$0x3]  ;;  %11783 = vst [vmem:[%s17895_s1 + $0x128] sm:$0x3] %v4231_v3 }
  0xcb   :  { %11785 = vst [vmem:[%s17895_s1 + $0x12c] sm:$0x3] %v4245_v4  ;;  %11787 = vst [vmem:[%s17895_s1 + $0x130] sm:$0x3] %v4259_v5  ;;  %v4273_v17 = vld [vmem:[#allocation0 + $0x4d0] sm:$0x3] }
  0xcc   :  { %v4287_v22 = vld [vmem:[#allocation0 + $0x4e0] sm:$0x3]  ;;  %v4301_v23 = vld [vmem:[#allocation0 + $0x4f0] sm:$0x3]  ;;  %11789 = vst [vmem:[%s17895_s1 + $0x134] sm:$0x3] %v4273_v17 }
  0xcd   :  { %11791 = vst [vmem:[%s17895_s1 + $0x138] sm:$0x3] %v4287_v22  ;;  %11793 = vst [vmem:[%s17895_s1 + $0x13c] sm:$0x3] %v4301_v23  ;;  %v4091_v26 = vld [vmem:[#allocation0 + $0x400] sm:$0x3] }
  0xce   :  { %v4105_v27 = vld [vmem:[#allocation0 + $0x410] sm:$0x3]  ;;  %v4119_v34 = vld [vmem:[#allocation0 + $0x420] sm:$0x3]  ;;  %11763 = vst [vmem:[%s17895_s1 + $0x100] sm:$0x3] %v4091_v26 }
  0xcf   :  { %11765 = vst [vmem:[%s17895_s1 + $0x104] sm:$0x3] %v4105_v27  ;;  %11767 = vst [vmem:[%s17895_s1 + $0x108] sm:$0x3] %v4119_v34  ;;  %v4133_v41 = vld [vmem:[#allocation0 + $0x430] sm:$0x3] }
  0xd0   :  { %v4147_v48 = vld [vmem:[#allocation0 + $0x440] sm:$0x3]  ;;  %v4161_v49 = vld [vmem:[#allocation0 + $0x450] sm:$0x3]  ;;  %11769 = vst [vmem:[%s17895_s1 + $0x10c] sm:$0x3] %v4133_v41  ;;  %v976_v41 = vpop.permute.xlu1 %975  }
  0xd1   :  { %927 = vst.msk [vmem:[#allocation0 + $0x881] ss:$16 sm:$0x3] %vm3_vm0, %v924_v35   ;;  %929 = vst.msk [vmem:[#allocation0 + $0x881] ss:$16 sm:$0xc] %vm3_vm0, %v924_v35  }
  0xd2   :  { %931 = vst.msk [vmem:[#allocation0 + $0x881] ss:$16 sm:$0x30] %vm3_vm0, %v924_v35   ;;  %933 = vst.msk [vmem:[#allocation0 + $0x881] ss:$16 sm:$0xc0] %vm3_vm0, %v924_v35  }
  0xd3   :  { %914 = vst.msk [vmem:[#allocation0 + $0x801] ss:$16 sm:$0x3] %vm3_vm0, %v911_v40   ;;  %916 = vst.msk [vmem:[#allocation0 + $0x801] ss:$16 sm:$0xc] %vm3_vm0, %v911_v40  }
  0xd4   :  { %918 = vst.msk [vmem:[#allocation0 + $0x801] ss:$16 sm:$0x30] %vm3_vm0, %v911_v40   ;;  %920 = vst.msk [vmem:[#allocation0 + $0x801] ss:$16 sm:$0xc0] %vm3_vm0, %v911_v40  }
  0xd5   :  { %v11521_v0 = vld [vmem:[%s17894_s0 + $0x60] sm:$0xff]   ;;  %11771 = vst [vmem:[%s17895_s1 + $0x110] sm:$0x3] %v4147_v48  ;;  %11773 = vst [vmem:[%s17895_s1 + $0x114] sm:$0x3] %v4161_v49  ;;  %v11524_v3 = vld [vmem:[%s17894_s0 + $0x78] sm:$0xff]   ;;  %v963_v48 = vpop.permute.xlu0 %962  }
  0xd6   :  { %v4175_v2 = vld [vmem:[#allocation0 + $0x460] sm:$0x3]  ;;  %v4189_v6 = vld [vmem:[#allocation0 + $0x470] sm:$0x3]  ;;  %1689 = vrot.lane.b32.xlu0 %v11521_v0, %s12663_s14  ;;  %1728 = vrot.lane.b32.xlu1 %v11524_v3, %s12663_s14 }
  0xd7   :  { %v4427_v7 = vld [vmem:[#allocation0 + $0x580] sm:$0x3]  ;;  %11775 = vst [vmem:[%s17895_s1 + $0x118] sm:$0x3] %v4175_v2  ;;  %11777 = vst [vmem:[%s17895_s1 + $0x11c] sm:$0x3] %v4189_v6 }
  0xd8   :  { %11811 = vst [vmem:[%s17895_s1 + $0x160] sm:$0x3] %v4427_v7  ;;  %v4441_v51 = vld [vmem:[#allocation0 + $0x590] sm:$0x3]  ;;  %v4455_v54 = vld [vmem:[#allocation0 + $0x5a0] sm:$0x3] }
  0xd9   :  { %v4469_v55 = vld [vmem:[#allocation0 + $0x5b0] sm:$0x3]  ;;  %11813 = vst [vmem:[%s17895_s1 + $0x164] sm:$0x3] %v4441_v51  ;;  %11815 = vst [vmem:[%s17895_s1 + $0x168] sm:$0x3] %v4455_v54 }
  0xda   :  { %11817 = vst [vmem:[%s17895_s1 + $0x16c] sm:$0x3] %v4469_v55  ;;  %v4483_v62 = vld [vmem:[#allocation0 + $0x5c0] sm:$0x3]  ;;  %v4497_v63 = vld [vmem:[#allocation0 + $0x5d0] sm:$0x3]  ;;  %1754 = vrot.lane.b32.xlu1 %v12870_v18, %s12663_s14 }
  0xdb   :  { %v4511_v8 = vld [vmem:[#allocation0 + $0x5e0] sm:$0x3]  ;;  %11819 = vst [vmem:[%s17895_s1 + $0x170] sm:$0x3] %v4483_v62  ;;  %11821 = vst [vmem:[%s17895_s1 + $0x174] sm:$0x3] %v4497_v63 }
  0xdc   :  { %11823 = vst [vmem:[%s17895_s1 + $0x178] sm:$0x3] %v4511_v8  ;;  %v4525_v13 = vld [vmem:[#allocation0 + $0x5f0] sm:$0x3]  ;;  %v4315_v16 = vld [vmem:[#allocation0 + $0x500] sm:$0x3] }
  0xdd   :  { %v4329_v1 = vld [vmem:[#allocation0 + $0x510] sm:$0x3]  ;;  %953 = vst.msk [vmem:[#allocation0 + $0x981] ss:$16 sm:$0x3] %vm3_vm0, %v950_v9  }
  0xde   :  { %955 = vst.msk [vmem:[#allocation0 + $0x981] ss:$16 sm:$0xc] %vm3_vm0, %v950_v9   ;;  %957 = vst.msk [vmem:[#allocation0 + $0x981] ss:$16 sm:$0x30] %vm3_vm0, %v950_v9   ;;  %1780 = vrot.lane.b32.xlu1 %v12910_v24, %s12663_s14 }
  0xdf   :  { %959 = vst.msk [vmem:[#allocation0 + $0x981] ss:$16 sm:$0xc0] %vm3_vm0, %v950_v9   ;;  %940 = vst.msk [vmem:[#allocation0 + $0x901] ss:$16 sm:$0x3] %vm3_vm0, %v937_v12   ;;  %v1002_v9 = vpop.permute.xlu1 %1001  }
  0xe0   :  { %942 = vst.msk [vmem:[#allocation0 + $0x901] ss:$16 sm:$0xc] %vm3_vm0, %v937_v12   ;;  %944 = vst.msk [vmem:[#allocation0 + $0x901] ss:$16 sm:$0x30] %vm3_vm0, %v937_v12  }
  0xe1   :  { %946 = vst.msk [vmem:[#allocation0 + $0x901] ss:$16 sm:$0xc0] %vm3_vm0, %v937_v12   ;;  %v11523_v4 = vld [vmem:[%s17894_s0 + $0x70] sm:$0xff]   ;;  %11825 = vst [vmem:[%s17895_s1 + $0x17c] sm:$0x3] %v4525_v13  ;;  %v989_v12 = vpop.permute.xlu0 %988  }
  0xe2   :  { %11795 = vst [vmem:[%s17895_s1 + $0x140] sm:$0x3] %v4315_v16  ;;  %11797 = vst [vmem:[%s17895_s1 + $0x144] sm:$0x3] %v4329_v1  ;;  %v4343_v5 = vld [vmem:[#allocation0 + $0x520] sm:$0x3]  ;;  %1715 = vrot.lane.b32.xlu0 %v11523_v4, %s12663_s14  ;;  %1806 = vrot.lane.b32.xlu1 %v12944_v28, %s12663_s14 }
  0xe3   :  { %v4357_v17 = vld [vmem:[#allocation0 + $0x530] sm:$0x3]  ;;  %v4371_v22 = vld [vmem:[#allocation0 + $0x540] sm:$0x3]  ;;  %11799 = vst [vmem:[%s17895_s1 + $0x148] sm:$0x3] %v4343_v5 }
  0xe4   :  { %11801 = vst [vmem:[%s17895_s1 + $0x14c] sm:$0x3] %v4357_v17  ;;  %11803 = vst [vmem:[%s17895_s1 + $0x150] sm:$0x3] %v4371_v22  ;;  %v4385_v23 = vld [vmem:[#allocation0 + $0x550] sm:$0x3] }
  0xe5   :  { %v4399_v26 = vld [vmem:[#allocation0 + $0x560] sm:$0x3]  ;;  %v4413_v27 = vld [vmem:[#allocation0 + $0x570] sm:$0x3]  ;;  %11805 = vst [vmem:[%s17895_s1 + $0x154] sm:$0x3] %v4385_v23 }
  0xe6   :  { %11807 = vst [vmem:[%s17895_s1 + $0x158] sm:$0x3] %v4399_v26  ;;  %11809 = vst [vmem:[%s17895_s1 + $0x15c] sm:$0x3] %v4413_v27  ;;  %v4651_v34 = vld [vmem:[#allocation0 + $0x680] sm:$0x3]  ;;  %1741 = vrot.lane.b32.xlu0 %v12875_v19, %s12663_s14  ;;  %v1028_v27 = vpop.permute.xlu1 %1027   ;;  %1832 = vrot.lane.b32.xlu1 %v12980_v32, %s12663_s14 }
  0xe7   :  { %v4665_v35 = vld [vmem:[#allocation0 + $0x690] sm:$0x3]  ;;  %v4679_v40 = vld [vmem:[#allocation0 + $0x6a0] sm:$0x3]  ;;  %11843 = vst [vmem:[%s17895_s1 + $0x1a0] sm:$0x3] %v4651_v34  ;;  %v1015_v34 = vpop.permute.xlu0 %1014  }
  0xe8   :  { %11845 = vst [vmem:[%s17895_s1 + $0x1a4] sm:$0x3] %v4665_v35  ;;  %11847 = vst [vmem:[%s17895_s1 + $0x1a8] sm:$0x3] %v4679_v40  ;;  %v4693_v49 = vld [vmem:[#allocation0 + $0x6b0] sm:$0x3] }
  0xe9   :  { %v4707_v50 = vld [vmem:[#allocation0 + $0x6c0] sm:$0x3]  ;;  %v4721_v0 = vld [vmem:[#allocation0 + $0x6d0] sm:$0x3]  ;;  %11849 = vst [vmem:[%s17895_s1 + $0x1ac] sm:$0x3] %v4693_v49 }
  0xea   :  { %979 = vst.msk [vmem:[#allocation0 + $0xa81] ss:$16 sm:$0x3] %vm3_vm0, %v976_v41   ;;  %981 = vst.msk [vmem:[#allocation0 + $0xa81] ss:$16 sm:$0xc] %vm3_vm0, %v976_v41   ;;  %1767 = vrot.lane.b32.xlu0 %v12915_v25, %s12663_s14  ;;  %1858 = vrot.lane.b32.xlu1 %v13020_v38, %s12663_s14 }
  0xeb   :  { %983 = vst.msk [vmem:[#allocation0 + $0xa81] ss:$16 sm:$0x30] %vm3_vm0, %v976_v41   ;;  %985 = vst.msk [vmem:[#allocation0 + $0xa81] ss:$16 sm:$0xc0] %vm3_vm0, %v976_v41  }
  0xec   :  { %966 = vst.msk [vmem:[#allocation0 + $0xa01] ss:$16 sm:$0x3] %vm3_vm0, %v963_v48   ;;  %968 = vst.msk [vmem:[#allocation0 + $0xa01] ss:$16 sm:$0xc] %vm3_vm0, %v963_v48  }
  0xed   :  { %970 = vst.msk [vmem:[#allocation0 + $0xa01] ss:$16 sm:$0x30] %vm3_vm0, %v963_v48   ;;  %972 = vst.msk [vmem:[#allocation0 + $0xa01] ss:$16 sm:$0xc0] %vm3_vm0, %v963_v48  }
  0xee   :  { %11851 = vst [vmem:[%s17895_s1 + $0x1b0] sm:$0x3] %v4707_v50  ;;  %11853 = vst [vmem:[%s17895_s1 + $0x1b4] sm:$0x3] %v4721_v0  ;;  %v4735_v2 = vld [vmem:[#allocation0 + $0x6e0] sm:$0x3]  ;;  %1793 = vrot.lane.b32.xlu0 %v12949_v29, %s12663_s14  ;;  %1884 = vrot.lane.b32.xlu1 %v13054_v42, %s12663_s14 }
  0xef   :  { %v4749_v6 = vld [vmem:[#allocation0 + $0x6f0] sm:$0x3]  ;;  %v4539_v7 = vld [vmem:[#allocation0 + $0x600] sm:$0x3]  ;;  %11855 = vst [vmem:[%s17895_s1 + $0x1b8] sm:$0x3] %v4735_v2 }
  0xf0   :  { %11857 = vst [vmem:[%s17895_s1 + $0x1bc] sm:$0x3] %v4749_v6  ;;  %11827 = vst [vmem:[%s17895_s1 + $0x180] sm:$0x3] %v4539_v7  ;;  %v4553_v51 = vld [vmem:[#allocation0 + $0x610] sm:$0x3] }
  0xf1   :  { %v4567_v54 = vld [vmem:[#allocation0 + $0x620] sm:$0x3]  ;;  %v4581_v55 = vld [vmem:[#allocation0 + $0x630] sm:$0x3]  ;;  %11829 = vst [vmem:[%s17895_s1 + $0x184] sm:$0x3] %v4553_v51  ;;  %v1054_v51 = vpop.permute.xlu1 %1053  }
  0xf2   :  { %11831 = vst [vmem:[%s17895_s1 + $0x188] sm:$0x3] %v4567_v54  ;;  %11833 = vst [vmem:[%s17895_s1 + $0x18c] sm:$0x3] %v4581_v55  ;;  %v4595_v62 = vld [vmem:[#allocation0 + $0x640] sm:$0x3]  ;;  %v1041_v54 = vpop.permute.xlu0 %1040   ;;  %1819 = vrot.lane.b32.xlu0 %v12985_v33, %s12663_s14  ;;  %1910 = vrot.lane.b32.xlu1 %v13090_v46, %s12663_s14 }
  0xf3   :  { %v4609_v63 = vld [vmem:[#allocation0 + $0x650] sm:$0x3]  ;;  %v4623_v8 = vld [vmem:[#allocation0 + $0x660] sm:$0x3]  ;;  %11835 = vst [vmem:[%s17895_s1 + $0x190] sm:$0x3] %v4595_v62 }
  0xf4   :  { %11837 = vst [vmem:[%s17895_s1 + $0x194] sm:$0x3] %v4609_v63  ;;  %11839 = vst [vmem:[%s17895_s1 + $0x198] sm:$0x3] %v4623_v8  ;;  %v4637_v13 = vld [vmem:[#allocation0 + $0x670] sm:$0x3] }
  0xf5   :  { %v4875_v16 = vld [vmem:[#allocation0 + $0x780] sm:$0x3]  ;;  %v4889_v1 = vld [vmem:[#allocation0 + $0x790] sm:$0x3]  ;;  %11841 = vst [vmem:[%s17895_s1 + $0x19c] sm:$0x3] %v4637_v13 }
  0xf6   :  { %1005 = vst.msk [vmem:[#allocation0 + $0xb81] ss:$16 sm:$0x3] %vm3_vm0, %v1002_v9   ;;  %1007 = vst.msk [vmem:[#allocation0 + $0xb81] ss:$16 sm:$0xc] %vm3_vm0, %v1002_v9   ;;  %1845 = vrot.lane.b32.xlu0 %v13025_v39, %s12663_s14  ;;  %1936 = vrot.lane.b32.xlu1 %v13130_v52, %s12663_s14 }
  0xf7   :  { %1009 = vst.msk [vmem:[#allocation0 + $0xb81] ss:$16 sm:$0x30] %vm3_vm0, %v1002_v9   ;;  %1011 = vst.msk [vmem:[#allocation0 + $0xb81] ss:$16 sm:$0xc0] %vm3_vm0, %v1002_v9  }
  0xf8   :  { %992 = vst.msk [vmem:[#allocation0 + $0xb01] ss:$16 sm:$0x3] %vm3_vm0, %v989_v12   ;;  %994 = vst.msk [vmem:[#allocation0 + $0xb01] ss:$16 sm:$0xc] %vm3_vm0, %v989_v12  }
  0xf9   :  { %996 = vst.msk [vmem:[#allocation0 + $0xb01] ss:$16 sm:$0x30] %vm3_vm0, %v989_v12   ;;  %998 = vst.msk [vmem:[#allocation0 + $0xb01] ss:$16 sm:$0xc0] %vm3_vm0, %v989_v12  }
  0xfa   :  { %11875 = vst [vmem:[%s17895_s1 + $0x1e0] sm:$0x3] %v4875_v16  ;;  %11877 = vst [vmem:[%s17895_s1 + $0x1e4] sm:$0x3] %v4889_v1  ;;  %v4903_v3 = vld [vmem:[#allocation0 + $0x7a0] sm:$0x3]  ;;  %1871 = vrot.lane.b32.xlu0 %v13059_v43, %s12663_s14  ;;  %1962 = vrot.lane.b32.xlu1 %v13164_v56, %s12663_s14 }
  0xfb   :  { %v4917_v4 = vld [vmem:[#allocation0 + $0x7b0] sm:$0x3]  ;;  %v4931_v5 = vld [vmem:[#allocation0 + $0x7c0] sm:$0x3]  ;;  %11879 = vst [vmem:[%s17895_s1 + $0x1e8] sm:$0x3] %v4903_v3 }
  0xfc   :  { %11881 = vst [vmem:[%s17895_s1 + $0x1ec] sm:$0x3] %v4917_v4  ;;  %11883 = vst [vmem:[%s17895_s1 + $0x1f0] sm:$0x3] %v4931_v5  ;;  %v4945_v18 = vld [vmem:[#allocation0 + $0x7d0] sm:$0x3]  ;;  %v1080_v4 = vpop.permute.xlu1 %1079   ;;  %v1067_v5 = vpop.permute.xlu0 %1066  }
  0xfd   :  { %v4959_v19 = vld [vmem:[#allocation0 + $0x7e0] sm:$0x3]  ;;  %v4973_v17 = vld [vmem:[#allocation0 + $0x7f0] sm:$0x3]  ;;  %11885 = vst [vmem:[%s17895_s1 + $0x1f4] sm:$0x3] %v4945_v18 }
  0xfe   :  { %11887 = vst [vmem:[%s17895_s1 + $0x1f8] sm:$0x3] %v4959_v19  ;;  %11889 = vst [vmem:[%s17895_s1 + $0x1fc] sm:$0x3] %v4973_v17  ;;  %v4763_v22 = vld [vmem:[#allocation0 + $0x700] sm:$0x3]  ;;  %1897 = vrot.lane.b32.xlu0 %v13095_v47, %s12663_s14  ;;  %1988 = vrot.lane.b32.xlu1 %v13200_v60, %s12663_s14 }
  0xff   :  { %v4777_v23 = vld [vmem:[#allocation0 + $0x710] sm:$0x3]  ;;  %v4791_v26 = vld [vmem:[#allocation0 + $0x720] sm:$0x3]  ;;  %11859 = vst [vmem:[%s17895_s1 + $0x1c0] sm:$0x3] %v4763_v22 }
 0x100   :  { %11861 = vst [vmem:[%s17895_s1 + $0x1c4] sm:$0x3] %v4777_v23  ;;  %11863 = vst [vmem:[%s17895_s1 + $0x1c8] sm:$0x3] %v4791_v26  ;;  %v4805_v35 = vld [vmem:[#allocation0 + $0x730] sm:$0x3] }
 0x101   :  { %v4819_v40 = vld [vmem:[#allocation0 + $0x740] sm:$0x3]  ;;  %v4833_v41 = vld [vmem:[#allocation0 + $0x750] sm:$0x3]  ;;  %11865 = vst [vmem:[%s17895_s1 + $0x1cc] sm:$0x3] %v4805_v35 }
 0x102   :  { %1031 = vst.msk [vmem:[#allocation0 + $0xc81] ss:$16 sm:$0x3] %vm3_vm0, %v1028_v27   ;;  %1033 = vst.msk [vmem:[#allocation0 + $0xc81] ss:$16 sm:$0xc] %vm3_vm0, %v1028_v27   ;;  %1923 = vrot.lane.b32.xlu0 %v13135_v53, %s12663_s14  ;;  %2014 = vrot.lane.b32.xlu1 %v13240_v10, %s12663_s14 }
 0x103   :  { %1035 = vst.msk [vmem:[#allocation0 + $0xc81] ss:$16 sm:$0x30] %vm3_vm0, %v1028_v27   ;;  %1037 = vst.msk [vmem:[#allocation0 + $0xc81] ss:$16 sm:$0xc0] %vm3_vm0, %v1028_v27  }
 0x104   :  { %1018 = vst.msk [vmem:[#allocation0 + $0xc01] ss:$16 sm:$0x3] %vm3_vm0, %v1015_v34   ;;  %1020 = vst.msk [vmem:[#allocation0 + $0xc01] ss:$16 sm:$0xc] %vm3_vm0, %v1015_v34  }
 0x105   :  { %1022 = vst.msk [vmem:[#allocation0 + $0xc01] ss:$16 sm:$0x30] %vm3_vm0, %v1015_v34   ;;  %1024 = vst.msk [vmem:[#allocation0 + $0xc01] ss:$16 sm:$0xc0] %vm3_vm0, %v1015_v34  }
 0x106   :  { %11867 = vst [vmem:[%s17895_s1 + $0x1d0] sm:$0x3] %v4819_v40  ;;  %11869 = vst [vmem:[%s17895_s1 + $0x1d4] sm:$0x3] %v4833_v41  ;;  %v4847_v48 = vld [vmem:[#allocation0 + $0x760] sm:$0x3]  ;;  %v1106_v41 = vpop.permute.xlu1 %1105   ;;  %1949 = vrot.lane.b32.xlu0 %v13169_v57, %s12663_s14  ;;  %2040 = vrot.lane.b32.xlu1 %v13274_v14, %s12663_s14 }
 0x107   :  { %v4861_v49 = vld [vmem:[#allocation0 + $0x770] sm:$0x3]  ;;  %v5099_v50 = vld [vmem:[#allocation0 + $0x880] sm:$0x3]  ;;  %11871 = vst [vmem:[%s17895_s1 + $0x1d8] sm:$0x3] %v4847_v48  ;;  %v1093_v48 = vpop.permute.xlu0 %1092  }
 0x108   :  { %11873 = vst [vmem:[%s17895_s1 + $0x1dc] sm:$0x3] %v4861_v49  ;;  %11907 = vst [vmem:[%s17895_s1 + $0x220] sm:$0x3] %v5099_v50  ;;  %v5113_v24 = vld [vmem:[#allocation0 + $0x890] sm:$0x3] }
 0x109   :  { %v5127_v25 = vld [vmem:[#allocation0 + $0x8a0] sm:$0x3]  ;;  %v5141_v0 = vld [vmem:[#allocation0 + $0x8b0] sm:$0x3]  ;;  %11909 = vst [vmem:[%s17895_s1 + $0x224] sm:$0x3] %v5113_v24 }
 0x10a   :  { %11911 = vst [vmem:[%s17895_s1 + $0x228] sm:$0x3] %v5127_v25  ;;  %11913 = vst [vmem:[%s17895_s1 + $0x22c] sm:$0x3] %v5141_v0  ;;  %v5155_v2 = vld [vmem:[#allocation0 + $0x8c0] sm:$0x3]  ;;  %1975 = vrot.lane.b32.xlu0 %v13205_v61, %s12663_s14  ;;  %2066 = vrot.lane.b32.xlu1 %v13310_v20, %s12663_s14 }
 0x10b   :  { %v5169_v6 = vld [vmem:[#allocation0 + $0x8d0] sm:$0x3]  ;;  %v5183_v7 = vld [vmem:[#allocation0 + $0x8e0] sm:$0x3]  ;;  %11915 = vst [vmem:[%s17895_s1 + $0x230] sm:$0x3] %v5155_v2 }
 0x10c   :  { %11917 = vst [vmem:[%s17895_s1 + $0x234] sm:$0x3] %v5169_v6  ;;  %11919 = vst [vmem:[%s17895_s1 + $0x238] sm:$0x3] %v5183_v7  ;;  %v5197_v55 = vld [vmem:[#allocation0 + $0x8f0] sm:$0x3] }
 0x10d   :  { %v4987_v62 = vld [vmem:[#allocation0 + $0x800] sm:$0x3]  ;;  %v5001_v63 = vld [vmem:[#allocation0 + $0x810] sm:$0x3]  ;;  %11921 = vst [vmem:[%s17895_s1 + $0x23c] sm:$0x3] %v5197_v55  ;;  %v1132_v55 = vpop.permute.xlu1 %1131  }
 0x10e   :  { %1057 = vst.msk [vmem:[#allocation0 + $0xd81] ss:$16 sm:$0x3] %vm3_vm0, %v1054_v51   ;;  %1059 = vst.msk [vmem:[#allocation0 + $0xd81] ss:$16 sm:$0xc] %vm3_vm0, %v1054_v51   ;;  %2001 = vrot.lane.b32.xlu0 %v13245_v11, %s12663_s14  ;;  %2092 = vrot.lane.b32.xlu1 %v13350_v30, %s12663_s14 }
 0x10f   :  { %1061 = vst.msk [vmem:[#allocation0 + $0xd81] ss:$16 sm:$0x30] %vm3_vm0, %v1054_v51   ;;  %1063 = vst.msk [vmem:[#allocation0 + $0xd81] ss:$16 sm:$0xc0] %vm3_vm0, %v1054_v51  }
 0x110   :  { %1044 = vst.msk [vmem:[#allocation0 + $0xd01] ss:$16 sm:$0x3] %vm3_vm0, %v1041_v54   ;;  %1046 = vst.msk [vmem:[#allocation0 + $0xd01] ss:$16 sm:$0xc] %vm3_vm0, %v1041_v54  }
 0x111   :  { %1048 = vst.msk [vmem:[#allocation0 + $0xd01] ss:$16 sm:$0x30] %vm3_vm0, %v1041_v54   ;;  %1050 = vst.msk [vmem:[#allocation0 + $0xd01] ss:$16 sm:$0xc0] %vm3_vm0, %v1041_v54  }
 0x112   :  { %11891 = vst [vmem:[%s17895_s1 + $0x200] sm:$0x3] %v4987_v62  ;;  %11893 = vst [vmem:[%s17895_s1 + $0x204] sm:$0x3] %v5001_v63  ;;  %v5015_v8 = vld [vmem:[#allocation0 + $0x820] sm:$0x3]  ;;  %v1119_v62 = vpop.permute.xlu0 %1118   ;;  %2027 = vrot.lane.b32.xlu0 %v13279_v15, %s12663_s14  ;;  %2118 = vrot.lane.b32.xlu1 %v13384_v36, %s12663_s14 }
 0x113   :  { %v5029_v9 = vld [vmem:[#allocation0 + $0x830] sm:$0x3]  ;;  %v5043_v12 = vld [vmem:[#allocation0 + $0x840] sm:$0x3]  ;;  %11895 = vst [vmem:[%s17895_s1 + $0x208] sm:$0x3] %v5015_v8 }
 0x114   :  { %11897 = vst [vmem:[%s17895_s1 + $0x20c] sm:$0x3] %v5029_v9  ;;  %11899 = vst [vmem:[%s17895_s1 + $0x210] sm:$0x3] %v5043_v12  ;;  %v5057_v28 = vld [vmem:[#allocation0 + $0x850] sm:$0x3] }
 0x115   :  { %v5071_v29 = vld [vmem:[#allocation0 + $0x860] sm:$0x3]  ;;  %v5085_v13 = vld [vmem:[#allocation0 + $0x870] sm:$0x3]  ;;  %11901 = vst [vmem:[%s17895_s1 + $0x214] sm:$0x3] %v5057_v28 }
 0x116   :  { %11903 = vst [vmem:[%s17895_s1 + $0x218] sm:$0x3] %v5071_v29  ;;  %11905 = vst [vmem:[%s17895_s1 + $0x21c] sm:$0x3] %v5085_v13  ;;  %v5323_v16 = vld [vmem:[#allocation0 + $0x980] sm:$0x3]  ;;  %2053 = vrot.lane.b32.xlu0 %v13315_v21, %s12663_s14  ;;  %2144 = vrot.lane.b32.xlu1 %v13420_v44, %s12663_s14 }
 0x117   :  { %v5337_v1 = vld [vmem:[#allocation0 + $0x990] sm:$0x3]  ;;  %v5351_v3 = vld [vmem:[#allocation0 + $0x9a0] sm:$0x3]  ;;  %11939 = vst [vmem:[%s17895_s1 + $0x260] sm:$0x3] %v5323_v16 }
 0x118   :  { %11941 = vst [vmem:[%s17895_s1 + $0x264] sm:$0x3] %v5337_v1  ;;  %11943 = vst [vmem:[%s17895_s1 + $0x268] sm:$0x3] %v5351_v3  ;;  %v5365_v18 = vld [vmem:[#allocation0 + $0x9b0] sm:$0x3] }
 0x119   :  { %v5379_v19 = vld [vmem:[#allocation0 + $0x9c0] sm:$0x3]  ;;  %v5393_v17 = vld [vmem:[#allocation0 + $0x9d0] sm:$0x3]  ;;  %11945 = vst [vmem:[%s17895_s1 + $0x26c] sm:$0x3] %v5365_v18 }
 0x11a   :  { %1083 = vst.msk [vmem:[#allocation0 + $0xe81] ss:$16 sm:$0x3] %vm3_vm0, %v1080_v4   ;;  %1085 = vst.msk [vmem:[#allocation0 + $0xe81] ss:$16 sm:$0xc] %vm3_vm0, %v1080_v4   ;;  %2079 = vrot.lane.b32.xlu0 %v13355_v31, %s12663_s14  ;;  %2170 = vrot.lane.b32.xlu1 %v13468_v58, %s12663_s14 }
 0x11b   :  { %1087 = vst.msk [vmem:[#allocation0 + $0xe81] ss:$16 sm:$0x30] %vm3_vm0, %v1080_v4   ;;  %1089 = vst.msk [vmem:[#allocation0 + $0xe81] ss:$16 sm:$0xc0] %vm3_vm0, %v1080_v4   ;;  %v1158_v4 = vpop.permute.xlu1 %1157  }
 0x11c   :  { %1070 = vst.msk [vmem:[#allocation0 + $0xe01] ss:$16 sm:$0x3] %vm3_vm0, %v1067_v5   ;;  %1072 = vst.msk [vmem:[#allocation0 + $0xe01] ss:$16 sm:$0xc] %vm3_vm0, %v1067_v5  }
 0x11d   :  { %1074 = vst.msk [vmem:[#allocation0 + $0xe01] ss:$16 sm:$0x30] %vm3_vm0, %v1067_v5   ;;  %1076 = vst.msk [vmem:[#allocation0 + $0xe01] ss:$16 sm:$0xc0] %vm3_vm0, %v1067_v5   ;;  %v1145_v5 = vpop.permute.xlu0 %1144  }
 0x11e   :  { %11947 = vst [vmem:[%s17895_s1 + $0x270] sm:$0x3] %v5379_v19  ;;  %11949 = vst [vmem:[%s17895_s1 + $0x274] sm:$0x3] %v5393_v17  ;;  %v5407_v22 = vld [vmem:[#allocation0 + $0x9e0] sm:$0x3]  ;;  %2105 = vrot.lane.b32.xlu0 %v13389_v37, %s12663_s14 }
 0x11f   :  { %v5421_v23 = vld [vmem:[#allocation0 + $0x9f0] sm:$0x3]  ;;  %v5211_v26 = vld [vmem:[#allocation0 + $0x900] sm:$0x3]  ;;  %11951 = vst [vmem:[%s17895_s1 + $0x278] sm:$0x3] %v5407_v22 }
 0x120   :  { %11953 = vst [vmem:[%s17895_s1 + $0x27c] sm:$0x3] %v5421_v23  ;;  %11923 = vst [vmem:[%s17895_s1 + $0x240] sm:$0x3] %v5211_v26  ;;  %v5225_v32 = vld [vmem:[#allocation0 + $0x910] sm:$0x3] }
 0x121   :  { %v5239_v33 = vld [vmem:[#allocation0 + $0x920] sm:$0x3]  ;;  %v5253_v27 = vld [vmem:[#allocation0 + $0x930] sm:$0x3]  ;;  %11925 = vst [vmem:[%s17895_s1 + $0x244] sm:$0x3] %v5225_v32 }
 0x122   :  { %11927 = vst [vmem:[%s17895_s1 + $0x248] sm:$0x3] %v5239_v33  ;;  %11929 = vst [vmem:[%s17895_s1 + $0x24c] sm:$0x3] %v5253_v27  ;;  %v5267_v34 = vld [vmem:[#allocation0 + $0x940] sm:$0x3]  ;;  %2131 = vrot.lane.b32.xlu0 %v13425_v45, %s12663_s14 }
 0x123   :  { %v5281_v35 = vld [vmem:[#allocation0 + $0x950] sm:$0x3]  ;;  %v5295_v40 = vld [vmem:[#allocation0 + $0x960] sm:$0x3]  ;;  %11931 = vst [vmem:[%s17895_s1 + $0x250] sm:$0x3] %v5267_v34 }
 0x124   :  { %11933 = vst [vmem:[%s17895_s1 + $0x254] sm:$0x3] %v5281_v35  ;;  %11935 = vst [vmem:[%s17895_s1 + $0x258] sm:$0x3] %v5295_v40  ;;  %v5309_v49 = vld [vmem:[#allocation0 + $0x970] sm:$0x3]  ;;  %v1184_v35 = vpop.permute.xlu1 %1183   ;;  %v1171_v40 = vpop.permute.xlu0 %1170  }
 0x125   :  { %v5547_v50 = vld [vmem:[#allocation0 + $0xa80] sm:$0x3]  ;;  %v5561_v24 = vld [vmem:[#allocation0 + $0xa90] sm:$0x3]  ;;  %11937 = vst [vmem:[%s17895_s1 + $0x25c] sm:$0x3] %v5309_v49 }
 0x126   :  { %1109 = vst.msk [vmem:[#allocation0 + $0xf81] ss:$16 sm:$0x3] %vm3_vm0, %v1106_v41   ;;  %1111 = vst.msk [vmem:[#allocation0 + $0xf81] ss:$16 sm:$0xc] %vm3_vm0, %v1106_v41   ;;  %2157 = vrot.lane.b32.xlu0 %v13473_v59, %s12663_s14 }
 0x127   :  { %1113 = vst.msk [vmem:[#allocation0 + $0xf81] ss:$16 sm:$0x30] %vm3_vm0, %v1106_v41   ;;  %1115 = vst.msk [vmem:[#allocation0 + $0xf81] ss:$16 sm:$0xc0] %vm3_vm0, %v1106_v41  }
 0x128   :  { %1096 = vst.msk [vmem:[#allocation0 + $0xf01] ss:$16 sm:$0x3] %vm3_vm0, %v1093_v48   ;;  %1098 = vst.msk [vmem:[#allocation0 + $0xf01] ss:$16 sm:$0xc] %vm3_vm0, %v1093_v48  }
 0x129   :  { %1100 = vst.msk [vmem:[#allocation0 + $0xf01] ss:$16 sm:$0x30] %vm3_vm0, %v1093_v48   ;;  %1102 = vst.msk [vmem:[#allocation0 + $0xf01] ss:$16 sm:$0xc0] %vm3_vm0, %v1093_v48  }
 0x12a   :  { %11971 = vst [vmem:[%s17895_s1 + $0x2a0] sm:$0x3] %v5547_v50  ;;  %11973 = vst [vmem:[%s17895_s1 + $0x2a4] sm:$0x3] %v5561_v24  ;;  %v5575_v25 = vld [vmem:[#allocation0 + $0xaa0] sm:$0x3] }
 0x12b   :  { %v5589_v0 = vld [vmem:[#allocation0 + $0xab0] sm:$0x3]  ;;  %v5603_v2 = vld [vmem:[#allocation0 + $0xac0] sm:$0x3]  ;;  %11975 = vst [vmem:[%s17895_s1 + $0x2a8] sm:$0x3] %v5575_v25 }
 0x12c   :  { %11977 = vst [vmem:[%s17895_s1 + $0x2ac] sm:$0x3] %v5589_v0  ;;  %11979 = vst [vmem:[%s17895_s1 + $0x2b0] sm:$0x3] %v5603_v2  ;;  %v5617_v38 = vld [vmem:[#allocation0 + $0xad0] sm:$0x3] }
 0x12d   :  { %v5631_v39 = vld [vmem:[#allocation0 + $0xae0] sm:$0x3]  ;;  %v5645_v6 = vld [vmem:[#allocation0 + $0xaf0] sm:$0x3]  ;;  %11981 = vst [vmem:[%s17895_s1 + $0x2b4] sm:$0x3] %v5617_v38 }
 0x12e   :  { %11983 = vst [vmem:[%s17895_s1 + $0x2b8] sm:$0x3] %v5631_v39  ;;  %11985 = vst [vmem:[%s17895_s1 + $0x2bc] sm:$0x3] %v5645_v6  ;;  %v5435_v7 = vld [vmem:[#allocation0 + $0xa00] sm:$0x3]  ;;  %v1210_v6 = vpop.permute.xlu1 %1209  }
 0x12f   :  { %v5449_v51 = vld [vmem:[#allocation0 + $0xa10] sm:$0x3]  ;;  %v5463_v54 = vld [vmem:[#allocation0 + $0xa20] sm:$0x3]  ;;  %11955 = vst [vmem:[%s17895_s1 + $0x280] sm:$0x3] %v5435_v7  ;;  %v1197_v7 = vpop.permute.xlu0 %1196  }
 0x130   :  { %11957 = vst [vmem:[%s17895_s1 + $0x284] sm:$0x3] %v5449_v51  ;;  %11959 = vst [vmem:[%s17895_s1 + $0x288] sm:$0x3] %v5463_v54  ;;  %v5477_v63 = vld [vmem:[#allocation0 + $0xa30] sm:$0x3] }
 0x131   :  { %v5491_v8 = vld [vmem:[#allocation0 + $0xa40] sm:$0x3]  ;;  %v5505_v9 = vld [vmem:[#allocation0 + $0xa50] sm:$0x3]  ;;  %11961 = vst [vmem:[%s17895_s1 + $0x28c] sm:$0x3] %v5477_v63 }
 0x132   :  { %1135 = vst.msk [vmem:[#allocation0 + $0x1081] ss:$16 sm:$0x3] %vm3_vm0, %v1132_v55   ;;  %1137 = vst.msk [vmem:[#allocation0 + $0x1081] ss:$16 sm:$0xc] %vm3_vm0, %v1132_v55  }
 0x133   :  { %1139 = vst.msk [vmem:[#allocation0 + $0x1081] ss:$16 sm:$0x30] %vm3_vm0, %v1132_v55   ;;  %1141 = vst.msk [vmem:[#allocation0 + $0x1081] ss:$16 sm:$0xc0] %vm3_vm0, %v1132_v55  }
 0x134   :  { %1122 = vst.msk [vmem:[#allocation0 + $0x1001] ss:$16 sm:$0x3] %vm3_vm0, %v1119_v62   ;;  %1124 = vst.msk [vmem:[#allocation0 + $0x1001] ss:$16 sm:$0xc] %vm3_vm0, %v1119_v62  }
 0x135   :  { %1126 = vst.msk [vmem:[#allocation0 + $0x1001] ss:$16 sm:$0x30] %vm3_vm0, %v1119_v62   ;;  %1128 = vst.msk [vmem:[#allocation0 + $0x1001] ss:$16 sm:$0xc0] %vm3_vm0, %v1119_v62  }
 0x136   :  { %11963 = vst [vmem:[%s17895_s1 + $0x290] sm:$0x3] %v5491_v8  ;;  %11965 = vst [vmem:[%s17895_s1 + $0x294] sm:$0x3] %v5505_v9  ;;  %v5519_v12 = vld [vmem:[#allocation0 + $0xa60] sm:$0x3] }
 0x137   :  { %v5533_v28 = vld [vmem:[#allocation0 + $0xa70] sm:$0x3]  ;;  %v5771_v29 = vld [vmem:[#allocation0 + $0xb80] sm:$0x3]  ;;  %11967 = vst [vmem:[%s17895_s1 + $0x298] sm:$0x3] %v5519_v12 }
 0x138   :  { %11969 = vst [vmem:[%s17895_s1 + $0x29c] sm:$0x3] %v5533_v28  ;;  %12003 = vst [vmem:[%s17895_s1 + $0x2e0] sm:$0x3] %v5771_v29  ;;  %v5785_v42 = vld [vmem:[#allocation0 + $0xb90] sm:$0x3] }
 0x139   :  { %v5799_v43 = vld [vmem:[#allocation0 + $0xba0] sm:$0x3]  ;;  %v5813_v13 = vld [vmem:[#allocation0 + $0xbb0] sm:$0x3]  ;;  %12005 = vst [vmem:[%s17895_s1 + $0x2e4] sm:$0x3] %v5785_v42  ;;  %v1236_v42 = vpop.permute.xlu1 %1235  }
 0x13a   :  { %12007 = vst [vmem:[%s17895_s1 + $0x2e8] sm:$0x3] %v5799_v43  ;;  %12009 = vst [vmem:[%s17895_s1 + $0x2ec] sm:$0x3] %v5813_v13  ;;  %v5827_v16 = vld [vmem:[#allocation0 + $0xbc0] sm:$0x3]  ;;  %v1223_v43 = vpop.permute.xlu0 %1222  }
 0x13b   :  { %v5841_v1 = vld [vmem:[#allocation0 + $0xbd0] sm:$0x3]  ;;  %v5855_v3 = vld [vmem:[#allocation0 + $0xbe0] sm:$0x3]  ;;  %12011 = vst [vmem:[%s17895_s1 + $0x2f0] sm:$0x3] %v5827_v16 }
 0x13c   :  { %12013 = vst [vmem:[%s17895_s1 + $0x2f4] sm:$0x3] %v5841_v1  ;;  %12015 = vst [vmem:[%s17895_s1 + $0x2f8] sm:$0x3] %v5855_v3  ;;  %v5869_v18 = vld [vmem:[#allocation0 + $0xbf0] sm:$0x3] }
 0x13d   :  { %v5659_v19 = vld [vmem:[#allocation0 + $0xb00] sm:$0x3]  ;;  %v5673_v17 = vld [vmem:[#allocation0 + $0xb10] sm:$0x3]  ;;  %12017 = vst [vmem:[%s17895_s1 + $0x2fc] sm:$0x3] %v5869_v18 }
 0x13e   :  { %1161 = vst.msk [vmem:[#allocation0 + $0x1181] ss:$16 sm:$0x3] %vm3_vm0, %v1158_v4   ;;  %1163 = vst.msk [vmem:[#allocation0 + $0x1181] ss:$16 sm:$0xc] %vm3_vm0, %v1158_v4  }
 0x13f   :  { %1165 = vst.msk [vmem:[#allocation0 + $0x1181] ss:$16 sm:$0x30] %vm3_vm0, %v1158_v4   ;;  %1167 = vst.msk [vmem:[#allocation0 + $0x1181] ss:$16 sm:$0xc0] %vm3_vm0, %v1158_v4  }
 0x140   :  { %1148 = vst.msk [vmem:[#allocation0 + $0x1101] ss:$16 sm:$0x3] %vm3_vm0, %v1145_v5   ;;  %1150 = vst.msk [vmem:[#allocation0 + $0x1101] ss:$16 sm:$0xc] %vm3_vm0, %v1145_v5  }
 0x141   :  { %1152 = vst.msk [vmem:[#allocation0 + $0x1101] ss:$16 sm:$0x30] %vm3_vm0, %v1145_v5   ;;  %1154 = vst.msk [vmem:[#allocation0 + $0x1101] ss:$16 sm:$0xc0] %vm3_vm0, %v1145_v5  }
 0x142   :  { %11987 = vst [vmem:[%s17895_s1 + $0x2c0] sm:$0x3] %v5659_v19  ;;  %11989 = vst [vmem:[%s17895_s1 + $0x2c4] sm:$0x3] %v5673_v17  ;;  %v5687_v22 = vld [vmem:[#allocation0 + $0xb20] sm:$0x3] }
 0x143   :  { %v5701_v23 = vld [vmem:[#allocation0 + $0xb30] sm:$0x3]  ;;  %v5715_v26 = vld [vmem:[#allocation0 + $0xb40] sm:$0x3]  ;;  %11991 = vst [vmem:[%s17895_s1 + $0x2c8] sm:$0x3] %v5687_v22 }
 0x144   :  { %11993 = vst [vmem:[%s17895_s1 + $0x2cc] sm:$0x3] %v5701_v23  ;;  %11995 = vst [vmem:[%s17895_s1 + $0x2d0] sm:$0x3] %v5715_v26  ;;  %v5729_v46 = vld [vmem:[#allocation0 + $0xb50] sm:$0x3]  ;;  %v1262_v23 = vpop.permute.xlu1 %1261   ;;  %v1249_v26 = vpop.permute.xlu0 %1248  }
 0x145   :  { %v5743_v47 = vld [vmem:[#allocation0 + $0xb60] sm:$0x3]  ;;  %v5757_v32 = vld [vmem:[#allocation0 + $0xb70] sm:$0x3]  ;;  %11997 = vst [vmem:[%s17895_s1 + $0x2d4] sm:$0x3] %v5729_v46 }
 0x146   :  { %11999 = vst [vmem:[%s17895_s1 + $0x2d8] sm:$0x3] %v5743_v47  ;;  %12001 = vst [vmem:[%s17895_s1 + $0x2dc] sm:$0x3] %v5757_v32  ;;  %v5995_v33 = vld [vmem:[#allocation0 + $0xc80] sm:$0x3] }
 0x147   :  { %v6009_v27 = vld [vmem:[#allocation0 + $0xc90] sm:$0x3]  ;;  %v6023_v34 = vld [vmem:[#allocation0 + $0xca0] sm:$0x3]  ;;  %12035 = vst [vmem:[%s17895_s1 + $0x320] sm:$0x3] %v5995_v33 }
 0x148   :  { %12037 = vst [vmem:[%s17895_s1 + $0x324] sm:$0x3] %v6009_v27  ;;  %12039 = vst [vmem:[%s17895_s1 + $0x328] sm:$0x3] %v6023_v34  ;;  %v6037_v41 = vld [vmem:[#allocation0 + $0xcb0] sm:$0x3] }
 0x149   :  { %v6051_v48 = vld [vmem:[#allocation0 + $0xcc0] sm:$0x3]  ;;  %v6065_v49 = vld [vmem:[#allocation0 + $0xcd0] sm:$0x3]  ;;  %12041 = vst [vmem:[%s17895_s1 + $0x32c] sm:$0x3] %v6037_v41 }
 0x14a   :  { %1187 = vst.msk [vmem:[#allocation0 + $0x1281] ss:$16 sm:$0x3] %vm3_vm0, %v1184_v35   ;;  %1189 = vst.msk [vmem:[#allocation0 + $0x1281] ss:$16 sm:$0xc] %vm3_vm0, %v1184_v35  }
 0x14b   :  { %1191 = vst.msk [vmem:[#allocation0 + $0x1281] ss:$16 sm:$0x30] %vm3_vm0, %v1184_v35   ;;  %1193 = vst.msk [vmem:[#allocation0 + $0x1281] ss:$16 sm:$0xc0] %vm3_vm0, %v1184_v35  }
 0x14c   :  { %1174 = vst.msk [vmem:[#allocation0 + $0x1201] ss:$16 sm:$0x3] %vm3_vm0, %v1171_v40   ;;  %1176 = vst.msk [vmem:[#allocation0 + $0x1201] ss:$16 sm:$0xc] %vm3_vm0, %v1171_v40  }
 0x14d   :  { %1178 = vst.msk [vmem:[#allocation0 + $0x1201] ss:$16 sm:$0x30] %vm3_vm0, %v1171_v40   ;;  %1180 = vst.msk [vmem:[#allocation0 + $0x1201] ss:$16 sm:$0xc0] %vm3_vm0, %v1171_v40  }
 0x14e   :  { %12043 = vst [vmem:[%s17895_s1 + $0x330] sm:$0x3] %v6051_v48  ;;  %12045 = vst [vmem:[%s17895_s1 + $0x334] sm:$0x3] %v6065_v49  ;;  %v6079_v50 = vld [vmem:[#allocation0 + $0xce0] sm:$0x3]  ;;  %v1288_v49 = vpop.permute.xlu1 %1287  }
 0x14f   :  { %v6093_v24 = vld [vmem:[#allocation0 + $0xcf0] sm:$0x3]  ;;  %v5883_v25 = vld [vmem:[#allocation0 + $0xc00] sm:$0x3]  ;;  %12047 = vst [vmem:[%s17895_s1 + $0x338] sm:$0x3] %v6079_v50  ;;  %v1275_v50 = vpop.permute.xlu0 %1274  }
 0x150   :  { %12049 = vst [vmem:[%s17895_s1 + $0x33c] sm:$0x3] %v6093_v24  ;;  %12019 = vst [vmem:[%s17895_s1 + $0x300] sm:$0x3] %v5883_v25  ;;  %v5897_v52 = vld [vmem:[#allocation0 + $0xc10] sm:$0x3] }
 0x151   :  { %v5911_v53 = vld [vmem:[#allocation0 + $0xc20] sm:$0x3]  ;;  %v5925_v0 = vld [vmem:[#allocation0 + $0xc30] sm:$0x3]  ;;  %12021 = vst [vmem:[%s17895_s1 + $0x304] sm:$0x3] %v5897_v52 }
 0x152   :  { %12023 = vst [vmem:[%s17895_s1 + $0x308] sm:$0x3] %v5911_v53  ;;  %12025 = vst [vmem:[%s17895_s1 + $0x30c] sm:$0x3] %v5925_v0  ;;  %v5939_v2 = vld [vmem:[#allocation0 + $0xc40] sm:$0x3] }
 0x153   :  { %v5953_v38 = vld [vmem:[#allocation0 + $0xc50] sm:$0x3]  ;;  %v5967_v39 = vld [vmem:[#allocation0 + $0xc60] sm:$0x3]  ;;  %12027 = vst [vmem:[%s17895_s1 + $0x310] sm:$0x3] %v5939_v2 }
 0x154   :  { %12029 = vst [vmem:[%s17895_s1 + $0x314] sm:$0x3] %v5953_v38  ;;  %12031 = vst [vmem:[%s17895_s1 + $0x318] sm:$0x3] %v5967_v39  ;;  %v5981_v51 = vld [vmem:[#allocation0 + $0xc70] sm:$0x3] }
 0x155   :  { %v6219_v54 = vld [vmem:[#allocation0 + $0xd80] sm:$0x3]  ;;  %v6233_v55 = vld [vmem:[#allocation0 + $0xd90] sm:$0x3]  ;;  %12033 = vst [vmem:[%s17895_s1 + $0x31c] sm:$0x3] %v5981_v51  ;;  %v1314_v51 = vpop.permute.xlu1 %1313  }
 0x156   :  { %1213 = vst.msk [vmem:[#allocation0 + $0x1381] ss:$16 sm:$0x3] %vm3_vm0, %v1210_v6   ;;  %1215 = vst.msk [vmem:[#allocation0 + $0x1381] ss:$16 sm:$0xc] %vm3_vm0, %v1210_v6  }
 0x157   :  { %1217 = vst.msk [vmem:[#allocation0 + $0x1381] ss:$16 sm:$0x30] %vm3_vm0, %v1210_v6   ;;  %1219 = vst.msk [vmem:[#allocation0 + $0x1381] ss:$16 sm:$0xc0] %vm3_vm0, %v1210_v6  }
 0x158   :  { %1200 = vst.msk [vmem:[#allocation0 + $0x1301] ss:$16 sm:$0x3] %vm3_vm0, %v1197_v7   ;;  %1202 = vst.msk [vmem:[#allocation0 + $0x1301] ss:$16 sm:$0xc] %vm3_vm0, %v1197_v7  }
 0x159   :  { %1204 = vst.msk [vmem:[#allocation0 + $0x1301] ss:$16 sm:$0x30] %vm3_vm0, %v1197_v7   ;;  %1206 = vst.msk [vmem:[#allocation0 + $0x1301] ss:$16 sm:$0xc0] %vm3_vm0, %v1197_v7  }
 0x15a   :  { %12067 = vst [vmem:[%s17895_s1 + $0x360] sm:$0x3] %v6219_v54  ;;  %12069 = vst [vmem:[%s17895_s1 + $0x364] sm:$0x3] %v6233_v55  ;;  %v6247_v62 = vld [vmem:[#allocation0 + $0xda0] sm:$0x3]  ;;  %v1301_v54 = vpop.permute.xlu0 %1300  }
 0x15b   :  { %v6261_v63 = vld [vmem:[#allocation0 + $0xdb0] sm:$0x3]  ;;  %v6275_v8 = vld [vmem:[#allocation0 + $0xdc0] sm:$0x3]  ;;  %12071 = vst [vmem:[%s17895_s1 + $0x368] sm:$0x3] %v6247_v62 }
 0x15c   :  { %12073 = vst [vmem:[%s17895_s1 + $0x36c] sm:$0x3] %v6261_v63  ;;  %12075 = vst [vmem:[%s17895_s1 + $0x370] sm:$0x3] %v6275_v8  ;;  %v6289_v56 = vld [vmem:[#allocation0 + $0xdd0] sm:$0x3] }
 0x15d   :  { %v6303_v57 = vld [vmem:[#allocation0 + $0xde0] sm:$0x3]  ;;  %v6317_v9 = vld [vmem:[#allocation0 + $0xdf0] sm:$0x3]  ;;  %12077 = vst [vmem:[%s17895_s1 + $0x374] sm:$0x3] %v6289_v56 }
 0x15e   :  { %12079 = vst [vmem:[%s17895_s1 + $0x378] sm:$0x3] %v6303_v57  ;;  %12081 = vst [vmem:[%s17895_s1 + $0x37c] sm:$0x3] %v6317_v9  ;;  %v6107_v12 = vld [vmem:[#allocation0 + $0xd00] sm:$0x3] }
 0x15f   :  { %v6121_v28 = vld [vmem:[#allocation0 + $0xd10] sm:$0x3]  ;;  %v6135_v29 = vld [vmem:[#allocation0 + $0xd20] sm:$0x3]  ;;  %12051 = vst [vmem:[%s17895_s1 + $0x340] sm:$0x3] %v6107_v12 }
 0x160   :  { %12053 = vst [vmem:[%s17895_s1 + $0x344] sm:$0x3] %v6121_v28  ;;  %12055 = vst [vmem:[%s17895_s1 + $0x348] sm:$0x3] %v6135_v29  ;;  %v6149_v13 = vld [vmem:[#allocation0 + $0xd30] sm:$0x3] }
 0x161   :  { %v6163_v16 = vld [vmem:[#allocation0 + $0xd40] sm:$0x3]  ;;  %v6177_v1 = vld [vmem:[#allocation0 + $0xd50] sm:$0x3]  ;;  %12057 = vst [vmem:[%s17895_s1 + $0x34c] sm:$0x3] %v6149_v13 }
 0x162   :  { %1239 = vst.msk [vmem:[#allocation0 + $0x1481] ss:$16 sm:$0x3] %vm3_vm0, %v1236_v42   ;;  %1241 = vst.msk [vmem:[#allocation0 + $0x1481] ss:$16 sm:$0xc] %vm3_vm0, %v1236_v42  }
 0x163   :  { %1243 = vst.msk [vmem:[#allocation0 + $0x1481] ss:$16 sm:$0x30] %vm3_vm0, %v1236_v42   ;;  %1245 = vst.msk [vmem:[#allocation0 + $0x1481] ss:$16 sm:$0xc0] %vm3_vm0, %v1236_v42   ;;  %v1340_v42 = vpop.permute.xlu1 %1339  }
 0x164   :  { %1226 = vst.msk [vmem:[#allocation0 + $0x1401] ss:$16 sm:$0x3] %vm3_vm0, %v1223_v43   ;;  %1228 = vst.msk [vmem:[#allocation0 + $0x1401] ss:$16 sm:$0xc] %vm3_vm0, %v1223_v43  }
 0x165   :  { %1230 = vst.msk [vmem:[#allocation0 + $0x1401] ss:$16 sm:$0x30] %vm3_vm0, %v1223_v43   ;;  %1232 = vst.msk [vmem:[#allocation0 + $0x1401] ss:$16 sm:$0xc0] %vm3_vm0, %v1223_v43   ;;  %v1327_v43 = vpop.permute.xlu0 %1326  }
 0x166   :  { %12059 = vst [vmem:[%s17895_s1 + $0x350] sm:$0x3] %v6163_v16  ;;  %12061 = vst [vmem:[%s17895_s1 + $0x354] sm:$0x3] %v6177_v1  ;;  %v6191_v3 = vld [vmem:[#allocation0 + $0xd60] sm:$0x3] }
 0x167   :  { %v6205_v4 = vld [vmem:[#allocation0 + $0xd70] sm:$0x3]  ;;  %v6443_v5 = vld [vmem:[#allocation0 + $0xe80] sm:$0x3]  ;;  %12063 = vst [vmem:[%s17895_s1 + $0x358] sm:$0x3] %v6191_v3 }
 0x168   :  { %12065 = vst [vmem:[%s17895_s1 + $0x35c] sm:$0x3] %v6205_v4  ;;  %12099 = vst [vmem:[%s17895_s1 + $0x3a0] sm:$0x3] %v6443_v5  ;;  %v6457_v60 = vld [vmem:[#allocation0 + $0xe90] sm:$0x3] }
 0x169   :  { %v6471_v61 = vld [vmem:[#allocation0 + $0xea0] sm:$0x3]  ;;  %v6485_v18 = vld [vmem:[#allocation0 + $0xeb0] sm:$0x3]  ;;  %12101 = vst [vmem:[%s17895_s1 + $0x3a4] sm:$0x3] %v6457_v60 }
 0x16a   :  { %12103 = vst [vmem:[%s17895_s1 + $0x3a8] sm:$0x3] %v6471_v61  ;;  %12105 = vst [vmem:[%s17895_s1 + $0x3ac] sm:$0x3] %v6485_v18  ;;  %v6499_v19 = vld [vmem:[#allocation0 + $0xec0] sm:$0x3] }
 0x16b   :  { %v6513_v17 = vld [vmem:[#allocation0 + $0xed0] sm:$0x3]  ;;  %v6527_v22 = vld [vmem:[#allocation0 + $0xee0] sm:$0x3]  ;;  %12107 = vst [vmem:[%s17895_s1 + $0x3b0] sm:$0x3] %v6499_v19 }
 0x16c   :  { %12109 = vst [vmem:[%s17895_s1 + $0x3b4] sm:$0x3] %v6513_v17  ;;  %12111 = vst [vmem:[%s17895_s1 + $0x3b8] sm:$0x3] %v6527_v22  ;;  %v6541_v46 = vld [vmem:[#allocation0 + $0xef0] sm:$0x3]  ;;  %v1366_v17 = vpop.permute.xlu1 %1365   ;;  %v1353_v22 = vpop.permute.xlu0 %1352  }
 0x16d   :  { %v6331_v47 = vld [vmem:[#allocation0 + $0xe00] sm:$0x3]  ;;  %v6345_v32 = vld [vmem:[#allocation0 + $0xe10] sm:$0x3]  ;;  %12113 = vst [vmem:[%s17895_s1 + $0x3bc] sm:$0x3] %v6541_v46 }
 0x16e   :  { %1265 = vst.msk [vmem:[#allocation0 + $0x1581] ss:$16 sm:$0x3] %vm3_vm0, %v1262_v23   ;;  %1267 = vst.msk [vmem:[#allocation0 + $0x1581] ss:$16 sm:$0xc] %vm3_vm0, %v1262_v23  }
 0x16f   :  { %1269 = vst.msk [vmem:[#allocation0 + $0x1581] ss:$16 sm:$0x30] %vm3_vm0, %v1262_v23   ;;  %1271 = vst.msk [vmem:[#allocation0 + $0x1581] ss:$16 sm:$0xc0] %vm3_vm0, %v1262_v23  }
 0x170   :  { %1252 = vst.msk [vmem:[#allocation0 + $0x1501] ss:$16 sm:$0x3] %vm3_vm0, %v1249_v26   ;;  %1254 = vst.msk [vmem:[#allocation0 + $0x1501] ss:$16 sm:$0xc] %vm3_vm0, %v1249_v26  }
 0x171   :  { %1256 = vst.msk [vmem:[#allocation0 + $0x1501] ss:$16 sm:$0x30] %vm3_vm0, %v1249_v26   ;;  %1258 = vst.msk [vmem:[#allocation0 + $0x1501] ss:$16 sm:$0xc0] %vm3_vm0, %v1249_v26  }
 0x172   :  { %12083 = vst [vmem:[%s17895_s1 + $0x380] sm:$0x3] %v6331_v47  ;;  %12085 = vst [vmem:[%s17895_s1 + $0x384] sm:$0x3] %v6345_v32  ;;  %v6359_v33 = vld [vmem:[#allocation0 + $0xe20] sm:$0x3] }
 0x173   :  { %v6373_v27 = vld [vmem:[#allocation0 + $0xe30] sm:$0x3]  ;;  %v6387_v34 = vld [vmem:[#allocation0 + $0xe40] sm:$0x3]  ;;  %12087 = vst [vmem:[%s17895_s1 + $0x388] sm:$0x3] %v6359_v33 }
 0x174   :  { %12089 = vst [vmem:[%s17895_s1 + $0x38c] sm:$0x3] %v6373_v27  ;;  %12091 = vst [vmem:[%s17895_s1 + $0x390] sm:$0x3] %v6387_v34  ;;  %v6401_v10 = vld [vmem:[#allocation0 + $0xe50] sm:$0x3] }
 0x175   :  { %v6415_v11 = vld [vmem:[#allocation0 + $0xe60] sm:$0x3]  ;;  %v6429_v35 = vld [vmem:[#allocation0 + $0xe70] sm:$0x3]  ;;  %12093 = vst [vmem:[%s17895_s1 + $0x394] sm:$0x3] %v6401_v10 }
 0x176   :  { %12095 = vst [vmem:[%s17895_s1 + $0x398] sm:$0x3] %v6415_v11  ;;  %12097 = vst [vmem:[%s17895_s1 + $0x39c] sm:$0x3] %v6429_v35  ;;  %v6667_v40 = vld [vmem:[#allocation0 + $0xf80] sm:$0x3]  ;;  %v1392_v35 = vpop.permute.xlu1 %1391  }
 0x177   :  { %v6681_v41 = vld [vmem:[#allocation0 + $0xf90] sm:$0x3]  ;;  %v6695_v48 = vld [vmem:[#allocation0 + $0xfa0] sm:$0x3]  ;;  %12131 = vst [vmem:[%s17895_s1 + $0x3e0] sm:$0x3] %v6667_v40  ;;  %v1379_v40 = vpop.permute.xlu0 %1378  }
 0x178   :  { %12133 = vst [vmem:[%s17895_s1 + $0x3e4] sm:$0x3] %v6681_v41  ;;  %12135 = vst [vmem:[%s17895_s1 + $0x3e8] sm:$0x3] %v6695_v48  ;;  %v6709_v24 = vld [vmem:[#allocation0 + $0xfb0] sm:$0x3] }
 0x179   :  { %v6723_v25 = vld [vmem:[#allocation0 + $0xfc0] sm:$0x3]  ;;  %v6737_v52 = vld [vmem:[#allocation0 + $0xfd0] sm:$0x3]  ;;  %12137 = vst [vmem:[%s17895_s1 + $0x3ec] sm:$0x3] %v6709_v24 }
 0x17a   :  { %1291 = vst.msk [vmem:[#allocation0 + $0x1681] ss:$16 sm:$0x3] %vm3_vm0, %v1288_v49   ;;  %1293 = vst.msk [vmem:[#allocation0 + $0x1681] ss:$16 sm:$0xc] %vm3_vm0, %v1288_v49  }
 0x17b   :  { %1295 = vst.msk [vmem:[#allocation0 + $0x1681] ss:$16 sm:$0x30] %vm3_vm0, %v1288_v49   ;;  %1297 = vst.msk [vmem:[#allocation0 + $0x1681] ss:$16 sm:$0xc0] %vm3_vm0, %v1288_v49  }
 0x17c   :  { %1278 = vst.msk [vmem:[#allocation0 + $0x1601] ss:$16 sm:$0x3] %vm3_vm0, %v1275_v50   ;;  %1280 = vst.msk [vmem:[#allocation0 + $0x1601] ss:$16 sm:$0xc] %vm3_vm0, %v1275_v50  }
 0x17d   :  { %1282 = vst.msk [vmem:[#allocation0 + $0x1601] ss:$16 sm:$0x30] %vm3_vm0, %v1275_v50   ;;  %1284 = vst.msk [vmem:[#allocation0 + $0x1601] ss:$16 sm:$0xc0] %vm3_vm0, %v1275_v50  }
 0x17e   :  { %12139 = vst [vmem:[%s17895_s1 + $0x3f0] sm:$0x3] %v6723_v25  ;;  %12141 = vst [vmem:[%s17895_s1 + $0x3f4] sm:$0x3] %v6737_v52  ;;  %v6751_v53 = vld [vmem:[#allocation0 + $0xfe0] sm:$0x3] }
 0x17f   :  { %v6765_v0 = vld [vmem:[#allocation0 + $0xff0] sm:$0x3]  ;;  %v6555_v2 = vld [vmem:[#allocation0 + $0xf00] sm:$0x3]  ;;  %12143 = vst [vmem:[%s17895_s1 + $0x3f8] sm:$0x3] %v6751_v53 }
 0x180   :  { %12145 = vst [vmem:[%s17895_s1 + $0x3fc] sm:$0x3] %v6765_v0  ;;  %12115 = vst [vmem:[%s17895_s1 + $0x3c0] sm:$0x3] %v6555_v2  ;;  %v6569_v14 = vld [vmem:[#allocation0 + $0xf10] sm:$0x3] }
 0x181   :  { %v6583_v15 = vld [vmem:[#allocation0 + $0xf20] sm:$0x3]  ;;  %v6597_v38 = vld [vmem:[#allocation0 + $0xf30] sm:$0x3]  ;;  %12117 = vst [vmem:[%s17895_s1 + $0x3c4] sm:$0x3] %v6569_v14  ;;  %v1418_v14 = vpop.permute.xlu1 %1417  }
 0x182   :  { %12119 = vst [vmem:[%s17895_s1 + $0x3c8] sm:$0x3] %v6583_v15  ;;  %12121 = vst [vmem:[%s17895_s1 + $0x3cc] sm:$0x3] %v6597_v38  ;;  %v6611_v39 = vld [vmem:[#allocation0 + $0xf40] sm:$0x3]  ;;  %v1405_v15 = vpop.permute.xlu0 %1404  }
 0x183   :  { %v6625_v6 = vld [vmem:[#allocation0 + $0xf50] sm:$0x3]  ;;  %v6639_v7 = vld [vmem:[#allocation0 + $0xf60] sm:$0x3]  ;;  %12123 = vst [vmem:[%s17895_s1 + $0x3d0] sm:$0x3] %v6611_v39 }
 0x184   :  { %12125 = vst [vmem:[%s17895_s1 + $0x3d4] sm:$0x3] %v6625_v6  ;;  %12127 = vst [vmem:[%s17895_s1 + $0x3d8] sm:$0x3] %v6639_v7  ;;  %v6653_v55 = vld [vmem:[#allocation0 + $0xf70] sm:$0x3] }
 0x185   :  { %v6891_v62 = vld [vmem:[#allocation0 + $0x1080] sm:$0x3]  ;;  %v6905_v63 = vld [vmem:[#allocation0 + $0x1090] sm:$0x3]  ;;  %12129 = vst [vmem:[%s17895_s1 + $0x3dc] sm:$0x3] %v6653_v55 }
 0x186   :  { %1317 = vst.msk [vmem:[#allocation0 + $0x1781] ss:$16 sm:$0x3] %vm3_vm0, %v1314_v51   ;;  %1319 = vst.msk [vmem:[#allocation0 + $0x1781] ss:$16 sm:$0xc] %vm3_vm0, %v1314_v51  }
 0x187   :  { %1321 = vst.msk [vmem:[#allocation0 + $0x1781] ss:$16 sm:$0x30] %vm3_vm0, %v1314_v51   ;;  %1323 = vst.msk [vmem:[#allocation0 + $0x1781] ss:$16 sm:$0xc0] %vm3_vm0, %v1314_v51  }
 0x188   :  { %1304 = vst.msk [vmem:[#allocation0 + $0x1701] ss:$16 sm:$0x3] %vm3_vm0, %v1301_v54   ;;  %1306 = vst.msk [vmem:[#allocation0 + $0x1701] ss:$16 sm:$0xc] %vm3_vm0, %v1301_v54  }
 0x189   :  { %1308 = vst.msk [vmem:[#allocation0 + $0x1701] ss:$16 sm:$0x30] %vm3_vm0, %v1301_v54   ;;  %1310 = vst.msk [vmem:[#allocation0 + $0x1701] ss:$16 sm:$0xc0] %vm3_vm0, %v1301_v54  }
 0x18a   :  { %12163 = vst [vmem:[%s17895_s1 + $0x420] sm:$0x3] %v6891_v62  ;;  %12165 = vst [vmem:[%s17895_s1 + $0x424] sm:$0x3] %v6905_v63  ;;  %v6919_v8 = vld [vmem:[#allocation0 + $0x10a0] sm:$0x3] }
 0x18b   :  { %v6933_v56 = vld [vmem:[#allocation0 + $0x10b0] sm:$0x3]  ;;  %v6947_v57 = vld [vmem:[#allocation0 + $0x10c0] sm:$0x3]  ;;  %12167 = vst [vmem:[%s17895_s1 + $0x428] sm:$0x3] %v6919_v8 }
 0x18c   :  { %12169 = vst [vmem:[%s17895_s1 + $0x42c] sm:$0x3] %v6933_v56  ;;  %12171 = vst [vmem:[%s17895_s1 + $0x430] sm:$0x3] %v6947_v57  ;;  %v6961_v20 = vld [vmem:[#allocation0 + $0x10d0] sm:$0x3]  ;;  %v1444_v56 = vpop.permute.xlu1 %1443   ;;  %v1431_v57 = vpop.permute.xlu0 %1430  }
 0x18d   :  { %v6975_v21 = vld [vmem:[#allocation0 + $0x10e0] sm:$0x3]  ;;  %v6989_v9 = vld [vmem:[#allocation0 + $0x10f0] sm:$0x3]  ;;  %12173 = vst [vmem:[%s17895_s1 + $0x434] sm:$0x3] %v6961_v20 }
 0x18e   :  { %12175 = vst [vmem:[%s17895_s1 + $0x438] sm:$0x3] %v6975_v21  ;;  %12177 = vst [vmem:[%s17895_s1 + $0x43c] sm:$0x3] %v6989_v9  ;;  %v6779_v12 = vld [vmem:[#allocation0 + $0x1000] sm:$0x3] }
 0x18f   :  { %v6793_v28 = vld [vmem:[#allocation0 + $0x1010] sm:$0x3]  ;;  %v6807_v29 = vld [vmem:[#allocation0 + $0x1020] sm:$0x3]  ;;  %12147 = vst [vmem:[%s17895_s1 + $0x400] sm:$0x3] %v6779_v12 }
 0x190   :  { %12149 = vst [vmem:[%s17895_s1 + $0x404] sm:$0x3] %v6793_v28  ;;  %12151 = vst [vmem:[%s17895_s1 + $0x408] sm:$0x3] %v6807_v29  ;;  %v6821_v13 = vld [vmem:[#allocation0 + $0x1030] sm:$0x3] }
 0x191   :  { %v6835_v16 = vld [vmem:[#allocation0 + $0x1040] sm:$0x3]  ;;  %v6849_v1 = vld [vmem:[#allocation0 + $0x1050] sm:$0x3]  ;;  %12153 = vst [vmem:[%s17895_s1 + $0x40c] sm:$0x3] %v6821_v13 }
 0x192   :  { %1343 = vst.msk [vmem:[#allocation0 + $0x1881] ss:$16 sm:$0x3] %vm3_vm0, %v1340_v42   ;;  %1345 = vst.msk [vmem:[#allocation0 + $0x1881] ss:$16 sm:$0xc] %vm3_vm0, %v1340_v42  }
 0x193   :  { %1347 = vst.msk [vmem:[#allocation0 + $0x1881] ss:$16 sm:$0x30] %vm3_vm0, %v1340_v42   ;;  %1349 = vst.msk [vmem:[#allocation0 + $0x1881] ss:$16 sm:$0xc0] %vm3_vm0, %v1340_v42  }
 0x194   :  { %1330 = vst.msk [vmem:[#allocation0 + $0x1801] ss:$16 sm:$0x3] %vm3_vm0, %v1327_v43   ;;  %1332 = vst.msk [vmem:[#allocation0 + $0x1801] ss:$16 sm:$0xc] %vm3_vm0, %v1327_v43  }
 0x195   :  { %1334 = vst.msk [vmem:[#allocation0 + $0x1801] ss:$16 sm:$0x30] %vm3_vm0, %v1327_v43   ;;  %1336 = vst.msk [vmem:[#allocation0 + $0x1801] ss:$16 sm:$0xc0] %vm3_vm0, %v1327_v43  }
 0x196   :  { %12155 = vst [vmem:[%s17895_s1 + $0x410] sm:$0x3] %v6835_v16  ;;  %12157 = vst [vmem:[%s17895_s1 + $0x414] sm:$0x3] %v6849_v1  ;;  %v6863_v3 = vld [vmem:[#allocation0 + $0x1060] sm:$0x3] }
 0x197   :  { %v6877_v4 = vld [vmem:[#allocation0 + $0x1070] sm:$0x3]  ;;  %v7115_v5 = vld [vmem:[#allocation0 + $0x1180] sm:$0x3]  ;;  %12159 = vst [vmem:[%s17895_s1 + $0x418] sm:$0x3] %v6863_v3 }
 0x198   :  { %12161 = vst [vmem:[%s17895_s1 + $0x41c] sm:$0x3] %v6877_v4  ;;  %12195 = vst [vmem:[%s17895_s1 + $0x460] sm:$0x3] %v7115_v5  ;;  %v7129_v30 = vld [vmem:[#allocation0 + $0x1190] sm:$0x3]  ;;  %v1470_v4 = vpop.permute.xlu1 %1469   ;;  %v1457_v5 = vpop.permute.xlu0 %1456  }
 0x199   :  { %v7143_v31 = vld [vmem:[#allocation0 + $0x11a0] sm:$0x3]  ;;  %v7157_v60 = vld [vmem:[#allocation0 + $0x11b0] sm:$0x3]  ;;  %12197 = vst [vmem:[%s17895_s1 + $0x464] sm:$0x3] %v7129_v30 }
 0x19a   :  { %12199 = vst [vmem:[%s17895_s1 + $0x468] sm:$0x3] %v7143_v31  ;;  %12201 = vst [vmem:[%s17895_s1 + $0x46c] sm:$0x3] %v7157_v60  ;;  %v7171_v61 = vld [vmem:[#allocation0 + $0x11c0] sm:$0x3] }
 0x19b   :  { %v7185_v18 = vld [vmem:[#allocation0 + $0x11d0] sm:$0x3]  ;;  %v7199_v19 = vld [vmem:[#allocation0 + $0x11e0] sm:$0x3]  ;;  %12203 = vst [vmem:[%s17895_s1 + $0x470] sm:$0x3] %v7171_v61 }
 0x19c   :  { %12205 = vst [vmem:[%s17895_s1 + $0x474] sm:$0x3] %v7185_v18  ;;  %12207 = vst [vmem:[%s17895_s1 + $0x478] sm:$0x3] %v7199_v19  ;;  %v7213_v23 = vld [vmem:[#allocation0 + $0x11f0] sm:$0x3] }
 0x19d   :  { %v7003_v26 = vld [vmem:[#allocation0 + $0x1100] sm:$0x3]  ;;  %v7017_v46 = vld [vmem:[#allocation0 + $0x1110] sm:$0x3]  ;;  %12209 = vst [vmem:[%s17895_s1 + $0x47c] sm:$0x3] %v7213_v23 }
 0x19e   :  { %1369 = vst.msk [vmem:[#allocation0 + $0x1981] ss:$16 sm:$0x3] %vm3_vm0, %v1366_v17   ;;  %1371 = vst.msk [vmem:[#allocation0 + $0x1981] ss:$16 sm:$0xc] %vm3_vm0, %v1366_v17  }
 0x19f   :  { %1373 = vst.msk [vmem:[#allocation0 + $0x1981] ss:$16 sm:$0x30] %vm3_vm0, %v1366_v17   ;;  %1375 = vst.msk [vmem:[#allocation0 + $0x1981] ss:$16 sm:$0xc0] %vm3_vm0, %v1366_v17  }
 0x1a0   :  { %1356 = vst.msk [vmem:[#allocation0 + $0x1901] ss:$16 sm:$0x3] %vm3_vm0, %v1353_v22   ;;  %1358 = vst.msk [vmem:[#allocation0 + $0x1901] ss:$16 sm:$0xc] %vm3_vm0, %v1353_v22  }
 0x1a1   :  { %1360 = vst.msk [vmem:[#allocation0 + $0x1901] ss:$16 sm:$0x30] %vm3_vm0, %v1353_v22   ;;  %1362 = vst.msk [vmem:[#allocation0 + $0x1901] ss:$16 sm:$0xc0] %vm3_vm0, %v1353_v22  }
 0x1a2   :  { %12179 = vst [vmem:[%s17895_s1 + $0x440] sm:$0x3] %v7003_v26  ;;  %12181 = vst [vmem:[%s17895_s1 + $0x444] sm:$0x3] %v7017_v46  ;;  %v7031_v47 = vld [vmem:[#allocation0 + $0x1120] sm:$0x3] }
 0x1a3   :  { %v7045_v32 = vld [vmem:[#allocation0 + $0x1130] sm:$0x3]  ;;  %v7059_v33 = vld [vmem:[#allocation0 + $0x1140] sm:$0x3]  ;;  %12183 = vst [vmem:[%s17895_s1 + $0x448] sm:$0x3] %v7031_v47 }
 0x1a4   :  { %12185 = vst [vmem:[%s17895_s1 + $0x44c] sm:$0x3] %v7045_v32  ;;  %12187 = vst [vmem:[%s17895_s1 + $0x450] sm:$0x3] %v7059_v33  ;;  %v7073_v36 = vld [vmem:[#allocation0 + $0x1150] sm:$0x3]  ;;  %v1496_v32 = vpop.permute.xlu1 %1495   ;;  %v1483_v33 = vpop.permute.xlu0 %1482  }
 0x1a5   :  { %v7087_v37 = vld [vmem:[#allocation0 + $0x1160] sm:$0x3]  ;;  %v7101_v27 = vld [vmem:[#allocation0 + $0x1170] sm:$0x3]  ;;  %12189 = vst [vmem:[%s17895_s1 + $0x454] sm:$0x3] %v7073_v36 }
 0x1a6   :  { %12191 = vst [vmem:[%s17895_s1 + $0x458] sm:$0x3] %v7087_v37  ;;  %12193 = vst [vmem:[%s17895_s1 + $0x45c] sm:$0x3] %v7101_v27  ;;  %v7339_v34 = vld [vmem:[#allocation0 + $0x1280] sm:$0x3] }
 0x1a7   :  { %v7353_v10 = vld [vmem:[#allocation0 + $0x1290] sm:$0x3]  ;;  %v7367_v11 = vld [vmem:[#allocation0 + $0x12a0] sm:$0x3]  ;;  %12227 = vst [vmem:[%s17895_s1 + $0x4a0] sm:$0x3] %v7339_v34 }
 0x1a8   :  { %12229 = vst [vmem:[%s17895_s1 + $0x4a4] sm:$0x3] %v7353_v10  ;;  %12231 = vst [vmem:[%s17895_s1 + $0x4a8] sm:$0x3] %v7367_v11  ;;  %v7381_v41 = vld [vmem:[#allocation0 + $0x12b0] sm:$0x3] }
 0x1a9   :  { %v7395_v48 = vld [vmem:[#allocation0 + $0x12c0] sm:$0x3]  ;;  %v7409_v49 = vld [vmem:[#allocation0 + $0x12d0] sm:$0x3]  ;;  %12233 = vst [vmem:[%s17895_s1 + $0x4ac] sm:$0x3] %v7381_v41 }
 0x1aa   :  { %1395 = vst.msk [vmem:[#allocation0 + $0x1a81] ss:$16 sm:$0x3] %vm3_vm0, %v1392_v35   ;;  %1397 = vst.msk [vmem:[#allocation0 + $0x1a81] ss:$16 sm:$0xc] %vm3_vm0, %v1392_v35  }
 0x1ab   :  { %1399 = vst.msk [vmem:[#allocation0 + $0x1a81] ss:$16 sm:$0x30] %vm3_vm0, %v1392_v35   ;;  %1401 = vst.msk [vmem:[#allocation0 + $0x1a81] ss:$16 sm:$0xc0] %vm3_vm0, %v1392_v35  }
 0x1ac   :  { %1382 = vst.msk [vmem:[#allocation0 + $0x1a01] ss:$16 sm:$0x3] %vm3_vm0, %v1379_v40   ;;  %1384 = vst.msk [vmem:[#allocation0 + $0x1a01] ss:$16 sm:$0xc] %vm3_vm0, %v1379_v40  }
 0x1ad   :  { %1386 = vst.msk [vmem:[#allocation0 + $0x1a01] ss:$16 sm:$0x30] %vm3_vm0, %v1379_v40   ;;  %1388 = vst.msk [vmem:[#allocation0 + $0x1a01] ss:$16 sm:$0xc0] %vm3_vm0, %v1379_v40  }
 0x1ae   :  { %12235 = vst [vmem:[%s17895_s1 + $0x4b0] sm:$0x3] %v7395_v48  ;;  %12237 = vst [vmem:[%s17895_s1 + $0x4b4] sm:$0x3] %v7409_v49  ;;  %v7423_v50 = vld [vmem:[#allocation0 + $0x12e0] sm:$0x3] }
 0x1af   :  { %v7437_v24 = vld [vmem:[#allocation0 + $0x12f0] sm:$0x3]  ;;  %v7227_v25 = vld [vmem:[#allocation0 + $0x1200] sm:$0x3]  ;;  %12239 = vst [vmem:[%s17895_s1 + $0x4b8] sm:$0x3] %v7423_v50 }
 0x1b0   :  { %12241 = vst [vmem:[%s17895_s1 + $0x4bc] sm:$0x3] %v7437_v24  ;;  %12211 = vst [vmem:[%s17895_s1 + $0x480] sm:$0x3] %v7227_v25  ;;  %v7241_v44 = vld [vmem:[#allocation0 + $0x1210] sm:$0x3]  ;;  %v1522_v24 = vpop.permute.xlu1 %1521   ;;  %v1509_v25 = vpop.permute.xlu0 %1508  }
 0x1b1   :  { %v7255_v45 = vld [vmem:[#allocation0 + $0x1220] sm:$0x3]  ;;  %v7269_v52 = vld [vmem:[#allocation0 + $0x1230] sm:$0x3]  ;;  %12213 = vst [vmem:[%s17895_s1 + $0x484] sm:$0x3] %v7241_v44 }
 0x1b2   :  { %12215 = vst [vmem:[%s17895_s1 + $0x488] sm:$0x3] %v7255_v45  ;;  %12217 = vst [vmem:[%s17895_s1 + $0x48c] sm:$0x3] %v7269_v52  ;;  %v7283_v53 = vld [vmem:[#allocation0 + $0x1240] sm:$0x3] }
 0x1b3   :  { %v7297_v0 = vld [vmem:[#allocation0 + $0x1250] sm:$0x3]  ;;  %v7311_v2 = vld [vmem:[#allocation0 + $0x1260] sm:$0x3]  ;;  %12219 = vst [vmem:[%s17895_s1 + $0x490] sm:$0x3] %v7283_v53 }
 0x1b4   :  { %12221 = vst [vmem:[%s17895_s1 + $0x494] sm:$0x3] %v7297_v0  ;;  %12223 = vst [vmem:[%s17895_s1 + $0x498] sm:$0x3] %v7311_v2  ;;  %v7325_v38 = vld [vmem:[#allocation0 + $0x1270] sm:$0x3] }
 0x1b5   :  { %v7563_v39 = vld [vmem:[#allocation0 + $0x1380] sm:$0x3]  ;;  %v7577_v6 = vld [vmem:[#allocation0 + $0x1390] sm:$0x3]  ;;  %12225 = vst [vmem:[%s17895_s1 + $0x49c] sm:$0x3] %v7325_v38 }
 0x1b6   :  { %1421 = vst.msk [vmem:[#allocation0 + $0x1b81] ss:$16 sm:$0x3] %vm3_vm0, %v1418_v14   ;;  %1423 = vst.msk [vmem:[#allocation0 + $0x1b81] ss:$16 sm:$0xc] %vm3_vm0, %v1418_v14  }
 0x1b7   :  { %1425 = vst.msk [vmem:[#allocation0 + $0x1b81] ss:$16 sm:$0x30] %vm3_vm0, %v1418_v14   ;;  %1427 = vst.msk [vmem:[#allocation0 + $0x1b81] ss:$16 sm:$0xc0] %vm3_vm0, %v1418_v14  }
 0x1b8   :  { %1408 = vst.msk [vmem:[#allocation0 + $0x1b01] ss:$16 sm:$0x3] %vm3_vm0, %v1405_v15   ;;  %1410 = vst.msk [vmem:[#allocation0 + $0x1b01] ss:$16 sm:$0xc] %vm3_vm0, %v1405_v15  }
 0x1b9   :  { %1412 = vst.msk [vmem:[#allocation0 + $0x1b01] ss:$16 sm:$0x30] %vm3_vm0, %v1405_v15   ;;  %1414 = vst.msk [vmem:[#allocation0 + $0x1b01] ss:$16 sm:$0xc0] %vm3_vm0, %v1405_v15  }
 0x1ba   :  { %12259 = vst [vmem:[%s17895_s1 + $0x4e0] sm:$0x3] %v7563_v39  ;;  %12261 = vst [vmem:[%s17895_s1 + $0x4e4] sm:$0x3] %v7577_v6  ;;  %v7591_v7 = vld [vmem:[#allocation0 + $0x13a0] sm:$0x3] }
 0x1bb   :  { %v7605_v51 = vld [vmem:[#allocation0 + $0x13b0] sm:$0x3]  ;;  %v7619_v54 = vld [vmem:[#allocation0 + $0x13c0] sm:$0x3]  ;;  %12263 = vst [vmem:[%s17895_s1 + $0x4e8] sm:$0x3] %v7591_v7 }
 0x1bc   :  { %12265 = vst [vmem:[%s17895_s1 + $0x4ec] sm:$0x3] %v7605_v51  ;;  %12267 = vst [vmem:[%s17895_s1 + $0x4f0] sm:$0x3] %v7619_v54  ;;  %v7633_v58 = vld [vmem:[#allocation0 + $0x13d0] sm:$0x3]  ;;  %v1547_v51 = vpop.permute.xlu1 %1546   ;;  %v1534_v54 = vpop.permute.xlu0 %1533  }
 0x1bd   :  { %v7647_v59 = vld [vmem:[#allocation0 + $0x13e0] sm:$0x3]  ;;  %v7661_v55 = vld [vmem:[#allocation0 + $0x13f0] sm:$0x3]  ;;  %12269 = vst [vmem:[%s17895_s1 + $0x4f4] sm:$0x3] %v7633_v58 }
 0x1be   :  { %12271 = vst [vmem:[%s17895_s1 + $0x4f8] sm:$0x3] %v7647_v59  ;;  %12273 = vst [vmem:[%s17895_s1 + $0x4fc] sm:$0x3] %v7661_v55  ;;  %v7451_v62 = vld [vmem:[#allocation0 + $0x1300] sm:$0x3] }
 0x1bf   :  { %v7465_v63 = vld [vmem:[#allocation0 + $0x1310] sm:$0x3]  ;;  %v7479_v8 = vld [vmem:[#allocation0 + $0x1320] sm:$0x3]  ;;  %12243 = vst [vmem:[%s17895_s1 + $0x4c0] sm:$0x3] %v7451_v62 }
 0x1c0   :  { %12245 = vst [vmem:[%s17895_s1 + $0x4c4] sm:$0x3] %v7465_v63  ;;  %12247 = vst [vmem:[%s17895_s1 + $0x4c8] sm:$0x3] %v7479_v8  ;;  %v7493_v20 = vld [vmem:[#allocation0 + $0x1330] sm:$0x3] }
 0x1c1   :  { %v7507_v21 = vld [vmem:[#allocation0 + $0x1340] sm:$0x3]  ;;  %v7521_v9 = vld [vmem:[#allocation0 + $0x1350] sm:$0x3]  ;;  %12249 = vst [vmem:[%s17895_s1 + $0x4cc] sm:$0x3] %v7493_v20 }
 0x1c2   :  { %1447 = vst.msk [vmem:[#allocation0 + $0x1c81] ss:$16 sm:$0x3] %vm3_vm0, %v1444_v56   ;;  %1449 = vst.msk [vmem:[#allocation0 + $0x1c81] ss:$16 sm:$0xc] %vm3_vm0, %v1444_v56  }
 0x1c3   :  { %1451 = vst.msk [vmem:[#allocation0 + $0x1c81] ss:$16 sm:$0x30] %vm3_vm0, %v1444_v56   ;;  %1453 = vst.msk [vmem:[#allocation0 + $0x1c81] ss:$16 sm:$0xc0] %vm3_vm0, %v1444_v56  }
 0x1c4   :  { %1434 = vst.msk [vmem:[#allocation0 + $0x1c01] ss:$16 sm:$0x3] %vm3_vm0, %v1431_v57   ;;  %1436 = vst.msk [vmem:[#allocation0 + $0x1c01] ss:$16 sm:$0xc] %vm3_vm0, %v1431_v57  }
 0x1c5   :  { %1438 = vst.msk [vmem:[#allocation0 + $0x1c01] ss:$16 sm:$0x30] %vm3_vm0, %v1431_v57   ;;  %1440 = vst.msk [vmem:[#allocation0 + $0x1c01] ss:$16 sm:$0xc0] %vm3_vm0, %v1431_v57  }
 0x1c6   :  { %12251 = vst [vmem:[%s17895_s1 + $0x4d0] sm:$0x3] %v7507_v21  ;;  %12253 = vst [vmem:[%s17895_s1 + $0x4d4] sm:$0x3] %v7521_v9  ;;  %v7535_v12 = vld [vmem:[#allocation0 + $0x1360] sm:$0x3] }
 0x1c7   :  { %v7549_v28 = vld [vmem:[#allocation0 + $0x1370] sm:$0x3]  ;;  %v7787_v29 = vld [vmem:[#allocation0 + $0x1480] sm:$0x3]  ;;  %12255 = vst [vmem:[%s17895_s1 + $0x4d8] sm:$0x3] %v7535_v12 }
 0x1c8   :  { %12257 = vst [vmem:[%s17895_s1 + $0x4dc] sm:$0x3] %v7549_v28  ;;  %12291 = vst [vmem:[%s17895_s1 + $0x520] sm:$0x3] %v7787_v29  ;;  %v7801_v42 = vld [vmem:[#allocation0 + $0x1490] sm:$0x3]  ;;  %v1573_v28 = vpop.permute.xlu1 %1572   ;;  %v1560_v29 = vpop.permute.xlu0 %1559  }
 0x1c9   :  { %v7815_v43 = vld [vmem:[#allocation0 + $0x14a0] sm:$0x3]  ;;  %v7829_v13 = vld [vmem:[#allocation0 + $0x14b0] sm:$0x3]  ;;  %12293 = vst [vmem:[%s17895_s1 + $0x524] sm:$0x3] %v7801_v42 }
 0x1ca   :  { %12295 = vst [vmem:[%s17895_s1 + $0x528] sm:$0x3] %v7815_v43  ;;  %12297 = vst [vmem:[%s17895_s1 + $0x52c] sm:$0x3] %v7829_v13  ;;  %v7843_v16 = vld [vmem:[#allocation0 + $0x14c0] sm:$0x3] }
 0x1cb   :  { %v7857_v1 = vld [vmem:[#allocation0 + $0x14d0] sm:$0x3]  ;;  %v7871_v3 = vld [vmem:[#allocation0 + $0x14e0] sm:$0x3]  ;;  %12299 = vst [vmem:[%s17895_s1 + $0x530] sm:$0x3] %v7843_v16 }
 0x1cc   :  { %12301 = vst [vmem:[%s17895_s1 + $0x534] sm:$0x3] %v7857_v1  ;;  %12303 = vst [vmem:[%s17895_s1 + $0x538] sm:$0x3] %v7871_v3  ;;  %v7885_v30 = vld [vmem:[#allocation0 + $0x14f0] sm:$0x3] }
 0x1cd   :  { %v7675_v31 = vld [vmem:[#allocation0 + $0x1400] sm:$0x3]  ;;  %v7689_v60 = vld [vmem:[#allocation0 + $0x1410] sm:$0x3]  ;;  %12305 = vst [vmem:[%s17895_s1 + $0x53c] sm:$0x3] %v7885_v30 }
 0x1ce   :  { %1473 = vst.msk [vmem:[#allocation0 + $0x1d81] ss:$16 sm:$0x3] %vm3_vm0, %v1470_v4   ;;  %1475 = vst.msk [vmem:[#allocation0 + $0x1d81] ss:$16 sm:$0xc] %vm3_vm0, %v1470_v4  }
 0x1cf   :  { %1477 = vst.msk [vmem:[#allocation0 + $0x1d81] ss:$16 sm:$0x30] %vm3_vm0, %v1470_v4   ;;  %1479 = vst.msk [vmem:[#allocation0 + $0x1d81] ss:$16 sm:$0xc0] %vm3_vm0, %v1470_v4  }
 0x1d0   :  { %1460 = vst.msk [vmem:[#allocation0 + $0x1d01] ss:$16 sm:$0x3] %vm3_vm0, %v1457_v5   ;;  %1462 = vst.msk [vmem:[#allocation0 + $0x1d01] ss:$16 sm:$0xc] %vm3_vm0, %v1457_v5  }
 0x1d1   :  { %1464 = vst.msk [vmem:[#allocation0 + $0x1d01] ss:$16 sm:$0x30] %vm3_vm0, %v1457_v5   ;;  %1466 = vst.msk [vmem:[#allocation0 + $0x1d01] ss:$16 sm:$0xc0] %vm3_vm0, %v1457_v5  }
 0x1d2   :  { %12275 = vst [vmem:[%s17895_s1 + $0x500] sm:$0x3] %v7675_v31  ;;  %12277 = vst [vmem:[%s17895_s1 + $0x504] sm:$0x3] %v7689_v60  ;;  %v7703_v61 = vld [vmem:[#allocation0 + $0x1420] sm:$0x3] }
 0x1d3   :  { %v7717_v18 = vld [vmem:[#allocation0 + $0x1430] sm:$0x3]  ;;  %v7731_v19 = vld [vmem:[#allocation0 + $0x1440] sm:$0x3]  ;;  %12279 = vst [vmem:[%s17895_s1 + $0x508] sm:$0x3] %v7703_v61 }
 0x1d4   :  { %12281 = vst [vmem:[%s17895_s1 + $0x50c] sm:$0x3] %v7717_v18  ;;  %12283 = vst [vmem:[%s17895_s1 + $0x510] sm:$0x3] %v7731_v19  ;;  %v7745_v17 = vld [vmem:[#allocation0 + $0x1450] sm:$0x3]  ;;  %v1599_v18 = vpop.permute.xlu1 %1598   ;;  %v1586_v19 = vpop.permute.xlu0 %1585  }
 0x1d5   :  { %v7759_v22 = vld [vmem:[#allocation0 + $0x1460] sm:$0x3]  ;;  %v7773_v23 = vld [vmem:[#allocation0 + $0x1470] sm:$0x3]  ;;  %12285 = vst [vmem:[%s17895_s1 + $0x514] sm:$0x3] %v7745_v17 }
 0x1d6   :  { %12287 = vst [vmem:[%s17895_s1 + $0x518] sm:$0x3] %v7759_v22  ;;  %12289 = vst [vmem:[%s17895_s1 + $0x51c] sm:$0x3] %v7773_v23  ;;  %v8011_v26 = vld [vmem:[#allocation0 + $0x1580] sm:$0x3] }
 0x1d7   :  { %v8025_v46 = vld [vmem:[#allocation0 + $0x1590] sm:$0x3]  ;;  %v8039_v47 = vld [vmem:[#allocation0 + $0x15a0] sm:$0x3]  ;;  %12323 = vst [vmem:[%s17895_s1 + $0x560] sm:$0x3] %v8011_v26 }
 0x1d8   :  { %12325 = vst [vmem:[%s17895_s1 + $0x564] sm:$0x3] %v8025_v46  ;;  %12327 = vst [vmem:[%s17895_s1 + $0x568] sm:$0x3] %v8039_v47  ;;  %v8053_v36 = vld [vmem:[#allocation0 + $0x15b0] sm:$0x3] }
 0x1d9   :  { %v8067_v37 = vld [vmem:[#allocation0 + $0x15c0] sm:$0x3]  ;;  %v8081_v27 = vld [vmem:[#allocation0 + $0x15d0] sm:$0x3]  ;;  %12329 = vst [vmem:[%s17895_s1 + $0x56c] sm:$0x3] %v8053_v36 }
 0x1da   :  { %1499 = vst.msk [vmem:[#allocation0 + $0x1e81] ss:$16 sm:$0x3] %vm3_vm0, %v1496_v32   ;;  %1501 = vst.msk [vmem:[#allocation0 + $0x1e81] ss:$16 sm:$0xc] %vm3_vm0, %v1496_v32  }
 0x1db   :  { %1503 = vst.msk [vmem:[#allocation0 + $0x1e81] ss:$16 sm:$0x30] %vm3_vm0, %v1496_v32   ;;  %1505 = vst.msk [vmem:[#allocation0 + $0x1e81] ss:$16 sm:$0xc0] %vm3_vm0, %v1496_v32  }
 0x1dc   :  { %1486 = vst.msk [vmem:[#allocation0 + $0x1e01] ss:$16 sm:$0x3] %vm3_vm0, %v1483_v33   ;;  %1488 = vst.msk [vmem:[#allocation0 + $0x1e01] ss:$16 sm:$0xc] %vm3_vm0, %v1483_v33  }
 0x1dd   :  { %1490 = vst.msk [vmem:[#allocation0 + $0x1e01] ss:$16 sm:$0x30] %vm3_vm0, %v1483_v33   ;;  %1492 = vst.msk [vmem:[#allocation0 + $0x1e01] ss:$16 sm:$0xc0] %vm3_vm0, %v1483_v33  }
 0x1de   :  { %12331 = vst [vmem:[%s17895_s1 + $0x570] sm:$0x3] %v8067_v37  ;;  %12333 = vst [vmem:[%s17895_s1 + $0x574] sm:$0x3] %v8081_v27  ;;  %v8095_v34 = vld [vmem:[#allocation0 + $0x15e0] sm:$0x3] }
 0x1df   :  { %v8109_v10 = vld [vmem:[#allocation0 + $0x15f0] sm:$0x3]  ;;  %v7899_v11 = vld [vmem:[#allocation0 + $0x1500] sm:$0x3]  ;;  %12335 = vst [vmem:[%s17895_s1 + $0x578] sm:$0x3] %v8095_v34 }
 0x1e0   :  { %12337 = vst [vmem:[%s17895_s1 + $0x57c] sm:$0x3] %v8109_v10  ;;  %12307 = vst [vmem:[%s17895_s1 + $0x540] sm:$0x3] %v7899_v11  ;;  %v7913_v35 = vld [vmem:[#allocation0 + $0x1510] sm:$0x3]  ;;  %v1625_v10 = vpop.permute.xlu1 %1624   ;;  %v1612_v11 = vpop.permute.xlu0 %1611  }
 0x1e1   :  { %v7927_v40 = vld [vmem:[#allocation0 + $0x1520] sm:$0x3]  ;;  %v7941_v41 = vld [vmem:[#allocation0 + $0x1530] sm:$0x3]  ;;  %12309 = vst [vmem:[%s17895_s1 + $0x544] sm:$0x3] %v7913_v35 }
 0x1e2   :  { %12311 = vst [vmem:[%s17895_s1 + $0x548] sm:$0x3] %v7927_v40  ;;  %12313 = vst [vmem:[%s17895_s1 + $0x54c] sm:$0x3] %v7941_v41  ;;  %v7955_v48 = vld [vmem:[#allocation0 + $0x1540] sm:$0x3] }
 0x1e3   :  { %v7969_v49 = vld [vmem:[#allocation0 + $0x1550] sm:$0x3]  ;;  %v7983_v50 = vld [vmem:[#allocation0 + $0x1560] sm:$0x3]  ;;  %12315 = vst [vmem:[%s17895_s1 + $0x550] sm:$0x3] %v7955_v48 }
 0x1e4   :  { %12317 = vst [vmem:[%s17895_s1 + $0x554] sm:$0x3] %v7969_v49  ;;  %12319 = vst [vmem:[%s17895_s1 + $0x558] sm:$0x3] %v7983_v50  ;;  %v7997_v44 = vld [vmem:[#allocation0 + $0x1570] sm:$0x3] }
 0x1e5   :  { %v8235_v45 = vld [vmem:[#allocation0 + $0x1680] sm:$0x3]  ;;  %v8249_v52 = vld [vmem:[#allocation0 + $0x1690] sm:$0x3]  ;;  %12321 = vst [vmem:[%s17895_s1 + $0x55c] sm:$0x3] %v7997_v44 }
 0x1e6   :  { %1525 = vst.msk [vmem:[#allocation0 + $0x1f81] ss:$16 sm:$0x3] %vm3_vm0, %v1522_v24   ;;  %1527 = vst.msk [vmem:[#allocation0 + $0x1f81] ss:$16 sm:$0xc] %vm3_vm0, %v1522_v24  }
 0x1e7   :  { %1529 = vst.msk [vmem:[#allocation0 + $0x1f81] ss:$16 sm:$0x30] %vm3_vm0, %v1522_v24   ;;  %1531 = vst.msk [vmem:[#allocation0 + $0x1f81] ss:$16 sm:$0xc0] %vm3_vm0, %v1522_v24  }
 0x1e8   :  { %1512 = vst.msk [vmem:[#allocation0 + $0x1f01] ss:$16 sm:$0x3] %vm3_vm0, %v1509_v25   ;;  %1514 = vst.msk [vmem:[#allocation0 + $0x1f01] ss:$16 sm:$0xc] %vm3_vm0, %v1509_v25  }
 0x1e9   :  { %1516 = vst.msk [vmem:[#allocation0 + $0x1f01] ss:$16 sm:$0x30] %vm3_vm0, %v1509_v25   ;;  %1518 = vst.msk [vmem:[#allocation0 + $0x1f01] ss:$16 sm:$0xc0] %vm3_vm0, %v1509_v25  }
 0x1ea   :  { %12355 = vst [vmem:[%s17895_s1 + $0x5a0] sm:$0x3] %v8235_v45  ;;  %12357 = vst [vmem:[%s17895_s1 + $0x5a4] sm:$0x3] %v8249_v52  ;;  %v8263_v53 = vld [vmem:[#allocation0 + $0x16a0] sm:$0x3] }
 0x1eb   :  { %v8277_v0 = vld [vmem:[#allocation0 + $0x16b0] sm:$0x3]  ;;  %v8291_v2 = vld [vmem:[#allocation0 + $0x16c0] sm:$0x3]  ;;  %12359 = vst [vmem:[%s17895_s1 + $0x5a8] sm:$0x3] %v8263_v53 }
 0x1ec   :  { %12361 = vst [vmem:[%s17895_s1 + $0x5ac] sm:$0x3] %v8277_v0  ;;  %12363 = vst [vmem:[%s17895_s1 + $0x5b0] sm:$0x3] %v8291_v2  ;;  %v8305_v14 = vld [vmem:[#allocation0 + $0x16d0] sm:$0x3]  ;;  %v1651_v0 = vpop.permute.xlu1 %1650   ;;  %v1638_v2 = vpop.permute.xlu0 %1637  }
 0x1ed   :  { %v8319_v15 = vld [vmem:[#allocation0 + $0x16e0] sm:$0x3]  ;;  %v8333_v38 = vld [vmem:[#allocation0 + $0x16f0] sm:$0x3]  ;;  %12365 = vst [vmem:[%s17895_s1 + $0x5b4] sm:$0x3] %v8305_v14 }
 0x1ee   :  { %12367 = vst [vmem:[%s17895_s1 + $0x5b8] sm:$0x3] %v8319_v15  ;;  %12369 = vst [vmem:[%s17895_s1 + $0x5bc] sm:$0x3] %v8333_v38  ;;  %v8123_v39 = vld [vmem:[#allocation0 + $0x1600] sm:$0x3] }
 0x1ef   :  { %v8137_v6 = vld [vmem:[#allocation0 + $0x1610] sm:$0x3]  ;;  %v8151_v7 = vld [vmem:[#allocation0 + $0x1620] sm:$0x3]  ;;  %12339 = vst [vmem:[%s17895_s1 + $0x580] sm:$0x3] %v8123_v39 }
 0x1f0   :  { %12341 = vst [vmem:[%s17895_s1 + $0x584] sm:$0x3] %v8137_v6  ;;  %12343 = vst [vmem:[%s17895_s1 + $0x588] sm:$0x3] %v8151_v7  ;;  %v8165_v58 = vld [vmem:[#allocation0 + $0x1630] sm:$0x3]  ;;  %v1677_v39 = vpop.permute.xlu1 %1676   ;;  %v1664_v6 = vpop.permute.xlu0 %1663  }
 0x1f1   :  { %v8179_v59 = vld [vmem:[#allocation0 + $0x1640] sm:$0x3]  ;;  %v8193_v55 = vld [vmem:[#allocation0 + $0x1650] sm:$0x3]  ;;  %12345 = vst [vmem:[%s17895_s1 + $0x58c] sm:$0x3] %v8165_v58 }
 0x1f2   :  { %1550 = vst.msk [vmem:[#allocation0 + $0x88] ss:$16 sm:$0x3] %vm3_vm0, %v1547_v51   ;;  %1552 = vst.msk [vmem:[#allocation0 + $0x88] ss:$16 sm:$0xc] %vm3_vm0, %v1547_v51  }
 0x1f3   :  { %1554 = vst.msk [vmem:[#allocation0 + $0x88] ss:$16 sm:$0x30] %vm3_vm0, %v1547_v51   ;;  %1556 = vst.msk [vmem:[#allocation0 + $0x88] ss:$16 sm:$0xc0] %vm3_vm0, %v1547_v51  }
 0x1f4   :  { %1537 = vst.msk [vmem:[#allocation0 + $0x8] ss:$16 sm:$0x3] %vm3_vm0, %v1534_v54   ;;  %1539 = vst.msk [vmem:[#allocation0 + $0x8] ss:$16 sm:$0xc] %vm3_vm0, %v1534_v54  }
 0x1f5   :  { %1541 = vst.msk [vmem:[#allocation0 + $0x8] ss:$16 sm:$0x30] %vm3_vm0, %v1534_v54   ;;  %1543 = vst.msk [vmem:[#allocation0 + $0x8] ss:$16 sm:$0xc0] %vm3_vm0, %v1534_v54  }
 0x1f6   :  { %12347 = vst [vmem:[%s17895_s1 + $0x590] sm:$0x3] %v8179_v59  ;;  %12349 = vst [vmem:[%s17895_s1 + $0x594] sm:$0x3] %v8193_v55  ;;  %v8207_v62 = vld [vmem:[#allocation0 + $0x1660] sm:$0x3] }
 0x1f7   :  { %v8221_v63 = vld [vmem:[#allocation0 + $0x1670] sm:$0x3]  ;;  %v8459_v8 = vld [vmem:[#allocation0 + $0x1780] sm:$0x3]  ;;  %12351 = vst [vmem:[%s17895_s1 + $0x598] sm:$0x3] %v8207_v62 }
 0x1f8   :  { %12353 = vst [vmem:[%s17895_s1 + $0x59c] sm:$0x3] %v8221_v63  ;;  %12387 = vst [vmem:[%s17895_s1 + $0x5e0] sm:$0x3] %v8459_v8  ;;  %v8473_v56 = vld [vmem:[#allocation0 + $0x1790] sm:$0x3] }
 0x1f9   :  { %v8487_v57 = vld [vmem:[#allocation0 + $0x17a0] sm:$0x3]  ;;  %v8501_v20 = vld [vmem:[#allocation0 + $0x17b0] sm:$0x3]  ;;  %12389 = vst [vmem:[%s17895_s1 + $0x5e4] sm:$0x3] %v8473_v56 }
 0x1fa   :  { %12391 = vst [vmem:[%s17895_s1 + $0x5e8] sm:$0x3] %v8487_v57  ;;  %12393 = vst [vmem:[%s17895_s1 + $0x5ec] sm:$0x3] %v8501_v20  ;;  %v8515_v21 = vld [vmem:[#allocation0 + $0x17c0] sm:$0x3] }
 0x1fb   :  { %v8529_v9 = vld [vmem:[#allocation0 + $0x17d0] sm:$0x3]  ;;  %v8543_v12 = vld [vmem:[#allocation0 + $0x17e0] sm:$0x3]  ;;  %12395 = vst [vmem:[%s17895_s1 + $0x5f0] sm:$0x3] %v8515_v21  ;;  %v1703_v21 = vpop.permute.xlu1 %1702  }
 0x1fc   :  { %12397 = vst [vmem:[%s17895_s1 + $0x5f4] sm:$0x3] %v8529_v9  ;;  %12399 = vst [vmem:[%s17895_s1 + $0x5f8] sm:$0x3] %v8543_v12  ;;  %v8557_v42 = vld [vmem:[#allocation0 + $0x17f0] sm:$0x3]  ;;  %v1690_v9 = vpop.permute.xlu0 %1689  }
 0x1fd   :  { %v8347_v43 = vld [vmem:[#allocation0 + $0x1700] sm:$0x3]  ;;  %v8361_v13 = vld [vmem:[#allocation0 + $0x1710] sm:$0x3]  ;;  %12401 = vst [vmem:[%s17895_s1 + $0x5fc] sm:$0x3] %v8557_v42 }
 0x1fe   :  { %1576 = vst.msk [vmem:[#allocation0 + $0x188] ss:$16 sm:$0x3] %vm3_vm0, %v1573_v28   ;;  %1578 = vst.msk [vmem:[#allocation0 + $0x188] ss:$16 sm:$0xc] %vm3_vm0, %v1573_v28  }
 0x1ff   :  { %1580 = vst.msk [vmem:[#allocation0 + $0x188] ss:$16 sm:$0x30] %vm3_vm0, %v1573_v28   ;;  %1582 = vst.msk [vmem:[#allocation0 + $0x188] ss:$16 sm:$0xc0] %vm3_vm0, %v1573_v28  }
 0x200   :  { %1563 = vst.msk [vmem:[#allocation0 + $0x108] ss:$16 sm:$0x3] %vm3_vm0, %v1560_v29   ;;  %1565 = vst.msk [vmem:[#allocation0 + $0x108] ss:$16 sm:$0xc] %vm3_vm0, %v1560_v29  }
 0x201   :  { %1567 = vst.msk [vmem:[#allocation0 + $0x108] ss:$16 sm:$0x30] %vm3_vm0, %v1560_v29   ;;  %1569 = vst.msk [vmem:[#allocation0 + $0x108] ss:$16 sm:$0xc0] %vm3_vm0, %v1560_v29  }
 0x202   :  { %12371 = vst [vmem:[%s17895_s1 + $0x5c0] sm:$0x3] %v8347_v43  ;;  %12373 = vst [vmem:[%s17895_s1 + $0x5c4] sm:$0x3] %v8361_v13  ;;  %v8375_v16 = vld [vmem:[#allocation0 + $0x1720] sm:$0x3] }
 0x203   :  { %v8389_v1 = vld [vmem:[#allocation0 + $0x1730] sm:$0x3]  ;;  %v8403_v3 = vld [vmem:[#allocation0 + $0x1740] sm:$0x3]  ;;  %12375 = vst [vmem:[%s17895_s1 + $0x5c8] sm:$0x3] %v8375_v16 }
 0x204   :  { %12377 = vst [vmem:[%s17895_s1 + $0x5cc] sm:$0x3] %v8389_v1  ;;  %12379 = vst [vmem:[%s17895_s1 + $0x5d0] sm:$0x3] %v8403_v3  ;;  %v8417_v4 = vld [vmem:[#allocation0 + $0x1750] sm:$0x3] }
 0x205   :  { %v8431_v5 = vld [vmem:[#allocation0 + $0x1760] sm:$0x3]  ;;  %v8445_v30 = vld [vmem:[#allocation0 + $0x1770] sm:$0x3]  ;;  %12381 = vst [vmem:[%s17895_s1 + $0x5d4] sm:$0x3] %v8417_v4 }
 0x206   :  { %12383 = vst [vmem:[%s17895_s1 + $0x5d8] sm:$0x3] %v8431_v5  ;;  %12385 = vst [vmem:[%s17895_s1 + $0x5dc] sm:$0x3] %v8445_v30  ;;  %v8683_v31 = vld [vmem:[#allocation0 + $0x1880] sm:$0x3] }
 0x207   :  { %v8697_v60 = vld [vmem:[#allocation0 + $0x1890] sm:$0x3]  ;;  %v8711_v61 = vld [vmem:[#allocation0 + $0x18a0] sm:$0x3]  ;;  %12419 = vst [vmem:[%s17895_s1 + $0x620] sm:$0x3] %v8683_v31  ;;  %v1729_v31 = vpop.permute.xlu1 %1728  }
 0x208   :  { %12421 = vst [vmem:[%s17895_s1 + $0x624] sm:$0x3] %v8697_v60  ;;  %12423 = vst [vmem:[%s17895_s1 + $0x628] sm:$0x3] %v8711_v61  ;;  %v8725_v17 = vld [vmem:[#allocation0 + $0x18b0] sm:$0x3]  ;;  %v1716_v60 = vpop.permute.xlu0 %1715  }
 0x209   :  { %v8739_v22 = vld [vmem:[#allocation0 + $0x18c0] sm:$0x3]  ;;  %v8753_v23 = vld [vmem:[#allocation0 + $0x18d0] sm:$0x3]  ;;  %12425 = vst [vmem:[%s17895_s1 + $0x62c] sm:$0x3] %v8725_v17 }
 0x20a   :  { %1602 = vst.msk [vmem:[#allocation0 + $0x288] ss:$16 sm:$0x3] %vm3_vm0, %v1599_v18   ;;  %1604 = vst.msk [vmem:[#allocation0 + $0x288] ss:$16 sm:$0xc] %vm3_vm0, %v1599_v18  }
 0x20b   :  { %1606 = vst.msk [vmem:[#allocation0 + $0x288] ss:$16 sm:$0x30] %vm3_vm0, %v1599_v18   ;;  %1608 = vst.msk [vmem:[#allocation0 + $0x288] ss:$16 sm:$0xc0] %vm3_vm0, %v1599_v18  }
 0x20c   :  { %1589 = vst.msk [vmem:[#allocation0 + $0x208] ss:$16 sm:$0x3] %vm3_vm0, %v1586_v19   ;;  %1591 = vst.msk [vmem:[#allocation0 + $0x208] ss:$16 sm:$0xc] %vm3_vm0, %v1586_v19  }
 0x20d   :  { %1593 = vst.msk [vmem:[#allocation0 + $0x208] ss:$16 sm:$0x30] %vm3_vm0, %v1586_v19   ;;  %1595 = vst.msk [vmem:[#allocation0 + $0x208] ss:$16 sm:$0xc0] %vm3_vm0, %v1586_v19  }
 0x20e   :  { %12427 = vst [vmem:[%s17895_s1 + $0x630] sm:$0x3] %v8739_v22  ;;  %12429 = vst [vmem:[%s17895_s1 + $0x634] sm:$0x3] %v8753_v23  ;;  %v8767_v26 = vld [vmem:[#allocation0 + $0x18e0] sm:$0x3] }
 0x20f   :  { %v8781_v46 = vld [vmem:[#allocation0 + $0x18f0] sm:$0x3]  ;;  %v8571_v47 = vld [vmem:[#allocation0 + $0x1800] sm:$0x3]  ;;  %12431 = vst [vmem:[%s17895_s1 + $0x638] sm:$0x3] %v8767_v26 }
 0x210   :  { %12433 = vst [vmem:[%s17895_s1 + $0x63c] sm:$0x3] %v8781_v46  ;;  %12403 = vst [vmem:[%s17895_s1 + $0x600] sm:$0x3] %v8571_v47  ;;  %v8585_v32 = vld [vmem:[#allocation0 + $0x1810] sm:$0x3] }
 0x211   :  { %v8599_v33 = vld [vmem:[#allocation0 + $0x1820] sm:$0x3]  ;;  %v8613_v36 = vld [vmem:[#allocation0 + $0x1830] sm:$0x3]  ;;  %12405 = vst [vmem:[%s17895_s1 + $0x604] sm:$0x3] %v8585_v32 }
 0x212   :  { %12407 = vst [vmem:[%s17895_s1 + $0x608] sm:$0x3] %v8599_v33  ;;  %12409 = vst [vmem:[%s17895_s1 + $0x60c] sm:$0x3] %v8613_v36  ;;  %v8627_v37 = vld [vmem:[#allocation0 + $0x1840] sm:$0x3] }
 0x213   :  { %v8641_v27 = vld [vmem:[#allocation0 + $0x1850] sm:$0x3]  ;;  %v8655_v34 = vld [vmem:[#allocation0 + $0x1860] sm:$0x3]  ;;  %12411 = vst [vmem:[%s17895_s1 + $0x610] sm:$0x3] %v8627_v37  ;;  %v1755_v37 = vpop.permute.xlu1 %1754  }
 0x214   :  { %12413 = vst [vmem:[%s17895_s1 + $0x614] sm:$0x3] %v8641_v27  ;;  %12415 = vst [vmem:[%s17895_s1 + $0x618] sm:$0x3] %v8655_v34  ;;  %v8669_v35 = vld [vmem:[#allocation0 + $0x1870] sm:$0x3]  ;;  %v1742_v27 = vpop.permute.xlu0 %1741  }
 0x215   :  { %v11434_v40 = vld [vmem:[%s17894_s0 + $0x198] sm:$0xff]   ;;  %v11433_v41 = vld [vmem:[%s17894_s0 + $0x190] sm:$0xff]   ;;  %1628 = vst.msk [vmem:[#allocation0 + $0x388] ss:$16 sm:$0x3] %vm3_vm0, %v1625_v10   ;;  %v11436_v48 = vld [vmem:[%s17894_s0 + $0x1a8] sm:$0xff]  }
 0x216   :  { %1630 = vst.msk [vmem:[#allocation0 + $0x388] ss:$16 sm:$0xc] %vm3_vm0, %v1625_v10   ;;  %1632 = vst.msk [vmem:[#allocation0 + $0x388] ss:$16 sm:$0x30] %vm3_vm0, %v1625_v10   ;;  %2196 = vrot.lane.b32.xlu1 %v11434_v40, %s12663_s14  ;;  %2183 = vrot.lane.b32.xlu0 %v11433_v41, %s12663_s14 }
 0x217   :  { %1634 = vst.msk [vmem:[#allocation0 + $0x388] ss:$16 sm:$0xc0] %vm3_vm0, %v1625_v10   ;;  %1615 = vst.msk [vmem:[#allocation0 + $0x308] ss:$16 sm:$0x3] %vm3_vm0, %v1612_v11  }
 0x218   :  { %1617 = vst.msk [vmem:[#allocation0 + $0x308] ss:$16 sm:$0xc] %vm3_vm0, %v1612_v11   ;;  %1619 = vst.msk [vmem:[#allocation0 + $0x308] ss:$16 sm:$0x30] %vm3_vm0, %v1612_v11  }
 0x219   :  { %1621 = vst.msk [vmem:[#allocation0 + $0x308] ss:$16 sm:$0xc0] %vm3_vm0, %v1612_v11   ;;  %12417 = vst [vmem:[%s17895_s1 + $0x61c] sm:$0x3] %v8669_v35  ;;  %v15117_v49 = vld [vmem:[%s17894_s0 + $0x1a0] sm:$0xff]  }
 0x21a   :  { %562 = vst.msk [vmem:[#allocation0 + $0x1980] ss:$16 sm:$0x3] %vm3_vm0, %v11434_v40   ;;  %564 = vst.msk [vmem:[#allocation0 + $0x1980] ss:$16 sm:$0xc] %vm3_vm0, %v11434_v40   ;;  %2222 = vrot.lane.b32.xlu1 %v11436_v48, %s12663_s14  ;;  %2209 = vrot.lane.b32.xlu0 %v15117_v49, %s12663_s14 }
 0x21b   :  { %566 = vst.msk [vmem:[#allocation0 + $0x1980] ss:$16 sm:$0x30] %vm3_vm0, %v11434_v40   ;;  %568 = vst.msk [vmem:[#allocation0 + $0x1980] ss:$16 sm:$0xc0] %vm3_vm0, %v11434_v40  }
 0x21c   :  { %551 = vst.msk [vmem:[#allocation0 + $0x1900] ss:$16 sm:$0x3] %vm3_vm0, %v11433_v41   ;;  %553 = vst.msk [vmem:[#allocation0 + $0x1900] ss:$16 sm:$0xc] %vm3_vm0, %v11433_v41  }
 0x21d   :  { %555 = vst.msk [vmem:[#allocation0 + $0x1900] ss:$16 sm:$0x30] %vm3_vm0, %v11433_v41   ;;  %557 = vst.msk [vmem:[#allocation0 + $0x1900] ss:$16 sm:$0xc0] %vm3_vm0, %v11433_v41  }
 0x21e   :  { %v15122_v50 = vld [vmem:[%s17894_s0 + $0x1b8] sm:$0xff]   ;;  %584 = vst.msk [vmem:[#allocation0 + $0x1a80] ss:$16 sm:$0x3] %vm3_vm0, %v11436_v48   ;;  %v15148_v24 = vld [vmem:[%s17894_s0 + $0x1b0] sm:$0xff]   ;;  %v15153_v25 = vld [vmem:[%s17894_s0 + $0x1c8] sm:$0xff]  }
 0x21f   :  { %586 = vst.msk [vmem:[#allocation0 + $0x1a80] ss:$16 sm:$0xc] %vm3_vm0, %v11436_v48   ;;  %588 = vst.msk [vmem:[#allocation0 + $0x1a80] ss:$16 sm:$0x30] %vm3_vm0, %v11436_v48   ;;  %2248 = vrot.lane.b32.xlu1 %v15122_v50, %s12663_s14  ;;  %2235 = vrot.lane.b32.xlu0 %v15148_v24, %s12663_s14 }
 0x220   :  { %590 = vst.msk [vmem:[#allocation0 + $0x1a80] ss:$16 sm:$0xc0] %vm3_vm0, %v11436_v48   ;;  %573 = vst.msk [vmem:[#allocation0 + $0x1a00] ss:$16 sm:$0x3] %vm3_vm0, %v15117_v49  }
 0x221   :  { %575 = vst.msk [vmem:[#allocation0 + $0x1a00] ss:$16 sm:$0xc] %vm3_vm0, %v15117_v49   ;;  %577 = vst.msk [vmem:[#allocation0 + $0x1a00] ss:$16 sm:$0x30] %vm3_vm0, %v15117_v49  }
 0x222   :  { %579 = vst.msk [vmem:[#allocation0 + $0x1a00] ss:$16 sm:$0xc0] %vm3_vm0, %v15117_v49   ;;  %606 = vst.msk [vmem:[#allocation0 + $0x1b80] ss:$16 sm:$0x3] %vm3_vm0, %v15122_v50  }
 0x223   :  { %608 = vst.msk [vmem:[#allocation0 + $0x1b80] ss:$16 sm:$0xc] %vm3_vm0, %v15122_v50   ;;  %610 = vst.msk [vmem:[#allocation0 + $0x1b80] ss:$16 sm:$0x30] %vm3_vm0, %v15122_v50   ;;  %2274 = vrot.lane.b32.xlu1 %v15153_v25, %s12663_s14 }
 0x224   :  { %612 = vst.msk [vmem:[#allocation0 + $0x1b80] ss:$16 sm:$0xc0] %vm3_vm0, %v15122_v50   ;;  %v15158_v44 = vld [vmem:[%s17894_s0 + $0x1c0] sm:$0xff]   ;;  %v15188_v45 = vld [vmem:[%s17894_s0 + $0x1d8] sm:$0xff]   ;;  %v15193_v52 = vld [vmem:[%s17894_s0 + $0x1d0] sm:$0xff]  }
 0x225   :  { %595 = vst.msk [vmem:[#allocation0 + $0x1b00] ss:$16 sm:$0x3] %vm3_vm0, %v15148_v24   ;;  %597 = vst.msk [vmem:[#allocation0 + $0x1b00] ss:$16 sm:$0xc] %vm3_vm0, %v15148_v24   ;;  %2261 = vrot.lane.b32.xlu0 %v15158_v44, %s12663_s14 }
 0x226   :  { %599 = vst.msk [vmem:[#allocation0 + $0x1b00] ss:$16 sm:$0x30] %vm3_vm0, %v15148_v24   ;;  %601 = vst.msk [vmem:[#allocation0 + $0x1b00] ss:$16 sm:$0xc0] %vm3_vm0, %v15148_v24  }
 0x227   :  { %628 = vst.msk [vmem:[#allocation0 + $0x1c80] ss:$16 sm:$0x3] %vm3_vm0, %v15153_v25   ;;  %630 = vst.msk [vmem:[#allocation0 + $0x1c80] ss:$16 sm:$0xc] %vm3_vm0, %v15153_v25   ;;  %2300 = vrot.lane.b32.xlu1 %v15188_v45, %s12663_s14 }
 0x228   :  { %632 = vst.msk [vmem:[#allocation0 + $0x1c80] ss:$16 sm:$0x30] %vm3_vm0, %v15153_v25   ;;  %634 = vst.msk [vmem:[#allocation0 + $0x1c80] ss:$16 sm:$0xc0] %vm3_vm0, %v15153_v25  }
 0x229   :  { %617 = vst.msk [vmem:[#allocation0 + $0x1c00] ss:$16 sm:$0x3] %vm3_vm0, %v15158_v44   ;;  %619 = vst.msk [vmem:[#allocation0 + $0x1c00] ss:$16 sm:$0xc] %vm3_vm0, %v15158_v44   ;;  %2287 = vrot.lane.b32.xlu0 %v15193_v52, %s12663_s14 }
 0x22a   :  { %621 = vst.msk [vmem:[#allocation0 + $0x1c00] ss:$16 sm:$0x30] %vm3_vm0, %v15158_v44   ;;  %623 = vst.msk [vmem:[#allocation0 + $0x1c00] ss:$16 sm:$0xc0] %vm3_vm0, %v15158_v44  }
 0x22b   :  { %v15198_v53 = vld [vmem:[%s17894_s0 + $0x1e8] sm:$0xff]   ;;  %650 = vst.msk [vmem:[#allocation0 + $0x1d80] ss:$16 sm:$0x3] %vm3_vm0, %v15188_v45   ;;  %v15227_v14 = vld [vmem:[%s17894_s0 + $0x1e0] sm:$0xff]   ;;  %v15232_v15 = vld [vmem:[%s17894_s0 + $0x1f8] sm:$0xff]  }
 0x22c   :  { %652 = vst.msk [vmem:[#allocation0 + $0x1d80] ss:$16 sm:$0xc] %vm3_vm0, %v15188_v45   ;;  %654 = vst.msk [vmem:[#allocation0 + $0x1d80] ss:$16 sm:$0x30] %vm3_vm0, %v15188_v45   ;;  %2326 = vrot.lane.b32.xlu1 %v15198_v53, %s12663_s14 }
 0x22d   :  { %656 = vst.msk [vmem:[#allocation0 + $0x1d80] ss:$16 sm:$0xc0] %vm3_vm0, %v15188_v45   ;;  %639 = vst.msk [vmem:[#allocation0 + $0x1d00] ss:$16 sm:$0x3] %vm3_vm0, %v15193_v52   ;;  %2313 = vrot.lane.b32.xlu0 %v15227_v14, %s12663_s14  ;;  %v1781_v45 = vpop.permute.xlu1 %1780  }
 0x22e   :  { %641 = vst.msk [vmem:[#allocation0 + $0x1d00] ss:$16 sm:$0xc] %vm3_vm0, %v15193_v52   ;;  %643 = vst.msk [vmem:[#allocation0 + $0x1d00] ss:$16 sm:$0x30] %vm3_vm0, %v15193_v52  }
 0x22f   :  { %645 = vst.msk [vmem:[#allocation0 + $0x1d00] ss:$16 sm:$0xc0] %vm3_vm0, %v15193_v52   ;;  %672 = vst.msk [vmem:[#allocation0 + $0x1e80] ss:$16 sm:$0x3] %vm3_vm0, %v15198_v53   ;;  %v1768_v52 = vpop.permute.xlu0 %1767  }
 0x230   :  { %674 = vst.msk [vmem:[#allocation0 + $0x1e80] ss:$16 sm:$0xc] %vm3_vm0, %v15198_v53   ;;  %676 = vst.msk [vmem:[#allocation0 + $0x1e80] ss:$16 sm:$0x30] %vm3_vm0, %v15198_v53   ;;  %2352 = vrot.lane.b32.xlu1 %v15232_v15, %s12663_s14 }
 0x231   :  { %678 = vst.msk [vmem:[#allocation0 + $0x1e80] ss:$16 sm:$0xc0] %vm3_vm0, %v15198_v53   ;;  %v15237_v38 = vld [vmem:[%s17894_s0 + $0x1f0] sm:$0xff]   ;;  %v8907_v7 = vld [vmem:[#allocation0 + $0x1980] sm:$0x3] }
 0x232   :  { %1654 = vst.msk [vmem:[#allocation0 + $0x488] ss:$16 sm:$0x3] %vm3_vm0, %v1651_v0   ;;  %1656 = vst.msk [vmem:[#allocation0 + $0x488] ss:$16 sm:$0xc] %vm3_vm0, %v1651_v0   ;;  %2339 = vrot.lane.b32.xlu0 %v15237_v38, %s12663_s14 }
 0x233   :  { %1658 = vst.msk [vmem:[#allocation0 + $0x488] ss:$16 sm:$0x30] %vm3_vm0, %v1651_v0   ;;  %1660 = vst.msk [vmem:[#allocation0 + $0x488] ss:$16 sm:$0xc0] %vm3_vm0, %v1651_v0  }
 0x234   :  { %1641 = vst.msk [vmem:[#allocation0 + $0x408] ss:$16 sm:$0x3] %vm3_vm0, %v1638_v2   ;;  %1643 = vst.msk [vmem:[#allocation0 + $0x408] ss:$16 sm:$0xc] %vm3_vm0, %v1638_v2  }
 0x235   :  { %1645 = vst.msk [vmem:[#allocation0 + $0x408] ss:$16 sm:$0x30] %vm3_vm0, %v1638_v2   ;;  %1647 = vst.msk [vmem:[#allocation0 + $0x408] ss:$16 sm:$0xc0] %vm3_vm0, %v1638_v2  }
 0x236   :  { %661 = vst.msk [vmem:[#allocation0 + $0x1e00] ss:$16 sm:$0x3] %vm3_vm0, %v15227_v14   ;;  %663 = vst.msk [vmem:[#allocation0 + $0x1e00] ss:$16 sm:$0xc] %vm3_vm0, %v15227_v14  }
 0x237   :  { %665 = vst.msk [vmem:[#allocation0 + $0x1e00] ss:$16 sm:$0x30] %vm3_vm0, %v15227_v14   ;;  %667 = vst.msk [vmem:[#allocation0 + $0x1e00] ss:$16 sm:$0xc0] %vm3_vm0, %v15227_v14  }
 0x238   :  { %694 = vst.msk [vmem:[#allocation0 + $0x1f80] ss:$16 sm:$0x3] %vm3_vm0, %v15232_v15   ;;  %696 = vst.msk [vmem:[#allocation0 + $0x1f80] ss:$16 sm:$0xc] %vm3_vm0, %v15232_v15  }
 0x239   :  { %698 = vst.msk [vmem:[#allocation0 + $0x1f80] ss:$16 sm:$0x30] %vm3_vm0, %v15232_v15   ;;  %700 = vst.msk [vmem:[#allocation0 + $0x1f80] ss:$16 sm:$0xc0] %vm3_vm0, %v15232_v15  }
 0x23a   :  { %683 = vst.msk [vmem:[#allocation0 + $0x1f00] ss:$16 sm:$0x3] %vm3_vm0, %v15237_v38   ;;  %685 = vst.msk [vmem:[#allocation0 + $0x1f00] ss:$16 sm:$0xc] %vm3_vm0, %v15237_v38  }
 0x23b   :  { %687 = vst.msk [vmem:[#allocation0 + $0x1f00] ss:$16 sm:$0x30] %vm3_vm0, %v15237_v38   ;;  %689 = vst.msk [vmem:[#allocation0 + $0x1f00] ss:$16 sm:$0xc0] %vm3_vm0, %v15237_v38  }
 0x23c   :  { %v8921_v51 = vld [vmem:[#allocation0 + $0x1990] sm:$0x3]  ;;  %v8935_v54 = vld [vmem:[#allocation0 + $0x19a0] sm:$0x3]  ;;  %12451 = vst [vmem:[%s17895_s1 + $0x660] sm:$0x3] %v8907_v7 }
 0x23d   :  { %1680 = vst.msk [vmem:[#allocation0 + $0x588] ss:$16 sm:$0x3] %vm3_vm0, %v1677_v39   ;;  %1682 = vst.msk [vmem:[#allocation0 + $0x588] ss:$16 sm:$0xc] %vm3_vm0, %v1677_v39  }
 0x23e   :  { %1684 = vst.msk [vmem:[#allocation0 + $0x588] ss:$16 sm:$0x30] %vm3_vm0, %v1677_v39   ;;  %1686 = vst.msk [vmem:[#allocation0 + $0x588] ss:$16 sm:$0xc0] %vm3_vm0, %v1677_v39  }
 0x23f   :  { %1667 = vst.msk [vmem:[#allocation0 + $0x508] ss:$16 sm:$0x3] %vm3_vm0, %v1664_v6   ;;  %1669 = vst.msk [vmem:[#allocation0 + $0x508] ss:$16 sm:$0xc] %vm3_vm0, %v1664_v6  }
 0x240   :  { %1671 = vst.msk [vmem:[#allocation0 + $0x508] ss:$16 sm:$0x30] %vm3_vm0, %v1664_v6   ;;  %1673 = vst.msk [vmem:[#allocation0 + $0x508] ss:$16 sm:$0xc0] %vm3_vm0, %v1664_v6  }
 0x241   :  { %12453 = vst [vmem:[%s17895_s1 + $0x664] sm:$0x3] %v8921_v51  ;;  %12455 = vst [vmem:[%s17895_s1 + $0x668] sm:$0x3] %v8935_v54  ;;  %v8949_v58 = vld [vmem:[#allocation0 + $0x19b0] sm:$0x3] }
 0x242   :  { %v8963_v59 = vld [vmem:[#allocation0 + $0x19c0] sm:$0x3]  ;;  %v8977_v55 = vld [vmem:[#allocation0 + $0x19d0] sm:$0x3]  ;;  %12457 = vst [vmem:[%s17895_s1 + $0x66c] sm:$0x3] %v8949_v58 }
 0x243   :  { %12459 = vst [vmem:[%s17895_s1 + $0x670] sm:$0x3] %v8963_v59  ;;  %12461 = vst [vmem:[%s17895_s1 + $0x674] sm:$0x3] %v8977_v55  ;;  %v8991_v62 = vld [vmem:[#allocation0 + $0x19e0] sm:$0x3] }
 0x244   :  { %v9005_v63 = vld [vmem:[#allocation0 + $0x19f0] sm:$0x3]  ;;  %v8795_v8 = vld [vmem:[#allocation0 + $0x1900] sm:$0x3]  ;;  %12463 = vst [vmem:[%s17895_s1 + $0x678] sm:$0x3] %v8991_v62  ;;  %v1807_v62 = vpop.permute.xlu1 %1806  }
 0x245   :  { %12465 = vst [vmem:[%s17895_s1 + $0x67c] sm:$0x3] %v9005_v63  ;;  %12435 = vst [vmem:[%s17895_s1 + $0x640] sm:$0x3] %v8795_v8  ;;  %v8809_v56 = vld [vmem:[#allocation0 + $0x1910] sm:$0x3]  ;;  %v1794_v63 = vpop.permute.xlu0 %1793  }
 0x246   :  { %v8823_v57 = vld [vmem:[#allocation0 + $0x1920] sm:$0x3]  ;;  %v8837_v20 = vld [vmem:[#allocation0 + $0x1930] sm:$0x3]  ;;  %12437 = vst [vmem:[%s17895_s1 + $0x644] sm:$0x3] %v8809_v56 }
 0x247   :  { %12439 = vst [vmem:[%s17895_s1 + $0x648] sm:$0x3] %v8823_v57  ;;  %12441 = vst [vmem:[%s17895_s1 + $0x64c] sm:$0x3] %v8837_v20  ;;  %v8851_v12 = vld [vmem:[#allocation0 + $0x1940] sm:$0x3] }
 0x248   :  { %v8865_v28 = vld [vmem:[#allocation0 + $0x1950] sm:$0x3]  ;;  %v8879_v29 = vld [vmem:[#allocation0 + $0x1960] sm:$0x3]  ;;  %12443 = vst [vmem:[%s17895_s1 + $0x650] sm:$0x3] %v8851_v12 }
 0x249   :  { %1706 = vst.msk [vmem:[#allocation0 + $0x688] ss:$16 sm:$0x3] %vm3_vm0, %v1703_v21   ;;  %1708 = vst.msk [vmem:[#allocation0 + $0x688] ss:$16 sm:$0xc] %vm3_vm0, %v1703_v21  }
 0x24a   :  { %1710 = vst.msk [vmem:[#allocation0 + $0x688] ss:$16 sm:$0x30] %vm3_vm0, %v1703_v21   ;;  %1712 = vst.msk [vmem:[#allocation0 + $0x688] ss:$16 sm:$0xc0] %vm3_vm0, %v1703_v21  }
 0x24b   :  { %1693 = vst.msk [vmem:[#allocation0 + $0x608] ss:$16 sm:$0x3] %vm3_vm0, %v1690_v9   ;;  %1695 = vst.msk [vmem:[#allocation0 + $0x608] ss:$16 sm:$0xc] %vm3_vm0, %v1690_v9  }
 0x24c   :  { %1697 = vst.msk [vmem:[#allocation0 + $0x608] ss:$16 sm:$0x30] %vm3_vm0, %v1690_v9   ;;  %1699 = vst.msk [vmem:[#allocation0 + $0x608] ss:$16 sm:$0xc0] %vm3_vm0, %v1690_v9  }
 0x24d   :  { %12445 = vst [vmem:[%s17895_s1 + $0x654] sm:$0x3] %v8865_v28  ;;  %12447 = vst [vmem:[%s17895_s1 + $0x658] sm:$0x3] %v8879_v29  ;;  %v8893_v42 = vld [vmem:[#allocation0 + $0x1970] sm:$0x3] }
 0x24e   :  { %v9131_v43 = vld [vmem:[#allocation0 + $0x1a80] sm:$0x3]  ;;  %v9145_v13 = vld [vmem:[#allocation0 + $0x1a90] sm:$0x3]  ;;  %12449 = vst [vmem:[%s17895_s1 + $0x65c] sm:$0x3] %v8893_v42 }
 0x24f   :  { %12483 = vst [vmem:[%s17895_s1 + $0x6a0] sm:$0x3] %v9131_v43  ;;  %12485 = vst [vmem:[%s17895_s1 + $0x6a4] sm:$0x3] %v9145_v13  ;;  %v9159_v16 = vld [vmem:[#allocation0 + $0x1aa0] sm:$0x3] }
 0x250   :  { %v9173_v1 = vld [vmem:[#allocation0 + $0x1ab0] sm:$0x3]  ;;  %v9187_v3 = vld [vmem:[#allocation0 + $0x1ac0] sm:$0x3]  ;;  %12487 = vst [vmem:[%s17895_s1 + $0x6a8] sm:$0x3] %v9159_v16 }
 0x251   :  { %12489 = vst [vmem:[%s17895_s1 + $0x6ac] sm:$0x3] %v9173_v1  ;;  %12491 = vst [vmem:[%s17895_s1 + $0x6b0] sm:$0x3] %v9187_v3  ;;  %v9201_v4 = vld [vmem:[#allocation0 + $0x1ad0] sm:$0x3]  ;;  %v1833_v3 = vpop.permute.xlu1 %1832  }
 0x252   :  { %v9215_v5 = vld [vmem:[#allocation0 + $0x1ae0] sm:$0x3]  ;;  %v9229_v30 = vld [vmem:[#allocation0 + $0x1af0] sm:$0x3]  ;;  %12493 = vst [vmem:[%s17895_s1 + $0x6b4] sm:$0x3] %v9201_v4  ;;  %v1820_v4 = vpop.permute.xlu0 %1819  }
 0x253   :  { %12495 = vst [vmem:[%s17895_s1 + $0x6b8] sm:$0x3] %v9215_v5  ;;  %12497 = vst [vmem:[%s17895_s1 + $0x6bc] sm:$0x3] %v9229_v30  ;;  %v9019_v61 = vld [vmem:[#allocation0 + $0x1a00] sm:$0x3] }
 0x254   :  { %v9033_v18 = vld [vmem:[#allocation0 + $0x1a10] sm:$0x3]  ;;  %v9047_v19 = vld [vmem:[#allocation0 + $0x1a20] sm:$0x3]  ;;  %12467 = vst [vmem:[%s17895_s1 + $0x680] sm:$0x3] %v9019_v61 }
 0x255   :  { %1732 = vst.msk [vmem:[#allocation0 + $0x788] ss:$16 sm:$0x3] %vm3_vm0, %v1729_v31   ;;  %1734 = vst.msk [vmem:[#allocation0 + $0x788] ss:$16 sm:$0xc] %vm3_vm0, %v1729_v31  }
 0x256   :  { %1736 = vst.msk [vmem:[#allocation0 + $0x788] ss:$16 sm:$0x30] %vm3_vm0, %v1729_v31   ;;  %1738 = vst.msk [vmem:[#allocation0 + $0x788] ss:$16 sm:$0xc0] %vm3_vm0, %v1729_v31  }
 0x257   :  { %1719 = vst.msk [vmem:[#allocation0 + $0x708] ss:$16 sm:$0x3] %vm3_vm0, %v1716_v60   ;;  %1721 = vst.msk [vmem:[#allocation0 + $0x708] ss:$16 sm:$0xc] %vm3_vm0, %v1716_v60  }
 0x258   :  { %1723 = vst.msk [vmem:[#allocation0 + $0x708] ss:$16 sm:$0x30] %vm3_vm0, %v1716_v60   ;;  %1725 = vst.msk [vmem:[#allocation0 + $0x708] ss:$16 sm:$0xc0] %vm3_vm0, %v1716_v60  }
 0x259   :  { %12469 = vst [vmem:[%s17895_s1 + $0x684] sm:$0x3] %v9033_v18  ;;  %12471 = vst [vmem:[%s17895_s1 + $0x688] sm:$0x3] %v9047_v19  ;;  %v9061_v17 = vld [vmem:[#allocation0 + $0x1a30] sm:$0x3] }
 0x25a   :  { %v9075_v22 = vld [vmem:[#allocation0 + $0x1a40] sm:$0x3]  ;;  %v9089_v23 = vld [vmem:[#allocation0 + $0x1a50] sm:$0x3]  ;;  %12473 = vst [vmem:[%s17895_s1 + $0x68c] sm:$0x3] %v9061_v17 }
 0x25b   :  { %12475 = vst [vmem:[%s17895_s1 + $0x690] sm:$0x3] %v9075_v22  ;;  %12477 = vst [vmem:[%s17895_s1 + $0x694] sm:$0x3] %v9089_v23  ;;  %v9103_v26 = vld [vmem:[#allocation0 + $0x1a60] sm:$0x3] }
 0x25c   :  { %v9117_v46 = vld [vmem:[#allocation0 + $0x1a70] sm:$0x3]  ;;  %v9355_v47 = vld [vmem:[#allocation0 + $0x1b80] sm:$0x3]  ;;  %12479 = vst [vmem:[%s17895_s1 + $0x698] sm:$0x3] %v9103_v26 }
 0x25d   :  { %12481 = vst [vmem:[%s17895_s1 + $0x69c] sm:$0x3] %v9117_v46  ;;  %12515 = vst [vmem:[%s17895_s1 + $0x6e0] sm:$0x3] %v9355_v47  ;;  %v9369_v32 = vld [vmem:[#allocation0 + $0x1b90] sm:$0x3] }
 0x25e   :  { %v9383_v33 = vld [vmem:[#allocation0 + $0x1ba0] sm:$0x3]  ;;  %v9397_v36 = vld [vmem:[#allocation0 + $0x1bb0] sm:$0x3]  ;;  %12517 = vst [vmem:[%s17895_s1 + $0x6e4] sm:$0x3] %v9369_v32 }
 0x25f   :  { %12519 = vst [vmem:[%s17895_s1 + $0x6e8] sm:$0x3] %v9383_v33  ;;  %12521 = vst [vmem:[%s17895_s1 + $0x6ec] sm:$0x3] %v9397_v36  ;;  %v9411_v34 = vld [vmem:[#allocation0 + $0x1bc0] sm:$0x3]  ;;  %v1859_v33 = vpop.permute.xlu1 %1858   ;;  %v1846_v36 = vpop.permute.xlu0 %1845  }
 0x260   :  { %v9425_v10 = vld [vmem:[#allocation0 + $0x1bd0] sm:$0x3]  ;;  %v9439_v11 = vld [vmem:[#allocation0 + $0x1be0] sm:$0x3]  ;;  %12523 = vst [vmem:[%s17895_s1 + $0x6f0] sm:$0x3] %v9411_v34 }
 0x261   :  { %1758 = vst.msk [vmem:[#allocation0 + $0x888] ss:$16 sm:$0x3] %vm3_vm0, %v1755_v37   ;;  %1760 = vst.msk [vmem:[#allocation0 + $0x888] ss:$16 sm:$0xc] %vm3_vm0, %v1755_v37  }
 0x262   :  { %1762 = vst.msk [vmem:[#allocation0 + $0x888] ss:$16 sm:$0x30] %vm3_vm0, %v1755_v37   ;;  %1764 = vst.msk [vmem:[#allocation0 + $0x888] ss:$16 sm:$0xc0] %vm3_vm0, %v1755_v37  }
 0x263   :  { %1745 = vst.msk [vmem:[#allocation0 + $0x808] ss:$16 sm:$0x3] %vm3_vm0, %v1742_v27   ;;  %1747 = vst.msk [vmem:[#allocation0 + $0x808] ss:$16 sm:$0xc] %vm3_vm0, %v1742_v27  }
 0x264   :  { %1749 = vst.msk [vmem:[#allocation0 + $0x808] ss:$16 sm:$0x30] %vm3_vm0, %v1742_v27   ;;  %1751 = vst.msk [vmem:[#allocation0 + $0x808] ss:$16 sm:$0xc0] %vm3_vm0, %v1742_v27  }
 0x265   :  { %12525 = vst [vmem:[%s17895_s1 + $0x6f4] sm:$0x3] %v9425_v10  ;;  %12527 = vst [vmem:[%s17895_s1 + $0x6f8] sm:$0x3] %v9439_v11  ;;  %v9453_v35 = vld [vmem:[#allocation0 + $0x1bf0] sm:$0x3] }
 0x266   :  { %v9243_v40 = vld [vmem:[#allocation0 + $0x1b00] sm:$0x3]  ;;  %v9257_v41 = vld [vmem:[#allocation0 + $0x1b10] sm:$0x3]  ;;  %12529 = vst [vmem:[%s17895_s1 + $0x6fc] sm:$0x3] %v9453_v35 }
 0x267   :  { %12499 = vst [vmem:[%s17895_s1 + $0x6c0] sm:$0x3] %v9243_v40  ;;  %12501 = vst [vmem:[%s17895_s1 + $0x6c4] sm:$0x3] %v9257_v41  ;;  %v9271_v48 = vld [vmem:[#allocation0 + $0x1b20] sm:$0x3] }
 0x268   :  { %v9285_v49 = vld [vmem:[#allocation0 + $0x1b30] sm:$0x3]  ;;  %v9299_v50 = vld [vmem:[#allocation0 + $0x1b40] sm:$0x3]  ;;  %12503 = vst [vmem:[%s17895_s1 + $0x6c8] sm:$0x3] %v9271_v48 }
 0x269   :  { %12505 = vst [vmem:[%s17895_s1 + $0x6cc] sm:$0x3] %v9285_v49  ;;  %12507 = vst [vmem:[%s17895_s1 + $0x6d0] sm:$0x3] %v9299_v50  ;;  %v9313_v24 = vld [vmem:[#allocation0 + $0x1b50] sm:$0x3] }
 0x26a   :  { %v9327_v25 = vld [vmem:[#allocation0 + $0x1b60] sm:$0x3]  ;;  %v9341_v44 = vld [vmem:[#allocation0 + $0x1b70] sm:$0x3]  ;;  %12509 = vst [vmem:[%s17895_s1 + $0x6d4] sm:$0x3] %v9313_v24 }
 0x26b   :  { %12511 = vst [vmem:[%s17895_s1 + $0x6d8] sm:$0x3] %v9327_v25  ;;  %12513 = vst [vmem:[%s17895_s1 + $0x6dc] sm:$0x3] %v9341_v44  ;;  %v9579_v53 = vld [vmem:[#allocation0 + $0x1c80] sm:$0x3] }
 0x26c   :  { %v9593_v0 = vld [vmem:[#allocation0 + $0x1c90] sm:$0x3]  ;;  %v9607_v2 = vld [vmem:[#allocation0 + $0x1ca0] sm:$0x3]  ;;  %v11573_v14 = vld [vmem:[%s17894_s0 + $0x8] sm:$0xff]  }
 0x26d   :  { %1784 = vst.msk [vmem:[#allocation0 + $0x988] ss:$16 sm:$0x3] %vm3_vm0, %v1781_v45   ;;  %1786 = vst.msk [vmem:[#allocation0 + $0x988] ss:$16 sm:$0xc] %vm3_vm0, %v1781_v45   ;;  %2377 = vrot.lane.b32.xlu1 %v11573_v14, %s12664_s29 }
 0x26e   :  { %1788 = vst.msk [vmem:[#allocation0 + $0x988] ss:$16 sm:$0x30] %vm3_vm0, %v1781_v45   ;;  %1790 = vst.msk [vmem:[#allocation0 + $0x988] ss:$16 sm:$0xc0] %vm3_vm0, %v1781_v45   ;;  %v1885_v45 = vpop.permute.xlu1 %1884  }
 0x26f   :  { %1771 = vst.msk [vmem:[#allocation0 + $0x908] ss:$16 sm:$0x3] %vm3_vm0, %v1768_v52   ;;  %1773 = vst.msk [vmem:[#allocation0 + $0x908] ss:$16 sm:$0xc] %vm3_vm0, %v1768_v52  }
 0x270   :  { %1775 = vst.msk [vmem:[#allocation0 + $0x908] ss:$16 sm:$0x30] %vm3_vm0, %v1768_v52   ;;  %1777 = vst.msk [vmem:[#allocation0 + $0x908] ss:$16 sm:$0xc0] %vm3_vm0, %v1768_v52   ;;  %v1872_v52 = vpop.permute.xlu0 %1871  }
 0x271   :  { %12547 = vst [vmem:[%s17895_s1 + $0x720] sm:$0x3] %v9579_v53  ;;  %12549 = vst [vmem:[%s17895_s1 + $0x724] sm:$0x3] %v9593_v0  ;;  %v9621_v39 = vld [vmem:[#allocation0 + $0x1cb0] sm:$0x3] }
 0x272   :  { %12551 = vst [vmem:[%s17895_s1 + $0x728] sm:$0x3] %v9607_v2  ;;  %v9635_v6 = vld [vmem:[#allocation0 + $0x1cc0] sm:$0x3]  ;;  %v9649_v7 = vld [vmem:[#allocation0 + $0x1cd0] sm:$0x3] }
 0x273   :  { %v2363_v15 = vld [vmem:[%s17894_s0] sm:$0xff]   ;;  %12553 = vst [vmem:[%s17895_s1 + $0x72c] sm:$0x3] %v9621_v39  ;;  %12555 = vst [vmem:[%s17895_s1 + $0x730] sm:$0x3] %v9635_v6  ;;  %v11575_v20 = vld [vmem:[%s17894_s0 + $0x18] sm:$0xff]  }
 0x274   :  { %12557 = vst [vmem:[%s17895_s1 + $0x734] sm:$0x3] %v9649_v7  ;;  %v9663_v51 = vld [vmem:[#allocation0 + $0x1ce0] sm:$0x3]  ;;  %v9677_v54 = vld [vmem:[#allocation0 + $0x1cf0] sm:$0x3]  ;;  %2364 = vrot.lane.b32.xlu0 %v2363_v15, %s12664_s29  ;;  %2403 = vrot.lane.b32.xlu1 %v11575_v20, %s12664_s29 }
 0x275   :  { %v9467_v58 = vld [vmem:[#allocation0 + $0x1c00] sm:$0x3]  ;;  %12559 = vst [vmem:[%s17895_s1 + $0x738] sm:$0x3] %v9663_v51  ;;  %12561 = vst [vmem:[%s17895_s1 + $0x73c] sm:$0x3] %v9677_v54 }
 0x276   :  { %12531 = vst [vmem:[%s17895_s1 + $0x700] sm:$0x3] %v9467_v58  ;;  %v9481_v38 = vld [vmem:[#allocation0 + $0x1c10] sm:$0x3]  ;;  %v9495_v59 = vld [vmem:[#allocation0 + $0x1c20] sm:$0x3] }
 0x277   :  { %v9509_v55 = vld [vmem:[#allocation0 + $0x1c30] sm:$0x3]  ;;  %12533 = vst [vmem:[%s17895_s1 + $0x704] sm:$0x3] %v9481_v38  ;;  %12535 = vst [vmem:[%s17895_s1 + $0x708] sm:$0x3] %v9495_v59 }
 0x278   :  { %12537 = vst [vmem:[%s17895_s1 + $0x70c] sm:$0x3] %v9509_v55  ;;  %v9523_v8 = vld [vmem:[#allocation0 + $0x1c40] sm:$0x3]  ;;  %v9537_v56 = vld [vmem:[#allocation0 + $0x1c50] sm:$0x3]  ;;  %v1911_v55 = vpop.permute.xlu1 %1910  }
 0x279   :  { %v9551_v57 = vld [vmem:[#allocation0 + $0x1c60] sm:$0x3]  ;;  %1810 = vst.msk [vmem:[#allocation0 + $0xa88] ss:$16 sm:$0x3] %vm3_vm0, %v1807_v62   ;;  %v11574_v28 = vld [vmem:[%s17894_s0 + $0x10] sm:$0xff]  }
 0x27a   :  { %1812 = vst.msk [vmem:[#allocation0 + $0xa88] ss:$16 sm:$0xc] %vm3_vm0, %v1807_v62   ;;  %1814 = vst.msk [vmem:[#allocation0 + $0xa88] ss:$16 sm:$0x30] %vm3_vm0, %v1807_v62   ;;  %2390 = vrot.lane.b32.xlu0 %v11574_v28, %s12664_s29 }
 0x27b   :  { %1816 = vst.msk [vmem:[#allocation0 + $0xa88] ss:$16 sm:$0xc0] %vm3_vm0, %v1807_v62   ;;  %1797 = vst.msk [vmem:[#allocation0 + $0xa08] ss:$16 sm:$0x3] %vm3_vm0, %v1794_v63   ;;  %v1898_v62 = vpop.permute.xlu0 %1897  }
 0x27c   :  { %1799 = vst.msk [vmem:[#allocation0 + $0xa08] ss:$16 sm:$0xc] %vm3_vm0, %v1794_v63   ;;  %1801 = vst.msk [vmem:[#allocation0 + $0xa08] ss:$16 sm:$0x30] %vm3_vm0, %v1794_v63  }
 0x27d   :  { %1803 = vst.msk [vmem:[#allocation0 + $0xa08] ss:$16 sm:$0xc0] %vm3_vm0, %v1794_v63   ;;  %12539 = vst [vmem:[%s17895_s1 + $0x710] sm:$0x3] %v9523_v8  ;;  %v11577_v60 = vld [vmem:[%s17894_s0 + $0x28] sm:$0xff]  }
 0x27e   :  { %12541 = vst [vmem:[%s17895_s1 + $0x714] sm:$0x3] %v9537_v56  ;;  %12543 = vst [vmem:[%s17895_s1 + $0x718] sm:$0x3] %v9551_v57  ;;  %v9565_v21 = vld [vmem:[#allocation0 + $0x1c70] sm:$0x3]  ;;  %2429 = vrot.lane.b32.xlu1 %v11577_v60, %s12664_s29 }
 0x27f   :  { %v9803_v9 = vld [vmem:[#allocation0 + $0x1d80] sm:$0x3]  ;;  %v9817_v12 = vld [vmem:[#allocation0 + $0x1d90] sm:$0x3]  ;;  %12545 = vst [vmem:[%s17895_s1 + $0x71c] sm:$0x3] %v9565_v21  ;;  %v1924_v28 = vpop.permute.xlu0 %1923  }
 0x280   :  { %12579 = vst [vmem:[%s17895_s1 + $0x760] sm:$0x3] %v9803_v9  ;;  %12581 = vst [vmem:[%s17895_s1 + $0x764] sm:$0x3] %v9817_v12  ;;  %v9831_v29 = vld [vmem:[#allocation0 + $0x1da0] sm:$0x3]  ;;  %v1937_v12 = vpop.permute.xlu1 %1936  }
 0x281   :  { %v9845_v42 = vld [vmem:[#allocation0 + $0x1db0] sm:$0x3]  ;;  %v9859_v43 = vld [vmem:[#allocation0 + $0x1dc0] sm:$0x3]  ;;  %12583 = vst [vmem:[%s17895_s1 + $0x768] sm:$0x3] %v9831_v29 }
 0x282   :  { %12585 = vst [vmem:[%s17895_s1 + $0x76c] sm:$0x3] %v9845_v42  ;;  %12587 = vst [vmem:[%s17895_s1 + $0x770] sm:$0x3] %v9859_v43  ;;  %v9873_v13 = vld [vmem:[#allocation0 + $0x1dd0] sm:$0x3] }
 0x283   :  { %v9887_v16 = vld [vmem:[#allocation0 + $0x1de0] sm:$0x3]  ;;  %v9901_v1 = vld [vmem:[#allocation0 + $0x1df0] sm:$0x3]  ;;  %12589 = vst [vmem:[%s17895_s1 + $0x774] sm:$0x3] %v9873_v13  ;;  %v1950_v13 = vpop.permute.xlu0 %1949  }
 0x284   :  { %12591 = vst [vmem:[%s17895_s1 + $0x778] sm:$0x3] %v9887_v16  ;;  %12593 = vst [vmem:[%s17895_s1 + $0x77c] sm:$0x3] %v9901_v1  ;;  %v9691_v5 = vld [vmem:[#allocation0 + $0x1d00] sm:$0x3]  ;;  %v1963_v43 = vpop.permute.xlu1 %1962  }
 0x285   :  { %v9705_v30 = vld [vmem:[#allocation0 + $0x1d10] sm:$0x3]  ;;  %v9719_v31 = vld [vmem:[#allocation0 + $0x1d20] sm:$0x3]  ;;  %12563 = vst [vmem:[%s17895_s1 + $0x740] sm:$0x3] %v9691_v5 }
 0x286   :  { %1836 = vst.msk [vmem:[#allocation0 + $0xb88] ss:$16 sm:$0x3] %vm3_vm0, %v1833_v3   ;;  %1838 = vst.msk [vmem:[#allocation0 + $0xb88] ss:$16 sm:$0xc] %vm3_vm0, %v1833_v3  }
 0x287   :  { %1840 = vst.msk [vmem:[#allocation0 + $0xb88] ss:$16 sm:$0x30] %vm3_vm0, %v1833_v3   ;;  %1842 = vst.msk [vmem:[#allocation0 + $0xb88] ss:$16 sm:$0xc0] %vm3_vm0, %v1833_v3  }
 0x288   :  { %1823 = vst.msk [vmem:[#allocation0 + $0xb08] ss:$16 sm:$0x3] %vm3_vm0, %v1820_v4   ;;  %1825 = vst.msk [vmem:[#allocation0 + $0xb08] ss:$16 sm:$0xc] %vm3_vm0, %v1820_v4   ;;  %v1989_v3 = vpop.permute.xlu1 %1988  }
 0x289   :  { %1827 = vst.msk [vmem:[#allocation0 + $0xb08] ss:$16 sm:$0x30] %vm3_vm0, %v1820_v4   ;;  %1829 = vst.msk [vmem:[#allocation0 + $0xb08] ss:$16 sm:$0xc0] %vm3_vm0, %v1820_v4   ;;  %v1976_v4 = vpop.permute.xlu0 %1975  }
 0x28a   :  { %12565 = vst [vmem:[%s17895_s1 + $0x744] sm:$0x3] %v9705_v30  ;;  %12567 = vst [vmem:[%s17895_s1 + $0x748] sm:$0x3] %v9719_v31  ;;  %v9733_v61 = vld [vmem:[#allocation0 + $0x1d30] sm:$0x3] }
 0x28b   :  { %v9747_v18 = vld [vmem:[#allocation0 + $0x1d40] sm:$0x3]  ;;  %v9761_v19 = vld [vmem:[#allocation0 + $0x1d50] sm:$0x3]  ;;  %12569 = vst [vmem:[%s17895_s1 + $0x74c] sm:$0x3] %v9733_v61 }
 0x28c   :  { %v11576_v17 = vld [vmem:[%s17894_s0 + $0x20] sm:$0xff]   ;;  %12571 = vst [vmem:[%s17895_s1 + $0x750] sm:$0x3] %v9747_v18  ;;  %12573 = vst [vmem:[%s17895_s1 + $0x754] sm:$0x3] %v9761_v19  ;;  %v11579_v10 = vld [vmem:[%s17894_s0 + $0x38] sm:$0xff]   ;;  %v2015_v31 = vpop.permute.xlu1 %2014  }
 0x28d   :  { %v9775_v22 = vld [vmem:[#allocation0 + $0x1d60] sm:$0x3]  ;;  %v9789_v23 = vld [vmem:[#allocation0 + $0x1d70] sm:$0x3]  ;;  %2416 = vrot.lane.b32.xlu0 %v11576_v17, %s12664_s29  ;;  %v11581_v14 = vld [vmem:[%s17894_s0 + $0x48] sm:$0xff]   ;;  %2455 = vrot.lane.b32.xlu1 %v11579_v10, %s12664_s29  ;;  %v2002_v60 = vpop.permute.xlu0 %2001  }
 0x28e   :  { %v10027_v26 = vld [vmem:[#allocation0 + $0x1e80] sm:$0x3]  ;;  %12575 = vst [vmem:[%s17895_s1 + $0x758] sm:$0x3] %v9775_v22  ;;  %12577 = vst [vmem:[%s17895_s1 + $0x75c] sm:$0x3] %v9789_v23 }
 0x28f   :  { %12611 = vst [vmem:[%s17895_s1 + $0x7a0] sm:$0x3] %v10027_v26  ;;  %v10041_v46 = vld [vmem:[#allocation0 + $0x1e90] sm:$0x3]  ;;  %v10055_v47 = vld [vmem:[#allocation0 + $0x1ea0] sm:$0x3] }
 0x290   :  { %v10069_v32 = vld [vmem:[#allocation0 + $0x1eb0] sm:$0x3]  ;;  %12613 = vst [vmem:[%s17895_s1 + $0x7a4] sm:$0x3] %v10041_v46  ;;  %12615 = vst [vmem:[%s17895_s1 + $0x7a8] sm:$0x3] %v10055_v47  ;;  %v2041_v19 = vpop.permute.xlu1 %2040  }
 0x291   :  { %12617 = vst [vmem:[%s17895_s1 + $0x7ac] sm:$0x3] %v10069_v32  ;;  %v10083_v37 = vld [vmem:[#allocation0 + $0x1ec0] sm:$0x3]  ;;  %v10097_v27 = vld [vmem:[#allocation0 + $0x1ed0] sm:$0x3]  ;;  %2481 = vrot.lane.b32.xlu1 %v11581_v14, %s12664_s29  ;;  %v2028_v17 = vpop.permute.xlu0 %2027  }
 0x292   :  { %v10111_v34 = vld [vmem:[#allocation0 + $0x1ee0] sm:$0x3]  ;;  %1862 = vst.msk [vmem:[#allocation0 + $0xc88] ss:$16 sm:$0x3] %vm3_vm0, %v1859_v33   ;;  %v11578_v41 = vld [vmem:[%s17894_s0 + $0x30] sm:$0xff]  }
 0x293   :  { %1864 = vst.msk [vmem:[#allocation0 + $0xc88] ss:$16 sm:$0xc] %vm3_vm0, %v1859_v33   ;;  %1866 = vst.msk [vmem:[#allocation0 + $0xc88] ss:$16 sm:$0x30] %vm3_vm0, %v1859_v33   ;;  %2442 = vrot.lane.b32.xlu0 %v11578_v41, %s12664_s29 }
 0x294   :  { %1868 = vst.msk [vmem:[#allocation0 + $0xc88] ss:$16 sm:$0xc0] %vm3_vm0, %v1859_v33   ;;  %1849 = vst.msk [vmem:[#allocation0 + $0xc08] ss:$16 sm:$0x3] %vm3_vm0, %v1846_v36   ;;  %v2067_v26 = vpop.permute.xlu1 %2066  }
 0x295   :  { %1851 = vst.msk [vmem:[#allocation0 + $0xc08] ss:$16 sm:$0xc] %vm3_vm0, %v1846_v36   ;;  %1853 = vst.msk [vmem:[#allocation0 + $0xc08] ss:$16 sm:$0x30] %vm3_vm0, %v1846_v36   ;;  %v2054_v46 = vpop.permute.xlu0 %2053  }
 0x296   :  { %1855 = vst.msk [vmem:[#allocation0 + $0xc08] ss:$16 sm:$0xc0] %vm3_vm0, %v1846_v36   ;;  %12619 = vst [vmem:[%s17895_s1 + $0x7b0] sm:$0x3] %v10083_v37  ;;  %v11580_v20 = vld [vmem:[%s17894_s0 + $0x40] sm:$0xff]  }
 0x297   :  { %12621 = vst [vmem:[%s17895_s1 + $0x7b4] sm:$0x3] %v10097_v27  ;;  %12623 = vst [vmem:[%s17895_s1 + $0x7b8] sm:$0x3] %v10111_v34  ;;  %v10125_v11 = vld [vmem:[#allocation0 + $0x1ef0] sm:$0x3]  ;;  %2468 = vrot.lane.b32.xlu0 %v11580_v20, %s12664_s29 }
 0x298   :  { %v9915_v35 = vld [vmem:[#allocation0 + $0x1e00] sm:$0x3]  ;;  %v9929_v40 = vld [vmem:[#allocation0 + $0x1e10] sm:$0x3]  ;;  %12625 = vst [vmem:[%s17895_s1 + $0x7bc] sm:$0x3] %v10125_v11  ;;  %v2093_v33 = vpop.permute.xlu1 %2092  }
 0x299   :  { %12595 = vst [vmem:[%s17895_s1 + $0x780] sm:$0x3] %v9915_v35  ;;  %12597 = vst [vmem:[%s17895_s1 + $0x784] sm:$0x3] %v9929_v40  ;;  %v9943_v48 = vld [vmem:[#allocation0 + $0x1e20] sm:$0x3]  ;;  %v2080_v36 = vpop.permute.xlu0 %2079  }
 0x29a   :  { %v9957_v49 = vld [vmem:[#allocation0 + $0x1e30] sm:$0x3]  ;;  %v9971_v50 = vld [vmem:[#allocation0 + $0x1e40] sm:$0x3]  ;;  %12599 = vst [vmem:[%s17895_s1 + $0x788] sm:$0x3] %v9943_v48 }
 0x29b   :  { %12601 = vst [vmem:[%s17895_s1 + $0x78c] sm:$0x3] %v9957_v49  ;;  %12603 = vst [vmem:[%s17895_s1 + $0x790] sm:$0x3] %v9971_v50  ;;  %v9985_v24 = vld [vmem:[#allocation0 + $0x1e50] sm:$0x3] }
 0x29c   :  { %v9999_v25 = vld [vmem:[#allocation0 + $0x1e60] sm:$0x3]  ;;  %v10013_v44 = vld [vmem:[#allocation0 + $0x1e70] sm:$0x3]  ;;  %12605 = vst [vmem:[%s17895_s1 + $0x794] sm:$0x3] %v9985_v24  ;;  %v2119_v34 = vpop.permute.xlu1 %2118  }
 0x29d   :  { %12607 = vst [vmem:[%s17895_s1 + $0x798] sm:$0x3] %v9999_v25  ;;  %12609 = vst [vmem:[%s17895_s1 + $0x79c] sm:$0x3] %v10013_v44  ;;  %v10251_v53 = vld [vmem:[#allocation0 + $0x1f80] sm:$0x3]  ;;  %v2106_v10 = vpop.permute.xlu0 %2105  }
 0x29e   :  { %v10265_v0 = vld [vmem:[#allocation0 + $0x1f90] sm:$0x3]  ;;  %v10279_v2 = vld [vmem:[#allocation0 + $0x1fa0] sm:$0x3]  ;;  %12643 = vst [vmem:[%s17895_s1 + $0x7e0] sm:$0x3] %v10251_v53 }
 0x29f   :  { %1888 = vst.msk [vmem:[#allocation0 + $0xd88] ss:$16 sm:$0x3] %vm3_vm0, %v1885_v45   ;;  %1890 = vst.msk [vmem:[#allocation0 + $0xd88] ss:$16 sm:$0xc] %vm3_vm0, %v1885_v45  }
 0x2a0   :  { %1892 = vst.msk [vmem:[#allocation0 + $0xd88] ss:$16 sm:$0x30] %vm3_vm0, %v1885_v45   ;;  %1894 = vst.msk [vmem:[#allocation0 + $0xd88] ss:$16 sm:$0xc0] %vm3_vm0, %v1885_v45   ;;  %v2145_v40 = vpop.permute.xlu1 %2144  }
 0x2a1   :  { %1875 = vst.msk [vmem:[#allocation0 + $0xd08] ss:$16 sm:$0x3] %vm3_vm0, %v1872_v52   ;;  %1877 = vst.msk [vmem:[#allocation0 + $0xd08] ss:$16 sm:$0xc] %vm3_vm0, %v1872_v52   ;;  %v2132_v41 = vpop.permute.xlu0 %2131  }
 0x2a2   :  { %1879 = vst.msk [vmem:[#allocation0 + $0xd08] ss:$16 sm:$0x30] %vm3_vm0, %v1872_v52   ;;  %1881 = vst.msk [vmem:[#allocation0 + $0xd08] ss:$16 sm:$0xc0] %vm3_vm0, %v1872_v52  }
 0x2a3   :  { %12645 = vst [vmem:[%s17895_s1 + $0x7e4] sm:$0x3] %v10265_v0  ;;  %12647 = vst [vmem:[%s17895_s1 + $0x7e8] sm:$0x3] %v10279_v2  ;;  %v10293_v39 = vld [vmem:[#allocation0 + $0x1fb0] sm:$0x3] }
 0x2a4   :  { %v10307_v6 = vld [vmem:[#allocation0 + $0x1fc0] sm:$0x3]  ;;  %v10321_v7 = vld [vmem:[#allocation0 + $0x1fd0] sm:$0x3]  ;;  %12649 = vst [vmem:[%s17895_s1 + $0x7ec] sm:$0x3] %v10293_v39  ;;  %v2171_v50 = vpop.permute.xlu1 %2170  }
 0x2a5   :  { %12651 = vst [vmem:[%s17895_s1 + $0x7f0] sm:$0x3] %v10307_v6  ;;  %12653 = vst [vmem:[%s17895_s1 + $0x7f4] sm:$0x3] %v10321_v7  ;;  %v10335_v15 = vld [vmem:[#allocation0 + $0x1fe0] sm:$0x3]  ;;  %v2158_v24 = vpop.permute.xlu0 %2157  }
 0x2a6   :  { %v10349_v51 = vld [vmem:[#allocation0 + $0x1ff0] sm:$0x3]  ;;  %v10139_v54 = vld [vmem:[#allocation0 + $0x1f00] sm:$0x3]  ;;  %12655 = vst [vmem:[%s17895_s1 + $0x7f8] sm:$0x3] %v10335_v15 }
 0x2a7   :  { %12657 = vst [vmem:[%s17895_s1 + $0x7fc] sm:$0x3] %v10349_v51  ;;  %12627 = vst [vmem:[%s17895_s1 + $0x7c0] sm:$0x3] %v10139_v54  ;;  %v10153_v58 = vld [vmem:[#allocation0 + $0x1f10] sm:$0x3] }
 0x2a8   :  { %v10167_v38 = vld [vmem:[#allocation0 + $0x1f20] sm:$0x3]  ;;  %v10181_v59 = vld [vmem:[#allocation0 + $0x1f30] sm:$0x3]  ;;  %12629 = vst [vmem:[%s17895_s1 + $0x7c4] sm:$0x3] %v10153_v58 }
 0x2a9   :  { %12631 = vst [vmem:[%s17895_s1 + $0x7c8] sm:$0x3] %v10167_v38  ;;  %12633 = vst [vmem:[%s17895_s1 + $0x7cc] sm:$0x3] %v10181_v59  ;;  %v10195_v63 = vld [vmem:[#allocation0 + $0x1f40] sm:$0x3]  ;;  %v2197_v38 = vpop.permute.xlu1 %2196  }
 0x2aa   :  { %v10209_v8 = vld [vmem:[#allocation0 + $0x1f50] sm:$0x3]  ;;  %v10223_v56 = vld [vmem:[#allocation0 + $0x1f60] sm:$0x3]  ;;  %12635 = vst [vmem:[%s17895_s1 + $0x7d0] sm:$0x3] %v10195_v63 }
 0x2ab   :  { %1914 = vst.msk [vmem:[#allocation0 + $0xe88] ss:$16 sm:$0x3] %vm3_vm0, %v1911_v55   ;;  %1916 = vst.msk [vmem:[#allocation0 + $0xe88] ss:$16 sm:$0xc] %vm3_vm0, %v1911_v55  }
 0x2ac   :  { %1918 = vst.msk [vmem:[#allocation0 + $0xe88] ss:$16 sm:$0x30] %vm3_vm0, %v1911_v55   ;;  %1920 = vst.msk [vmem:[#allocation0 + $0xe88] ss:$16 sm:$0xc0] %vm3_vm0, %v1911_v55   ;;  %v2184_v55 = vpop.permute.xlu0 %2183  }
 0x2ad   :  { %1901 = vst.msk [vmem:[#allocation0 + $0xe08] ss:$16 sm:$0x3] %vm3_vm0, %v1898_v62   ;;  %1903 = vst.msk [vmem:[#allocation0 + $0xe08] ss:$16 sm:$0xc] %vm3_vm0, %v1898_v62   ;;  %v2223_v63 = vpop.permute.xlu1 %2222  }
 0x2ae   :  { %1905 = vst.msk [vmem:[#allocation0 + $0xe08] ss:$16 sm:$0x30] %vm3_vm0, %v1898_v62   ;;  %1907 = vst.msk [vmem:[#allocation0 + $0xe08] ss:$16 sm:$0xc0] %vm3_vm0, %v1898_v62  }
 0x2af   :  { %12637 = vst [vmem:[%s17895_s1 + $0x7d4] sm:$0x3] %v10209_v8  ;;  %12639 = vst [vmem:[%s17895_s1 + $0x7d8] sm:$0x3] %v10223_v56  ;;  %v10237_v57 = vld [vmem:[#allocation0 + $0x1f70] sm:$0x3] }
 0x2b0   :  { %12641 = vst [vmem:[%s17895_s1 + $0x7dc] sm:$0x3] %v10237_v57  ;;  %v11583_v21 = vld [vmem:[%s17894_s0 + $0x58] sm:$0xff]   ;;  %v11582_v9 = vld [vmem:[%s17894_s0 + $0x50] sm:$0xff]   ;;  %v11585_v29 = vld [vmem:[%s17894_s0 + $0x68] sm:$0xff]   ;;  %v2210_v56 = vpop.permute.xlu0 %2209  }
 0x2b1   :  { %1940 = vst.msk [vmem:[#allocation0 + $0xf88] ss:$16 sm:$0x3] %vm3_vm0, %v1937_v12   ;;  %1942 = vst.msk [vmem:[#allocation0 + $0xf88] ss:$16 sm:$0xc] %vm3_vm0, %v1937_v12   ;;  %2507 = vrot.lane.b32.xlu1 %v11583_v21, %s12664_s29  ;;  %2494 = vrot.lane.b32.xlu0 %v11582_v9, %s12664_s29  ;;  %v2249_v20 = vpop.permute.xlu1 %2248  }
 0x2b2   :  { %1944 = vst.msk [vmem:[#allocation0 + $0xf88] ss:$16 sm:$0x30] %vm3_vm0, %v1937_v12   ;;  %1946 = vst.msk [vmem:[#allocation0 + $0xf88] ss:$16 sm:$0xc0] %vm3_vm0, %v1937_v12  }
 0x2b3   :  { %1927 = vst.msk [vmem:[#allocation0 + $0xf08] ss:$16 sm:$0x3] %vm3_vm0, %v1924_v28   ;;  %1929 = vst.msk [vmem:[#allocation0 + $0xf08] ss:$16 sm:$0xc] %vm3_vm0, %v1924_v28  }
 0x2b4   :  { %1931 = vst.msk [vmem:[#allocation0 + $0xf08] ss:$16 sm:$0x30] %vm3_vm0, %v1924_v28   ;;  %1933 = vst.msk [vmem:[#allocation0 + $0xf08] ss:$16 sm:$0xc0] %vm3_vm0, %v1924_v28   ;;  %v2236_v9 = vpop.permute.xlu0 %2235  }
 0x2b5   :  { %v11584_v42 = vld [vmem:[%s17894_s0 + $0x60] sm:$0xff]   ;;  %1966 = vst.msk [vmem:[#allocation0 + $0x1088] ss:$16 sm:$0x3] %vm3_vm0, %v1963_v43   ;;  %2533 = vrot.lane.b32.xlu1 %v11585_v29, %s12664_s29  ;;  %v11587_v16 = vld [vmem:[%s17894_s0 + $0x78] sm:$0xff]   ;;  %v11586_v1 = vld [vmem:[%s17894_s0 + $0x70] sm:$0xff]   ;;  %v2275_v28 = vpop.permute.xlu1 %2274  }
 0x2b6   :  { %1968 = vst.msk [vmem:[#allocation0 + $0x1088] ss:$16 sm:$0xc] %vm3_vm0, %v1963_v43   ;;  %1970 = vst.msk [vmem:[#allocation0 + $0x1088] ss:$16 sm:$0x30] %vm3_vm0, %v1963_v43   ;;  %2520 = vrot.lane.b32.xlu0 %v11584_v42, %s12664_s29 }
 0x2b7   :  { %1972 = vst.msk [vmem:[#allocation0 + $0x1088] ss:$16 sm:$0xc0] %vm3_vm0, %v1963_v43   ;;  %1953 = vst.msk [vmem:[#allocation0 + $0x1008] ss:$16 sm:$0x3] %vm3_vm0, %v1950_v13  }
 0x2b8   :  { %1955 = vst.msk [vmem:[#allocation0 + $0x1008] ss:$16 sm:$0xc] %vm3_vm0, %v1950_v13   ;;  %1957 = vst.msk [vmem:[#allocation0 + $0x1008] ss:$16 sm:$0x30] %vm3_vm0, %v1950_v13   ;;  %v2262_v42 = vpop.permute.xlu0 %2261  }
 0x2b9   :  { %1959 = vst.msk [vmem:[#allocation0 + $0x1008] ss:$16 sm:$0xc0] %vm3_vm0, %v1950_v13   ;;  %1992 = vst.msk [vmem:[#allocation0 + $0x1188] ss:$16 sm:$0x3] %vm3_vm0, %v1989_v3   ;;  %2559 = vrot.lane.b32.xlu1 %v11587_v16, %s12664_s29  ;;  %v2301_v13 = vpop.permute.xlu1 %2300  }
 0x2ba   :  { %1994 = vst.msk [vmem:[#allocation0 + $0x1188] ss:$16 sm:$0xc] %vm3_vm0, %v1989_v3   ;;  %1996 = vst.msk [vmem:[#allocation0 + $0x1188] ss:$16 sm:$0x30] %vm3_vm0, %v1989_v3   ;;  %2546 = vrot.lane.b32.xlu0 %v11586_v1, %s12664_s29 }
 0x2bb   :  { %1998 = vst.msk [vmem:[#allocation0 + $0x1188] ss:$16 sm:$0xc0] %vm3_vm0, %v1989_v3   ;;  %1979 = vst.msk [vmem:[#allocation0 + $0x1108] ss:$16 sm:$0x3] %vm3_vm0, %v1976_v4  }
 0x2bc   :  { %1981 = vst.msk [vmem:[#allocation0 + $0x1108] ss:$16 sm:$0xc] %vm3_vm0, %v1976_v4   ;;  %1983 = vst.msk [vmem:[#allocation0 + $0x1108] ss:$16 sm:$0x30] %vm3_vm0, %v1976_v4   ;;  %v2288_v1 = vpop.permute.xlu0 %2287  }
 0x2bd   :  { %1985 = vst.msk [vmem:[#allocation0 + $0x1108] ss:$16 sm:$0xc0] %vm3_vm0, %v1976_v4   ;;  %v11589_v5 = vld [vmem:[%s17894_s0 + $0x88] sm:$0xff]   ;;  %v11588_v30 = vld [vmem:[%s17894_s0 + $0x80] sm:$0xff]   ;;  %v11591_v61 = vld [vmem:[%s17894_s0 + $0x98] sm:$0xff]   ;;  %v2327_v4 = vpop.permute.xlu1 %2326  }
 0x2be   :  { %2018 = vst.msk [vmem:[#allocation0 + $0x1288] ss:$16 sm:$0x3] %vm3_vm0, %v2015_v31   ;;  %2020 = vst.msk [vmem:[#allocation0 + $0x1288] ss:$16 sm:$0xc] %vm3_vm0, %v2015_v31   ;;  %2585 = vrot.lane.b32.xlu1 %v11589_v5, %s12664_s29  ;;  %2572 = vrot.lane.b32.xlu0 %v11588_v30, %s12664_s29 }
 0x2bf   :  { %2022 = vst.msk [vmem:[#allocation0 + $0x1288] ss:$16 sm:$0x30] %vm3_vm0, %v2015_v31   ;;  %2024 = vst.msk [vmem:[#allocation0 + $0x1288] ss:$16 sm:$0xc0] %vm3_vm0, %v2015_v31  }
 0x2c0   :  { %2005 = vst.msk [vmem:[#allocation0 + $0x1208] ss:$16 sm:$0x3] %vm3_vm0, %v2002_v60   ;;  %2007 = vst.msk [vmem:[#allocation0 + $0x1208] ss:$16 sm:$0xc] %vm3_vm0, %v2002_v60   ;;  %v2314_v30 = vpop.permute.xlu0 %2313  }
 0x2c1   :  { %2009 = vst.msk [vmem:[#allocation0 + $0x1208] ss:$16 sm:$0x30] %vm3_vm0, %v2002_v60   ;;  %2011 = vst.msk [vmem:[#allocation0 + $0x1208] ss:$16 sm:$0xc0] %vm3_vm0, %v2002_v60   ;;  %v2353_v60 = vpop.permute.xlu1 %2352  }
 0x2c2   :  { %v11590_v18 = vld [vmem:[%s17894_s0 + $0x90] sm:$0xff]   ;;  %2044 = vst.msk [vmem:[#allocation0 + $0x1388] ss:$16 sm:$0x3] %vm3_vm0, %v2041_v19   ;;  %2611 = vrot.lane.b32.xlu1 %v11591_v61, %s12664_s29  ;;  %v11593_v22 = vld [vmem:[%s17894_s0 + $0xa8] sm:$0xff]   ;;  %v11592_v23 = vld [vmem:[%s17894_s0 + $0xa0] sm:$0xff]  }
 0x2c3   :  { %2046 = vst.msk [vmem:[#allocation0 + $0x1388] ss:$16 sm:$0xc] %vm3_vm0, %v2041_v19   ;;  %2048 = vst.msk [vmem:[#allocation0 + $0x1388] ss:$16 sm:$0x30] %vm3_vm0, %v2041_v19   ;;  %2598 = vrot.lane.b32.xlu0 %v11590_v18, %s12664_s29 }
 0x2c4   :  { %2050 = vst.msk [vmem:[#allocation0 + $0x1388] ss:$16 sm:$0xc0] %vm3_vm0, %v2041_v19   ;;  %2031 = vst.msk [vmem:[#allocation0 + $0x1308] ss:$16 sm:$0x3] %vm3_vm0, %v2028_v17   ;;  %v2340_v18 = vpop.permute.xlu0 %2339  }
 0x2c5   :  { %2033 = vst.msk [vmem:[#allocation0 + $0x1308] ss:$16 sm:$0xc] %vm3_vm0, %v2028_v17   ;;  %2035 = vst.msk [vmem:[#allocation0 + $0x1308] ss:$16 sm:$0x30] %vm3_vm0, %v2028_v17  }
 0x2c6   :  { %2037 = vst.msk [vmem:[#allocation0 + $0x1308] ss:$16 sm:$0xc0] %vm3_vm0, %v2028_v17   ;;  %2070 = vst.msk [vmem:[#allocation0 + $0x1488] ss:$16 sm:$0x3] %vm3_vm0, %v2067_v26   ;;  %2637 = vrot.lane.b32.xlu1 %v11593_v22, %s12664_s29 }
 0x2c7   :  { %2072 = vst.msk [vmem:[#allocation0 + $0x1488] ss:$16 sm:$0xc] %vm3_vm0, %v2067_v26   ;;  %2074 = vst.msk [vmem:[#allocation0 + $0x1488] ss:$16 sm:$0x30] %vm3_vm0, %v2067_v26   ;;  %2624 = vrot.lane.b32.xlu0 %v11592_v23, %s12664_s29 }
 0x2c8   :  { %2076 = vst.msk [vmem:[#allocation0 + $0x1488] ss:$16 sm:$0xc0] %vm3_vm0, %v2067_v26   ;;  %2057 = vst.msk [vmem:[#allocation0 + $0x1408] ss:$16 sm:$0x3] %vm3_vm0, %v2054_v46  }
 0x2c9   :  { %2059 = vst.msk [vmem:[#allocation0 + $0x1408] ss:$16 sm:$0xc] %vm3_vm0, %v2054_v46   ;;  %2061 = vst.msk [vmem:[#allocation0 + $0x1408] ss:$16 sm:$0x30] %vm3_vm0, %v2054_v46  }
 0x2ca   :  { %2063 = vst.msk [vmem:[#allocation0 + $0x1408] ss:$16 sm:$0xc0] %vm3_vm0, %v2054_v46   ;;  %v11595_v47 = vld [vmem:[%s17894_s0 + $0xb8] sm:$0xff]   ;;  %v11594_v32 = vld [vmem:[%s17894_s0 + $0xb0] sm:$0xff]   ;;  %v11597_v37 = vld [vmem:[%s17894_s0 + $0xc8] sm:$0xff]  }
 0x2cb   :  { %2096 = vst.msk [vmem:[#allocation0 + $0x1588] ss:$16 sm:$0x3] %vm3_vm0, %v2093_v33   ;;  %2098 = vst.msk [vmem:[#allocation0 + $0x1588] ss:$16 sm:$0xc] %vm3_vm0, %v2093_v33   ;;  %2663 = vrot.lane.b32.xlu1 %v11595_v47, %s12664_s29  ;;  %2650 = vrot.lane.b32.xlu0 %v11594_v32, %s12664_s29 }
 0x2cc   :  { %2100 = vst.msk [vmem:[#allocation0 + $0x1588] ss:$16 sm:$0x30] %vm3_vm0, %v2093_v33   ;;  %2102 = vst.msk [vmem:[#allocation0 + $0x1588] ss:$16 sm:$0xc0] %vm3_vm0, %v2093_v33  }
 0x2cd   :  { %2083 = vst.msk [vmem:[#allocation0 + $0x1508] ss:$16 sm:$0x3] %vm3_vm0, %v2080_v36   ;;  %2085 = vst.msk [vmem:[#allocation0 + $0x1508] ss:$16 sm:$0xc] %vm3_vm0, %v2080_v36  }
 0x2ce   :  { %2087 = vst.msk [vmem:[#allocation0 + $0x1508] ss:$16 sm:$0x30] %vm3_vm0, %v2080_v36   ;;  %2089 = vst.msk [vmem:[#allocation0 + $0x1508] ss:$16 sm:$0xc0] %vm3_vm0, %v2080_v36  }
 0x2cf   :  { %v11596_v27 = vld [vmem:[%s17894_s0 + $0xc0] sm:$0xff]   ;;  %2122 = vst.msk [vmem:[#allocation0 + $0x1688] ss:$16 sm:$0x3] %vm3_vm0, %v2119_v34   ;;  %2689 = vrot.lane.b32.xlu1 %v11597_v37, %s12664_s29  ;;  %v11599_v11 = vld [vmem:[%s17894_s0 + $0xd8] sm:$0xff]   ;;  %v11598_v35 = vld [vmem:[%s17894_s0 + $0xd0] sm:$0xff]  }
 0x2d0   :  { %2124 = vst.msk [vmem:[#allocation0 + $0x1688] ss:$16 sm:$0xc] %vm3_vm0, %v2119_v34   ;;  %2126 = vst.msk [vmem:[#allocation0 + $0x1688] ss:$16 sm:$0x30] %vm3_vm0, %v2119_v34   ;;  %2676 = vrot.lane.b32.xlu0 %v11596_v27, %s12664_s29 }
 0x2d1   :  { %2128 = vst.msk [vmem:[#allocation0 + $0x1688] ss:$16 sm:$0xc0] %vm3_vm0, %v2119_v34   ;;  %2109 = vst.msk [vmem:[#allocation0 + $0x1608] ss:$16 sm:$0x3] %vm3_vm0, %v2106_v10  }
 0x2d2   :  { %2111 = vst.msk [vmem:[#allocation0 + $0x1608] ss:$16 sm:$0xc] %vm3_vm0, %v2106_v10   ;;  %2113 = vst.msk [vmem:[#allocation0 + $0x1608] ss:$16 sm:$0x30] %vm3_vm0, %v2106_v10  }
 0x2d3   :  { %2115 = vst.msk [vmem:[#allocation0 + $0x1608] ss:$16 sm:$0xc0] %vm3_vm0, %v2106_v10   ;;  %2148 = vst.msk [vmem:[#allocation0 + $0x1788] ss:$16 sm:$0x3] %vm3_vm0, %v2145_v40   ;;  %2715 = vrot.lane.b32.xlu1 %v11599_v11, %s12664_s29 }
 0x2d4   :  { %2150 = vst.msk [vmem:[#allocation0 + $0x1788] ss:$16 sm:$0xc] %vm3_vm0, %v2145_v40   ;;  %2152 = vst.msk [vmem:[#allocation0 + $0x1788] ss:$16 sm:$0x30] %vm3_vm0, %v2145_v40   ;;  %2702 = vrot.lane.b32.xlu0 %v11598_v35, %s12664_s29 }
 0x2d5   :  { %2154 = vst.msk [vmem:[#allocation0 + $0x1788] ss:$16 sm:$0xc0] %vm3_vm0, %v2145_v40   ;;  %2135 = vst.msk [vmem:[#allocation0 + $0x1708] ss:$16 sm:$0x3] %vm3_vm0, %v2132_v41  }
 0x2d6   :  { %2137 = vst.msk [vmem:[#allocation0 + $0x1708] ss:$16 sm:$0xc] %vm3_vm0, %v2132_v41   ;;  %2139 = vst.msk [vmem:[#allocation0 + $0x1708] ss:$16 sm:$0x30] %vm3_vm0, %v2132_v41  }
 0x2d7   :  { %2141 = vst.msk [vmem:[#allocation0 + $0x1708] ss:$16 sm:$0xc0] %vm3_vm0, %v2132_v41   ;;  %v11601_v48 = vld [vmem:[%s17894_s0 + $0xe8] sm:$0xff]   ;;  %v11600_v49 = vld [vmem:[%s17894_s0 + $0xe0] sm:$0xff]   ;;  %v11603_v25 = vld [vmem:[%s17894_s0 + $0xf8] sm:$0xff]  }
 0x2d8   :  { %2174 = vst.msk [vmem:[#allocation0 + $0x1888] ss:$16 sm:$0x3] %vm3_vm0, %v2171_v50   ;;  %2176 = vst.msk [vmem:[#allocation0 + $0x1888] ss:$16 sm:$0xc] %vm3_vm0, %v2171_v50   ;;  %2741 = vrot.lane.b32.xlu1 %v11601_v48, %s12664_s29  ;;  %2728 = vrot.lane.b32.xlu0 %v11600_v49, %s12664_s29 }
 0x2d9   :  { %2178 = vst.msk [vmem:[#allocation0 + $0x1888] ss:$16 sm:$0x30] %vm3_vm0, %v2171_v50   ;;  %2180 = vst.msk [vmem:[#allocation0 + $0x1888] ss:$16 sm:$0xc0] %vm3_vm0, %v2171_v50  }
 0x2da   :  { %2161 = vst.msk [vmem:[#allocation0 + $0x1808] ss:$16 sm:$0x3] %vm3_vm0, %v2158_v24   ;;  %2163 = vst.msk [vmem:[#allocation0 + $0x1808] ss:$16 sm:$0xc] %vm3_vm0, %v2158_v24  }
 0x2db   :  { %2165 = vst.msk [vmem:[#allocation0 + $0x1808] ss:$16 sm:$0x30] %vm3_vm0, %v2158_v24   ;;  %2167 = vst.msk [vmem:[#allocation0 + $0x1808] ss:$16 sm:$0xc0] %vm3_vm0, %v2158_v24  }
 0x2dc   :  { %v11602_v44 = vld [vmem:[%s17894_s0 + $0xf0] sm:$0xff]   ;;  %2767 = vrot.lane.b32.xlu1 %v11603_v25, %s12664_s29  ;;  %v11605_v45 = vld [vmem:[%s17894_s0 + $0x108] sm:$0xff]   ;;  %v11604_v52 = vld [vmem:[%s17894_s0 + $0x100] sm:$0xff]   ;;  %2200 = vst.msk [vmem:[#allocation0 + $0x1988] ss:$16 sm:$0x3] %vm3_vm0, %v2197_v38  }
 0x2dd   :  { %2754 = vrot.lane.b32.xlu0 %v11602_v44, %s12664_s29  ;;  %v11607_v53 = vld [vmem:[%s17894_s0 + $0x118] sm:$0xff]   ;;  %v11606_v0 = vld [vmem:[%s17894_s0 + $0x110] sm:$0xff]   ;;  %v11609_v2 = vld [vmem:[%s17894_s0 + $0x128] sm:$0xff]   ;;  %2202 = vst.msk [vmem:[#allocation0 + $0x1988] ss:$16 sm:$0xc] %vm3_vm0, %v2197_v38  }
 0x2de   :  { %v11608_v14 = vld [vmem:[%s17894_s0 + $0x120] sm:$0xff]   ;;  %v11611_v39 = vld [vmem:[%s17894_s0 + $0x138] sm:$0xff]   ;;  %v11610_v6 = vld [vmem:[%s17894_s0 + $0x130] sm:$0xff]   ;;  %2204 = vst.msk [vmem:[#allocation0 + $0x1988] ss:$16 sm:$0x30] %vm3_vm0, %v2197_v38  }
 0x2df   :  { %v11613_v7 = vld [vmem:[%s17894_s0 + $0x148] sm:$0xff]   ;;  %v11612_v15 = vld [vmem:[%s17894_s0 + $0x140] sm:$0xff]   ;;  %v11615_v51 = vld [vmem:[%s17894_s0 + $0x158] sm:$0xff]   ;;  %2206 = vst.msk [vmem:[#allocation0 + $0x1988] ss:$16 sm:$0xc0] %vm3_vm0, %v2197_v38   ;;  %v2378_v17 = vpop.permute.xlu1 %2377  }
 0x2e0   :  { %2793 = vrot.lane.b32.xlu1 %v11605_v45, %s12664_s29  ;;  %v11614_v54 = vld [vmem:[%s17894_s0 + $0x150] sm:$0xff]   ;;  %v11617_v58 = vld [vmem:[%s17894_s0 + $0x168] sm:$0xff]   ;;  %v11616_v59 = vld [vmem:[%s17894_s0 + $0x160] sm:$0xff]   ;;  %2187 = vst.msk [vmem:[#allocation0 + $0x1908] ss:$16 sm:$0x3] %vm3_vm0, %v2184_v55  }
 0x2e1   :  { %2780 = vrot.lane.b32.xlu0 %v11604_v52, %s12664_s29  ;;  %2189 = vst.msk [vmem:[#allocation0 + $0x1908] ss:$16 sm:$0xc] %vm3_vm0, %v2184_v55   ;;  %2191 = vst.msk [vmem:[#allocation0 + $0x1908] ss:$16 sm:$0x30] %vm3_vm0, %v2184_v55  }
 0x2e2   :  { %2193 = vst.msk [vmem:[#allocation0 + $0x1908] ss:$16 sm:$0xc0] %vm3_vm0, %v2184_v55   ;;  %v11619_v62 = vld [vmem:[%s17894_s0 + $0x178] sm:$0xff]   ;;  %v11618_v8 = vld [vmem:[%s17894_s0 + $0x170] sm:$0xff]   ;;  %v11621_v57 = vld [vmem:[%s17894_s0 + $0x188] sm:$0xff]  }
 0x2e3   :  { %2226 = vst.msk [vmem:[#allocation0 + $0x1a88] ss:$16 sm:$0x3] %vm3_vm0, %v2223_v63   ;;  %2228 = vst.msk [vmem:[#allocation0 + $0x1a88] ss:$16 sm:$0xc] %vm3_vm0, %v2223_v63  }
 0x2e4   :  { %2819 = vrot.lane.b32.xlu1 %v11607_v53, %s12664_s29  ;;  %2230 = vst.msk [vmem:[#allocation0 + $0x1a88] ss:$16 sm:$0x30] %vm3_vm0, %v2223_v63   ;;  %2232 = vst.msk [vmem:[#allocation0 + $0x1a88] ss:$16 sm:$0xc0] %vm3_vm0, %v2223_v63  }
 0x2e5   :  { %2806 = vrot.lane.b32.xlu0 %v11606_v0, %s12664_s29  ;;  %2213 = vst.msk [vmem:[#allocation0 + $0x1a08] ss:$16 sm:$0x3] %vm3_vm0, %v2210_v56   ;;  %2215 = vst.msk [vmem:[#allocation0 + $0x1a08] ss:$16 sm:$0xc] %vm3_vm0, %v2210_v56  }
 0x2e6   :  { %2217 = vst.msk [vmem:[#allocation0 + $0x1a08] ss:$16 sm:$0x30] %vm3_vm0, %v2210_v56   ;;  %2219 = vst.msk [vmem:[#allocation0 + $0x1a08] ss:$16 sm:$0xc0] %vm3_vm0, %v2210_v56   ;;  %v2365_v23 = vpop.permute.xlu0 %2364   ;;  %v2404_v46 = vpop.permute.xlu1 %2403  }
 0x2e7   :  { %v11620_v21 = vld [vmem:[%s17894_s0 + $0x180] sm:$0xff]   ;;  %2252 = vst.msk [vmem:[#allocation0 + $0x1b88] ss:$16 sm:$0x3] %vm3_vm0, %v2249_v20   ;;  %v11623_v12 = vld [vmem:[%s17894_s0 + $0x198] sm:$0xff]   ;;  %v11622_v29 = vld [vmem:[%s17894_s0 + $0x190] sm:$0xff]  }
 0x2e8   :  { %2845 = vrot.lane.b32.xlu1 %v11609_v2, %s12664_s29  ;;  %2254 = vst.msk [vmem:[#allocation0 + $0x1b88] ss:$16 sm:$0xc] %vm3_vm0, %v2249_v20   ;;  %2256 = vst.msk [vmem:[#allocation0 + $0x1b88] ss:$16 sm:$0x30] %vm3_vm0, %v2249_v20  }
 0x2e9   :  { %2832 = vrot.lane.b32.xlu0 %v11608_v14, %s12664_s29  ;;  %2258 = vst.msk [vmem:[#allocation0 + $0x1b88] ss:$16 sm:$0xc0] %vm3_vm0, %v2249_v20   ;;  %2239 = vst.msk [vmem:[#allocation0 + $0x1b08] ss:$16 sm:$0x3] %vm3_vm0, %v2236_v9  }
 0x2ea   :  { %2241 = vst.msk [vmem:[#allocation0 + $0x1b08] ss:$16 sm:$0xc] %vm3_vm0, %v2236_v9   ;;  %2243 = vst.msk [vmem:[#allocation0 + $0x1b08] ss:$16 sm:$0x30] %vm3_vm0, %v2236_v9  }
 0x2eb   :  { %2245 = vst.msk [vmem:[#allocation0 + $0x1b08] ss:$16 sm:$0xc0] %vm3_vm0, %v2236_v9   ;;  %2278 = vst.msk [vmem:[#allocation0 + $0x1c88] ss:$16 sm:$0x3] %vm3_vm0, %v2275_v28  }
 0x2ec   :  { %2871 = vrot.lane.b32.xlu1 %v11611_v39, %s12664_s29  ;;  %2280 = vst.msk [vmem:[#allocation0 + $0x1c88] ss:$16 sm:$0xc] %vm3_vm0, %v2275_v28   ;;  %2282 = vst.msk [vmem:[#allocation0 + $0x1c88] ss:$16 sm:$0x30] %vm3_vm0, %v2275_v28   ;;  %v2391_v32 = vpop.permute.xlu0 %2390  }
 0x2ed   :  { %2858 = vrot.lane.b32.xlu0 %v11610_v6, %s12664_s29  ;;  %2284 = vst.msk [vmem:[#allocation0 + $0x1c88] ss:$16 sm:$0xc0] %vm3_vm0, %v2275_v28   ;;  %2265 = vst.msk [vmem:[#allocation0 + $0x1c08] ss:$16 sm:$0x3] %vm3_vm0, %v2262_v42  }
 0x2ee   :  { %2267 = vst.msk [vmem:[#allocation0 + $0x1c08] ss:$16 sm:$0xc] %vm3_vm0, %v2262_v42   ;;  %2269 = vst.msk [vmem:[#allocation0 + $0x1c08] ss:$16 sm:$0x30] %vm3_vm0, %v2262_v42  }
 0x2ef   :  { %2271 = vst.msk [vmem:[#allocation0 + $0x1c08] ss:$16 sm:$0xc0] %vm3_vm0, %v2262_v42   ;;  %v11625_v43 = vld [vmem:[%s17894_s0 + $0x1a8] sm:$0xff]   ;;  %v11624_v16 = vld [vmem:[%s17894_s0 + $0x1a0] sm:$0xff]   ;;  %v11627_v3 = vld [vmem:[%s17894_s0 + $0x1b8] sm:$0xff]  }
 0x2f0   :  { %2897 = vrot.lane.b32.xlu1 %v11613_v7, %s12664_s29  ;;  %2304 = vst.msk [vmem:[#allocation0 + $0x1d88] ss:$16 sm:$0x3] %vm3_vm0, %v2301_v13   ;;  %2306 = vst.msk [vmem:[#allocation0 + $0x1d88] ss:$16 sm:$0xc] %vm3_vm0, %v2301_v13   ;;  %v2430_v10 = vpop.permute.xlu1 %2429  }
 0x2f1   :  { %2884 = vrot.lane.b32.xlu0 %v11612_v15, %s12664_s29  ;;  %2308 = vst.msk [vmem:[#allocation0 + $0x1d88] ss:$16 sm:$0x30] %vm3_vm0, %v2301_v13   ;;  %2310 = vst.msk [vmem:[#allocation0 + $0x1d88] ss:$16 sm:$0xc0] %vm3_vm0, %v2301_v13  }
 0x2f2   :  { %2291 = vst.msk [vmem:[#allocation0 + $0x1d08] ss:$16 sm:$0x3] %vm3_vm0, %v2288_v1   ;;  %2293 = vst.msk [vmem:[#allocation0 + $0x1d08] ss:$16 sm:$0xc] %vm3_vm0, %v2288_v1  }
 0x2f3   :  { %2295 = vst.msk [vmem:[#allocation0 + $0x1d08] ss:$16 sm:$0x30] %vm3_vm0, %v2288_v1   ;;  %2297 = vst.msk [vmem:[#allocation0 + $0x1d08] ss:$16 sm:$0xc0] %vm3_vm0, %v2288_v1  }
 0x2f4   :  { %2923 = vrot.lane.b32.xlu1 %v11615_v51, %s12664_s29  ;;  %v11626_v5 = vld [vmem:[%s17894_s0 + $0x1b0] sm:$0xff]   ;;  %2330 = vst.msk [vmem:[#allocation0 + $0x1e88] ss:$16 sm:$0x3] %vm3_vm0, %v2327_v4   ;;  %v11629_v31 = vld [vmem:[%s17894_s0 + $0x1c8] sm:$0xff]   ;;  %v11628_v61 = vld [vmem:[%s17894_s0 + $0x1c0] sm:$0xff]  }
 0x2f5   :  { %2910 = vrot.lane.b32.xlu0 %v11614_v54, %s12664_s29  ;;  %2332 = vst.msk [vmem:[#allocation0 + $0x1e88] ss:$16 sm:$0xc] %vm3_vm0, %v2327_v4   ;;  %2334 = vst.msk [vmem:[#allocation0 + $0x1e88] ss:$16 sm:$0x30] %vm3_vm0, %v2327_v4  }
 0x2f6   :  { %2336 = vst.msk [vmem:[#allocation0 + $0x1e88] ss:$16 sm:$0xc0] %vm3_vm0, %v2327_v4   ;;  %2317 = vst.msk [vmem:[#allocation0 + $0x1e08] ss:$16 sm:$0x3] %vm3_vm0, %v2314_v30  }
 0x2f7   :  { %2319 = vst.msk [vmem:[#allocation0 + $0x1e08] ss:$16 sm:$0xc] %vm3_vm0, %v2314_v30   ;;  %2321 = vst.msk [vmem:[#allocation0 + $0x1e08] ss:$16 sm:$0x30] %vm3_vm0, %v2314_v30  }
 0x2f8   :  { %2949 = vrot.lane.b32.xlu1 %v11617_v58, %s12664_s29  ;;  %2323 = vst.msk [vmem:[#allocation0 + $0x1e08] ss:$16 sm:$0xc0] %vm3_vm0, %v2314_v30   ;;  %2356 = vst.msk [vmem:[#allocation0 + $0x1f88] ss:$16 sm:$0x3] %vm3_vm0, %v2353_v60  }
 0x2f9   :  { %2936 = vrot.lane.b32.xlu0 %v11616_v59, %s12664_s29  ;;  %2358 = vst.msk [vmem:[#allocation0 + $0x1f88] ss:$16 sm:$0xc] %vm3_vm0, %v2353_v60   ;;  %2360 = vst.msk [vmem:[#allocation0 + $0x1f88] ss:$16 sm:$0x30] %vm3_vm0, %v2353_v60  }
 0x2fa   :  { %2362 = vst.msk [vmem:[#allocation0 + $0x1f88] ss:$16 sm:$0xc0] %vm3_vm0, %v2353_v60   ;;  %2343 = vst.msk [vmem:[#allocation0 + $0x1f08] ss:$16 sm:$0x3] %vm3_vm0, %v2340_v18  }
 0x2fb   :  { %2345 = vst.msk [vmem:[#allocation0 + $0x1f08] ss:$16 sm:$0xc] %vm3_vm0, %v2340_v18   ;;  %2347 = vst.msk [vmem:[#allocation0 + $0x1f08] ss:$16 sm:$0x30] %vm3_vm0, %v2340_v18  }
 0x2fc   :  { %2975 = vrot.lane.b32.xlu1 %v11619_v62, %s12664_s29  ;;  %2349 = vst.msk [vmem:[#allocation0 + $0x1f08] ss:$16 sm:$0xc0] %vm3_vm0, %v2340_v18   ;;  %v11631_v19 = vld [vmem:[%s17894_s0 + $0x1d8] sm:$0xff]   ;;  %v11630_v22 = vld [vmem:[%s17894_s0 + $0x1d0] sm:$0xff]   ;;  %v11633_v26 = vld [vmem:[%s17894_s0 + $0x1e8] sm:$0xff]  }
 0x2fd   :  { %2962 = vrot.lane.b32.xlu0 %v11618_v8, %s12664_s29  ;;  %2381 = vst.msk [vmem:[#allocation0 + $0x89] ss:$16 sm:$0x3] %vm3_vm0, %v2378_v17   ;;  %2383 = vst.msk [vmem:[#allocation0 + $0x89] ss:$16 sm:$0xc] %vm3_vm0, %v2378_v17  }
 0x2fe   :  { %2385 = vst.msk [vmem:[#allocation0 + $0x89] ss:$16 sm:$0x30] %vm3_vm0, %v2378_v17   ;;  %2387 = vst.msk [vmem:[#allocation0 + $0x89] ss:$16 sm:$0xc0] %vm3_vm0, %v2378_v17  }
 0x2ff   :  { %2368 = vst.msk [vmem:[#allocation0 + $0x9] ss:$16 sm:$0x3] %vm3_vm0, %v2365_v23   ;;  %2370 = vst.msk [vmem:[#allocation0 + $0x9] ss:$16 sm:$0xc] %vm3_vm0, %v2365_v23   ;;  %v2417_v41 = vpop.permute.xlu0 %2416   ;;  %v2456_v0 = vpop.permute.xlu1 %2455  }
 0x300   :  { %3001 = vrot.lane.b32.xlu1 %v11621_v57, %s12664_s29  ;;  %2372 = vst.msk [vmem:[#allocation0 + $0x9] ss:$16 sm:$0x30] %vm3_vm0, %v2365_v23   ;;  %2374 = vst.msk [vmem:[#allocation0 + $0x9] ss:$16 sm:$0xc0] %vm3_vm0, %v2365_v23  }
 0x301   :  { %2988 = vrot.lane.b32.xlu0 %v11620_v21, %s12664_s29  ;;  %v11632_v47 = vld [vmem:[%s17894_s0 + $0x1e0] sm:$0xff]   ;;  %2407 = vst.msk [vmem:[#allocation0 + $0x189] ss:$16 sm:$0x3] %vm3_vm0, %v2404_v46   ;;  %v11635_v33 = vld [vmem:[%s17894_s0 + $0x1f8] sm:$0xff]   ;;  %v11634_v36 = vld [vmem:[%s17894_s0 + $0x1f0] sm:$0xff]  }
 0x302   :  { %2409 = vst.msk [vmem:[#allocation0 + $0x189] ss:$16 sm:$0xc] %vm3_vm0, %v2404_v46   ;;  %2411 = vst.msk [vmem:[#allocation0 + $0x189] ss:$16 sm:$0x30] %vm3_vm0, %v2404_v46  }
 0x303   :  { %2413 = vst.msk [vmem:[#allocation0 + $0x189] ss:$16 sm:$0xc0] %vm3_vm0, %v2404_v46   ;;  %2394 = vst.msk [vmem:[#allocation0 + $0x109] ss:$16 sm:$0x3] %vm3_vm0, %v2391_v32   ;;  %v2482_v63 = vpop.permute.xlu1 %2481  }
 0x304   :  { %3027 = vrot.lane.b32.xlu1 %v11623_v12, %s12664_s29  ;;  %2396 = vst.msk [vmem:[#allocation0 + $0x109] ss:$16 sm:$0xc] %vm3_vm0, %v2391_v32   ;;  %2398 = vst.msk [vmem:[#allocation0 + $0x109] ss:$16 sm:$0x30] %vm3_vm0, %v2391_v32  }
 0x305   :  { %3014 = vrot.lane.b32.xlu0 %v11622_v29, %s12664_s29  ;;  %2400 = vst.msk [vmem:[#allocation0 + $0x109] ss:$16 sm:$0xc0] %vm3_vm0, %v2391_v32   ;;  %v3314_v37 = vld [vmem:[#allocation0 + $0x88] sm:$0x3]  ;;  %v2443_v6 = vpop.permute.xlu0 %2442  }
 0x306   :  { %v3328_v27 = vld [vmem:[#allocation0 + $0x98] sm:$0x3]  ;;  %v3342_v34 = vld [vmem:[#allocation0 + $0xa8] sm:$0x3]  ;;  %11652 = vst [vmem:[%s17895_s1 + $0x22] sm:$0x3] %v3314_v37 }
 0x307   :  { %11654 = vst [vmem:[%s17895_s1 + $0x26] sm:$0x3] %v3328_v27  ;;  %11656 = vst [vmem:[%s17895_s1 + $0x2a] sm:$0x3] %v3342_v34  ;;  %v3356_v11 = vld [vmem:[#allocation0 + $0xb8] sm:$0x3] }
 0x308   :  { %3053 = vrot.lane.b32.xlu1 %v11625_v43, %s12664_s29  ;;  %v3370_v35 = vld [vmem:[#allocation0 + $0xc8] sm:$0x3]  ;;  %v3384_v40 = vld [vmem:[#allocation0 + $0xd8] sm:$0x3]  ;;  %11658 = vst [vmem:[%s17895_s1 + $0x2e] sm:$0x3] %v3356_v11 }
 0x309   :  { %3040 = vrot.lane.b32.xlu0 %v11624_v16, %s12664_s29  ;;  %2433 = vst.msk [vmem:[#allocation0 + $0x289] ss:$16 sm:$0x3] %vm3_vm0, %v2430_v10   ;;  %2435 = vst.msk [vmem:[#allocation0 + $0x289] ss:$16 sm:$0xc] %vm3_vm0, %v2430_v10   ;;  %v2469_v20 = vpop.permute.xlu0 %2468  }
 0x30a   :  { %2437 = vst.msk [vmem:[#allocation0 + $0x289] ss:$16 sm:$0x30] %vm3_vm0, %v2430_v10   ;;  %2439 = vst.msk [vmem:[#allocation0 + $0x289] ss:$16 sm:$0xc0] %vm3_vm0, %v2430_v10  }
 0x30b   :  { %11660 = vst [vmem:[%s17895_s1 + $0x32] sm:$0x3] %v3370_v35  ;;  %11662 = vst [vmem:[%s17895_s1 + $0x36] sm:$0x3] %v3384_v40  ;;  %v3398_v48 = vld [vmem:[#allocation0 + $0xe8] sm:$0x3] }
 0x30c   :  { %3079 = vrot.lane.b32.xlu1 %v11627_v3, %s12664_s29  ;;  %v3412_v49 = vld [vmem:[#allocation0 + $0xf8] sm:$0x3]  ;;  %v3203_v50 = vld [vmem:[#allocation0 + $0x8] sm:$0x3]  ;;  %11664 = vst [vmem:[%s17895_s1 + $0x3a] sm:$0x3] %v3398_v48 }
 0x30d   :  { %3066 = vrot.lane.b32.xlu0 %v11626_v5, %s12664_s29  ;;  %2420 = vst.msk [vmem:[#allocation0 + $0x209] ss:$16 sm:$0x3] %vm3_vm0, %v2417_v41   ;;  %2422 = vst.msk [vmem:[#allocation0 + $0x209] ss:$16 sm:$0xc] %vm3_vm0, %v2417_v41  }
 0x30e   :  { %2424 = vst.msk [vmem:[#allocation0 + $0x209] ss:$16 sm:$0x30] %vm3_vm0, %v2417_v41   ;;  %2426 = vst.msk [vmem:[#allocation0 + $0x209] ss:$16 sm:$0xc0] %vm3_vm0, %v2417_v41  }
 0x30f   :  { %11666 = vst [vmem:[%s17895_s1 + $0x3e] sm:$0x3] %v3412_v49  ;;  %11636 = vst [vmem:[%s17895_s1 + $0x2] sm:$0x3] %v3203_v50  ;;  %v3216_v24 = vld [vmem:[#allocation0 + $0x18] sm:$0x3] }
 0x310   :  { %3105 = vrot.lane.b32.xlu1 %v11629_v31, %s12664_s29  ;;  %v3230_v25 = vld [vmem:[#allocation0 + $0x28] sm:$0x3]  ;;  %v3244_v44 = vld [vmem:[#allocation0 + $0x38] sm:$0x3]  ;;  %11638 = vst [vmem:[%s17895_s1 + $0x6] sm:$0x3] %v3216_v24 }
 0x311   :  { %3092 = vrot.lane.b32.xlu0 %v11628_v61, %s12664_s29  ;;  %11640 = vst [vmem:[%s17895_s1 + $0xa] sm:$0x3] %v3230_v25  ;;  %11642 = vst [vmem:[%s17895_s1 + $0xe] sm:$0x3] %v3244_v44  ;;  %v3258_v45 = vld [vmem:[#allocation0 + $0x48] sm:$0x3] }
 0x312   :  { %v3272_v52 = vld [vmem:[#allocation0 + $0x58] sm:$0x3]  ;;  %v3286_v53 = vld [vmem:[#allocation0 + $0x68] sm:$0x3]  ;;  %11644 = vst [vmem:[%s17895_s1 + $0x12] sm:$0x3] %v3258_v45 }
 0x313   :  { %11646 = vst [vmem:[%s17895_s1 + $0x16] sm:$0x3] %v3272_v52  ;;  %11648 = vst [vmem:[%s17895_s1 + $0x1a] sm:$0x3] %v3286_v53  ;;  %v3300_v2 = vld [vmem:[#allocation0 + $0x78] sm:$0x3] }
 0x314   :  { %3131 = vrot.lane.b32.xlu1 %v11631_v19, %s12664_s29  ;;  %v3538_v14 = vld [vmem:[#allocation0 + $0x188] sm:$0x3]  ;;  %v3552_v39 = vld [vmem:[#allocation0 + $0x198] sm:$0x3]  ;;  %11650 = vst [vmem:[%s17895_s1 + $0x1e] sm:$0x3] %v3300_v2 }
 0x315   :  { %3118 = vrot.lane.b32.xlu0 %v11630_v22, %s12664_s29  ;;  %2459 = vst.msk [vmem:[#allocation0 + $0x389] ss:$16 sm:$0x3] %vm3_vm0, %v2456_v0   ;;  %2461 = vst.msk [vmem:[#allocation0 + $0x389] ss:$16 sm:$0xc] %vm3_vm0, %v2456_v0  }
 0x316   :  { %2463 = vst.msk [vmem:[#allocation0 + $0x389] ss:$16 sm:$0x30] %vm3_vm0, %v2456_v0   ;;  %2465 = vst.msk [vmem:[#allocation0 + $0x389] ss:$16 sm:$0xc0] %vm3_vm0, %v2456_v0  }
 0x317   :  { %11684 = vst [vmem:[%s17895_s1 + $0x62] sm:$0x3] %v3538_v14  ;;  %11686 = vst [vmem:[%s17895_s1 + $0x66] sm:$0x3] %v3552_v39  ;;  %v3566_v7 = vld [vmem:[#allocation0 + $0x1a8] sm:$0x3] }
 0x318   :  { %3157 = vrot.lane.b32.xlu1 %v11633_v26, %s12664_s29  ;;  %v3580_v15 = vld [vmem:[#allocation0 + $0x1b8] sm:$0x3]  ;;  %v3594_v51 = vld [vmem:[#allocation0 + $0x1c8] sm:$0x3]  ;;  %11688 = vst [vmem:[%s17895_s1 + $0x6a] sm:$0x3] %v3566_v7 }
 0x319   :  { %3144 = vrot.lane.b32.xlu0 %v11632_v47, %s12664_s29  ;;  %2446 = vst.msk [vmem:[#allocation0 + $0x309] ss:$16 sm:$0x3] %vm3_vm0, %v2443_v6   ;;  %2448 = vst.msk [vmem:[#allocation0 + $0x309] ss:$16 sm:$0xc] %vm3_vm0, %v2443_v6  }
 0x31a   :  { %2450 = vst.msk [vmem:[#allocation0 + $0x309] ss:$16 sm:$0x30] %vm3_vm0, %v2443_v6   ;;  %2452 = vst.msk [vmem:[#allocation0 + $0x309] ss:$16 sm:$0xc0] %vm3_vm0, %v2443_v6  }
 0x31b   :  { %11690 = vst [vmem:[%s17895_s1 + $0x6e] sm:$0x3] %v3580_v15  ;;  %11692 = vst [vmem:[%s17895_s1 + $0x72] sm:$0x3] %v3594_v51  ;;  %v3608_v54 = vld [vmem:[#allocation0 + $0x1d8] sm:$0x3] }
 0x31c   :  { %3183 = vrot.lane.b32.xlu1 %v11635_v33, %s12664_s29  ;;  %v3622_v58 = vld [vmem:[#allocation0 + $0x1e8] sm:$0x3]  ;;  %v3636_v38 = vld [vmem:[#allocation0 + $0x1f8] sm:$0x3]  ;;  %11694 = vst [vmem:[%s17895_s1 + $0x76] sm:$0x3] %v3608_v54 }
 0x31d   :  { %3170 = vrot.lane.b32.xlu0 %v11634_v36, %s12664_s29  ;;  %11696 = vst [vmem:[%s17895_s1 + $0x7a] sm:$0x3] %v3622_v58  ;;  %11698 = vst [vmem:[%s17895_s1 + $0x7e] sm:$0x3] %v3636_v38  ;;  %v3426_v59 = vld [vmem:[#allocation0 + $0x108] sm:$0x3] }
 0x31e   :  { %v3440_v55 = vld [vmem:[#allocation0 + $0x118] sm:$0x3]  ;;  %v3454_v62 = vld [vmem:[#allocation0 + $0x128] sm:$0x3]  ;;  %11668 = vst [vmem:[%s17895_s1 + $0x42] sm:$0x3] %v3426_v59 }
 0x31f   :  { %11670 = vst [vmem:[%s17895_s1 + $0x46] sm:$0x3] %v3440_v55  ;;  %11672 = vst [vmem:[%s17895_s1 + $0x4a] sm:$0x3] %v3454_v62  ;;  %v3468_v8 = vld [vmem:[#allocation0 + $0x138] sm:$0x3] }
 0x320   :  { %v3482_v56 = vld [vmem:[#allocation0 + $0x148] sm:$0x3]  ;;  %v3496_v57 = vld [vmem:[#allocation0 + $0x158] sm:$0x3]  ;;  %11674 = vst [vmem:[%s17895_s1 + $0x4e] sm:$0x3] %v3468_v8 }
 0x321   :  { %2485 = vst.msk [vmem:[#allocation0 + $0x489] ss:$16 sm:$0x3] %vm3_vm0, %v2482_v63   ;;  %2487 = vst.msk [vmem:[#allocation0 + $0x489] ss:$16 sm:$0xc] %vm3_vm0, %v2482_v63  }
 0x322   :  { %2489 = vst.msk [vmem:[#allocation0 + $0x489] ss:$16 sm:$0x30] %vm3_vm0, %v2482_v63   ;;  %2491 = vst.msk [vmem:[#allocation0 + $0x489] ss:$16 sm:$0xc0] %vm3_vm0, %v2482_v63  }
 0x323   :  { %11676 = vst [vmem:[%s17895_s1 + $0x52] sm:$0x3] %v3482_v56  ;;  %11678 = vst [vmem:[%s17895_s1 + $0x56] sm:$0x3] %v3496_v57  ;;  %v3510_v21 = vld [vmem:[#allocation0 + $0x168] sm:$0x3]  ;;  %v2508_v1 = vpop.permute.xlu1 %2507   ;;  %v2495_v30 = vpop.permute.xlu0 %2494  }
 0x324   :  { %v3524_v9 = vld [vmem:[#allocation0 + $0x178] sm:$0x3]  ;;  %v3762_v12 = vld [vmem:[#allocation0 + $0x288] sm:$0x3]  ;;  %11680 = vst [vmem:[%s17895_s1 + $0x5a] sm:$0x3] %v3510_v21 }
 0x325   :  { %2472 = vst.msk [vmem:[#allocation0 + $0x409] ss:$16 sm:$0x3] %vm3_vm0, %v2469_v20   ;;  %2474 = vst.msk [vmem:[#allocation0 + $0x409] ss:$16 sm:$0xc] %vm3_vm0, %v2469_v20  }
 0x326   :  { %2476 = vst.msk [vmem:[#allocation0 + $0x409] ss:$16 sm:$0x30] %vm3_vm0, %v2469_v20   ;;  %2478 = vst.msk [vmem:[#allocation0 + $0x409] ss:$16 sm:$0xc0] %vm3_vm0, %v2469_v20  }
 0x327   :  { %11682 = vst [vmem:[%s17895_s1 + $0x5e] sm:$0x3] %v3524_v9  ;;  %11716 = vst [vmem:[%s17895_s1 + $0xa2] sm:$0x3] %v3762_v12  ;;  %v3776_v28 = vld [vmem:[#allocation0 + $0x298] sm:$0x3]  ;;  %v2534_v46 = vpop.permute.xlu1 %2533  }
 0x328   :  { %v3790_v29 = vld [vmem:[#allocation0 + $0x2a8] sm:$0x3]  ;;  %v3804_v42 = vld [vmem:[#allocation0 + $0x2b8] sm:$0x3]  ;;  %11718 = vst [vmem:[%s17895_s1 + $0xa6] sm:$0x3] %v3776_v28  ;;  %v2521_v36 = vpop.permute.xlu0 %2520  }
 0x329   :  { %11720 = vst [vmem:[%s17895_s1 + $0xaa] sm:$0x3] %v3790_v29  ;;  %11722 = vst [vmem:[%s17895_s1 + $0xae] sm:$0x3] %v3804_v42  ;;  %v3818_v43 = vld [vmem:[#allocation0 + $0x2c8] sm:$0x3] }
 0x32a   :  { %v3832_v13 = vld [vmem:[#allocation0 + $0x2d8] sm:$0x3]  ;;  %v3846_v16 = vld [vmem:[#allocation0 + $0x2e8] sm:$0x3]  ;;  %11724 = vst [vmem:[%s17895_s1 + $0xb2] sm:$0x3] %v3818_v43 }
 0x32b   :  { %11726 = vst [vmem:[%s17895_s1 + $0xb6] sm:$0x3] %v3832_v13  ;;  %11728 = vst [vmem:[%s17895_s1 + $0xba] sm:$0x3] %v3846_v16  ;;  %v3860_v3 = vld [vmem:[#allocation0 + $0x2f8] sm:$0x3]  ;;  %v2560_v49 = vpop.permute.xlu1 %2559  }
 0x32c   :  { %v3650_v4 = vld [vmem:[#allocation0 + $0x208] sm:$0x3]  ;;  %v3664_v5 = vld [vmem:[#allocation0 + $0x218] sm:$0x3]  ;;  %11730 = vst [vmem:[%s17895_s1 + $0xbe] sm:$0x3] %v3860_v3  ;;  %v2547_v44 = vpop.permute.xlu0 %2546  }
 0x32d   :  { %2511 = vst.msk [vmem:[#allocation0 + $0x589] ss:$16 sm:$0x3] %vm3_vm0, %v2508_v1   ;;  %2513 = vst.msk [vmem:[#allocation0 + $0x589] ss:$16 sm:$0xc] %vm3_vm0, %v2508_v1  }
 0x32e   :  { %2515 = vst.msk [vmem:[#allocation0 + $0x589] ss:$16 sm:$0x30] %vm3_vm0, %v2508_v1   ;;  %2517 = vst.msk [vmem:[#allocation0 + $0x589] ss:$16 sm:$0xc0] %vm3_vm0, %v2508_v1  }
 0x32f   :  { %11700 = vst [vmem:[%s17895_s1 + $0x82] sm:$0x3] %v3650_v4  ;;  %11702 = vst [vmem:[%s17895_s1 + $0x86] sm:$0x3] %v3664_v5  ;;  %v3678_v31 = vld [vmem:[#allocation0 + $0x228] sm:$0x3] }
 0x330   :  { %v3692_v60 = vld [vmem:[#allocation0 + $0x238] sm:$0x3]  ;;  %v3706_v61 = vld [vmem:[#allocation0 + $0x248] sm:$0x3]  ;;  %11704 = vst [vmem:[%s17895_s1 + $0x8a] sm:$0x3] %v3678_v31  ;;  %v2586_v15 = vpop.permute.xlu1 %2585   ;;  %v2573_v38 = vpop.permute.xlu0 %2572  }
 0x331   :  { %2498 = vst.msk [vmem:[#allocation0 + $0x509] ss:$16 sm:$0x3] %vm3_vm0, %v2495_v30   ;;  %2500 = vst.msk [vmem:[#allocation0 + $0x509] ss:$16 sm:$0xc] %vm3_vm0, %v2495_v30  }
 0x332   :  { %2502 = vst.msk [vmem:[#allocation0 + $0x509] ss:$16 sm:$0x30] %vm3_vm0, %v2495_v30   ;;  %2504 = vst.msk [vmem:[#allocation0 + $0x509] ss:$16 sm:$0xc0] %vm3_vm0, %v2495_v30  }
 0x333   :  { %11706 = vst [vmem:[%s17895_s1 + $0x8e] sm:$0x3] %v3692_v60  ;;  %11708 = vst [vmem:[%s17895_s1 + $0x92] sm:$0x3] %v3706_v61  ;;  %v3720_v18 = vld [vmem:[#allocation0 + $0x258] sm:$0x3] }
 0x334   :  { %v3734_v19 = vld [vmem:[#allocation0 + $0x268] sm:$0x3]  ;;  %v3748_v17 = vld [vmem:[#allocation0 + $0x278] sm:$0x3]  ;;  %11710 = vst [vmem:[%s17895_s1 + $0x96] sm:$0x3] %v3720_v18  ;;  %v2612_v9 = vpop.permute.xlu1 %2611  }
 0x335   :  { %11712 = vst [vmem:[%s17895_s1 + $0x9a] sm:$0x3] %v3734_v19  ;;  %11714 = vst [vmem:[%s17895_s1 + $0x9e] sm:$0x3] %v3748_v17  ;;  %v3986_v22 = vld [vmem:[#allocation0 + $0x388] sm:$0x3]  ;;  %v2599_v42 = vpop.permute.xlu0 %2598  }
 0x336   :  { %v4000_v23 = vld [vmem:[#allocation0 + $0x398] sm:$0x3]  ;;  %v4014_v26 = vld [vmem:[#allocation0 + $0x3a8] sm:$0x3]  ;;  %11748 = vst [vmem:[%s17895_s1 + $0xe2] sm:$0x3] %v3986_v22 }
 0x337   :  { %11750 = vst [vmem:[%s17895_s1 + $0xe6] sm:$0x3] %v4000_v23  ;;  %11752 = vst [vmem:[%s17895_s1 + $0xea] sm:$0x3] %v4014_v26  ;;  %v4028_v47 = vld [vmem:[#allocation0 + $0x3b8] sm:$0x3] }
 0x338   :  { %v4042_v32 = vld [vmem:[#allocation0 + $0x3c8] sm:$0x3]  ;;  %v4056_v33 = vld [vmem:[#allocation0 + $0x3d8] sm:$0x3]  ;;  %11754 = vst [vmem:[%s17895_s1 + $0xee] sm:$0x3] %v4028_v47  ;;  %v2638_v60 = vpop.permute.xlu1 %2637  }
 0x339   :  { %2537 = vst.msk [vmem:[#allocation0 + $0x689] ss:$16 sm:$0x3] %vm3_vm0, %v2534_v46   ;;  %2539 = vst.msk [vmem:[#allocation0 + $0x689] ss:$16 sm:$0xc] %vm3_vm0, %v2534_v46   ;;  %v2625_v17 = vpop.permute.xlu0 %2624  }
 0x33a   :  { %2541 = vst.msk [vmem:[#allocation0 + $0x689] ss:$16 sm:$0x30] %vm3_vm0, %v2534_v46   ;;  %2543 = vst.msk [vmem:[#allocation0 + $0x689] ss:$16 sm:$0xc0] %vm3_vm0, %v2534_v46  }
 0x33b   :  { %11756 = vst [vmem:[%s17895_s1 + $0xf2] sm:$0x3] %v4042_v32  ;;  %11758 = vst [vmem:[%s17895_s1 + $0xf6] sm:$0x3] %v4056_v33  ;;  %v4070_v37 = vld [vmem:[#allocation0 + $0x3e8] sm:$0x3] }
 0x33c   :  { %v4084_v27 = vld [vmem:[#allocation0 + $0x3f8] sm:$0x3]  ;;  %v3874_v34 = vld [vmem:[#allocation0 + $0x308] sm:$0x3]  ;;  %11760 = vst [vmem:[%s17895_s1 + $0xfa] sm:$0x3] %v4070_v37 }
 0x33d   :  { %2524 = vst.msk [vmem:[#allocation0 + $0x609] ss:$16 sm:$0x3] %vm3_vm0, %v2521_v36   ;;  %2526 = vst.msk [vmem:[#allocation0 + $0x609] ss:$16 sm:$0xc] %vm3_vm0, %v2521_v36  }
 0x33e   :  { %2528 = vst.msk [vmem:[#allocation0 + $0x609] ss:$16 sm:$0x30] %vm3_vm0, %v2521_v36   ;;  %2530 = vst.msk [vmem:[#allocation0 + $0x609] ss:$16 sm:$0xc0] %vm3_vm0, %v2521_v36  }
 0x33f   :  { %11762 = vst [vmem:[%s17895_s1 + $0xfe] sm:$0x3] %v4084_v27  ;;  %11732 = vst [vmem:[%s17895_s1 + $0xc2] sm:$0x3] %v3874_v34  ;;  %v3888_v10 = vld [vmem:[#allocation0 + $0x318] sm:$0x3]  ;;  %v2664_v27 = vpop.permute.xlu1 %2663  }
 0x340   :  { %v3902_v11 = vld [vmem:[#allocation0 + $0x328] sm:$0x3]  ;;  %v3916_v35 = vld [vmem:[#allocation0 + $0x338] sm:$0x3]  ;;  %11734 = vst [vmem:[%s17895_s1 + $0xc6] sm:$0x3] %v3888_v10 }
 0x341   :  { %11736 = vst [vmem:[%s17895_s1 + $0xca] sm:$0x3] %v3902_v11  ;;  %11738 = vst [vmem:[%s17895_s1 + $0xce] sm:$0x3] %v3916_v35  ;;  %v3930_v40 = vld [vmem:[#allocation0 + $0x348] sm:$0x3]  ;;  %v2651_v35 = vpop.permute.xlu0 %2650  }
 0x342   :  { %v3944_v41 = vld [vmem:[#allocation0 + $0x358] sm:$0x3]  ;;  %v3958_v48 = vld [vmem:[#allocation0 + $0x368] sm:$0x3]  ;;  %11740 = vst [vmem:[%s17895_s1 + $0xd2] sm:$0x3] %v3930_v40 }
 0x343   :  { %11742 = vst [vmem:[%s17895_s1 + $0xd6] sm:$0x3] %v3944_v41  ;;  %11744 = vst [vmem:[%s17895_s1 + $0xda] sm:$0x3] %v3958_v48  ;;  %v3972_v50 = vld [vmem:[#allocation0 + $0x378] sm:$0x3] }
 0x344   :  { %v4210_v24 = vld [vmem:[#allocation0 + $0x488] sm:$0x3]  ;;  %v4224_v25 = vld [vmem:[#allocation0 + $0x498] sm:$0x3]  ;;  %11746 = vst [vmem:[%s17895_s1 + $0xde] sm:$0x3] %v3972_v50 }
 0x345   :  { %2563 = vst.msk [vmem:[#allocation0 + $0x789] ss:$16 sm:$0x3] %vm3_vm0, %v2560_v49   ;;  %2565 = vst.msk [vmem:[#allocation0 + $0x789] ss:$16 sm:$0xc] %vm3_vm0, %v2560_v49  }
 0x346   :  { %2567 = vst.msk [vmem:[#allocation0 + $0x789] ss:$16 sm:$0x30] %vm3_vm0, %v2560_v49   ;;  %2569 = vst.msk [vmem:[#allocation0 + $0x789] ss:$16 sm:$0xc0] %vm3_vm0, %v2560_v49  }
 0x347   :  { %11780 = vst [vmem:[%s17895_s1 + $0x122] sm:$0x3] %v4210_v24  ;;  %11782 = vst [vmem:[%s17895_s1 + $0x126] sm:$0x3] %v4224_v25  ;;  %v4238_v45 = vld [vmem:[#allocation0 + $0x4a8] sm:$0x3] }
 0x348   :  { %v4252_v52 = vld [vmem:[#allocation0 + $0x4b8] sm:$0x3]  ;;  %v4266_v53 = vld [vmem:[#allocation0 + $0x4c8] sm:$0x3]  ;;  %11784 = vst [vmem:[%s17895_s1 + $0x12a] sm:$0x3] %v4238_v45 }
 0x349   :  { %2550 = vst.msk [vmem:[#allocation0 + $0x709] ss:$16 sm:$0x3] %vm3_vm0, %v2547_v44   ;;  %2552 = vst.msk [vmem:[#allocation0 + $0x709] ss:$16 sm:$0xc] %vm3_vm0, %v2547_v44  }
 0x34a   :  { %2554 = vst.msk [vmem:[#allocation0 + $0x709] ss:$16 sm:$0x30] %vm3_vm0, %v2547_v44   ;;  %2556 = vst.msk [vmem:[#allocation0 + $0x709] ss:$16 sm:$0xc0] %vm3_vm0, %v2547_v44  }
 0x34b   :  { %11786 = vst [vmem:[%s17895_s1 + $0x12e] sm:$0x3] %v4252_v52  ;;  %11788 = vst [vmem:[%s17895_s1 + $0x132] sm:$0x3] %v4266_v53  ;;  %v4280_v0 = vld [vmem:[#allocation0 + $0x4d8] sm:$0x3]  ;;  %v2690_v52 = vpop.permute.xlu1 %2689  }
 0x34c   :  { %v4294_v2 = vld [vmem:[#allocation0 + $0x4e8] sm:$0x3]  ;;  %v4308_v14 = vld [vmem:[#allocation0 + $0x4f8] sm:$0x3]  ;;  %11790 = vst [vmem:[%s17895_s1 + $0x136] sm:$0x3] %v4280_v0 }
 0x34d   :  { %11792 = vst [vmem:[%s17895_s1 + $0x13a] sm:$0x3] %v4294_v2  ;;  %11794 = vst [vmem:[%s17895_s1 + $0x13e] sm:$0x3] %v4308_v14  ;;  %v4098_v39 = vld [vmem:[#allocation0 + $0x408] sm:$0x3]  ;;  %v2677_v14 = vpop.permute.xlu0 %2676  }
 0x34e   :  { %v4112_v6 = vld [vmem:[#allocation0 + $0x418] sm:$0x3]  ;;  %v4126_v7 = vld [vmem:[#allocation0 + $0x428] sm:$0x3]  ;;  %11764 = vst [vmem:[%s17895_s1 + $0x102] sm:$0x3] %v4098_v39 }
 0x34f   :  { %11766 = vst [vmem:[%s17895_s1 + $0x106] sm:$0x3] %v4112_v6  ;;  %11768 = vst [vmem:[%s17895_s1 + $0x10a] sm:$0x3] %v4126_v7  ;;  %v4140_v51 = vld [vmem:[#allocation0 + $0x438] sm:$0x3] }
 0x350   :  { %v4154_v54 = vld [vmem:[#allocation0 + $0x448] sm:$0x3]  ;;  %v4168_v58 = vld [vmem:[#allocation0 + $0x458] sm:$0x3]  ;;  %11770 = vst [vmem:[%s17895_s1 + $0x10e] sm:$0x3] %v4140_v51 }
 0x351   :  { %2589 = vst.msk [vmem:[#allocation0 + $0x889] ss:$16 sm:$0x3] %vm3_vm0, %v2586_v15   ;;  %2591 = vst.msk [vmem:[#allocation0 + $0x889] ss:$16 sm:$0xc] %vm3_vm0, %v2586_v15  }
 0x352   :  { %2593 = vst.msk [vmem:[#allocation0 + $0x889] ss:$16 sm:$0x30] %vm3_vm0, %v2586_v15   ;;  %2595 = vst.msk [vmem:[#allocation0 + $0x889] ss:$16 sm:$0xc0] %vm3_vm0, %v2586_v15  }
 0x353   :  { %11772 = vst [vmem:[%s17895_s1 + $0x112] sm:$0x3] %v4154_v54  ;;  %11774 = vst [vmem:[%s17895_s1 + $0x116] sm:$0x3] %v4168_v58  ;;  %v4182_v59 = vld [vmem:[#allocation0 + $0x468] sm:$0x3] }
 0x354   :  { %v4196_v55 = vld [vmem:[#allocation0 + $0x478] sm:$0x3]  ;;  %v4434_v62 = vld [vmem:[#allocation0 + $0x588] sm:$0x3]  ;;  %11776 = vst [vmem:[%s17895_s1 + $0x11a] sm:$0x3] %v4182_v59 }
 0x355   :  { %2576 = vst.msk [vmem:[#allocation0 + $0x809] ss:$16 sm:$0x3] %vm3_vm0, %v2573_v38   ;;  %2578 = vst.msk [vmem:[#allocation0 + $0x809] ss:$16 sm:$0xc] %vm3_vm0, %v2573_v38  }
 0x356   :  { %2580 = vst.msk [vmem:[#allocation0 + $0x809] ss:$16 sm:$0x30] %vm3_vm0, %v2573_v38   ;;  %2582 = vst.msk [vmem:[#allocation0 + $0x809] ss:$16 sm:$0xc0] %vm3_vm0, %v2573_v38  }
 0x357   :  { %11778 = vst [vmem:[%s17895_s1 + $0x11e] sm:$0x3] %v4196_v55  ;;  %11812 = vst [vmem:[%s17895_s1 + $0x162] sm:$0x3] %v4434_v62  ;;  %v4448_v63 = vld [vmem:[#allocation0 + $0x598] sm:$0x3]  ;;  %v2716_v55 = vpop.permute.xlu1 %2715  }
 0x358   :  { %v4462_v8 = vld [vmem:[#allocation0 + $0x5a8] sm:$0x3]  ;;  %v4476_v56 = vld [vmem:[#allocation0 + $0x5b8] sm:$0x3]  ;;  %11814 = vst [vmem:[%s17895_s1 + $0x166] sm:$0x3] %v4448_v63 }
 0x359   :  { %11816 = vst [vmem:[%s17895_s1 + $0x16a] sm:$0x3] %v4462_v8  ;;  %11818 = vst [vmem:[%s17895_s1 + $0x16e] sm:$0x3] %v4476_v56  ;;  %v4490_v57 = vld [vmem:[#allocation0 + $0x5c8] sm:$0x3]  ;;  %v2703_v56 = vpop.permute.xlu0 %2702  }
 0x35a   :  { %v4504_v20 = vld [vmem:[#allocation0 + $0x5d8] sm:$0x3]  ;;  %v4518_v21 = vld [vmem:[#allocation0 + $0x5e8] sm:$0x3]  ;;  %11820 = vst [vmem:[%s17895_s1 + $0x172] sm:$0x3] %v4490_v57 }
 0x35b   :  { %11822 = vst [vmem:[%s17895_s1 + $0x176] sm:$0x3] %v4504_v20  ;;  %11824 = vst [vmem:[%s17895_s1 + $0x17a] sm:$0x3] %v4518_v21  ;;  %v4532_v12 = vld [vmem:[#allocation0 + $0x5f8] sm:$0x3] }
 0x35c   :  { %v4322_v28 = vld [vmem:[#allocation0 + $0x508] sm:$0x3]  ;;  %v4336_v29 = vld [vmem:[#allocation0 + $0x518] sm:$0x3]  ;;  %11826 = vst [vmem:[%s17895_s1 + $0x17e] sm:$0x3] %v4532_v12 }
 0x35d   :  { %2615 = vst.msk [vmem:[#allocation0 + $0x989] ss:$16 sm:$0x3] %vm3_vm0, %v2612_v9   ;;  %2617 = vst.msk [vmem:[#allocation0 + $0x989] ss:$16 sm:$0xc] %vm3_vm0, %v2612_v9  }
 0x35e   :  { %2619 = vst.msk [vmem:[#allocation0 + $0x989] ss:$16 sm:$0x30] %vm3_vm0, %v2612_v9   ;;  %2621 = vst.msk [vmem:[#allocation0 + $0x989] ss:$16 sm:$0xc0] %vm3_vm0, %v2612_v9  }
 0x35f   :  { %11796 = vst [vmem:[%s17895_s1 + $0x142] sm:$0x3] %v4322_v28  ;;  %11798 = vst [vmem:[%s17895_s1 + $0x146] sm:$0x3] %v4336_v29  ;;  %v4350_v43 = vld [vmem:[#allocation0 + $0x528] sm:$0x3] }
 0x360   :  { %v4364_v13 = vld [vmem:[#allocation0 + $0x538] sm:$0x3]  ;;  %v4378_v16 = vld [vmem:[#allocation0 + $0x548] sm:$0x3]  ;;  %11800 = vst [vmem:[%s17895_s1 + $0x14a] sm:$0x3] %v4350_v43 }
 0x361   :  { %2602 = vst.msk [vmem:[#allocation0 + $0x909] ss:$16 sm:$0x3] %vm3_vm0, %v2599_v42   ;;  %2604 = vst.msk [vmem:[#allocation0 + $0x909] ss:$16 sm:$0xc] %vm3_vm0, %v2599_v42  }
 0x362   :  { %2606 = vst.msk [vmem:[#allocation0 + $0x909] ss:$16 sm:$0x30] %vm3_vm0, %v2599_v42   ;;  %2608 = vst.msk [vmem:[#allocation0 + $0x909] ss:$16 sm:$0xc0] %vm3_vm0, %v2599_v42  }
 0x363   :  { %11802 = vst [vmem:[%s17895_s1 + $0x14e] sm:$0x3] %v4364_v13  ;;  %11804 = vst [vmem:[%s17895_s1 + $0x152] sm:$0x3] %v4378_v16  ;;  %v4392_v1 = vld [vmem:[#allocation0 + $0x558] sm:$0x3]  ;;  %v2742_v13 = vpop.permute.xlu1 %2741  }
 0x364   :  { %v4406_v3 = vld [vmem:[#allocation0 + $0x568] sm:$0x3]  ;;  %v4420_v4 = vld [vmem:[#allocation0 + $0x578] sm:$0x3]  ;;  %11806 = vst [vmem:[%s17895_s1 + $0x156] sm:$0x3] %v4392_v1 }
 0x365   :  { %11808 = vst [vmem:[%s17895_s1 + $0x15a] sm:$0x3] %v4406_v3  ;;  %11810 = vst [vmem:[%s17895_s1 + $0x15e] sm:$0x3] %v4420_v4  ;;  %v4658_v5 = vld [vmem:[#allocation0 + $0x688] sm:$0x3]  ;;  %v2729_v4 = vpop.permute.xlu0 %2728  }
 0x366   :  { %v4672_v30 = vld [vmem:[#allocation0 + $0x698] sm:$0x3]  ;;  %v4686_v31 = vld [vmem:[#allocation0 + $0x6a8] sm:$0x3]  ;;  %11844 = vst [vmem:[%s17895_s1 + $0x1a2] sm:$0x3] %v4658_v5 }
 0x367   :  { %11846 = vst [vmem:[%s17895_s1 + $0x1a6] sm:$0x3] %v4672_v30  ;;  %11848 = vst [vmem:[%s17895_s1 + $0x1aa] sm:$0x3] %v4686_v31  ;;  %v4700_v61 = vld [vmem:[#allocation0 + $0x6b8] sm:$0x3] }
 0x368   :  { %v4714_v18 = vld [vmem:[#allocation0 + $0x6c8] sm:$0x3]  ;;  %v4728_v19 = vld [vmem:[#allocation0 + $0x6d8] sm:$0x3]  ;;  %11850 = vst [vmem:[%s17895_s1 + $0x1ae] sm:$0x3] %v4700_v61 }
 0x369   :  { %2641 = vst.msk [vmem:[#allocation0 + $0xa89] ss:$16 sm:$0x3] %vm3_vm0, %v2638_v60   ;;  %2643 = vst.msk [vmem:[#allocation0 + $0xa89] ss:$16 sm:$0xc] %vm3_vm0, %v2638_v60  }
 0x36a   :  { %2645 = vst.msk [vmem:[#allocation0 + $0xa89] ss:$16 sm:$0x30] %vm3_vm0, %v2638_v60   ;;  %2647 = vst.msk [vmem:[#allocation0 + $0xa89] ss:$16 sm:$0xc0] %vm3_vm0, %v2638_v60  }
 0x36b   :  { %11852 = vst [vmem:[%s17895_s1 + $0x1b2] sm:$0x3] %v4714_v18  ;;  %11854 = vst [vmem:[%s17895_s1 + $0x1b6] sm:$0x3] %v4728_v19  ;;  %v4742_v22 = vld [vmem:[#allocation0 + $0x6e8] sm:$0x3] }
 0x36c   :  { %v4756_v23 = vld [vmem:[#allocation0 + $0x6f8] sm:$0x3]  ;;  %v4546_v26 = vld [vmem:[#allocation0 + $0x608] sm:$0x3]  ;;  %11856 = vst [vmem:[%s17895_s1 + $0x1ba] sm:$0x3] %v4742_v22 }
 0x36d   :  { %2628 = vst.msk [vmem:[#allocation0 + $0xa09] ss:$16 sm:$0x3] %vm3_vm0, %v2625_v17   ;;  %2630 = vst.msk [vmem:[#allocation0 + $0xa09] ss:$16 sm:$0xc] %vm3_vm0, %v2625_v17  }
 0x36e   :  { %2632 = vst.msk [vmem:[#allocation0 + $0xa09] ss:$16 sm:$0x30] %vm3_vm0, %v2625_v17   ;;  %2634 = vst.msk [vmem:[#allocation0 + $0xa09] ss:$16 sm:$0xc0] %vm3_vm0, %v2625_v17  }
 0x36f   :  { %11858 = vst [vmem:[%s17895_s1 + $0x1be] sm:$0x3] %v4756_v23  ;;  %11828 = vst [vmem:[%s17895_s1 + $0x182] sm:$0x3] %v4546_v26  ;;  %v4560_v46 = vld [vmem:[#allocation0 + $0x618] sm:$0x3]  ;;  %v2768_v23 = vpop.permute.xlu1 %2767  }
 0x370   :  { %v4574_v47 = vld [vmem:[#allocation0 + $0x628] sm:$0x3]  ;;  %v4588_v32 = vld [vmem:[#allocation0 + $0x638] sm:$0x3]  ;;  %11830 = vst [vmem:[%s17895_s1 + $0x186] sm:$0x3] %v4560_v46 }
 0x371   :  { %11832 = vst [vmem:[%s17895_s1 + $0x18a] sm:$0x3] %v4574_v47  ;;  %11834 = vst [vmem:[%s17895_s1 + $0x18e] sm:$0x3] %v4588_v32  ;;  %v4602_v33 = vld [vmem:[#allocation0 + $0x648] sm:$0x3]  ;;  %v2755_v32 = vpop.permute.xlu0 %2754  }
 0x372   :  { %v4616_v36 = vld [vmem:[#allocation0 + $0x658] sm:$0x3]  ;;  %v4630_v37 = vld [vmem:[#allocation0 + $0x668] sm:$0x3]  ;;  %11836 = vst [vmem:[%s17895_s1 + $0x192] sm:$0x3] %v4602_v33 }
 0x373   :  { %11838 = vst [vmem:[%s17895_s1 + $0x196] sm:$0x3] %v4616_v36  ;;  %11840 = vst [vmem:[%s17895_s1 + $0x19a] sm:$0x3] %v4630_v37  ;;  %v4644_v34 = vld [vmem:[#allocation0 + $0x678] sm:$0x3] }
 0x374   :  { %v4882_v10 = vld [vmem:[#allocation0 + $0x788] sm:$0x3]  ;;  %v4896_v11 = vld [vmem:[#allocation0 + $0x798] sm:$0x3]  ;;  %11842 = vst [vmem:[%s17895_s1 + $0x19e] sm:$0x3] %v4644_v34 }
 0x375   :  { %2667 = vst.msk [vmem:[#allocation0 + $0xb89] ss:$16 sm:$0x3] %vm3_vm0, %v2664_v27   ;;  %2669 = vst.msk [vmem:[#allocation0 + $0xb89] ss:$16 sm:$0xc] %vm3_vm0, %v2664_v27  }
 0x376   :  { %2671 = vst.msk [vmem:[#allocation0 + $0xb89] ss:$16 sm:$0x30] %vm3_vm0, %v2664_v27   ;;  %2673 = vst.msk [vmem:[#allocation0 + $0xb89] ss:$16 sm:$0xc0] %vm3_vm0, %v2664_v27  }
 0x377   :  { %11876 = vst [vmem:[%s17895_s1 + $0x1e2] sm:$0x3] %v4882_v10  ;;  %11878 = vst [vmem:[%s17895_s1 + $0x1e6] sm:$0x3] %v4896_v11  ;;  %v4910_v40 = vld [vmem:[#allocation0 + $0x7a8] sm:$0x3] }
 0x378   :  { %v4924_v41 = vld [vmem:[#allocation0 + $0x7b8] sm:$0x3]  ;;  %v4938_v48 = vld [vmem:[#allocation0 + $0x7c8] sm:$0x3]  ;;  %11880 = vst [vmem:[%s17895_s1 + $0x1ea] sm:$0x3] %v4910_v40 }
 0x379   :  { %2654 = vst.msk [vmem:[#allocation0 + $0xb09] ss:$16 sm:$0x3] %vm3_vm0, %v2651_v35   ;;  %2656 = vst.msk [vmem:[#allocation0 + $0xb09] ss:$16 sm:$0xc] %vm3_vm0, %v2651_v35  }
 0x37a   :  { %2658 = vst.msk [vmem:[#allocation0 + $0xb09] ss:$16 sm:$0x30] %vm3_vm0, %v2651_v35   ;;  %2660 = vst.msk [vmem:[#allocation0 + $0xb09] ss:$16 sm:$0xc0] %vm3_vm0, %v2651_v35  }
 0x37b   :  { %11882 = vst [vmem:[%s17895_s1 + $0x1ee] sm:$0x3] %v4924_v41  ;;  %11884 = vst [vmem:[%s17895_s1 + $0x1f2] sm:$0x3] %v4938_v48  ;;  %v4952_v49 = vld [vmem:[#allocation0 + $0x7d8] sm:$0x3]  ;;  %v2794_v41 = vpop.permute.xlu1 %2793  }
 0x37c   :  { %v4966_v50 = vld [vmem:[#allocation0 + $0x7e8] sm:$0x3]  ;;  %v4980_v24 = vld [vmem:[#allocation0 + $0x7f8] sm:$0x3]  ;;  %11886 = vst [vmem:[%s17895_s1 + $0x1f6] sm:$0x3] %v4952_v49 }
 0x37d   :  { %11888 = vst [vmem:[%s17895_s1 + $0x1fa] sm:$0x3] %v4966_v50  ;;  %11890 = vst [vmem:[%s17895_s1 + $0x1fe] sm:$0x3] %v4980_v24  ;;  %v4770_v25 = vld [vmem:[#allocation0 + $0x708] sm:$0x3]  ;;  %v2781_v24 = vpop.permute.xlu0 %2780  }
 0x37e   :  { %v4784_v44 = vld [vmem:[#allocation0 + $0x718] sm:$0x3]  ;;  %v4798_v45 = vld [vmem:[#allocation0 + $0x728] sm:$0x3]  ;;  %11860 = vst [vmem:[%s17895_s1 + $0x1c2] sm:$0x3] %v4770_v25 }
 0x37f   :  { %11862 = vst [vmem:[%s17895_s1 + $0x1c6] sm:$0x3] %v4784_v44  ;;  %11864 = vst [vmem:[%s17895_s1 + $0x1ca] sm:$0x3] %v4798_v45  ;;  %v4812_v53 = vld [vmem:[#allocation0 + $0x738] sm:$0x3] }
 0x380   :  { %v4826_v0 = vld [vmem:[#allocation0 + $0x748] sm:$0x3]  ;;  %v4840_v2 = vld [vmem:[#allocation0 + $0x758] sm:$0x3]  ;;  %11866 = vst [vmem:[%s17895_s1 + $0x1ce] sm:$0x3] %v4812_v53 }
 0x381   :  { %2693 = vst.msk [vmem:[#allocation0 + $0xc89] ss:$16 sm:$0x3] %vm3_vm0, %v2690_v52   ;;  %2695 = vst.msk [vmem:[#allocation0 + $0xc89] ss:$16 sm:$0xc] %vm3_vm0, %v2690_v52  }
 0x382   :  { %2697 = vst.msk [vmem:[#allocation0 + $0xc89] ss:$16 sm:$0x30] %vm3_vm0, %v2690_v52   ;;  %2699 = vst.msk [vmem:[#allocation0 + $0xc89] ss:$16 sm:$0xc0] %vm3_vm0, %v2690_v52  }
 0x383   :  { %11868 = vst [vmem:[%s17895_s1 + $0x1d2] sm:$0x3] %v4826_v0  ;;  %11870 = vst [vmem:[%s17895_s1 + $0x1d6] sm:$0x3] %v4840_v2  ;;  %v4854_v39 = vld [vmem:[#allocation0 + $0x768] sm:$0x3] }
 0x384   :  { %v4868_v6 = vld [vmem:[#allocation0 + $0x778] sm:$0x3]  ;;  %v5106_v7 = vld [vmem:[#allocation0 + $0x888] sm:$0x3]  ;;  %11872 = vst [vmem:[%s17895_s1 + $0x1da] sm:$0x3] %v4854_v39 }
 0x385   :  { %2680 = vst.msk [vmem:[#allocation0 + $0xc09] ss:$16 sm:$0x3] %vm3_vm0, %v2677_v14   ;;  %2682 = vst.msk [vmem:[#allocation0 + $0xc09] ss:$16 sm:$0xc] %vm3_vm0, %v2677_v14  }
 0x386   :  { %2684 = vst.msk [vmem:[#allocation0 + $0xc09] ss:$16 sm:$0x30] %vm3_vm0, %v2677_v14   ;;  %2686 = vst.msk [vmem:[#allocation0 + $0xc09] ss:$16 sm:$0xc0] %vm3_vm0, %v2677_v14  }
 0x387   :  { %11874 = vst [vmem:[%s17895_s1 + $0x1de] sm:$0x3] %v4868_v6  ;;  %11908 = vst [vmem:[%s17895_s1 + $0x222] sm:$0x3] %v5106_v7  ;;  %v5120_v15 = vld [vmem:[#allocation0 + $0x898] sm:$0x3]  ;;  %v2820_v6 = vpop.permute.xlu1 %2819  }
 0x388   :  { %v5134_v51 = vld [vmem:[#allocation0 + $0x8a8] sm:$0x3]  ;;  %v5148_v54 = vld [vmem:[#allocation0 + $0x8b8] sm:$0x3]  ;;  %11910 = vst [vmem:[%s17895_s1 + $0x226] sm:$0x3] %v5120_v15 }
 0x389   :  { %11912 = vst [vmem:[%s17895_s1 + $0x22a] sm:$0x3] %v5134_v51  ;;  %11914 = vst [vmem:[%s17895_s1 + $0x22e] sm:$0x3] %v5148_v54  ;;  %v5162_v58 = vld [vmem:[#allocation0 + $0x8c8] sm:$0x3]  ;;  %v2807_v54 = vpop.permute.xlu0 %2806  }
 0x38a   :  { %v5176_v38 = vld [vmem:[#allocation0 + $0x8d8] sm:$0x3]  ;;  %v5190_v59 = vld [vmem:[#allocation0 + $0x8e8] sm:$0x3]  ;;  %11916 = vst [vmem:[%s17895_s1 + $0x232] sm:$0x3] %v5162_v58 }
 0x38b   :  { %11918 = vst [vmem:[%s17895_s1 + $0x236] sm:$0x3] %v5176_v38  ;;  %11920 = vst [vmem:[%s17895_s1 + $0x23a] sm:$0x3] %v5190_v59  ;;  %v5204_v62 = vld [vmem:[#allocation0 + $0x8f8] sm:$0x3] }
 0x38c   :  { %v4994_v63 = vld [vmem:[#allocation0 + $0x808] sm:$0x3]  ;;  %v5008_v8 = vld [vmem:[#allocation0 + $0x818] sm:$0x3]  ;;  %11922 = vst [vmem:[%s17895_s1 + $0x23e] sm:$0x3] %v5204_v62 }
 0x38d   :  { %2719 = vst.msk [vmem:[#allocation0 + $0xd89] ss:$16 sm:$0x3] %vm3_vm0, %v2716_v55   ;;  %2721 = vst.msk [vmem:[#allocation0 + $0xd89] ss:$16 sm:$0xc] %vm3_vm0, %v2716_v55  }
 0x38e   :  { %2723 = vst.msk [vmem:[#allocation0 + $0xd89] ss:$16 sm:$0x30] %vm3_vm0, %v2716_v55   ;;  %2725 = vst.msk [vmem:[#allocation0 + $0xd89] ss:$16 sm:$0xc0] %vm3_vm0, %v2716_v55  }
 0x38f   :  { %11892 = vst [vmem:[%s17895_s1 + $0x202] sm:$0x3] %v4994_v63  ;;  %11894 = vst [vmem:[%s17895_s1 + $0x206] sm:$0x3] %v5008_v8  ;;  %v5022_v57 = vld [vmem:[#allocation0 + $0x828] sm:$0x3] }
 0x390   :  { %v5036_v20 = vld [vmem:[#allocation0 + $0x838] sm:$0x3]  ;;  %v5050_v21 = vld [vmem:[#allocation0 + $0x848] sm:$0x3]  ;;  %11896 = vst [vmem:[%s17895_s1 + $0x20a] sm:$0x3] %v5022_v57 }
 0x391   :  { %2706 = vst.msk [vmem:[#allocation0 + $0xd09] ss:$16 sm:$0x3] %vm3_vm0, %v2703_v56   ;;  %2708 = vst.msk [vmem:[#allocation0 + $0xd09] ss:$16 sm:$0xc] %vm3_vm0, %v2703_v56  }
 0x392   :  { %2710 = vst.msk [vmem:[#allocation0 + $0xd09] ss:$16 sm:$0x30] %vm3_vm0, %v2703_v56   ;;  %2712 = vst.msk [vmem:[#allocation0 + $0xd09] ss:$16 sm:$0xc0] %vm3_vm0, %v2703_v56  }
 0x393   :  { %11898 = vst [vmem:[%s17895_s1 + $0x20e] sm:$0x3] %v5036_v20  ;;  %11900 = vst [vmem:[%s17895_s1 + $0x212] sm:$0x3] %v5050_v21  ;;  %v5064_v9 = vld [vmem:[#allocation0 + $0x858] sm:$0x3]  ;;  %v2846_v20 = vpop.permute.xlu1 %2845  }
 0x394   :  { %v5078_v12 = vld [vmem:[#allocation0 + $0x868] sm:$0x3]  ;;  %v5092_v28 = vld [vmem:[#allocation0 + $0x878] sm:$0x3]  ;;  %11902 = vst [vmem:[%s17895_s1 + $0x216] sm:$0x3] %v5064_v9 }
 0x395   :  { %11904 = vst [vmem:[%s17895_s1 + $0x21a] sm:$0x3] %v5078_v12  ;;  %11906 = vst [vmem:[%s17895_s1 + $0x21e] sm:$0x3] %v5092_v28  ;;  %v5330_v29 = vld [vmem:[#allocation0 + $0x988] sm:$0x3]  ;;  %v2833_v28 = vpop.permute.xlu0 %2832  }
 0x396   :  { %v5344_v42 = vld [vmem:[#allocation0 + $0x998] sm:$0x3]  ;;  %v5358_v43 = vld [vmem:[#allocation0 + $0x9a8] sm:$0x3]  ;;  %11940 = vst [vmem:[%s17895_s1 + $0x262] sm:$0x3] %v5330_v29 }
 0x397   :  { %11942 = vst [vmem:[%s17895_s1 + $0x266] sm:$0x3] %v5344_v42  ;;  %11944 = vst [vmem:[%s17895_s1 + $0x26a] sm:$0x3] %v5358_v43  ;;  %v5372_v16 = vld [vmem:[#allocation0 + $0x9b8] sm:$0x3] }
 0x398   :  { %v5386_v1 = vld [vmem:[#allocation0 + $0x9c8] sm:$0x3]  ;;  %v5400_v3 = vld [vmem:[#allocation0 + $0x9d8] sm:$0x3]  ;;  %11946 = vst [vmem:[%s17895_s1 + $0x26e] sm:$0x3] %v5372_v16 }
 0x399   :  { %2745 = vst.msk [vmem:[#allocation0 + $0xe89] ss:$16 sm:$0x3] %vm3_vm0, %v2742_v13   ;;  %2747 = vst.msk [vmem:[#allocation0 + $0xe89] ss:$16 sm:$0xc] %vm3_vm0, %v2742_v13  }
 0x39a   :  { %2749 = vst.msk [vmem:[#allocation0 + $0xe89] ss:$16 sm:$0x30] %vm3_vm0, %v2742_v13   ;;  %2751 = vst.msk [vmem:[#allocation0 + $0xe89] ss:$16 sm:$0xc0] %vm3_vm0, %v2742_v13  }
 0x39b   :  { %11948 = vst [vmem:[%s17895_s1 + $0x272] sm:$0x3] %v5386_v1  ;;  %11950 = vst [vmem:[%s17895_s1 + $0x276] sm:$0x3] %v5400_v3  ;;  %v5414_v5 = vld [vmem:[#allocation0 + $0x9e8] sm:$0x3] }
 0x39c   :  { %v5428_v30 = vld [vmem:[#allocation0 + $0x9f8] sm:$0x3]  ;;  %v5218_v31 = vld [vmem:[#allocation0 + $0x908] sm:$0x3]  ;;  %11952 = vst [vmem:[%s17895_s1 + $0x27a] sm:$0x3] %v5414_v5 }
 0x39d   :  { %2732 = vst.msk [vmem:[#allocation0 + $0xe09] ss:$16 sm:$0x3] %vm3_vm0, %v2729_v4   ;;  %2734 = vst.msk [vmem:[#allocation0 + $0xe09] ss:$16 sm:$0xc] %vm3_vm0, %v2729_v4  }
 0x39e   :  { %2736 = vst.msk [vmem:[#allocation0 + $0xe09] ss:$16 sm:$0x30] %vm3_vm0, %v2729_v4   ;;  %2738 = vst.msk [vmem:[#allocation0 + $0xe09] ss:$16 sm:$0xc0] %vm3_vm0, %v2729_v4  }
 0x39f   :  { %11954 = vst [vmem:[%s17895_s1 + $0x27e] sm:$0x3] %v5428_v30  ;;  %11924 = vst [vmem:[%s17895_s1 + $0x242] sm:$0x3] %v5218_v31  ;;  %v5232_v60 = vld [vmem:[#allocation0 + $0x918] sm:$0x3]  ;;  %v2872_v30 = vpop.permute.xlu1 %2871  }
 0x3a0   :  { %v5246_v61 = vld [vmem:[#allocation0 + $0x928] sm:$0x3]  ;;  %v5260_v18 = vld [vmem:[#allocation0 + $0x938] sm:$0x3]  ;;  %11926 = vst [vmem:[%s17895_s1 + $0x246] sm:$0x3] %v5232_v60 }
 0x3a1   :  { %11928 = vst [vmem:[%s17895_s1 + $0x24a] sm:$0x3] %v5246_v61  ;;  %11930 = vst [vmem:[%s17895_s1 + $0x24e] sm:$0x3] %v5260_v18  ;;  %v5274_v19 = vld [vmem:[#allocation0 + $0x948] sm:$0x3]  ;;  %v2859_v18 = vpop.permute.xlu0 %2858  }
 0x3a2   :  { %v5288_v17 = vld [vmem:[#allocation0 + $0x958] sm:$0x3]  ;;  %v5302_v22 = vld [vmem:[#allocation0 + $0x968] sm:$0x3]  ;;  %11932 = vst [vmem:[%s17895_s1 + $0x252] sm:$0x3] %v5274_v19 }
 0x3a3   :  { %11934 = vst [vmem:[%s17895_s1 + $0x256] sm:$0x3] %v5288_v17  ;;  %11936 = vst [vmem:[%s17895_s1 + $0x25a] sm:$0x3] %v5302_v22  ;;  %v5316_v26 = vld [vmem:[#allocation0 + $0x978] sm:$0x3] }
 0x3a4   :  { %v5554_v46 = vld [vmem:[#allocation0 + $0xa88] sm:$0x3]  ;;  %v5568_v47 = vld [vmem:[#allocation0 + $0xa98] sm:$0x3]  ;;  %11938 = vst [vmem:[%s17895_s1 + $0x25e] sm:$0x3] %v5316_v26 }
 0x3a5   :  { %2771 = vst.msk [vmem:[#allocation0 + $0xf89] ss:$16 sm:$0x3] %vm3_vm0, %v2768_v23   ;;  %2773 = vst.msk [vmem:[#allocation0 + $0xf89] ss:$16 sm:$0xc] %vm3_vm0, %v2768_v23  }
 0x3a6   :  { %2775 = vst.msk [vmem:[#allocation0 + $0xf89] ss:$16 sm:$0x30] %vm3_vm0, %v2768_v23   ;;  %2777 = vst.msk [vmem:[#allocation0 + $0xf89] ss:$16 sm:$0xc0] %vm3_vm0, %v2768_v23  }
 0x3a7   :  { %11972 = vst [vmem:[%s17895_s1 + $0x2a2] sm:$0x3] %v5554_v46  ;;  %11974 = vst [vmem:[%s17895_s1 + $0x2a6] sm:$0x3] %v5568_v47  ;;  %v5582_v33 = vld [vmem:[#allocation0 + $0xaa8] sm:$0x3] }
 0x3a8   :  { %v5596_v36 = vld [vmem:[#allocation0 + $0xab8] sm:$0x3]  ;;  %v5610_v37 = vld [vmem:[#allocation0 + $0xac8] sm:$0x3]  ;;  %11976 = vst [vmem:[%s17895_s1 + $0x2aa] sm:$0x3] %v5582_v33 }
 0x3a9   :  { %2758 = vst.msk [vmem:[#allocation0 + $0xf09] ss:$16 sm:$0x3] %vm3_vm0, %v2755_v32   ;;  %2760 = vst.msk [vmem:[#allocation0 + $0xf09] ss:$16 sm:$0xc] %vm3_vm0, %v2755_v32  }
 0x3aa   :  { %2762 = vst.msk [vmem:[#allocation0 + $0xf09] ss:$16 sm:$0x30] %vm3_vm0, %v2755_v32   ;;  %2764 = vst.msk [vmem:[#allocation0 + $0xf09] ss:$16 sm:$0xc0] %vm3_vm0, %v2755_v32  }
 0x3ab   :  { %11978 = vst [vmem:[%s17895_s1 + $0x2ae] sm:$0x3] %v5596_v36  ;;  %11980 = vst [vmem:[%s17895_s1 + $0x2b2] sm:$0x3] %v5610_v37  ;;  %v5624_v27 = vld [vmem:[#allocation0 + $0xad8] sm:$0x3]  ;;  %v2898_v36 = vpop.permute.xlu1 %2897  }
 0x3ac   :  { %v5638_v34 = vld [vmem:[#allocation0 + $0xae8] sm:$0x3]  ;;  %v5652_v10 = vld [vmem:[#allocation0 + $0xaf8] sm:$0x3]  ;;  %11982 = vst [vmem:[%s17895_s1 + $0x2b6] sm:$0x3] %v5624_v27 }
 0x3ad   :  { %11984 = vst [vmem:[%s17895_s1 + $0x2ba] sm:$0x3] %v5638_v34  ;;  %11986 = vst [vmem:[%s17895_s1 + $0x2be] sm:$0x3] %v5652_v10  ;;  %v5442_v11 = vld [vmem:[#allocation0 + $0xa08] sm:$0x3]  ;;  %v2885_v10 = vpop.permute.xlu0 %2884  }
 0x3ae   :  { %v5456_v35 = vld [vmem:[#allocation0 + $0xa18] sm:$0x3]  ;;  %v5470_v40 = vld [vmem:[#allocation0 + $0xa28] sm:$0x3]  ;;  %11956 = vst [vmem:[%s17895_s1 + $0x282] sm:$0x3] %v5442_v11 }
 0x3af   :  { %11958 = vst [vmem:[%s17895_s1 + $0x286] sm:$0x3] %v5456_v35  ;;  %11960 = vst [vmem:[%s17895_s1 + $0x28a] sm:$0x3] %v5470_v40  ;;  %v5484_v48 = vld [vmem:[#allocation0 + $0xa38] sm:$0x3] }
 0x3b0   :  { %v5498_v49 = vld [vmem:[#allocation0 + $0xa48] sm:$0x3]  ;;  %v5512_v50 = vld [vmem:[#allocation0 + $0xa58] sm:$0x3]  ;;  %11962 = vst [vmem:[%s17895_s1 + $0x28e] sm:$0x3] %v5484_v48 }
 0x3b1   :  { %2797 = vst.msk [vmem:[#allocation0 + $0x1089] ss:$16 sm:$0x3] %vm3_vm0, %v2794_v41   ;;  %2799 = vst.msk [vmem:[#allocation0 + $0x1089] ss:$16 sm:$0xc] %vm3_vm0, %v2794_v41  }
 0x3b2   :  { %2801 = vst.msk [vmem:[#allocation0 + $0x1089] ss:$16 sm:$0x30] %vm3_vm0, %v2794_v41   ;;  %2803 = vst.msk [vmem:[#allocation0 + $0x1089] ss:$16 sm:$0xc0] %vm3_vm0, %v2794_v41  }
 0x3b3   :  { %11964 = vst [vmem:[%s17895_s1 + $0x292] sm:$0x3] %v5498_v49  ;;  %11966 = vst [vmem:[%s17895_s1 + $0x296] sm:$0x3] %v5512_v50  ;;  %v5526_v25 = vld [vmem:[#allocation0 + $0xa68] sm:$0x3] }
 0x3b4   :  { %v5540_v44 = vld [vmem:[#allocation0 + $0xa78] sm:$0x3]  ;;  %v5778_v45 = vld [vmem:[#allocation0 + $0xb88] sm:$0x3]  ;;  %11968 = vst [vmem:[%s17895_s1 + $0x29a] sm:$0x3] %v5526_v25 }
 0x3b5   :  { %2784 = vst.msk [vmem:[#allocation0 + $0x1009] ss:$16 sm:$0x3] %vm3_vm0, %v2781_v24   ;;  %2786 = vst.msk [vmem:[#allocation0 + $0x1009] ss:$16 sm:$0xc] %vm3_vm0, %v2781_v24  }
 0x3b6   :  { %2788 = vst.msk [vmem:[#allocation0 + $0x1009] ss:$16 sm:$0x30] %vm3_vm0, %v2781_v24   ;;  %2790 = vst.msk [vmem:[#allocation0 + $0x1009] ss:$16 sm:$0xc0] %vm3_vm0, %v2781_v24  }
 0x3b7   :  { %11970 = vst [vmem:[%s17895_s1 + $0x29e] sm:$0x3] %v5540_v44  ;;  %12004 = vst [vmem:[%s17895_s1 + $0x2e2] sm:$0x3] %v5778_v45  ;;  %v5792_v52 = vld [vmem:[#allocation0 + $0xb98] sm:$0x3]  ;;  %v2924_v44 = vpop.permute.xlu1 %2923  }
 0x3b8   :  { %v5806_v53 = vld [vmem:[#allocation0 + $0xba8] sm:$0x3]  ;;  %v5820_v0 = vld [vmem:[#allocation0 + $0xbb8] sm:$0x3]  ;;  %12006 = vst [vmem:[%s17895_s1 + $0x2e6] sm:$0x3] %v5792_v52 }
 0x3b9   :  { %12008 = vst [vmem:[%s17895_s1 + $0x2ea] sm:$0x3] %v5806_v53  ;;  %12010 = vst [vmem:[%s17895_s1 + $0x2ee] sm:$0x3] %v5820_v0  ;;  %v5834_v2 = vld [vmem:[#allocation0 + $0xbc8] sm:$0x3]  ;;  %v2911_v0 = vpop.permute.xlu0 %2910  }
 0x3ba   :  { %v5848_v14 = vld [vmem:[#allocation0 + $0xbd8] sm:$0x3]  ;;  %v5862_v39 = vld [vmem:[#allocation0 + $0xbe8] sm:$0x3]  ;;  %12012 = vst [vmem:[%s17895_s1 + $0x2f2] sm:$0x3] %v5834_v2 }
 0x3bb   :  { %12014 = vst [vmem:[%s17895_s1 + $0x2f6] sm:$0x3] %v5848_v14  ;;  %12016 = vst [vmem:[%s17895_s1 + $0x2fa] sm:$0x3] %v5862_v39  ;;  %v5876_v7 = vld [vmem:[#allocation0 + $0xbf8] sm:$0x3] }
 0x3bc   :  { %v5666_v15 = vld [vmem:[#allocation0 + $0xb08] sm:$0x3]  ;;  %v5680_v51 = vld [vmem:[#allocation0 + $0xb18] sm:$0x3]  ;;  %12018 = vst [vmem:[%s17895_s1 + $0x2fe] sm:$0x3] %v5876_v7 }
 0x3bd   :  { %2823 = vst.msk [vmem:[#allocation0 + $0x1189] ss:$16 sm:$0x3] %vm3_vm0, %v2820_v6   ;;  %2825 = vst.msk [vmem:[#allocation0 + $0x1189] ss:$16 sm:$0xc] %vm3_vm0, %v2820_v6  }
 0x3be   :  { %2827 = vst.msk [vmem:[#allocation0 + $0x1189] ss:$16 sm:$0x30] %vm3_vm0, %v2820_v6   ;;  %2829 = vst.msk [vmem:[#allocation0 + $0x1189] ss:$16 sm:$0xc0] %vm3_vm0, %v2820_v6  }
 0x3bf   :  { %11988 = vst [vmem:[%s17895_s1 + $0x2c2] sm:$0x3] %v5666_v15  ;;  %11990 = vst [vmem:[%s17895_s1 + $0x2c6] sm:$0x3] %v5680_v51  ;;  %v5694_v58 = vld [vmem:[#allocation0 + $0xb28] sm:$0x3] }
 0x3c0   :  { %v5708_v38 = vld [vmem:[#allocation0 + $0xb38] sm:$0x3]  ;;  %v5722_v59 = vld [vmem:[#allocation0 + $0xb48] sm:$0x3]  ;;  %11992 = vst [vmem:[%s17895_s1 + $0x2ca] sm:$0x3] %v5694_v58 }
 0x3c1   :  { %2810 = vst.msk [vmem:[#allocation0 + $0x1109] ss:$16 sm:$0x3] %vm3_vm0, %v2807_v54   ;;  %2812 = vst.msk [vmem:[#allocation0 + $0x1109] ss:$16 sm:$0xc] %vm3_vm0, %v2807_v54  }
 0x3c2   :  { %2814 = vst.msk [vmem:[#allocation0 + $0x1109] ss:$16 sm:$0x30] %vm3_vm0, %v2807_v54   ;;  %2816 = vst.msk [vmem:[#allocation0 + $0x1109] ss:$16 sm:$0xc0] %vm3_vm0, %v2807_v54  }
 0x3c3   :  { %11994 = vst [vmem:[%s17895_s1 + $0x2ce] sm:$0x3] %v5708_v38  ;;  %11996 = vst [vmem:[%s17895_s1 + $0x2d2] sm:$0x3] %v5722_v59  ;;  %v5736_v55 = vld [vmem:[#allocation0 + $0xb58] sm:$0x3]  ;;  %v2950_v38 = vpop.permute.xlu1 %2949  }
 0x3c4   :  { %v5750_v62 = vld [vmem:[#allocation0 + $0xb68] sm:$0x3]  ;;  %v5764_v63 = vld [vmem:[#allocation0 + $0xb78] sm:$0x3]  ;;  %11998 = vst [vmem:[%s17895_s1 + $0x2d6] sm:$0x3] %v5736_v55 }
 0x3c5   :  { %12000 = vst [vmem:[%s17895_s1 + $0x2da] sm:$0x3] %v5750_v62  ;;  %12002 = vst [vmem:[%s17895_s1 + $0x2de] sm:$0x3] %v5764_v63  ;;  %v6002_v8 = vld [vmem:[#allocation0 + $0xc88] sm:$0x3]  ;;  %v2937_v63 = vpop.permute.xlu0 %2936  }
 0x3c6   :  { %v6016_v56 = vld [vmem:[#allocation0 + $0xc98] sm:$0x3]  ;;  %v6030_v57 = vld [vmem:[#allocation0 + $0xca8] sm:$0x3]  ;;  %12036 = vst [vmem:[%s17895_s1 + $0x322] sm:$0x3] %v6002_v8 }
 0x3c7   :  { %12038 = vst [vmem:[%s17895_s1 + $0x326] sm:$0x3] %v6016_v56  ;;  %12040 = vst [vmem:[%s17895_s1 + $0x32a] sm:$0x3] %v6030_v57  ;;  %v6044_v21 = vld [vmem:[#allocation0 + $0xcb8] sm:$0x3] }
 0x3c8   :  { %v6058_v9 = vld [vmem:[#allocation0 + $0xcc8] sm:$0x3]  ;;  %v6072_v12 = vld [vmem:[#allocation0 + $0xcd8] sm:$0x3]  ;;  %12042 = vst [vmem:[%s17895_s1 + $0x32e] sm:$0x3] %v6044_v21 }
 0x3c9   :  { %2849 = vst.msk [vmem:[#allocation0 + $0x1289] ss:$16 sm:$0x3] %vm3_vm0, %v2846_v20   ;;  %2851 = vst.msk [vmem:[#allocation0 + $0x1289] ss:$16 sm:$0xc] %vm3_vm0, %v2846_v20  }
 0x3ca   :  { %2853 = vst.msk [vmem:[#allocation0 + $0x1289] ss:$16 sm:$0x30] %vm3_vm0, %v2846_v20   ;;  %2855 = vst.msk [vmem:[#allocation0 + $0x1289] ss:$16 sm:$0xc0] %vm3_vm0, %v2846_v20  }
 0x3cb   :  { %12044 = vst [vmem:[%s17895_s1 + $0x332] sm:$0x3] %v6058_v9  ;;  %12046 = vst [vmem:[%s17895_s1 + $0x336] sm:$0x3] %v6072_v12  ;;  %v6086_v29 = vld [vmem:[#allocation0 + $0xce8] sm:$0x3] }
 0x3cc   :  { %v6100_v42 = vld [vmem:[#allocation0 + $0xcf8] sm:$0x3]  ;;  %v5890_v43 = vld [vmem:[#allocation0 + $0xc08] sm:$0x3]  ;;  %12048 = vst [vmem:[%s17895_s1 + $0x33a] sm:$0x3] %v6086_v29 }
 0x3cd   :  { %2836 = vst.msk [vmem:[#allocation0 + $0x1209] ss:$16 sm:$0x3] %vm3_vm0, %v2833_v28   ;;  %2838 = vst.msk [vmem:[#allocation0 + $0x1209] ss:$16 sm:$0xc] %vm3_vm0, %v2833_v28  }
 0x3ce   :  { %2840 = vst.msk [vmem:[#allocation0 + $0x1209] ss:$16 sm:$0x30] %vm3_vm0, %v2833_v28   ;;  %2842 = vst.msk [vmem:[#allocation0 + $0x1209] ss:$16 sm:$0xc0] %vm3_vm0, %v2833_v28  }
 0x3cf   :  { %12050 = vst [vmem:[%s17895_s1 + $0x33e] sm:$0x3] %v6100_v42  ;;  %12020 = vst [vmem:[%s17895_s1 + $0x302] sm:$0x3] %v5890_v43  ;;  %v5904_v13 = vld [vmem:[#allocation0 + $0xc18] sm:$0x3]  ;;  %v2976_v42 = vpop.permute.xlu1 %2975  }
 0x3d0   :  { %v5918_v16 = vld [vmem:[#allocation0 + $0xc28] sm:$0x3]  ;;  %v5932_v1 = vld [vmem:[#allocation0 + $0xc38] sm:$0x3]  ;;  %12022 = vst [vmem:[%s17895_s1 + $0x306] sm:$0x3] %v5904_v13 }
 0x3d1   :  { %12024 = vst [vmem:[%s17895_s1 + $0x30a] sm:$0x3] %v5918_v16  ;;  %12026 = vst [vmem:[%s17895_s1 + $0x30e] sm:$0x3] %v5932_v1  ;;  %v5946_v3 = vld [vmem:[#allocation0 + $0xc48] sm:$0x3]  ;;  %v2963_v1 = vpop.permute.xlu0 %2962  }
 0x3d2   :  { %v5960_v4 = vld [vmem:[#allocation0 + $0xc58] sm:$0x3]  ;;  %v5974_v5 = vld [vmem:[#allocation0 + $0xc68] sm:$0x3]  ;;  %12028 = vst [vmem:[%s17895_s1 + $0x312] sm:$0x3] %v5946_v3 }
 0x3d3   :  { %12030 = vst [vmem:[%s17895_s1 + $0x316] sm:$0x3] %v5960_v4  ;;  %12032 = vst [vmem:[%s17895_s1 + $0x31a] sm:$0x3] %v5974_v5  ;;  %v5988_v31 = vld [vmem:[#allocation0 + $0xc78] sm:$0x3] }
 0x3d4   :  { %v6226_v60 = vld [vmem:[#allocation0 + $0xd88] sm:$0x3]  ;;  %v6240_v61 = vld [vmem:[#allocation0 + $0xd98] sm:$0x3]  ;;  %12034 = vst [vmem:[%s17895_s1 + $0x31e] sm:$0x3] %v5988_v31 }
 0x3d5   :  { %2875 = vst.msk [vmem:[#allocation0 + $0x1389] ss:$16 sm:$0x3] %vm3_vm0, %v2872_v30   ;;  %2877 = vst.msk [vmem:[#allocation0 + $0x1389] ss:$16 sm:$0xc] %vm3_vm0, %v2872_v30  }
 0x3d6   :  { %2879 = vst.msk [vmem:[#allocation0 + $0x1389] ss:$16 sm:$0x30] %vm3_vm0, %v2872_v30   ;;  %2881 = vst.msk [vmem:[#allocation0 + $0x1389] ss:$16 sm:$0xc0] %vm3_vm0, %v2872_v30  }
 0x3d7   :  { %12068 = vst [vmem:[%s17895_s1 + $0x362] sm:$0x3] %v6226_v60  ;;  %12070 = vst [vmem:[%s17895_s1 + $0x366] sm:$0x3] %v6240_v61  ;;  %v6254_v19 = vld [vmem:[#allocation0 + $0xda8] sm:$0x3] }
 0x3d8   :  { %v6268_v17 = vld [vmem:[#allocation0 + $0xdb8] sm:$0x3]  ;;  %v6282_v22 = vld [vmem:[#allocation0 + $0xdc8] sm:$0x3]  ;;  %12072 = vst [vmem:[%s17895_s1 + $0x36a] sm:$0x3] %v6254_v19 }
 0x3d9   :  { %2862 = vst.msk [vmem:[#allocation0 + $0x1309] ss:$16 sm:$0x3] %vm3_vm0, %v2859_v18   ;;  %2864 = vst.msk [vmem:[#allocation0 + $0x1309] ss:$16 sm:$0xc] %vm3_vm0, %v2859_v18  }
 0x3da   :  { %2866 = vst.msk [vmem:[#allocation0 + $0x1309] ss:$16 sm:$0x30] %vm3_vm0, %v2859_v18   ;;  %2868 = vst.msk [vmem:[#allocation0 + $0x1309] ss:$16 sm:$0xc0] %vm3_vm0, %v2859_v18  }
 0x3db   :  { %12074 = vst [vmem:[%s17895_s1 + $0x36e] sm:$0x3] %v6268_v17  ;;  %12076 = vst [vmem:[%s17895_s1 + $0x372] sm:$0x3] %v6282_v22  ;;  %v6296_v23 = vld [vmem:[#allocation0 + $0xdd8] sm:$0x3]  ;;  %v3002_v17 = vpop.permute.xlu1 %3001  }
 0x3dc   :  { %v6310_v26 = vld [vmem:[#allocation0 + $0xde8] sm:$0x3]  ;;  %v6324_v46 = vld [vmem:[#allocation0 + $0xdf8] sm:$0x3]  ;;  %12078 = vst [vmem:[%s17895_s1 + $0x376] sm:$0x3] %v6296_v23 }
 0x3dd   :  { %12080 = vst [vmem:[%s17895_s1 + $0x37a] sm:$0x3] %v6310_v26  ;;  %12082 = vst [vmem:[%s17895_s1 + $0x37e] sm:$0x3] %v6324_v46  ;;  %v6114_v47 = vld [vmem:[#allocation0 + $0xd08] sm:$0x3]  ;;  %v2989_v46 = vpop.permute.xlu0 %2988  }
 0x3de   :  { %v6128_v32 = vld [vmem:[#allocation0 + $0xd18] sm:$0x3]  ;;  %v6142_v33 = vld [vmem:[#allocation0 + $0xd28] sm:$0x3]  ;;  %12052 = vst [vmem:[%s17895_s1 + $0x342] sm:$0x3] %v6114_v47 }
 0x3df   :  { %12054 = vst [vmem:[%s17895_s1 + $0x346] sm:$0x3] %v6128_v32  ;;  %12056 = vst [vmem:[%s17895_s1 + $0x34a] sm:$0x3] %v6142_v33  ;;  %v6156_v37 = vld [vmem:[#allocation0 + $0xd38] sm:$0x3] }
 0x3e0   :  { %v6170_v27 = vld [vmem:[#allocation0 + $0xd48] sm:$0x3]  ;;  %v6184_v34 = vld [vmem:[#allocation0 + $0xd58] sm:$0x3]  ;;  %12058 = vst [vmem:[%s17895_s1 + $0x34e] sm:$0x3] %v6156_v37 }
 0x3e1   :  { %2901 = vst.msk [vmem:[#allocation0 + $0x1489] ss:$16 sm:$0x3] %vm3_vm0, %v2898_v36   ;;  %2903 = vst.msk [vmem:[#allocation0 + $0x1489] ss:$16 sm:$0xc] %vm3_vm0, %v2898_v36  }
 0x3e2   :  { %2905 = vst.msk [vmem:[#allocation0 + $0x1489] ss:$16 sm:$0x30] %vm3_vm0, %v2898_v36   ;;  %2907 = vst.msk [vmem:[#allocation0 + $0x1489] ss:$16 sm:$0xc0] %vm3_vm0, %v2898_v36  }
 0x3e3   :  { %12060 = vst [vmem:[%s17895_s1 + $0x352] sm:$0x3] %v6170_v27  ;;  %12062 = vst [vmem:[%s17895_s1 + $0x356] sm:$0x3] %v6184_v34  ;;  %v6198_v11 = vld [vmem:[#allocation0 + $0xd68] sm:$0x3] }
 0x3e4   :  { %v6212_v35 = vld [vmem:[#allocation0 + $0xd78] sm:$0x3]  ;;  %v6450_v40 = vld [vmem:[#allocation0 + $0xe88] sm:$0x3]  ;;  %12064 = vst [vmem:[%s17895_s1 + $0x35a] sm:$0x3] %v6198_v11 }
 0x3e5   :  { %2888 = vst.msk [vmem:[#allocation0 + $0x1409] ss:$16 sm:$0x3] %vm3_vm0, %v2885_v10   ;;  %2890 = vst.msk [vmem:[#allocation0 + $0x1409] ss:$16 sm:$0xc] %vm3_vm0, %v2885_v10  }
 0x3e6   :  { %2892 = vst.msk [vmem:[#allocation0 + $0x1409] ss:$16 sm:$0x30] %vm3_vm0, %v2885_v10   ;;  %2894 = vst.msk [vmem:[#allocation0 + $0x1409] ss:$16 sm:$0xc0] %vm3_vm0, %v2885_v10  }
 0x3e7   :  { %12066 = vst [vmem:[%s17895_s1 + $0x35e] sm:$0x3] %v6212_v35  ;;  %12100 = vst [vmem:[%s17895_s1 + $0x3a2] sm:$0x3] %v6450_v40  ;;  %v6464_v41 = vld [vmem:[#allocation0 + $0xe98] sm:$0x3]  ;;  %v3028_v35 = vpop.permute.xlu1 %3027  }
 0x3e8   :  { %v6478_v48 = vld [vmem:[#allocation0 + $0xea8] sm:$0x3]  ;;  %v6492_v49 = vld [vmem:[#allocation0 + $0xeb8] sm:$0x3]  ;;  %12102 = vst [vmem:[%s17895_s1 + $0x3a6] sm:$0x3] %v6464_v41 }
 0x3e9   :  { %12104 = vst [vmem:[%s17895_s1 + $0x3aa] sm:$0x3] %v6478_v48  ;;  %12106 = vst [vmem:[%s17895_s1 + $0x3ae] sm:$0x3] %v6492_v49  ;;  %v6506_v50 = vld [vmem:[#allocation0 + $0xec8] sm:$0x3]  ;;  %v3015_v49 = vpop.permute.xlu0 %3014  }
 0x3ea   :  { %v6520_v24 = vld [vmem:[#allocation0 + $0xed8] sm:$0x3]  ;;  %v6534_v25 = vld [vmem:[#allocation0 + $0xee8] sm:$0x3]  ;;  %12108 = vst [vmem:[%s17895_s1 + $0x3b2] sm:$0x3] %v6506_v50 }
 0x3eb   :  { %12110 = vst [vmem:[%s17895_s1 + $0x3b6] sm:$0x3] %v6520_v24  ;;  %12112 = vst [vmem:[%s17895_s1 + $0x3ba] sm:$0x3] %v6534_v25  ;;  %v6548_v45 = vld [vmem:[#allocation0 + $0xef8] sm:$0x3] }
 0x3ec   :  { %v6338_v52 = vld [vmem:[#allocation0 + $0xe08] sm:$0x3]  ;;  %v6352_v53 = vld [vmem:[#allocation0 + $0xe18] sm:$0x3]  ;;  %12114 = vst [vmem:[%s17895_s1 + $0x3be] sm:$0x3] %v6548_v45 }
 0x3ed   :  { %2927 = vst.msk [vmem:[#allocation0 + $0x1589] ss:$16 sm:$0x3] %vm3_vm0, %v2924_v44   ;;  %2929 = vst.msk [vmem:[#allocation0 + $0x1589] ss:$16 sm:$0xc] %vm3_vm0, %v2924_v44  }
 0x3ee   :  { %2931 = vst.msk [vmem:[#allocation0 + $0x1589] ss:$16 sm:$0x30] %vm3_vm0, %v2924_v44   ;;  %2933 = vst.msk [vmem:[#allocation0 + $0x1589] ss:$16 sm:$0xc0] %vm3_vm0, %v2924_v44  }
 0x3ef   :  { %12084 = vst [vmem:[%s17895_s1 + $0x382] sm:$0x3] %v6338_v52  ;;  %12086 = vst [vmem:[%s17895_s1 + $0x386] sm:$0x3] %v6352_v53  ;;  %v6366_v2 = vld [vmem:[#allocation0 + $0xe28] sm:$0x3] }
 0x3f0   :  { %v6380_v14 = vld [vmem:[#allocation0 + $0xe38] sm:$0x3]  ;;  %v6394_v39 = vld [vmem:[#allocation0 + $0xe48] sm:$0x3]  ;;  %12088 = vst [vmem:[%s17895_s1 + $0x38a] sm:$0x3] %v6366_v2 }
 0x3f1   :  { %2914 = vst.msk [vmem:[#allocation0 + $0x1509] ss:$16 sm:$0x3] %vm3_vm0, %v2911_v0   ;;  %2916 = vst.msk [vmem:[#allocation0 + $0x1509] ss:$16 sm:$0xc] %vm3_vm0, %v2911_v0  }
 0x3f2   :  { %2918 = vst.msk [vmem:[#allocation0 + $0x1509] ss:$16 sm:$0x30] %vm3_vm0, %v2911_v0   ;;  %2920 = vst.msk [vmem:[#allocation0 + $0x1509] ss:$16 sm:$0xc0] %vm3_vm0, %v2911_v0  }
 0x3f3   :  { %12090 = vst [vmem:[%s17895_s1 + $0x38e] sm:$0x3] %v6380_v14  ;;  %12092 = vst [vmem:[%s17895_s1 + $0x392] sm:$0x3] %v6394_v39  ;;  %v6408_v6 = vld [vmem:[#allocation0 + $0xe58] sm:$0x3]  ;;  %v3054_v14 = vpop.permute.xlu1 %3053  }
 0x3f4   :  { %v6422_v7 = vld [vmem:[#allocation0 + $0xe68] sm:$0x3]  ;;  %v6436_v15 = vld [vmem:[#allocation0 + $0xe78] sm:$0x3]  ;;  %12094 = vst [vmem:[%s17895_s1 + $0x396] sm:$0x3] %v6408_v6 }
 0x3f5   :  { %12096 = vst [vmem:[%s17895_s1 + $0x39a] sm:$0x3] %v6422_v7  ;;  %12098 = vst [vmem:[%s17895_s1 + $0x39e] sm:$0x3] %v6436_v15  ;;  %v6674_v51 = vld [vmem:[#allocation0 + $0xf88] sm:$0x3]  ;;  %v3041_v15 = vpop.permute.xlu0 %3040  }
 0x3f6   :  { %v6688_v54 = vld [vmem:[#allocation0 + $0xf98] sm:$0x3]  ;;  %v6730_v58 = vld [vmem:[#allocation0 + $0xfc8] sm:$0x3]  ;;  %12132 = vst [vmem:[%s17895_s1 + $0x3e2] sm:$0x3] %v6674_v51 }
 0x3f7   :  { %12134 = vst [vmem:[%s17895_s1 + $0x3e6] sm:$0x3] %v6688_v54  ;;  %12140 = vst [vmem:[%s17895_s1 + $0x3f2] sm:$0x3] %v6730_v58  ;;  %v6744_v59 = vld [vmem:[#allocation0 + $0xfd8] sm:$0x3] }
 0x3f8   :  { %v6758_v55 = vld [vmem:[#allocation0 + $0xfe8] sm:$0x3]  ;;  %v6772_v62 = vld [vmem:[#allocation0 + $0xff8] sm:$0x3]  ;;  %12142 = vst [vmem:[%s17895_s1 + $0x3f6] sm:$0x3] %v6744_v59 }
 0x3f9   :  { %2953 = vst.msk [vmem:[#allocation0 + $0x1689] ss:$16 sm:$0x3] %vm3_vm0, %v2950_v38   ;;  %2955 = vst.msk [vmem:[#allocation0 + $0x1689] ss:$16 sm:$0xc] %vm3_vm0, %v2950_v38  }
 0x3fa   :  { %2957 = vst.msk [vmem:[#allocation0 + $0x1689] ss:$16 sm:$0x30] %vm3_vm0, %v2950_v38   ;;  %2959 = vst.msk [vmem:[#allocation0 + $0x1689] ss:$16 sm:$0xc0] %vm3_vm0, %v2950_v38  }
 0x3fb   :  { %12144 = vst [vmem:[%s17895_s1 + $0x3fa] sm:$0x3] %v6758_v55  ;;  %12146 = vst [vmem:[%s17895_s1 + $0x3fe] sm:$0x3] %v6772_v62  ;;  %v6702_v8 = vld [vmem:[#allocation0 + $0xfa8] sm:$0x3] }
 0x3fc   :  { %v6716_v56 = vld [vmem:[#allocation0 + $0xfb8] sm:$0x3]  ;;  %v6590_v57 = vld [vmem:[#allocation0 + $0xf28] sm:$0x3]  ;;  %12136 = vst [vmem:[%s17895_s1 + $0x3ea] sm:$0x3] %v6702_v8 }
 0x3fd   :  { %2940 = vst.msk [vmem:[#allocation0 + $0x1609] ss:$16 sm:$0x3] %vm3_vm0, %v2937_v63   ;;  %2942 = vst.msk [vmem:[#allocation0 + $0x1609] ss:$16 sm:$0xc] %vm3_vm0, %v2937_v63  }
 0x3fe   :  { %2944 = vst.msk [vmem:[#allocation0 + $0x1609] ss:$16 sm:$0x30] %vm3_vm0, %v2937_v63   ;;  %2946 = vst.msk [vmem:[#allocation0 + $0x1609] ss:$16 sm:$0xc0] %vm3_vm0, %v2937_v63  }
 0x3ff   :  { %12120 = vst [vmem:[%s17895_s1 + $0x3ca] sm:$0x3] %v6590_v57  ;;  %v6604_v20 = vld [vmem:[#allocation0 + $0xf38] sm:$0x3]  ;;  %v6646_v21 = vld [vmem:[#allocation0 + $0xf68] sm:$0x3] }
 0x400   :  { %v6660_v9 = vld [vmem:[#allocation0 + $0xf78] sm:$0x3]  ;;  %12138 = vst [vmem:[%s17895_s1 + $0x3ee] sm:$0x3] %v6716_v56  ;;  %12122 = vst [vmem:[%s17895_s1 + $0x3ce] sm:$0x3] %v6604_v20  ;;  %v3080_v56 = vpop.permute.xlu1 %3079  }
 0x401   :  { %12128 = vst [vmem:[%s17895_s1 + $0x3da] sm:$0x3] %v6646_v21  ;;  %12130 = vst [vmem:[%s17895_s1 + $0x3de] sm:$0x3] %v6660_v9  ;;  %v6562_v12 = vld [vmem:[#allocation0 + $0xf08] sm:$0x3]  ;;  %v3067_v9 = vpop.permute.xlu0 %3066  }
 0x402   :  { %v6576_v28 = vld [vmem:[#allocation0 + $0xf18] sm:$0x3]  ;;  %v6618_v29 = vld [vmem:[#allocation0 + $0xf48] sm:$0x3]  ;;  %12116 = vst [vmem:[%s17895_s1 + $0x3c2] sm:$0x3] %v6562_v12 }
 0x403   :  { %v6632_v43 = vld [vmem:[#allocation0 + $0xf58] sm:$0x3]  ;;  %v6926_v13 = vld [vmem:[#allocation0 + $0x10a8] sm:$0x3]  ;;  %12118 = vst [vmem:[%s17895_s1 + $0x3c6] sm:$0x3] %v6576_v28 }
 0x404   :  { %v6940_v16 = vld [vmem:[#allocation0 + $0x10b8] sm:$0x3]  ;;  %12124 = vst [vmem:[%s17895_s1 + $0x3d2] sm:$0x3] %v6618_v29  ;;  %12168 = vst [vmem:[%s17895_s1 + $0x42a] sm:$0x3] %v6926_v13 }
 0x405   :  { %2979 = vst.msk [vmem:[#allocation0 + $0x1789] ss:$16 sm:$0x3] %vm3_vm0, %v2976_v42   ;;  %2981 = vst.msk [vmem:[#allocation0 + $0x1789] ss:$16 sm:$0xc] %vm3_vm0, %v2976_v42  }
 0x406   :  { %2983 = vst.msk [vmem:[#allocation0 + $0x1789] ss:$16 sm:$0x30] %vm3_vm0, %v2976_v42   ;;  %2985 = vst.msk [vmem:[#allocation0 + $0x1789] ss:$16 sm:$0xc0] %vm3_vm0, %v2976_v42  }
 0x407   :  { %12170 = vst [vmem:[%s17895_s1 + $0x42e] sm:$0x3] %v6940_v16  ;;  %v6982_v3 = vld [vmem:[#allocation0 + $0x10e8] sm:$0x3]  ;;  %v6996_v4 = vld [vmem:[#allocation0 + $0x10f8] sm:$0x3] }
 0x408   :  { %12126 = vst [vmem:[%s17895_s1 + $0x3d6] sm:$0x3] %v6632_v43  ;;  %v6898_v5 = vld [vmem:[#allocation0 + $0x1088] sm:$0x3]  ;;  %12176 = vst [vmem:[%s17895_s1 + $0x43a] sm:$0x3] %v6982_v3 }
 0x409   :  { %2966 = vst.msk [vmem:[#allocation0 + $0x1709] ss:$16 sm:$0x3] %vm3_vm0, %v2963_v1   ;;  %2968 = vst.msk [vmem:[#allocation0 + $0x1709] ss:$16 sm:$0xc] %vm3_vm0, %v2963_v1  }
 0x40a   :  { %2970 = vst.msk [vmem:[#allocation0 + $0x1709] ss:$16 sm:$0x30] %vm3_vm0, %v2963_v1   ;;  %2972 = vst.msk [vmem:[#allocation0 + $0x1709] ss:$16 sm:$0xc0] %vm3_vm0, %v2963_v1  }
 0x40b   :  { %12178 = vst [vmem:[%s17895_s1 + $0x43e] sm:$0x3] %v6996_v4  ;;  %v6912_v30 = vld [vmem:[#allocation0 + $0x1098] sm:$0x3]  ;;  %v6954_v31 = vld [vmem:[#allocation0 + $0x10c8] sm:$0x3]  ;;  %v3106_v4 = vpop.permute.xlu1 %3105  }
 0x40c   :  { %v6968_v60 = vld [vmem:[#allocation0 + $0x10d8] sm:$0x3]  ;;  %12164 = vst [vmem:[%s17895_s1 + $0x422] sm:$0x3] %v6898_v5  ;;  %v6786_v61 = vld [vmem:[#allocation0 + $0x1008] sm:$0x3] }
 0x40d   :  { %v6800_v18 = vld [vmem:[#allocation0 + $0x1018] sm:$0x3]  ;;  %v6842_v19 = vld [vmem:[#allocation0 + $0x1048] sm:$0x3]  ;;  %12166 = vst [vmem:[%s17895_s1 + $0x426] sm:$0x3] %v6912_v30 }
 0x40e   :  { %12172 = vst [vmem:[%s17895_s1 + $0x432] sm:$0x3] %v6954_v31  ;;  %12174 = vst [vmem:[%s17895_s1 + $0x436] sm:$0x3] %v6968_v60  ;;  %v6856_v22 = vld [vmem:[#allocation0 + $0x1058] sm:$0x3]  ;;  %v3093_v60 = vpop.permute.xlu0 %3092  }
 0x40f   :  { %12148 = vst [vmem:[%s17895_s1 + $0x402] sm:$0x3] %v6786_v61  ;;  %12150 = vst [vmem:[%s17895_s1 + $0x406] sm:$0x3] %v6800_v18  ;;  %v6870_v23 = vld [vmem:[#allocation0 + $0x1068] sm:$0x3] }
 0x410   :  { %12156 = vst [vmem:[%s17895_s1 + $0x412] sm:$0x3] %v6842_v19  ;;  %v6884_v26 = vld [vmem:[#allocation0 + $0x1078] sm:$0x3]  ;;  %12158 = vst [vmem:[%s17895_s1 + $0x416] sm:$0x3] %v6856_v22 }
 0x411   :  { %3005 = vst.msk [vmem:[#allocation0 + $0x1889] ss:$16 sm:$0x3] %vm3_vm0, %v3002_v17   ;;  %3007 = vst.msk [vmem:[#allocation0 + $0x1889] ss:$16 sm:$0xc] %vm3_vm0, %v3002_v17  }
 0x412   :  { %3009 = vst.msk [vmem:[#allocation0 + $0x1889] ss:$16 sm:$0x30] %vm3_vm0, %v3002_v17   ;;  %3011 = vst.msk [vmem:[#allocation0 + $0x1889] ss:$16 sm:$0xc0] %vm3_vm0, %v3002_v17  }
 0x413   :  { %12160 = vst [vmem:[%s17895_s1 + $0x41a] sm:$0x3] %v6870_v23  ;;  %12162 = vst [vmem:[%s17895_s1 + $0x41e] sm:$0x3] %v6884_v26  ;;  %v6814_v47 = vld [vmem:[#allocation0 + $0x1028] sm:$0x3] }
 0x414   :  { %v6828_v32 = vld [vmem:[#allocation0 + $0x1038] sm:$0x3]  ;;  %v7122_v33 = vld [vmem:[#allocation0 + $0x1188] sm:$0x3]  ;;  %12152 = vst [vmem:[%s17895_s1 + $0x40a] sm:$0x3] %v6814_v47 }
 0x415   :  { %2992 = vst.msk [vmem:[#allocation0 + $0x1809] ss:$16 sm:$0x3] %vm3_vm0, %v2989_v46   ;;  %2994 = vst.msk [vmem:[#allocation0 + $0x1809] ss:$16 sm:$0xc] %vm3_vm0, %v2989_v46  }
 0x416   :  { %2996 = vst.msk [vmem:[#allocation0 + $0x1809] ss:$16 sm:$0x30] %vm3_vm0, %v2989_v46   ;;  %2998 = vst.msk [vmem:[#allocation0 + $0x1809] ss:$16 sm:$0xc0] %vm3_vm0, %v2989_v46  }
 0x417   :  { %12196 = vst [vmem:[%s17895_s1 + $0x462] sm:$0x3] %v7122_v33  ;;  %v7136_v36 = vld [vmem:[#allocation0 + $0x1198] sm:$0x3]  ;;  %v7206_v37 = vld [vmem:[#allocation0 + $0x11e8] sm:$0x3] }
 0x418   :  { %v7220_v27 = vld [vmem:[#allocation0 + $0x11f8] sm:$0x3]  ;;  %12154 = vst [vmem:[%s17895_s1 + $0x40e] sm:$0x3] %v6828_v32  ;;  %12198 = vst [vmem:[%s17895_s1 + $0x466] sm:$0x3] %v7136_v36  ;;  %v3132_v32 = vpop.permute.xlu1 %3131  }
 0x419   :  { %12208 = vst [vmem:[%s17895_s1 + $0x47a] sm:$0x3] %v7206_v37  ;;  %12210 = vst [vmem:[%s17895_s1 + $0x47e] sm:$0x3] %v7220_v27  ;;  %v7150_v34 = vld [vmem:[#allocation0 + $0x11a8] sm:$0x3]  ;;  %v3119_v27 = vpop.permute.xlu0 %3118  }
 0x41a   :  { %v7164_v10 = vld [vmem:[#allocation0 + $0x11b8] sm:$0x3]  ;;  %v7178_v11 = vld [vmem:[#allocation0 + $0x11c8] sm:$0x3]  ;;  %12200 = vst [vmem:[%s17895_s1 + $0x46a] sm:$0x3] %v7150_v34 }
 0x41b   :  { %v7192_v40 = vld [vmem:[#allocation0 + $0x11d8] sm:$0x3]  ;;  %v7010_v41 = vld [vmem:[#allocation0 + $0x1108] sm:$0x3]  ;;  %12202 = vst [vmem:[%s17895_s1 + $0x46e] sm:$0x3] %v7164_v10 }
 0x41c   :  { %v7024_v48 = vld [vmem:[#allocation0 + $0x1118] sm:$0x3]  ;;  %12204 = vst [vmem:[%s17895_s1 + $0x472] sm:$0x3] %v7178_v11  ;;  %12180 = vst [vmem:[%s17895_s1 + $0x442] sm:$0x3] %v7010_v41 }
 0x41d   :  { %3031 = vst.msk [vmem:[#allocation0 + $0x1989] ss:$16 sm:$0x3] %vm3_vm0, %v3028_v35   ;;  %3033 = vst.msk [vmem:[#allocation0 + $0x1989] ss:$16 sm:$0xc] %vm3_vm0, %v3028_v35  }
 0x41e   :  { %3035 = vst.msk [vmem:[#allocation0 + $0x1989] ss:$16 sm:$0x30] %vm3_vm0, %v3028_v35   ;;  %3037 = vst.msk [vmem:[#allocation0 + $0x1989] ss:$16 sm:$0xc0] %vm3_vm0, %v3028_v35  }
 0x41f   :  { %12182 = vst [vmem:[%s17895_s1 + $0x446] sm:$0x3] %v7024_v48  ;;  %v7038_v50 = vld [vmem:[#allocation0 + $0x1128] sm:$0x3]  ;;  %v7052_v24 = vld [vmem:[#allocation0 + $0x1138] sm:$0x3] }
 0x420   :  { %v7066_v25 = vld [vmem:[#allocation0 + $0x1148] sm:$0x3]  ;;  %12206 = vst [vmem:[%s17895_s1 + $0x476] sm:$0x3] %v7192_v40  ;;  %12184 = vst [vmem:[%s17895_s1 + $0x44a] sm:$0x3] %v7038_v50 }
 0x421   :  { %3018 = vst.msk [vmem:[#allocation0 + $0x1909] ss:$16 sm:$0x3] %vm3_vm0, %v3015_v49   ;;  %3020 = vst.msk [vmem:[#allocation0 + $0x1909] ss:$16 sm:$0xc] %vm3_vm0, %v3015_v49  }
 0x422   :  { %3022 = vst.msk [vmem:[#allocation0 + $0x1909] ss:$16 sm:$0x30] %vm3_vm0, %v3015_v49   ;;  %3024 = vst.msk [vmem:[#allocation0 + $0x1909] ss:$16 sm:$0xc0] %vm3_vm0, %v3015_v49  }
 0x423   :  { %12186 = vst [vmem:[%s17895_s1 + $0x44e] sm:$0x3] %v7052_v24  ;;  %12188 = vst [vmem:[%s17895_s1 + $0x452] sm:$0x3] %v7066_v25  ;;  %v7080_v44 = vld [vmem:[#allocation0 + $0x1158] sm:$0x3]  ;;  %v3158_v24 = vpop.permute.xlu1 %3157  }
 0x424   :  { %v7094_v45 = vld [vmem:[#allocation0 + $0x1168] sm:$0x3]  ;;  %v7108_v52 = vld [vmem:[#allocation0 + $0x1178] sm:$0x3]  ;;  %12190 = vst [vmem:[%s17895_s1 + $0x456] sm:$0x3] %v7080_v44 }
 0x425   :  { %v7346_v53 = vld [vmem:[#allocation0 + $0x1288] sm:$0x3]  ;;  %v7360_v0 = vld [vmem:[#allocation0 + $0x1298] sm:$0x3]  ;;  %12192 = vst [vmem:[%s17895_s1 + $0x45a] sm:$0x3] %v7094_v45 }
 0x426   :  { %v7374_v2 = vld [vmem:[#allocation0 + $0x12a8] sm:$0x3]  ;;  %12194 = vst [vmem:[%s17895_s1 + $0x45e] sm:$0x3] %v7108_v52  ;;  %12228 = vst [vmem:[%s17895_s1 + $0x4a2] sm:$0x3] %v7346_v53  ;;  %v3145_v52 = vpop.permute.xlu0 %3144  }
 0x427   :  { %12230 = vst [vmem:[%s17895_s1 + $0x4a6] sm:$0x3] %v7360_v0  ;;  %12232 = vst [vmem:[%s17895_s1 + $0x4aa] sm:$0x3] %v7374_v2  ;;  %v7388_v39 = vld [vmem:[#allocation0 + $0x12b8] sm:$0x3] }
 0x428   :  { %v7402_v6 = vld [vmem:[#allocation0 + $0x12c8] sm:$0x3]  ;;  %v7416_v7 = vld [vmem:[#allocation0 + $0x12d8] sm:$0x3]  ;;  %12234 = vst [vmem:[%s17895_s1 + $0x4ae] sm:$0x3] %v7388_v39 }
 0x429   :  { %3057 = vst.msk [vmem:[#allocation0 + $0x1a89] ss:$16 sm:$0x3] %vm3_vm0, %v3054_v14   ;;  %3059 = vst.msk [vmem:[#allocation0 + $0x1a89] ss:$16 sm:$0xc] %vm3_vm0, %v3054_v14  }
 0x42a   :  { %3061 = vst.msk [vmem:[#allocation0 + $0x1a89] ss:$16 sm:$0x30] %vm3_vm0, %v3054_v14   ;;  %3063 = vst.msk [vmem:[#allocation0 + $0x1a89] ss:$16 sm:$0xc0] %vm3_vm0, %v3054_v14  }
 0x42b   :  { %12236 = vst [vmem:[%s17895_s1 + $0x4b2] sm:$0x3] %v7402_v6  ;;  %12238 = vst [vmem:[%s17895_s1 + $0x4b6] sm:$0x3] %v7416_v7  ;;  %v7430_v51 = vld [vmem:[#allocation0 + $0x12e8] sm:$0x3] }
 0x42c   :  { %v7444_v54 = vld [vmem:[#allocation0 + $0x12f8] sm:$0x3]  ;;  %v7234_v58 = vld [vmem:[#allocation0 + $0x1208] sm:$0x3]  ;;  %12240 = vst [vmem:[%s17895_s1 + $0x4ba] sm:$0x3] %v7430_v51 }
 0x42d   :  { %3044 = vst.msk [vmem:[#allocation0 + $0x1a09] ss:$16 sm:$0x3] %vm3_vm0, %v3041_v15   ;;  %3046 = vst.msk [vmem:[#allocation0 + $0x1a09] ss:$16 sm:$0xc] %vm3_vm0, %v3041_v15  }
 0x42e   :  { %3048 = vst.msk [vmem:[#allocation0 + $0x1a09] ss:$16 sm:$0x30] %vm3_vm0, %v3041_v15   ;;  %3050 = vst.msk [vmem:[#allocation0 + $0x1a09] ss:$16 sm:$0xc0] %vm3_vm0, %v3041_v15  }
 0x42f   :  { %12212 = vst [vmem:[%s17895_s1 + $0x482] sm:$0x3] %v7234_v58  ;;  %v7248_v38 = vld [vmem:[#allocation0 + $0x1218] sm:$0x3]  ;;  %v7262_v59 = vld [vmem:[#allocation0 + $0x1228] sm:$0x3] }
 0x430   :  { %v7276_v55 = vld [vmem:[#allocation0 + $0x1238] sm:$0x3]  ;;  %12242 = vst [vmem:[%s17895_s1 + $0x4be] sm:$0x3] %v7444_v54  ;;  %12214 = vst [vmem:[%s17895_s1 + $0x486] sm:$0x3] %v7248_v38  ;;  %v3184_v54 = vpop.permute.xlu1 %3183  }
 0x431   :  { %12216 = vst [vmem:[%s17895_s1 + $0x48a] sm:$0x3] %v7262_v59  ;;  %12218 = vst [vmem:[%s17895_s1 + $0x48e] sm:$0x3] %v7276_v55  ;;  %v7290_v62 = vld [vmem:[#allocation0 + $0x1248] sm:$0x3]  ;;  %v3171_v55 = vpop.permute.xlu0 %3170  }
 0x432   :  { %v7304_v63 = vld [vmem:[#allocation0 + $0x1258] sm:$0x3]  ;;  %v7318_v8 = vld [vmem:[#allocation0 + $0x1268] sm:$0x3]  ;;  %12220 = vst [vmem:[%s17895_s1 + $0x492] sm:$0x3] %v7290_v62 }
 0x433   :  { %12222 = vst [vmem:[%s17895_s1 + $0x496] sm:$0x3] %v7304_v63  ;;  %v7332_v57 = vld [vmem:[#allocation0 + $0x1278] sm:$0x3]  ;;  %v7570_v20 = vld [vmem:[#allocation0 + $0x1388] sm:$0x3] }
 0x434   :  { %v7584_v21 = vld [vmem:[#allocation0 + $0x1398] sm:$0x3]  ;;  %12224 = vst [vmem:[%s17895_s1 + $0x49a] sm:$0x3] %v7318_v8  ;;  %12260 = vst [vmem:[%s17895_s1 + $0x4e2] sm:$0x3] %v7570_v20 }
 0x435   :  { %3083 = vst.msk [vmem:[#allocation0 + $0x1b89] ss:$16 sm:$0x3] %vm3_vm0, %v3080_v56   ;;  %3085 = vst.msk [vmem:[#allocation0 + $0x1b89] ss:$16 sm:$0xc] %vm3_vm0, %v3080_v56  }
 0x436   :  { %3087 = vst.msk [vmem:[#allocation0 + $0x1b89] ss:$16 sm:$0x30] %vm3_vm0, %v3080_v56   ;;  %3089 = vst.msk [vmem:[#allocation0 + $0x1b89] ss:$16 sm:$0xc0] %vm3_vm0, %v3080_v56  }
 0x437   :  { %12262 = vst [vmem:[%s17895_s1 + $0x4e6] sm:$0x3] %v7584_v21  ;;  %v7598_v12 = vld [vmem:[#allocation0 + $0x13a8] sm:$0x3]  ;;  %v7612_v28 = vld [vmem:[#allocation0 + $0x13b8] sm:$0x3] }
 0x438   :  { %v7626_v29 = vld [vmem:[#allocation0 + $0x13c8] sm:$0x3]  ;;  %12226 = vst [vmem:[%s17895_s1 + $0x49e] sm:$0x3] %v7332_v57  ;;  %12264 = vst [vmem:[%s17895_s1 + $0x4ea] sm:$0x3] %v7598_v12 }
 0x439   :  { %3070 = vst.msk [vmem:[#allocation0 + $0x1b09] ss:$16 sm:$0x3] %vm3_vm0, %v3067_v9   ;;  %3072 = vst.msk [vmem:[#allocation0 + $0x1b09] ss:$16 sm:$0xc] %vm3_vm0, %v3067_v9  }
 0x43a   :  { %3074 = vst.msk [vmem:[#allocation0 + $0x1b09] ss:$16 sm:$0x30] %vm3_vm0, %v3067_v9   ;;  %3076 = vst.msk [vmem:[#allocation0 + $0x1b09] ss:$16 sm:$0xc0] %vm3_vm0, %v3067_v9  }
 0x43b   :  { %12266 = vst [vmem:[%s17895_s1 + $0x4ee] sm:$0x3] %v7612_v28  ;;  %12268 = vst [vmem:[%s17895_s1 + $0x4f2] sm:$0x3] %v7626_v29  ;;  %v7640_v42 = vld [vmem:[#allocation0 + $0x13d8] sm:$0x3] }
 0x43c   :  { %v7654_v43 = vld [vmem:[#allocation0 + $0x13e8] sm:$0x3]  ;;  %v7668_v13 = vld [vmem:[#allocation0 + $0x13f8] sm:$0x3]  ;;  %12270 = vst [vmem:[%s17895_s1 + $0x4f6] sm:$0x3] %v7640_v42 }
 0x43d   :  { %v7458_v16 = vld [vmem:[#allocation0 + $0x1308] sm:$0x3]  ;;  %v7472_v1 = vld [vmem:[#allocation0 + $0x1318] sm:$0x3]  ;;  %12272 = vst [vmem:[%s17895_s1 + $0x4fa] sm:$0x3] %v7654_v43 }
 0x43e   :  { %v7486_v3 = vld [vmem:[#allocation0 + $0x1328] sm:$0x3]  ;;  %12274 = vst [vmem:[%s17895_s1 + $0x4fe] sm:$0x3] %v7668_v13  ;;  %12244 = vst [vmem:[%s17895_s1 + $0x4c2] sm:$0x3] %v7458_v16 }
 0x43f   :  { %12246 = vst [vmem:[%s17895_s1 + $0x4c6] sm:$0x3] %v7472_v1  ;;  %12248 = vst [vmem:[%s17895_s1 + $0x4ca] sm:$0x3] %v7486_v3  ;;  %v7500_v5 = vld [vmem:[#allocation0 + $0x1338] sm:$0x3] }
 0x440   :  { %v7514_v30 = vld [vmem:[#allocation0 + $0x1348] sm:$0x3]  ;;  %v7528_v31 = vld [vmem:[#allocation0 + $0x1358] sm:$0x3]  ;;  %12250 = vst [vmem:[%s17895_s1 + $0x4ce] sm:$0x3] %v7500_v5 }
 0x441   :  { %3109 = vst.msk [vmem:[#allocation0 + $0x1c89] ss:$16 sm:$0x3] %vm3_vm0, %v3106_v4   ;;  %3111 = vst.msk [vmem:[#allocation0 + $0x1c89] ss:$16 sm:$0xc] %vm3_vm0, %v3106_v4  }
 0x442   :  { %3113 = vst.msk [vmem:[#allocation0 + $0x1c89] ss:$16 sm:$0x30] %vm3_vm0, %v3106_v4   ;;  %3115 = vst.msk [vmem:[#allocation0 + $0x1c89] ss:$16 sm:$0xc0] %vm3_vm0, %v3106_v4  }
 0x443   :  { %12252 = vst [vmem:[%s17895_s1 + $0x4d2] sm:$0x3] %v7514_v30  ;;  %12254 = vst [vmem:[%s17895_s1 + $0x4d6] sm:$0x3] %v7528_v31  ;;  %v7542_v61 = vld [vmem:[#allocation0 + $0x1368] sm:$0x3] }
 0x444   :  { %v7556_v18 = vld [vmem:[#allocation0 + $0x1378] sm:$0x3]  ;;  %v7794_v19 = vld [vmem:[#allocation0 + $0x1488] sm:$0x3]  ;;  %12256 = vst [vmem:[%s17895_s1 + $0x4da] sm:$0x3] %v7542_v61 }
 0x445   :  { %3096 = vst.msk [vmem:[#allocation0 + $0x1c09] ss:$16 sm:$0x3] %vm3_vm0, %v3093_v60   ;;  %3098 = vst.msk [vmem:[#allocation0 + $0x1c09] ss:$16 sm:$0xc] %vm3_vm0, %v3093_v60  }
 0x446   :  { %3100 = vst.msk [vmem:[#allocation0 + $0x1c09] ss:$16 sm:$0x30] %vm3_vm0, %v3093_v60   ;;  %3102 = vst.msk [vmem:[#allocation0 + $0x1c09] ss:$16 sm:$0xc0] %vm3_vm0, %v3093_v60  }
 0x447   :  { %12292 = vst [vmem:[%s17895_s1 + $0x522] sm:$0x3] %v7794_v19  ;;  %v7808_v17 = vld [vmem:[#allocation0 + $0x1498] sm:$0x3]  ;;  %v7822_v22 = vld [vmem:[#allocation0 + $0x14a8] sm:$0x3] }
 0x448   :  { %v7836_v23 = vld [vmem:[#allocation0 + $0x14b8] sm:$0x3]  ;;  %12258 = vst [vmem:[%s17895_s1 + $0x4de] sm:$0x3] %v7556_v18  ;;  %12294 = vst [vmem:[%s17895_s1 + $0x526] sm:$0x3] %v7808_v17 }
 0x449   :  { %12296 = vst [vmem:[%s17895_s1 + $0x52a] sm:$0x3] %v7822_v22  ;;  %12298 = vst [vmem:[%s17895_s1 + $0x52e] sm:$0x3] %v7836_v23  ;;  %v7850_v26 = vld [vmem:[#allocation0 + $0x14c8] sm:$0x3] }
 0x44a   :  { %v7864_v46 = vld [vmem:[#allocation0 + $0x14d8] sm:$0x3]  ;;  %v7878_v47 = vld [vmem:[#allocation0 + $0x14e8] sm:$0x3]  ;;  %12300 = vst [vmem:[%s17895_s1 + $0x532] sm:$0x3] %v7850_v26 }
 0x44b   :  { %12302 = vst [vmem:[%s17895_s1 + $0x536] sm:$0x3] %v7864_v46  ;;  %v7892_v33 = vld [vmem:[#allocation0 + $0x14f8] sm:$0x3]  ;;  %v7682_v36 = vld [vmem:[#allocation0 + $0x1408] sm:$0x3] }
 0x44c   :  { %v7696_v37 = vld [vmem:[#allocation0 + $0x1418] sm:$0x3]  ;;  %12304 = vst [vmem:[%s17895_s1 + $0x53a] sm:$0x3] %v7878_v47  ;;  %12276 = vst [vmem:[%s17895_s1 + $0x502] sm:$0x3] %v7682_v36 }
 0x44d   :  { %3135 = vst.msk [vmem:[#allocation0 + $0x1d89] ss:$16 sm:$0x3] %vm3_vm0, %v3132_v32   ;;  %3137 = vst.msk [vmem:[#allocation0 + $0x1d89] ss:$16 sm:$0xc] %vm3_vm0, %v3132_v32  }
 0x44e   :  { %3139 = vst.msk [vmem:[#allocation0 + $0x1d89] ss:$16 sm:$0x30] %vm3_vm0, %v3132_v32   ;;  %3141 = vst.msk [vmem:[#allocation0 + $0x1d89] ss:$16 sm:$0xc0] %vm3_vm0, %v3132_v32  }
 0x44f   :  { %12278 = vst [vmem:[%s17895_s1 + $0x506] sm:$0x3] %v7696_v37  ;;  %v7710_v34 = vld [vmem:[#allocation0 + $0x1428] sm:$0x3]  ;;  %v7724_v10 = vld [vmem:[#allocation0 + $0x1438] sm:$0x3] }
 0x450   :  { %v7738_v11 = vld [vmem:[#allocation0 + $0x1448] sm:$0x3]  ;;  %12306 = vst [vmem:[%s17895_s1 + $0x53e] sm:$0x3] %v7892_v33  ;;  %12280 = vst [vmem:[%s17895_s1 + $0x50a] sm:$0x3] %v7710_v34 }
 0x451   :  { %3122 = vst.msk [vmem:[#allocation0 + $0x1d09] ss:$16 sm:$0x3] %vm3_vm0, %v3119_v27   ;;  %3124 = vst.msk [vmem:[#allocation0 + $0x1d09] ss:$16 sm:$0xc] %vm3_vm0, %v3119_v27  }
 0x452   :  { %3126 = vst.msk [vmem:[#allocation0 + $0x1d09] ss:$16 sm:$0x30] %vm3_vm0, %v3119_v27   ;;  %3128 = vst.msk [vmem:[#allocation0 + $0x1d09] ss:$16 sm:$0xc0] %vm3_vm0, %v3119_v27  }
 0x453   :  { %12282 = vst [vmem:[%s17895_s1 + $0x50e] sm:$0x3] %v7724_v10  ;;  %12284 = vst [vmem:[%s17895_s1 + $0x512] sm:$0x3] %v7738_v11  ;;  %v7752_v35 = vld [vmem:[#allocation0 + $0x1458] sm:$0x3] }
 0x454   :  { %v7766_v40 = vld [vmem:[#allocation0 + $0x1468] sm:$0x3]  ;;  %v7780_v41 = vld [vmem:[#allocation0 + $0x1478] sm:$0x3]  ;;  %12286 = vst [vmem:[%s17895_s1 + $0x516] sm:$0x3] %v7752_v35 }
 0x455   :  { %v8018_v48 = vld [vmem:[#allocation0 + $0x1588] sm:$0x3]  ;;  %v8032_v49 = vld [vmem:[#allocation0 + $0x1598] sm:$0x3]  ;;  %12288 = vst [vmem:[%s17895_s1 + $0x51a] sm:$0x3] %v7766_v40 }
 0x456   :  { %v8046_v50 = vld [vmem:[#allocation0 + $0x15a8] sm:$0x3]  ;;  %12290 = vst [vmem:[%s17895_s1 + $0x51e] sm:$0x3] %v7780_v41  ;;  %12324 = vst [vmem:[%s17895_s1 + $0x562] sm:$0x3] %v8018_v48 }
 0x457   :  { %12326 = vst [vmem:[%s17895_s1 + $0x566] sm:$0x3] %v8032_v49  ;;  %12328 = vst [vmem:[%s17895_s1 + $0x56a] sm:$0x3] %v8046_v50  ;;  %v8060_v25 = vld [vmem:[#allocation0 + $0x15b8] sm:$0x3] }
 0x458   :  { %v8074_v44 = vld [vmem:[#allocation0 + $0x15c8] sm:$0x3]  ;;  %v8088_v45 = vld [vmem:[#allocation0 + $0x15d8] sm:$0x3]  ;;  %12330 = vst [vmem:[%s17895_s1 + $0x56e] sm:$0x3] %v8060_v25 }
 0x459   :  { %3161 = vst.msk [vmem:[#allocation0 + $0x1e89] ss:$16 sm:$0x3] %vm3_vm0, %v3158_v24   ;;  %3163 = vst.msk [vmem:[#allocation0 + $0x1e89] ss:$16 sm:$0xc] %vm3_vm0, %v3158_v24  }
 0x45a   :  { %3165 = vst.msk [vmem:[#allocation0 + $0x1e89] ss:$16 sm:$0x30] %vm3_vm0, %v3158_v24   ;;  %3167 = vst.msk [vmem:[#allocation0 + $0x1e89] ss:$16 sm:$0xc0] %vm3_vm0, %v3158_v24  }
 0x45b   :  { %12332 = vst [vmem:[%s17895_s1 + $0x572] sm:$0x3] %v8074_v44  ;;  %12334 = vst [vmem:[%s17895_s1 + $0x576] sm:$0x3] %v8088_v45  ;;  %v8102_v53 = vld [vmem:[#allocation0 + $0x15e8] sm:$0x3] }
 0x45c   :  { %v8116_v0 = vld [vmem:[#allocation0 + $0x15f8] sm:$0x3]  ;;  %v7906_v2 = vld [vmem:[#allocation0 + $0x1508] sm:$0x3]  ;;  %12336 = vst [vmem:[%s17895_s1 + $0x57a] sm:$0x3] %v8102_v53 }
 0x45d   :  { %3148 = vst.msk [vmem:[#allocation0 + $0x1e09] ss:$16 sm:$0x3] %vm3_vm0, %v3145_v52   ;;  %3150 = vst.msk [vmem:[#allocation0 + $0x1e09] ss:$16 sm:$0xc] %vm3_vm0, %v3145_v52  }
 0x45e   :  { %3152 = vst.msk [vmem:[#allocation0 + $0x1e09] ss:$16 sm:$0x30] %vm3_vm0, %v3145_v52   ;;  %3154 = vst.msk [vmem:[#allocation0 + $0x1e09] ss:$16 sm:$0xc0] %vm3_vm0, %v3145_v52  }
 0x45f   :  { %12308 = vst [vmem:[%s17895_s1 + $0x542] sm:$0x3] %v7906_v2  ;;  %v7920_v14 = vld [vmem:[#allocation0 + $0x1518] sm:$0x3]  ;;  %v7934_v39 = vld [vmem:[#allocation0 + $0x1528] sm:$0x3] }
 0x460   :  { %v7948_v6 = vld [vmem:[#allocation0 + $0x1538] sm:$0x3]  ;;  %12338 = vst [vmem:[%s17895_s1 + $0x57e] sm:$0x3] %v8116_v0  ;;  %12310 = vst [vmem:[%s17895_s1 + $0x546] sm:$0x3] %v7920_v14 }
 0x461   :  { %12312 = vst [vmem:[%s17895_s1 + $0x54a] sm:$0x3] %v7934_v39  ;;  %12314 = vst [vmem:[%s17895_s1 + $0x54e] sm:$0x3] %v7948_v6  ;;  %v7962_v7 = vld [vmem:[#allocation0 + $0x1548] sm:$0x3] }
 0x462   :  { %v7976_v15 = vld [vmem:[#allocation0 + $0x1558] sm:$0x3]  ;;  %v7990_v51 = vld [vmem:[#allocation0 + $0x1568] sm:$0x3]  ;;  %12316 = vst [vmem:[%s17895_s1 + $0x552] sm:$0x3] %v7962_v7 }
 0x463   :  { %12318 = vst [vmem:[%s17895_s1 + $0x556] sm:$0x3] %v7976_v15  ;;  %v8004_v58 = vld [vmem:[#allocation0 + $0x1578] sm:$0x3]  ;;  %v8242_v38 = vld [vmem:[#allocation0 + $0x1688] sm:$0x3] }
 0x464   :  { %v8256_v59 = vld [vmem:[#allocation0 + $0x1698] sm:$0x3]  ;;  %12320 = vst [vmem:[%s17895_s1 + $0x55a] sm:$0x3] %v7990_v51  ;;  %12356 = vst [vmem:[%s17895_s1 + $0x5a2] sm:$0x3] %v8242_v38 }
 0x465   :  { %3187 = vst.msk [vmem:[#allocation0 + $0x1f89] ss:$16 sm:$0x3] %vm3_vm0, %v3184_v54   ;;  %3189 = vst.msk [vmem:[#allocation0 + $0x1f89] ss:$16 sm:$0xc] %vm3_vm0, %v3184_v54  }
 0x466   :  { %3191 = vst.msk [vmem:[#allocation0 + $0x1f89] ss:$16 sm:$0x30] %vm3_vm0, %v3184_v54   ;;  %3193 = vst.msk [vmem:[#allocation0 + $0x1f89] ss:$16 sm:$0xc0] %vm3_vm0, %v3184_v54  }
 0x467   :  { %12358 = vst [vmem:[%s17895_s1 + $0x5a6] sm:$0x3] %v8256_v59  ;;  %v8270_v62 = vld [vmem:[#allocation0 + $0x16a8] sm:$0x3]  ;;  %v8284_v63 = vld [vmem:[#allocation0 + $0x16b8] sm:$0x3] }
 0x468   :  { %v8298_v8 = vld [vmem:[#allocation0 + $0x16c8] sm:$0x3]  ;;  %12322 = vst [vmem:[%s17895_s1 + $0x55e] sm:$0x3] %v8004_v58  ;;  %12360 = vst [vmem:[%s17895_s1 + $0x5aa] sm:$0x3] %v8270_v62 }
 0x469   :  { %3174 = vst.msk [vmem:[#allocation0 + $0x1f09] ss:$16 sm:$0x3] %vm3_vm0, %v3171_v55   ;;  %3176 = vst.msk [vmem:[#allocation0 + $0x1f09] ss:$16 sm:$0xc] %vm3_vm0, %v3171_v55  }
 0x46a   :  { %3178 = vst.msk [vmem:[#allocation0 + $0x1f09] ss:$16 sm:$0x30] %vm3_vm0, %v3171_v55   ;;  %3180 = vst.msk [vmem:[#allocation0 + $0x1f09] ss:$16 sm:$0xc0] %vm3_vm0, %v3171_v55  }
 0x46b   :  { %12362 = vst [vmem:[%s17895_s1 + $0x5ae] sm:$0x3] %v8284_v63  ;;  %12364 = vst [vmem:[%s17895_s1 + $0x5b2] sm:$0x3] %v8298_v8  ;;  %v8312_v56 = vld [vmem:[#allocation0 + $0x16d8] sm:$0x3] }
 0x46c   :  { %v8326_v57 = vld [vmem:[#allocation0 + $0x16e8] sm:$0x3]  ;;  %v8340_v20 = vld [vmem:[#allocation0 + $0x16f8] sm:$0x3]  ;;  %12366 = vst [vmem:[%s17895_s1 + $0x5b6] sm:$0x3] %v8312_v56 }
 0x46d   :  { %v8130_v21 = vld [vmem:[#allocation0 + $0x1608] sm:$0x3]  ;;  %v8144_v9 = vld [vmem:[#allocation0 + $0x1618] sm:$0x3]  ;;  %12368 = vst [vmem:[%s17895_s1 + $0x5ba] sm:$0x3] %v8326_v57 }
 0x46e   :  { %v8158_v12 = vld [vmem:[#allocation0 + $0x1628] sm:$0x3]  ;;  %12370 = vst [vmem:[%s17895_s1 + $0x5be] sm:$0x3] %v8340_v20  ;;  %12340 = vst [vmem:[%s17895_s1 + $0x582] sm:$0x3] %v8130_v21 }
 0x46f   :  { %12342 = vst [vmem:[%s17895_s1 + $0x586] sm:$0x3] %v8144_v9  ;;  %12344 = vst [vmem:[%s17895_s1 + $0x58a] sm:$0x3] %v8158_v12  ;;  %v8172_v28 = vld [vmem:[#allocation0 + $0x1638] sm:$0x3] }
 0x470   :  { %v8186_v29 = vld [vmem:[#allocation0 + $0x1648] sm:$0x3]  ;;  %v8200_v42 = vld [vmem:[#allocation0 + $0x1658] sm:$0x3]  ;;  %12346 = vst [vmem:[%s17895_s1 + $0x58e] sm:$0x3] %v8172_v28 }
 0x471   :  { %12348 = vst [vmem:[%s17895_s1 + $0x592] sm:$0x3] %v8186_v29  ;;  %12350 = vst [vmem:[%s17895_s1 + $0x596] sm:$0x3] %v8200_v42  ;;  %v8214_v43 = vld [vmem:[#allocation0 + $0x1668] sm:$0x3] }
 0x472   :  { %v8228_v13 = vld [vmem:[#allocation0 + $0x1678] sm:$0x3]  ;;  %v8466_v16 = vld [vmem:[#allocation0 + $0x1788] sm:$0x3]  ;;  %12352 = vst [vmem:[%s17895_s1 + $0x59a] sm:$0x3] %v8214_v43 }
 0x473   :  { %12388 = vst [vmem:[%s17895_s1 + $0x5e2] sm:$0x3] %v8466_v16  ;;  %v8480_v1 = vld [vmem:[#allocation0 + $0x1798] sm:$0x3]  ;;  %v8494_v3 = vld [vmem:[#allocation0 + $0x17a8] sm:$0x3] }
 0x474   :  { %v8508_v4 = vld [vmem:[#allocation0 + $0x17b8] sm:$0x3]  ;;  %12354 = vst [vmem:[%s17895_s1 + $0x59e] sm:$0x3] %v8228_v13  ;;  %12390 = vst [vmem:[%s17895_s1 + $0x5e6] sm:$0x3] %v8480_v1 }
 0x475   :  { %12392 = vst [vmem:[%s17895_s1 + $0x5ea] sm:$0x3] %v8494_v3  ;;  %12394 = vst [vmem:[%s17895_s1 + $0x5ee] sm:$0x3] %v8508_v4  ;;  %v8522_v5 = vld [vmem:[#allocation0 + $0x17c8] sm:$0x3] }
 0x476   :  { %v8536_v30 = vld [vmem:[#allocation0 + $0x17d8] sm:$0x3]  ;;  %v8550_v31 = vld [vmem:[#allocation0 + $0x17e8] sm:$0x3]  ;;  %12396 = vst [vmem:[%s17895_s1 + $0x5f2] sm:$0x3] %v8522_v5 }
 0x477   :  { %12398 = vst [vmem:[%s17895_s1 + $0x5f6] sm:$0x3] %v8536_v30  ;;  %v8564_v60 = vld [vmem:[#allocation0 + $0x17f8] sm:$0x3]  ;;  %v8354_v61 = vld [vmem:[#allocation0 + $0x1708] sm:$0x3] }
 0x478   :  { %v8368_v18 = vld [vmem:[#allocation0 + $0x1718] sm:$0x3]  ;;  %12400 = vst [vmem:[%s17895_s1 + $0x5fa] sm:$0x3] %v8550_v31  ;;  %12372 = vst [vmem:[%s17895_s1 + $0x5c2] sm:$0x3] %v8354_v61 }
 0x479   :  { %12374 = vst [vmem:[%s17895_s1 + $0x5c6] sm:$0x3] %v8368_v18  ;;  %v8382_v19 = vld [vmem:[#allocation0 + $0x1728] sm:$0x3]  ;;  %v8396_v17 = vld [vmem:[#allocation0 + $0x1738] sm:$0x3] }
 0x47a   :  { %v8410_v22 = vld [vmem:[#allocation0 + $0x1748] sm:$0x3]  ;;  %12402 = vst [vmem:[%s17895_s1 + $0x5fe] sm:$0x3] %v8564_v60  ;;  %12376 = vst [vmem:[%s17895_s1 + $0x5ca] sm:$0x3] %v8382_v19 }
 0x47b   :  { %12378 = vst [vmem:[%s17895_s1 + $0x5ce] sm:$0x3] %v8396_v17  ;;  %12380 = vst [vmem:[%s17895_s1 + $0x5d2] sm:$0x3] %v8410_v22  ;;  %v8424_v23 = vld [vmem:[#allocation0 + $0x1758] sm:$0x3] }
 0x47c   :  { %v8438_v26 = vld [vmem:[#allocation0 + $0x1768] sm:$0x3]  ;;  %v8452_v46 = vld [vmem:[#allocation0 + $0x1778] sm:$0x3]  ;;  %12382 = vst [vmem:[%s17895_s1 + $0x5d6] sm:$0x3] %v8424_v23 }
 0x47d   :  { %v8690_v47 = vld [vmem:[#allocation0 + $0x1888] sm:$0x3]  ;;  %v8704_v32 = vld [vmem:[#allocation0 + $0x1898] sm:$0x3]  ;;  %12384 = vst [vmem:[%s17895_s1 + $0x5da] sm:$0x3] %v8438_v26 }
 0x47e   :  { %v8718_v33 = vld [vmem:[#allocation0 + $0x18a8] sm:$0x3]  ;;  %12386 = vst [vmem:[%s17895_s1 + $0x5de] sm:$0x3] %v8452_v46  ;;  %12420 = vst [vmem:[%s17895_s1 + $0x622] sm:$0x3] %v8690_v47 }
 0x47f   :  { %12422 = vst [vmem:[%s17895_s1 + $0x626] sm:$0x3] %v8704_v32  ;;  %12424 = vst [vmem:[%s17895_s1 + $0x62a] sm:$0x3] %v8718_v33  ;;  %v8732_v36 = vld [vmem:[#allocation0 + $0x18b8] sm:$0x3] }
 0x480   :  { %v8746_v37 = vld [vmem:[#allocation0 + $0x18c8] sm:$0x3]  ;;  %v8760_v27 = vld [vmem:[#allocation0 + $0x18d8] sm:$0x3]  ;;  %12426 = vst [vmem:[%s17895_s1 + $0x62e] sm:$0x3] %v8732_v36 }
 0x481   :  { %12428 = vst [vmem:[%s17895_s1 + $0x632] sm:$0x3] %v8746_v37  ;;  %12430 = vst [vmem:[%s17895_s1 + $0x636] sm:$0x3] %v8760_v27  ;;  %v8774_v34 = vld [vmem:[#allocation0 + $0x18e8] sm:$0x3] }
 0x482   :  { %v8788_v10 = vld [vmem:[#allocation0 + $0x18f8] sm:$0x3]  ;;  %v8578_v11 = vld [vmem:[#allocation0 + $0x1808] sm:$0x3]  ;;  %12432 = vst [vmem:[%s17895_s1 + $0x63a] sm:$0x3] %v8774_v34 }
 0x483   :  { %12404 = vst [vmem:[%s17895_s1 + $0x602] sm:$0x3] %v8578_v11  ;;  %v8592_v35 = vld [vmem:[#allocation0 + $0x1818] sm:$0x3]  ;;  %v8606_v40 = vld [vmem:[#allocation0 + $0x1828] sm:$0x3] }
 0x484   :  { %v8620_v41 = vld [vmem:[#allocation0 + $0x1838] sm:$0x3]  ;;  %12434 = vst [vmem:[%s17895_s1 + $0x63e] sm:$0x3] %v8788_v10  ;;  %12406 = vst [vmem:[%s17895_s1 + $0x606] sm:$0x3] %v8592_v35 }
 0x485   :  { %12408 = vst [vmem:[%s17895_s1 + $0x60a] sm:$0x3] %v8606_v40  ;;  %12410 = vst [vmem:[%s17895_s1 + $0x60e] sm:$0x3] %v8620_v41  ;;  %v8634_v48 = vld [vmem:[#allocation0 + $0x1848] sm:$0x3] }
 0x486   :  { %v8648_v49 = vld [vmem:[#allocation0 + $0x1858] sm:$0x3]  ;;  %v8662_v50 = vld [vmem:[#allocation0 + $0x1868] sm:$0x3]  ;;  %12412 = vst [vmem:[%s17895_s1 + $0x612] sm:$0x3] %v8634_v48 }
 0x487   :  { %12414 = vst [vmem:[%s17895_s1 + $0x616] sm:$0x3] %v8648_v49  ;;  %v8676_v24 = vld [vmem:[#allocation0 + $0x1878] sm:$0x3]  ;;  %v8914_v25 = vld [vmem:[#allocation0 + $0x1988] sm:$0x3] }
 0x488   :  { %v8928_v44 = vld [vmem:[#allocation0 + $0x1998] sm:$0x3]  ;;  %12416 = vst [vmem:[%s17895_s1 + $0x61a] sm:$0x3] %v8662_v50  ;;  %12452 = vst [vmem:[%s17895_s1 + $0x662] sm:$0x3] %v8914_v25 }
 0x489   :  { %12454 = vst [vmem:[%s17895_s1 + $0x666] sm:$0x3] %v8928_v44  ;;  %v8942_v45 = vld [vmem:[#allocation0 + $0x19a8] sm:$0x3]  ;;  %v8956_v52 = vld [vmem:[#allocation0 + $0x19b8] sm:$0x3] }
 0x48a   :  { %v8970_v53 = vld [vmem:[#allocation0 + $0x19c8] sm:$0x3]  ;;  %12418 = vst [vmem:[%s17895_s1 + $0x61e] sm:$0x3] %v8676_v24  ;;  %12456 = vst [vmem:[%s17895_s1 + $0x66a] sm:$0x3] %v8942_v45 }
 0x48b   :  { %12458 = vst [vmem:[%s17895_s1 + $0x66e] sm:$0x3] %v8956_v52  ;;  %12460 = vst [vmem:[%s17895_s1 + $0x672] sm:$0x3] %v8970_v53  ;;  %v8984_v0 = vld [vmem:[#allocation0 + $0x19d8] sm:$0x3] }
 0x48c   :  { %v8998_v2 = vld [vmem:[#allocation0 + $0x19e8] sm:$0x3]  ;;  %v9012_v14 = vld [vmem:[#allocation0 + $0x19f8] sm:$0x3]  ;;  %12462 = vst [vmem:[%s17895_s1 + $0x676] sm:$0x3] %v8984_v0 }
 0x48d   :  { %v8802_v39 = vld [vmem:[#allocation0 + $0x1908] sm:$0x3]  ;;  %v8816_v6 = vld [vmem:[#allocation0 + $0x1918] sm:$0x3]  ;;  %12464 = vst [vmem:[%s17895_s1 + $0x67a] sm:$0x3] %v8998_v2 }
 0x48e   :  { %v8830_v7 = vld [vmem:[#allocation0 + $0x1928] sm:$0x3]  ;;  %12466 = vst [vmem:[%s17895_s1 + $0x67e] sm:$0x3] %v9012_v14  ;;  %12436 = vst [vmem:[%s17895_s1 + $0x642] sm:$0x3] %v8802_v39 }
 0x48f   :  { %12438 = vst [vmem:[%s17895_s1 + $0x646] sm:$0x3] %v8816_v6  ;;  %12440 = vst [vmem:[%s17895_s1 + $0x64a] sm:$0x3] %v8830_v7  ;;  %v8844_v15 = vld [vmem:[#allocation0 + $0x1938] sm:$0x3] }
 0x490   :  { %v8858_v51 = vld [vmem:[#allocation0 + $0x1948] sm:$0x3]  ;;  %v8872_v54 = vld [vmem:[#allocation0 + $0x1958] sm:$0x3]  ;;  %12442 = vst [vmem:[%s17895_s1 + $0x64e] sm:$0x3] %v8844_v15 }
 0x491   :  { %12444 = vst [vmem:[%s17895_s1 + $0x652] sm:$0x3] %v8858_v51  ;;  %12446 = vst [vmem:[%s17895_s1 + $0x656] sm:$0x3] %v8872_v54  ;;  %v8886_v58 = vld [vmem:[#allocation0 + $0x1968] sm:$0x3] }
 0x492   :  { %v8900_v38 = vld [vmem:[#allocation0 + $0x1978] sm:$0x3]  ;;  %v9138_v59 = vld [vmem:[#allocation0 + $0x1a88] sm:$0x3]  ;;  %12448 = vst [vmem:[%s17895_s1 + $0x65a] sm:$0x3] %v8886_v58 }
 0x493   :  { %12484 = vst [vmem:[%s17895_s1 + $0x6a2] sm:$0x3] %v9138_v59  ;;  %v9152_v55 = vld [vmem:[#allocation0 + $0x1a98] sm:$0x3]  ;;  %v9166_v62 = vld [vmem:[#allocation0 + $0x1aa8] sm:$0x3] }
 0x494   :  { %v9180_v63 = vld [vmem:[#allocation0 + $0x1ab8] sm:$0x3]  ;;  %12450 = vst [vmem:[%s17895_s1 + $0x65e] sm:$0x3] %v8900_v38  ;;  %12486 = vst [vmem:[%s17895_s1 + $0x6a6] sm:$0x3] %v9152_v55 }
 0x495   :  { %12488 = vst [vmem:[%s17895_s1 + $0x6aa] sm:$0x3] %v9166_v62  ;;  %12490 = vst [vmem:[%s17895_s1 + $0x6ae] sm:$0x3] %v9180_v63  ;;  %v9194_v8 = vld [vmem:[#allocation0 + $0x1ac8] sm:$0x3] }
 0x496   :  { %v9208_v56 = vld [vmem:[#allocation0 + $0x1ad8] sm:$0x3]  ;;  %v9222_v57 = vld [vmem:[#allocation0 + $0x1ae8] sm:$0x3]  ;;  %12492 = vst [vmem:[%s17895_s1 + $0x6b2] sm:$0x3] %v9194_v8 }
 0x497   :  { %12494 = vst [vmem:[%s17895_s1 + $0x6b6] sm:$0x3] %v9208_v56  ;;  %v9236_v20 = vld [vmem:[#allocation0 + $0x1af8] sm:$0x3]  ;;  %v9026_v21 = vld [vmem:[#allocation0 + $0x1a08] sm:$0x3] }
 0x498   :  { %v9040_v9 = vld [vmem:[#allocation0 + $0x1a18] sm:$0x3]  ;;  %12496 = vst [vmem:[%s17895_s1 + $0x6ba] sm:$0x3] %v9222_v57  ;;  %12468 = vst [vmem:[%s17895_s1 + $0x682] sm:$0x3] %v9026_v21 }
 0x499   :  { %12470 = vst [vmem:[%s17895_s1 + $0x686] sm:$0x3] %v9040_v9  ;;  %v9054_v12 = vld [vmem:[#allocation0 + $0x1a28] sm:$0x3]  ;;  %v9068_v28 = vld [vmem:[#allocation0 + $0x1a38] sm:$0x3] }
 0x49a   :  { %v9082_v29 = vld [vmem:[#allocation0 + $0x1a48] sm:$0x3]  ;;  %12498 = vst [vmem:[%s17895_s1 + $0x6be] sm:$0x3] %v9236_v20  ;;  %12472 = vst [vmem:[%s17895_s1 + $0x68a] sm:$0x3] %v9054_v12 }
 0x49b   :  { %12474 = vst [vmem:[%s17895_s1 + $0x68e] sm:$0x3] %v9068_v28  ;;  %12476 = vst [vmem:[%s17895_s1 + $0x692] sm:$0x3] %v9082_v29  ;;  %v9096_v42 = vld [vmem:[#allocation0 + $0x1a58] sm:$0x3] }
 0x49c   :  { %v9110_v43 = vld [vmem:[#allocation0 + $0x1a68] sm:$0x3]  ;;  %v9124_v13 = vld [vmem:[#allocation0 + $0x1a78] sm:$0x3]  ;;  %12478 = vst [vmem:[%s17895_s1 + $0x696] sm:$0x3] %v9096_v42 }
 0x49d   :  { %v9362_v16 = vld [vmem:[#allocation0 + $0x1b88] sm:$0x3]  ;;  %v9376_v1 = vld [vmem:[#allocation0 + $0x1b98] sm:$0x3]  ;;  %12480 = vst [vmem:[%s17895_s1 + $0x69a] sm:$0x3] %v9110_v43 }
 0x49e   :  { %v9390_v3 = vld [vmem:[#allocation0 + $0x1ba8] sm:$0x3]  ;;  %12482 = vst [vmem:[%s17895_s1 + $0x69e] sm:$0x3] %v9124_v13  ;;  %12516 = vst [vmem:[%s17895_s1 + $0x6e2] sm:$0x3] %v9362_v16 }
 0x49f   :  { %12518 = vst [vmem:[%s17895_s1 + $0x6e6] sm:$0x3] %v9376_v1  ;;  %12520 = vst [vmem:[%s17895_s1 + $0x6ea] sm:$0x3] %v9390_v3  ;;  %v9404_v4 = vld [vmem:[#allocation0 + $0x1bb8] sm:$0x3] }
 0x4a0   :  { %v9418_v5 = vld [vmem:[#allocation0 + $0x1bc8] sm:$0x3]  ;;  %v9432_v30 = vld [vmem:[#allocation0 + $0x1bd8] sm:$0x3]  ;;  %12522 = vst [vmem:[%s17895_s1 + $0x6ee] sm:$0x3] %v9404_v4 }
 0x4a1   :  { %12524 = vst [vmem:[%s17895_s1 + $0x6f2] sm:$0x3] %v9418_v5  ;;  %12526 = vst [vmem:[%s17895_s1 + $0x6f6] sm:$0x3] %v9432_v30  ;;  %v9446_v31 = vld [vmem:[#allocation0 + $0x1be8] sm:$0x3] }
 0x4a2   :  { %v9460_v60 = vld [vmem:[#allocation0 + $0x1bf8] sm:$0x3]  ;;  %v9250_v61 = vld [vmem:[#allocation0 + $0x1b08] sm:$0x3]  ;;  %12528 = vst [vmem:[%s17895_s1 + $0x6fa] sm:$0x3] %v9446_v31 }
 0x4a3   :  { %12500 = vst [vmem:[%s17895_s1 + $0x6c2] sm:$0x3] %v9250_v61  ;;  %v9264_v18 = vld [vmem:[#allocation0 + $0x1b18] sm:$0x3]  ;;  %v9278_v19 = vld [vmem:[#allocation0 + $0x1b28] sm:$0x3] }
 0x4a4   :  { %v9292_v17 = vld [vmem:[#allocation0 + $0x1b38] sm:$0x3]  ;;  %12530 = vst [vmem:[%s17895_s1 + $0x6fe] sm:$0x3] %v9460_v60  ;;  %12502 = vst [vmem:[%s17895_s1 + $0x6c6] sm:$0x3] %v9264_v18 }
 0x4a5   :  { %12504 = vst [vmem:[%s17895_s1 + $0x6ca] sm:$0x3] %v9278_v19  ;;  %12506 = vst [vmem:[%s17895_s1 + $0x6ce] sm:$0x3] %v9292_v17  ;;  %v9306_v22 = vld [vmem:[#allocation0 + $0x1b48] sm:$0x3] }
 0x4a6   :  { %v9320_v23 = vld [vmem:[#allocation0 + $0x1b58] sm:$0x3]  ;;  %v9334_v26 = vld [vmem:[#allocation0 + $0x1b68] sm:$0x3]  ;;  %12508 = vst [vmem:[%s17895_s1 + $0x6d2] sm:$0x3] %v9306_v22 }
 0x4a7   :  { %12510 = vst [vmem:[%s17895_s1 + $0x6d6] sm:$0x3] %v9320_v23  ;;  %v9348_v46 = vld [vmem:[#allocation0 + $0x1b78] sm:$0x3]  ;;  %v9586_v47 = vld [vmem:[#allocation0 + $0x1c88] sm:$0x3] }
 0x4a8   :  { %v9600_v32 = vld [vmem:[#allocation0 + $0x1c98] sm:$0x3]  ;;  %12512 = vst [vmem:[%s17895_s1 + $0x6da] sm:$0x3] %v9334_v26  ;;  %12548 = vst [vmem:[%s17895_s1 + $0x722] sm:$0x3] %v9586_v47 }
 0x4a9   :  { %12550 = vst [vmem:[%s17895_s1 + $0x726] sm:$0x3] %v9600_v32  ;;  %v9614_v33 = vld [vmem:[#allocation0 + $0x1ca8] sm:$0x3]  ;;  %v9628_v36 = vld [vmem:[#allocation0 + $0x1cb8] sm:$0x3] }
 0x4aa   :  { %v9642_v37 = vld [vmem:[#allocation0 + $0x1cc8] sm:$0x3]  ;;  %12514 = vst [vmem:[%s17895_s1 + $0x6de] sm:$0x3] %v9348_v46  ;;  %12552 = vst [vmem:[%s17895_s1 + $0x72a] sm:$0x3] %v9614_v33 }
 0x4ab   :  { %12554 = vst [vmem:[%s17895_s1 + $0x72e] sm:$0x3] %v9628_v36  ;;  %12556 = vst [vmem:[%s17895_s1 + $0x732] sm:$0x3] %v9642_v37  ;;  %v9656_v27 = vld [vmem:[#allocation0 + $0x1cd8] sm:$0x3] }
 0x4ac   :  { %v9670_v34 = vld [vmem:[#allocation0 + $0x1ce8] sm:$0x3]  ;;  %v9684_v10 = vld [vmem:[#allocation0 + $0x1cf8] sm:$0x3]  ;;  %12558 = vst [vmem:[%s17895_s1 + $0x736] sm:$0x3] %v9656_v27 }
 0x4ad   :  { %v9474_v11 = vld [vmem:[#allocation0 + $0x1c08] sm:$0x3]  ;;  %v9488_v35 = vld [vmem:[#allocation0 + $0x1c18] sm:$0x3]  ;;  %12560 = vst [vmem:[%s17895_s1 + $0x73a] sm:$0x3] %v9670_v34 }
 0x4ae   :  { %v9502_v40 = vld [vmem:[#allocation0 + $0x1c28] sm:$0x3]  ;;  %12562 = vst [vmem:[%s17895_s1 + $0x73e] sm:$0x3] %v9684_v10  ;;  %12532 = vst [vmem:[%s17895_s1 + $0x702] sm:$0x3] %v9474_v11 }
 0x4af   :  { %12534 = vst [vmem:[%s17895_s1 + $0x706] sm:$0x3] %v9488_v35  ;;  %12536 = vst [vmem:[%s17895_s1 + $0x70a] sm:$0x3] %v9502_v40  ;;  %v9516_v41 = vld [vmem:[#allocation0 + $0x1c38] sm:$0x3] }
 0x4b0   :  { %v9530_v48 = vld [vmem:[#allocation0 + $0x1c48] sm:$0x3]  ;;  %v9544_v49 = vld [vmem:[#allocation0 + $0x1c58] sm:$0x3]  ;;  %12538 = vst [vmem:[%s17895_s1 + $0x70e] sm:$0x3] %v9516_v41 }
 0x4b1   :  { %12540 = vst [vmem:[%s17895_s1 + $0x712] sm:$0x3] %v9530_v48  ;;  %12542 = vst [vmem:[%s17895_s1 + $0x716] sm:$0x3] %v9544_v49  ;;  %v9558_v50 = vld [vmem:[#allocation0 + $0x1c68] sm:$0x3] }
 0x4b2   :  { %v9572_v24 = vld [vmem:[#allocation0 + $0x1c78] sm:$0x3]  ;;  %v9810_v25 = vld [vmem:[#allocation0 + $0x1d88] sm:$0x3]  ;;  %12544 = vst [vmem:[%s17895_s1 + $0x71a] sm:$0x3] %v9558_v50 }
 0x4b3   :  { %12580 = vst [vmem:[%s17895_s1 + $0x762] sm:$0x3] %v9810_v25  ;;  %v9824_v44 = vld [vmem:[#allocation0 + $0x1d98] sm:$0x3]  ;;  %v9838_v45 = vld [vmem:[#allocation0 + $0x1da8] sm:$0x3] }
 0x4b4   :  { %v9852_v52 = vld [vmem:[#allocation0 + $0x1db8] sm:$0x3]  ;;  %12546 = vst [vmem:[%s17895_s1 + $0x71e] sm:$0x3] %v9572_v24  ;;  %12582 = vst [vmem:[%s17895_s1 + $0x766] sm:$0x3] %v9824_v44 }
 0x4b5   :  { %12584 = vst [vmem:[%s17895_s1 + $0x76a] sm:$0x3] %v9838_v45  ;;  %12586 = vst [vmem:[%s17895_s1 + $0x76e] sm:$0x3] %v9852_v52  ;;  %v9866_v53 = vld [vmem:[#allocation0 + $0x1dc8] sm:$0x3] }
 0x4b6   :  { %v9880_v0 = vld [vmem:[#allocation0 + $0x1dd8] sm:$0x3]  ;;  %v9894_v2 = vld [vmem:[#allocation0 + $0x1de8] sm:$0x3]  ;;  %12588 = vst [vmem:[%s17895_s1 + $0x772] sm:$0x3] %v9866_v53 }
 0x4b7   :  { %12590 = vst [vmem:[%s17895_s1 + $0x776] sm:$0x3] %v9880_v0  ;;  %v9908_v14 = vld [vmem:[#allocation0 + $0x1df8] sm:$0x3]  ;;  %v9698_v39 = vld [vmem:[#allocation0 + $0x1d08] sm:$0x3] }
 0x4b8   :  { %v9712_v6 = vld [vmem:[#allocation0 + $0x1d18] sm:$0x3]  ;;  %12592 = vst [vmem:[%s17895_s1 + $0x77a] sm:$0x3] %v9894_v2  ;;  %12564 = vst [vmem:[%s17895_s1 + $0x742] sm:$0x3] %v9698_v39 }
 0x4b9   :  { %12566 = vst [vmem:[%s17895_s1 + $0x746] sm:$0x3] %v9712_v6  ;;  %v9726_v7 = vld [vmem:[#allocation0 + $0x1d28] sm:$0x3]  ;;  %v9740_v15 = vld [vmem:[#allocation0 + $0x1d38] sm:$0x3] }
 0x4ba   :  { %v9754_v51 = vld [vmem:[#allocation0 + $0x1d48] sm:$0x3]  ;;  %12594 = vst [vmem:[%s17895_s1 + $0x77e] sm:$0x3] %v9908_v14  ;;  %12568 = vst [vmem:[%s17895_s1 + $0x74a] sm:$0x3] %v9726_v7 }
 0x4bb   :  { %12570 = vst [vmem:[%s17895_s1 + $0x74e] sm:$0x3] %v9740_v15  ;;  %v9768_v54 = vld [vmem:[#allocation0 + $0x1d58] sm:$0x3]  ;;  %v9782_v58 = vld [vmem:[#allocation0 + $0x1d68] sm:$0x3] }
 0x4bc   :  { %v9796_v38 = vld [vmem:[#allocation0 + $0x1d78] sm:$0x3]  ;;  %12572 = vst [vmem:[%s17895_s1 + $0x752] sm:$0x3] %v9754_v51  ;;  %12574 = vst [vmem:[%s17895_s1 + $0x756] sm:$0x3] %v9768_v54 }
 0x4bd   :  { %12576 = vst [vmem:[%s17895_s1 + $0x75a] sm:$0x3] %v9782_v58  ;;  %12578 = vst [vmem:[%s17895_s1 + $0x75e] sm:$0x3] %v9796_v38  ;;  %v10034_v59 = vld [vmem:[#allocation0 + $0x1e88] sm:$0x3] }
 0x4be   :  { %v10048_v55 = vld [vmem:[#allocation0 + $0x1e98] sm:$0x3]  ;;  %v10062_v62 = vld [vmem:[#allocation0 + $0x1ea8] sm:$0x3]  ;;  %12612 = vst [vmem:[%s17895_s1 + $0x7a2] sm:$0x3] %v10034_v59 }
 0x4bf   :  { %v10076_v63 = vld [vmem:[#allocation0 + $0x1eb8] sm:$0x3]  ;;  %v10090_v8 = vld [vmem:[#allocation0 + $0x1ec8] sm:$0x3]  ;;  %12614 = vst [vmem:[%s17895_s1 + $0x7a6] sm:$0x3] %v10048_v55 }
 0x4c0   :  { %v10104_v56 = vld [vmem:[#allocation0 + $0x1ed8] sm:$0x3]  ;;  %12616 = vst [vmem:[%s17895_s1 + $0x7aa] sm:$0x3] %v10062_v62  ;;  %v10118_v57 = vld [vmem:[#allocation0 + $0x1ee8] sm:$0x3] }
 0x4c1   :  { %v10132_v20 = vld [vmem:[#allocation0 + $0x1ef8] sm:$0x3]  ;;  %v9922_v21 = vld [vmem:[#allocation0 + $0x1e08] sm:$0x3]  ;;  %12618 = vst [vmem:[%s17895_s1 + $0x7ae] sm:$0x3] %v10076_v63 }
 0x4c2   :  { %12620 = vst [vmem:[%s17895_s1 + $0x7b2] sm:$0x3] %v10090_v8  ;;  %12622 = vst [vmem:[%s17895_s1 + $0x7b6] sm:$0x3] %v10104_v56  ;;  %v9936_v9 = vld [vmem:[#allocation0 + $0x1e18] sm:$0x3] }
 0x4c3   :  { %v9950_v12 = vld [vmem:[#allocation0 + $0x1e28] sm:$0x3]  ;;  %v9964_v28 = vld [vmem:[#allocation0 + $0x1e38] sm:$0x3]  ;;  %12624 = vst [vmem:[%s17895_s1 + $0x7ba] sm:$0x3] %v10118_v57 }
 0x4c4   :  { %12626 = vst [vmem:[%s17895_s1 + $0x7be] sm:$0x3] %v10132_v20  ;;  %12596 = vst [vmem:[%s17895_s1 + $0x782] sm:$0x3] %v9922_v21  ;;  %v9978_v29 = vld [vmem:[#allocation0 + $0x1e48] sm:$0x3] }
 0x4c5   :  { %v9992_v42 = vld [vmem:[#allocation0 + $0x1e58] sm:$0x3]  ;;  %v10006_v43 = vld [vmem:[#allocation0 + $0x1e68] sm:$0x3]  ;;  %12598 = vst [vmem:[%s17895_s1 + $0x786] sm:$0x3] %v9936_v9 }
 0x4c6   :  { %12600 = vst [vmem:[%s17895_s1 + $0x78a] sm:$0x3] %v9950_v12  ;;  %12602 = vst [vmem:[%s17895_s1 + $0x78e] sm:$0x3] %v9964_v28  ;;  %v10020_v13 = vld [vmem:[#allocation0 + $0x1e78] sm:$0x3] }
 0x4c7   :  { %v10258_v16 = vld [vmem:[#allocation0 + $0x1f88] sm:$0x3]  ;;  %v10272_v1 = vld [vmem:[#allocation0 + $0x1f98] sm:$0x3]  ;;  %12604 = vst [vmem:[%s17895_s1 + $0x792] sm:$0x3] %v9978_v29 }
 0x4c8   :  { %12606 = vst [vmem:[%s17895_s1 + $0x796] sm:$0x3] %v9992_v42  ;;  %12608 = vst [vmem:[%s17895_s1 + $0x79a] sm:$0x3] %v10006_v43  ;;  %v10286_v3 = vld [vmem:[#allocation0 + $0x1fa8] sm:$0x3] }
 0x4c9   :  { %12644 = vst [vmem:[%s17895_s1 + $0x7e2] sm:$0x3] %v10258_v16  ;;  %12646 = vst [vmem:[%s17895_s1 + $0x7e6] sm:$0x3] %v10272_v1  ;;  %v10300_v4 = vld [vmem:[#allocation0 + $0x1fb8] sm:$0x3] }
 0x4ca   :  { %v10314_v5 = vld [vmem:[#allocation0 + $0x1fc8] sm:$0x3]  ;;  %12610 = vst [vmem:[%s17895_s1 + $0x79e] sm:$0x3] %v10020_v13  ;;  %12648 = vst [vmem:[%s17895_s1 + $0x7ea] sm:$0x3] %v10286_v3 }
 0x4cb   :  { %12650 = vst [vmem:[%s17895_s1 + $0x7ee] sm:$0x3] %v10300_v4  ;;  %12652 = vst [vmem:[%s17895_s1 + $0x7f2] sm:$0x3] %v10314_v5  ;;  %v10328_v30 = vld [vmem:[#allocation0 + $0x1fd8] sm:$0x3] }
 0x4cc   :  { %v10342_v31 = vld [vmem:[#allocation0 + $0x1fe8] sm:$0x3]  ;;  %v10356_v60 = vld [vmem:[#allocation0 + $0x1ff8] sm:$0x3]  ;;  %12654 = vst [vmem:[%s17895_s1 + $0x7f6] sm:$0x3] %v10328_v30 }
 0x4cd   :  { %12656 = vst [vmem:[%s17895_s1 + $0x7fa] sm:$0x3] %v10342_v31  ;;  %12658 = vst [vmem:[%s17895_s1 + $0x7fe] sm:$0x3] %v10356_v60  ;;  %v10146_v61 = vld [vmem:[#allocation0 + $0x1f08] sm:$0x3] }
 0x4ce   :  { %v10160_v18 = vld [vmem:[#allocation0 + $0x1f18] sm:$0x3]  ;;  %v10174_v19 = vld [vmem:[#allocation0 + $0x1f28] sm:$0x3]  ;;  %12628 = vst [vmem:[%s17895_s1 + $0x7c2] sm:$0x3] %v10146_v61 }
 0x4cf   :  { %12630 = vst [vmem:[%s17895_s1 + $0x7c6] sm:$0x3] %v10160_v18  ;;  %12632 = vst [vmem:[%s17895_s1 + $0x7ca] sm:$0x3] %v10174_v19  ;;  %v10188_v17 = vld [vmem:[#allocation0 + $0x1f38] sm:$0x3] }
 0x4d0   :  { %v10202_v22 = vld [vmem:[#allocation0 + $0x1f48] sm:$0x3]  ;;  %v10216_v23 = vld [vmem:[#allocation0 + $0x1f58] sm:$0x3]  ;;  %12634 = vst [vmem:[%s17895_s1 + $0x7ce] sm:$0x3] %v10188_v17 }
 0x4d1   :  { %12636 = vst [vmem:[%s17895_s1 + $0x7d2] sm:$0x3] %v10202_v22  ;;  %12638 = vst [vmem:[%s17895_s1 + $0x7d6] sm:$0x3] %v10216_v23  ;;  %v10230_v26 = vld [vmem:[#allocation0 + $0x1f68] sm:$0x3] }
 0x4d2   :  { %v10244_v46 = vld [vmem:[#allocation0 + $0x1f78] sm:$0x3]  ;;  %12640 = vst [vmem:[%s17895_s1 + $0x7da] sm:$0x3] %v10230_v26 }
 0x4d3   :  { %12642 = vst [vmem:[%s17895_s1 + $0x7de] sm:$0x3] %v10244_v46 }

// kernel: upscale2d_conv2d.1
= control target key start
LH: loop header
LB: loop body
LE: loop exit
PB: predicated region body
PF: predicated region fallthrough
CT: control target
= control target key end

     0   :  { %s5374_s12 = smov 0   ;;  %s5376_s13 = smov 0   ;;  %s6990_s0 = inlined_call_operand.vmem [shape: bf16[2,1,19,32,4], index: 0, kind: input, shape index: {}]   ;;  %s6991_s1 = inlined_call_operand.vmem [shape: bf16[9,4,128], index: 1, kind: input, shape index: {}]   ;;  %s6992_s2 = inlined_call_operand.vmem [shape: f32[1,1,128], index: 2, kind: input, shape index: {}]   ;;  %s6993_s3 = inlined_call_operand.vmem [shape: f32[1,1,2,16,16,128], index: 3, kind: output, shape index: {}]  }
   0x1   :  { %s5378_s14 = smov 0  }
   0x2 LB: > { %s32_s15 = sadd.s32 1, %s5348_s13  ;;  %p3992_p0 = scmp.ge.s32.totalorder %s5352_s14, 1  ;;  %s5352_s14 = sphi %s5378_s14, %s13_s14   ;;  %s5348_s13 = sphi %s5376_s13, %s7270_s13   ;;  %s5344_s12 = sphi %s5374_s12, %s7269_s12  }
   0x3   : > { %p34_p1 = scmp.ge.s32.totalorder %s32_s15, 2  ;;  %p183_p2 = scmp.lt.s32.totalorder %s5352_s14, 3 }
   0x5   : > { %s7272_s15 = smov (%p34_p1, %s32_s15), 0  ;;  %p184_p3 = pnand %p3992_p0, %p183_p2 }
   0x7   : > { %187 = sbr.rel (%p184_p3) target bundleno = 803 (0x323), region = 32 }
   0xc   : > { %v3997_v0 = vld [vmem:[%s6991_s1 + $0x2] sm:$0x3]  ;;  %vm861_vm0 = vcmask 1041408   ;;  %p226_p4 = scmp.lt.s32.totalorder %s5344_s12, 1  ;;  %v337_v2 = vld [vmem:[%s6991_s1] sm:$0x3] }
   0xd   : > { %5229 = vmatprep.subr.msk.bf16.mxu1 %vm861_vm0, %v3997_v0  ;;  %5228 = vmatprep.subr.msk.bf16.mxu0 %vm861_vm0, %v3997_v0  ;;  %v863_v1 = vsel %vm861_vm0, %v3997_v0, 0  ;;  %v4095_v3 = vld [vmem:[%s6991_s1 + $0x4] sm:$0x3]  ;;  %vm503_vm1 = vsmask.f32 7424  ;;  %vm764_vm2 = vcmask 31744  }
   0xe   : > { %5227 = vmatpush3.bf16.msra.mxu1 %v863_v1  ;;  %4633 = vmatpush3.bf16.msra.mxu0 %v863_v1  ;;  %s7274_s12 = smov (!%p226_p4, %s5344_s12), 1  ;;  %v1187_v12 = vsel %vm861_vm0, %v337_v2, 0  ;;  %v1611_v13 = vsel %vm861_vm0, %v4095_v3, 0  ;;  %v5454_v33 = vld [vmem:[%s6991_s1 + $0x8] sm:$0x3]  ;;  %vm1448_vm3 = vcmask 1046528  }
   0xf   : > { %5230 = vmatprep.subr.msk.bf16.mxu1 %vm861_vm0, %v337_v2  ;;  %5231 = vmatprep.subr.msk.bf16.mxu0 %vm861_vm0, %v4095_v3  ;;  %s5238_s22 = smul.u32 304, %s7274_s12  ;;  %v5474_v44 = vld [vmem:[%s6991_s1 + $0x6] sm:$0x3]  ;;  %s4334_s11 = sshll.u32 %s7274_s12, 8 }
  0x10   : > { %s6884_s20 = scalar_lea.vmem %s6993_s3, %s4334_s11 }
  0x11   : > { %s5412_s25 = scalar_lea.vmem %s6990_s0, %s5238_s22 }
  0x12   : > { %v5415_v4 = vld [vmem:[%s5412_s25] sm:$0xff]   ;;  %v5418_v5 = vld [vmem:[%s5412_s25 + $0x8] sm:$0xff]   ;;  %v5433_v16 = vld [vmem:[%s5412_s25 + $0x10] sm:$0xff]  }
  0x13   : > { %v505_v6 = vshrl.u32 %v5415_v4, 16  ;;  %v507_v7 = vshll.u32 %v5415_v4, 16  ;;  %v512_v8 = vshll.u32 %v5418_v5, 16  ;;  %v516_v9 = vshrl.u32 %v5418_v5, 16  ;;  %v5425_v10 = vld [vmem:[%s5412_s25 + $0x80] sm:$0xff]   ;;  %v5428_v11 = vld [vmem:[%s5412_s25 + $0x88] sm:$0xff]  }
  0x14   : > { %v5436_v17 = vld [vmem:[%s5412_s25 + $0x90] sm:$0xff]   ;;  %v632_v18 = vshll.u32 %v5425_v10, 16  ;;  %v636_v19 = vshrl.u32 %v5425_v10, 16  ;;  %v640_v20 = vshll.u32 %v5428_v11, 16  ;;  %v644_v21 = vshrl.u32 %v5428_v11, 16  ;;  %v5447_v28 = vld [vmem:[%s5412_s25 + $0x18] sm:$0xff]  }
  0x15   : > { %v509_v14 = vrot.slane %v507_v7, 1  ;;  %v514_v15 = vrot.slane %v512_v8, 1  ;;  %v520_v24 = vshll.u32 %v5433_v16, 16  ;;  %v648_v25 = vshll.u32 %v5436_v17, 16  ;;  %v5460_v37 = vld [vmem:[%s5412_s25 + $0x98] sm:$0xff]   ;;  %v5464_v39 = vld [vmem:[%s5412_s25 + $0x20] sm:$0xff]  }
  0x16   : > { %v5444_v26 = vrot.slane %v632_v18, 1  ;;  %v642_v27 = vrot.slane %v640_v20, 1  ;;  %v524_v29 = vshrl.u32 %v5433_v16, 16  ;;  %v528_v36 = vshll.u32 %v5447_v28, 16  ;;  %v5469_v43 = vld [vmem:[%s5412_s25 + $0xa0] sm:$0xff]   ;;  %v5484_v49 = vld [vmem:[%s5412_s25 + $0x28] sm:$0xff]  }
  0x17   : > { %v510_v22 = vor.u32 %v509_v14, %v505_v6  ;;  %v518_v23 = vor.u32 %v516_v9, %v514_v15  ;;  %v522_v31 = vrot.slane %v520_v24, 1  ;;  %v650_v32 = vrot.slane %v648_v25, 1  ;;  %v5504_v61 = vld [vmem:[%s5412_s25 + $0xa8] sm:$0xff]   ;;  %v5508_v63 = vld [vmem:[%s5412_s25 + $0x30] sm:$0xff]   ;;  %v5535_v20 = vld [vmem:[%s5412_s25 + $0x38] sm:$0xff]  }
  0x18   : > { %v638_v34 = vor.u32 %v636_v19, %v5444_v26  ;;  %v646_v35 = vor.u32 %v644_v21, %v642_v27  ;;  %v652_v38 = vshrl.u32 %v5436_v17, 16  ;;  %v532_v42 = vshrl.u32 %v5447_v28, 16  ;;  %v5520_v8 = vld [vmem:[%s5412_s25 + $0xb0] sm:$0xff]   ;;  %v5538_v21 = vld [vmem:[%s5412_s25 + $0xb8] sm:$0xff]  }
  0x19   : > { %v515_v30 = vsel %vm503_vm1, %v510_v22, %v514_v15  ;;  %v523_v40 = vsel %vm503_vm1, %v518_v23, %v522_v31  ;;  %v526_v41 = vor.u32 %v524_v29, %v522_v31  ;;  %v530_v47 = vrot.slane %v528_v36, 1 }
  0x1a   : > { %4634 = vmatprep.mubr.msk.bf16.mxu0 %vm764_vm2, %v515_v30  ;;  %v5477_v45 = vsel %vm503_vm1, %v638_v34, %v642_v27  ;;  %v5481_v46 = vsel %vm503_vm1, %v646_v35, %v650_v32  ;;  %v654_v48 = vor.u32 %v652_v38, %v650_v32  ;;  %v656_v50 = vshll.u32 %v5460_v37, 16  ;;  %v5549_v32 = vld [vmem:[%s5412_s25 + $0x40] sm:$0xff]  }
  0x1b   : > { %7089 = vst [vmem:[#allocation2_spill] sm:$0xff] %v5477_v45  ;;  %4635 = vmatmul.mubr.msk.bf16.vlgmr.msra.gmra.mxu0 %vm764_vm2, %v523_v40  ;;  %7090 = vst [vmem:[#allocation3_spill] sm:$0xff] %v5481_v46  ;;  %4666 = vmatprep.mubr.msk.bf16.mxu1 %vm764_vm2, %v5477_v45  ;;  %v536_v51 = vshll.u32 %v5464_v39, 16  ;;  %v660_v52 = vshrl.u32 %v5460_v37, 16  ;;  %v664_v53 = vshll.u32 %v5469_v43, 16  ;;  %v5495_v54 = vsel %vm503_vm1, %v526_v41, %v530_v47  ;;  %v5559_v40 = vld [vmem:[%s5412_s25 + $0xc0] sm:$0xff]  }
  0x1c   : > { %4765 = vmatpush3.bf16.msra.mxu0 %v1611_v13  ;;  %4667 = vmatmul.mubr.msk.bf16.vlgmr.msra.gmra.mxu1 %vm764_vm2, %v5481_v46  ;;  %v534_v55 = vor.u32 %v532_v42, %v530_v47  ;;  %v540_v56 = vshrl.u32 %v5464_v39, 16  ;;  %v544_v57 = vshll.u32 %v5484_v49, 16  ;;  %v658_v58 = vrot.slane %v656_v50, 1 }
  0x1d   : > { %5233 = vmatprep.subr.msk.bf16.mxu0 %vm861_vm0, %v5454_v33  ;;  %4699 = vmatpush3.bf16.msra.mxu1 %v1187_v12  ;;  %v538_v59 = vrot.slane %v536_v51, 1  ;;  %v666_v60 = vrot.slane %v664_v53, 1  ;;  %v668_v62 = vshrl.u32 %v5469_v43, 16  ;;  %v548_v1 = vshrl.u32 %v5484_v49, 16 }
  0x1e   : > { %4638 = vmatprep.mubr.msk.bf16.mxu0 %vm764_vm2, %v5495_v54  ;;  %v546_v0 = vrot.slane %v544_v57, 1  ;;  %5232 = vmatprep.subr.msk.bf16.mxu1 %vm861_vm0, %v5474_v44  ;;  %v5514_v2 = vsel %vm503_vm1, %v654_v48, %v658_v58  ;;  %v662_v6 = vor.u32 %v660_v52, %v658_v58  ;;  %v672_v12 = vshll.u32 %v5504_v61, 16  ;;  %v5563_v48 = vld [vmem:[%s5412_s25 + $0x48] sm:$0xff]  }
  0x1f   : > { %7091 = vst [vmem:[#allocation4_spill] sm:$0xff] %v5514_v2  ;;  %v5517_v3 = vsel %vm503_vm1, %v534_v55, %v538_v59  ;;  %v542_v7 = vor.u32 %v540_v56, %v538_v59  ;;  %4670 = vmatprep.mubr.msk.bf16.mxu1 %vm764_vm2, %v5514_v2  ;;  %v670_v9 = vor.u32 %v668_v62, %v666_v60  ;;  %v552_v13 = vshll.u32 %v5508_v63, 16  ;;  %v5570_v52 = vld [vmem:[%s5412_s25 + $0xc8] sm:$0xff]   ;;  %v5583_v62 = vld [vmem:[%s5412_s25 + $0x50] sm:$0xff]  }
  0x20   : > { %v5527_v14 = vsel %vm503_vm1, %v662_v6, %v666_v60  ;;  %v676_v18 = vshrl.u32 %v5504_v61, 16  ;;  %v680_v19 = vshll.u32 %v5520_v8, 16  ;;  %v674_v22 = vrot.slane %v672_v12, 1 }
  0x21   : > { %7092 = vst [vmem:[#allocation5_spill] sm:$0xff] %v5527_v14  ;;  %v5530_v15 = vsel %vm503_vm1, %v542_v7, %v546_v0  ;;  %v554_v23 = vrot.slane %v552_v13, 1  ;;  %v556_v24 = vshrl.u32 %v5508_v63, 16  ;;  %v684_v25 = vshrl.u32 %v5520_v8, 16 }
  0x22   : > { %7093 = vst [vmem:[#allocation6_spill] sm:$0xff] %v5530_v15  ;;  %v550_v27 = vor.u32 %v548_v1, %v546_v0  ;;  %v682_v29 = vrot.slane %v680_v19, 1  ;;  %v560_v30 = vshll.u32 %v5535_v20, 16  ;;  %v688_v31 = vshll.u32 %v5538_v21, 16  ;;  %v5600_v19 = vld [vmem:[%s5412_s25 + $0x58] sm:$0xff]  }
  0x23   : > { %4639 = vmatmul.mubr.msk.bf16.gmra.mxu0 %vm764_vm2, %v5517_v3  ;;  %v5554_v34 = vsel %vm503_vm1, %v670_v9, %v674_v22  ;;  %v558_v35 = vor.u32 %v556_v24, %v554_v23  ;;  %v678_v36 = vor.u32 %v676_v18, %v674_v22  ;;  %v568_v47 = vshll.u32 %v5549_v32, 16  ;;  %v5595_v9 = vld [vmem:[%s5412_s25 + $0xd0] sm:$0xff]  }
  0x24   : > { %4642 = vmatprep.mubr.msk.bf16.mxu0 %vm764_vm2, %v5530_v15  ;;  %4671 = vmatmul.mubr.msk.bf16.gmra.mxu1 %vm764_vm2, %v5527_v14  ;;  %7094 = vst [vmem:[#allocation7_spill] sm:$0xff] %v5554_v34  ;;  %v562_v38 = vrot.slane %v560_v30, 1  ;;  %v686_v41 = vor.u32 %v684_v25, %v682_v29  ;;  %v690_v42 = vrot.slane %v688_v31, 1  ;;  %v5566_v50 = vsel %vm503_vm1, %v550_v27, %v554_v23  ;;  %v5606_v27 = vld [vmem:[%s5412_s25 + $0xd8] sm:$0xff]  }
  0x25   : > { %4674 = vmatprep.mubr.msk.bf16.mxu1 %vm764_vm2, %v5554_v34  ;;  %7095 = vst [vmem:[#allocation8_spill] sm:$0xff] %v5566_v50  ;;  %v564_v51 = vshrl.u32 %v5535_v20, 16  ;;  %v696_v55 = vshll.u32 %v5559_v40, 16  ;;  %v572_v56 = vshrl.u32 %v5549_v32, 16  ;;  %v576_v57 = vshll.u32 %v5563_v48, 16  ;;  %v5677_v34 = vld [vmem:[%s5412_s25 + $0xf0] sm:$0xff]  }
  0x26   : > { %v5573_v53 = vsel %vm503_vm1, %v558_v35, %v562_v38  ;;  %v5579_v58 = vsel %vm503_vm1, %v678_v36, %v682_v29  ;;  %v570_v59 = vrot.slane %v568_v47, 1  ;;  %v692_v60 = vshrl.u32 %v5538_v21, 16  ;;  %v5680_v14 = vld [vmem:[%s5412_s25 + $0x78] sm:$0xff]  }
  0x27   : > { %7096 = vst [vmem:[#allocation9_spill] sm:$0xff] %v5573_v53  ;;  %7097 = vst [vmem:[#allocation10_spill] sm:$0xff] %v5579_v58  ;;  %v5588_v0 = vsel %vm503_vm1, %v686_v41, %v690_v42  ;;  %v700_v1 = vshrl.u32 %v5559_v40, 16  ;;  %v704_v6 = vshll.u32 %v5570_v52, 16  ;;  %v566_v7 = vor.u32 %v564_v51, %v562_v38 }
  0x28   : > { %7098 = vst [vmem:[#allocation11_spill] sm:$0xff] %v5588_v0  ;;  %v698_v12 = vrot.slane %v696_v55, 1  ;;  %v574_v13 = vor.u32 %v572_v56, %v570_v59  ;;  %v578_v18 = vrot.slane %v576_v57, 1  ;;  %v694_v22 = vor.u32 %v692_v60, %v690_v42  ;;  %v5630_v57 = vld [vmem:[%s5412_s25 + $0x60] sm:$0xff]  }
  0x29   : > { %v584_v23 = vshll.u32 %v5583_v62, 16  ;;  %v706_v25 = vrot.slane %v704_v6, 1  ;;  %v5609_v29 = vsel %vm503_vm1, %v566_v7, %v570_v59  ;;  %v580_v30 = vshrl.u32 %v5563_v48, 16  ;;  %v5637_v7 = vld [vmem:[%s5412_s25 + $0xe0] sm:$0xff]  }
  0x2a   : > { %v702_v24 = vor.u32 %v700_v1, %v698_v12  ;;  %7099 = vst [vmem:[#allocation12_spill] sm:$0xff] %v5609_v29  ;;  %v712_v31 = vshll.u32 %v5595_v9, 16  ;;  %v5614_v35 = vsel %vm503_vm1, %v574_v13, %v578_v18  ;;  %v588_v36 = vshrl.u32 %v5583_v62, 16 }
  0x2b   : > { %4643 = vmatmul.mubr.msk.bf16.gmra.mxu0 %vm764_vm2, %v5566_v50  ;;  %7100 = vst [vmem:[#allocation13_spill] sm:$0xff] %v5614_v35  ;;  %v592_v38 = vshll.u32 %v5600_v19, 16  ;;  %v5619_v41 = vsel %vm503_vm1, %v694_v22, %v698_v12  ;;  %v586_v42 = vrot.slane %v584_v23, 1  ;;  %v708_v47 = vshrl.u32 %v5570_v52, 16  ;;  %v5640_v12 = vld [vmem:[%s5412_s25 + $0x68] sm:$0xff]  }
  0x2c   : > { %4646 = vmatprep.mubr.msk.bf16.mxu0 %vm764_vm2, %v5573_v53  ;;  %4675 = vmatmul.mubr.msk.bf16.gmra.mxu1 %vm764_vm2, %v5579_v58  ;;  %7101 = vst [vmem:[#allocation14_spill] sm:$0xff] %v5619_v41  ;;  %v716_v51 = vshrl.u32 %v5595_v9, 16  ;;  %v5626_v55 = vsel %vm503_vm1, %v702_v24, %v706_v25  ;;  %v720_v56 = vshll.u32 %v5606_v27, 16  ;;  %v582_v59 = vor.u32 %v580_v30, %v578_v18  ;;  %v5646_v18 = vld [vmem:[%s5412_s25 + $0xe8] sm:$0xff]  }
  0x2d   : > { %4678 = vmatprep.mubr.msk.bf16.mxu1 %vm764_vm2, %v5588_v0  ;;  %7102 = vst [vmem:[#allocation15_spill] sm:$0xff] %v5626_v55  ;;  %v714_v60 = vrot.slane %v712_v31, 1  ;;  %v590_v1 = vor.u32 %v588_v36, %v586_v42  ;;  %v594_v6 = vrot.slane %v592_v38, 1  ;;  %v710_v13 = vor.u32 %v708_v47, %v706_v25 }
  0x2e   : > { %v722_v23 = vrot.slane %v720_v56, 1  ;;  %v600_v24 = vshll.u32 %v5630_v57, 16  ;;  %v5649_v30 = vsel %vm503_vm1, %v582_v59, %v586_v42  ;;  %v596_v31 = vshrl.u32 %v5600_v19, 16  ;;  %v5664_v56 = vld [vmem:[%s5412_s25 + $0x70] sm:$0xff]  }
  0x2f   : > { %v718_v22 = vor.u32 %v716_v51, %v714_v60  ;;  %7103 = vst [vmem:[#allocation16_spill] sm:$0xff] %v5649_v30  ;;  %v5653_v36 = vsel %vm503_vm1, %v590_v1, %v594_v6  ;;  %v728_v38 = vshll.u32 %v5637_v7, 16  ;;  %v608_v25 = vshll.u32 %v5640_v12, 16 }
  0x30   : > { %7104 = vst [vmem:[#allocation17_spill] sm:$0xff] %v5653_v36  ;;  %v5659_v47 = vsel %vm503_vm1, %v710_v13, %v714_v60  ;;  %v724_v51 = vshrl.u32 %v5606_v27, 16  ;;  %v732_v42 = vshrl.u32 %v5637_v7, 16  ;;  %v602_v1 = vrot.slane %v600_v24, 1 }
  0x31   : > { %7105 = vst [vmem:[#allocation18_spill] sm:$0xff] %v5659_v47  ;;  %v5669_v59 = vsel %vm503_vm1, %v718_v22, %v722_v23  ;;  %v598_v60 = vor.u32 %v596_v31, %v594_v6  ;;  %v730_v13 = vrot.slane %v728_v38, 1  ;;  %v610_v58 = vrot.slane %v608_v25, 1  ;;  %v5686_v6 = vld [vmem:[%s5412_s25 + $0xf8] sm:$0xff]  }
  0x32   : > { %7106 = vst [vmem:[#allocation19_spill] sm:$0xff] %v5669_v59  ;;  %v726_v22 = vor.u32 %v724_v51, %v722_v23  ;;  %v616_v46 = vshll.u32 %v5664_v56, 16  ;;  %v744_v25 = vshll.u32 %v5677_v34, 16  ;;  %v624_v23 = vshll.u32 %v5680_v14, 16 }
  0x33   : > { %4647 = vmatmul.mubr.msk.bf16.gmra.mxu0 %vm764_vm2, %v5609_v29  ;;  %v734_v24 = vor.u32 %v732_v42, %v730_v13  ;;  %v5689_v31 = vsel %vm503_vm1, %v598_v60, %v602_v1  ;;  %v740_v51 = vshrl.u32 %v5646_v18, 16  ;;  %v752_v60 = vshll.u32 %v5686_v6, 16 }
  0x34   : > { %4650 = vmatprep.mubr.msk.bf16.mxu0 %vm764_vm2, %v5614_v35  ;;  %4679 = vmatmul.mubr.msk.bf16.gmra.mxu1 %vm764_vm2, %v5619_v41  ;;  %v604_v41 = vshrl.u32 %v5630_v57, 16  ;;  %7107 = vst [vmem:[#allocation20_spill] sm:$0xff] %v5689_v31 }
  0x35   : > { %4682 = vmatprep.mubr.msk.bf16.mxu1 %vm764_vm2, %v5626_v55  ;;  %v736_v55 = vshll.u32 %v5646_v18, 16 }
  0x36   : > { %v606_v0 = vor.u32 %v604_v41, %v602_v1  ;;  %v612_v41 = vshrl.u32 %v5640_v12, 16  ;;  %v618_v1 = vrot.slane %v616_v46, 1 }
  0x37   : > { %v738_v2 = vrot.slane %v736_v55, 1  ;;  %v5699_v55 = vsel %vm503_vm1, %v726_v22, %v730_v13  ;;  %v746_v22 = vrot.slane %v744_v25, 1  ;;  %v756_v25 = vshrl.u32 %v5686_v6, 16 }
  0x38   : > { %v5693_v38 = vsel %vm503_vm1, %v606_v0, %v610_v58  ;;  %7109 = vst [vmem:[#allocation22_spill] sm:$0xff] %v5699_v55  ;;  %v748_v0 = vshrl.u32 %v5677_v34, 16  ;;  %v614_v13 = vor.u32 %v612_v41, %v610_v58  ;;  %v628_v58 = vshrl.u32 %v5680_v14, 16 }
  0x39   : > { %7108 = vst [vmem:[#allocation21_spill] sm:$0xff] %v5693_v38  ;;  %v5705_v42 = vsel %vm503_vm1, %v734_v24, %v738_v2  ;;  %v742_v46 = vor.u32 %v740_v51, %v738_v2 }
  0x3a   : > { %7110 = vst [vmem:[#allocation23_spill] sm:$0xff] %v5705_v42  ;;  %v5723_v35 = vsel %vm503_vm1, %v614_v13, %v618_v1 }
  0x3b   : > { %4651 = vmatmul.mubr.msk.bf16.gmra.mxu0 %vm764_vm2, %v5649_v30  ;;  %v754_v30 = vrot.slane %v752_v60, 1  ;;  %7111 = vst [vmem:[#allocation24_spill] sm:$0xff] %v5723_v35 }
  0x3c   : > { %4654 = vmatprep.mubr.msk.bf16.mxu0 %vm764_vm2, %v5653_v36  ;;  %4683 = vmatmul.mubr.msk.bf16.gmra.mxu1 %vm764_vm2, %v5659_v47  ;;  %v5710_v47 = vld [vmem:[%s5412_s25 + $0x100] sm:$0xf]  ;;  %v750_v36 = vor.u32 %v748_v0, %v746_v22 }
  0x3d   : > { %4686 = vmatprep.mubr.msk.bf16.mxu1 %vm764_vm2, %v5669_v59  ;;  %v620_v59 = vshrl.u32 %v5664_v56, 16  ;;  %v5720_v24 = vcombine.low %v5710_v47, %v5710_v47  ;;  %v5747_v0 = vor.u32 %v756_v25, %v754_v30  ;;  %v1919_v25 = vsel %vm861_vm0, %v5474_v44, 0  ;;  %v5789_v44 = vld [vmem:[%s6991_s1 + $0xc] sm:$0x3] }
  0x3f   : > { %v622_v45 = vor.u32 %v620_v59, %v618_v1  ;;  %v5730_v59 = vsel %vm503_vm1, %v742_v46, %v746_v22  ;;  %v760_v2 = vshll.u32 %v5720_v24, 16  ;;  %v1450_v1 = vrot.slane %v5418_v5, 1 }
  0x40   : > { %7113 = vst [vmem:[#allocation26_spill] sm:$0xff] %v5730_v59  ;;  %v1452_v22 = vrot.slane %v5433_v16, 1  ;;  %v2244_v46 = vsel %vm861_vm0, %v5454_v33, 0  ;;  %v1458_v33 = vrot.slane %v5484_v49, 1 }
  0x41   : > { %v762_v60 = vrot.slane %v760_v2, 1  ;;  %v1456_v2 = vrot.slane %v5464_v39, 1 }
  0x43   : > { %4655 = vmatmul.mubr.msk.bf16.gmra.mxu0 %vm764_vm2, %v5689_v31  ;;  %v626_v31 = vrot.slane %v624_v23, 1  ;;  %v5737_v23 = vsel %vm503_vm1, %v750_v36, %v754_v30  ;;  %v763_v13 = vsel %vm503_vm1, %v5747_v0, %v762_v60  ;;  %v1454_v30 = vrot.slane %v5447_v28, 1 }
  0x44   : > { %4658 = vmatprep.mubr.msk.bf16.mxu0 %vm764_vm2, %v5693_v38  ;;  %4687 = vmatmul.mubr.msk.bf16.gmra.mxu1 %vm764_vm2, %v5699_v55  ;;  %7114 = vst [vmem:[#allocation27_spill] sm:$0xff] %v5737_v23 }
  0x45   : > { %4690 = vmatprep.mubr.msk.bf16.mxu1 %vm764_vm2, %v5705_v42  ;;  %v5727_v41 = vsel %vm503_vm1, %v622_v45, %v626_v31  ;;  %v630_v51 = vor.u32 %v628_v58, %v626_v31  ;;  %v1449_v45 = vrot.slane %v5415_v4, 1  ;;  %v5768_v58 = vsel %vm1448_vm3, %v1452_v22, %v1454_v30 }
  0x46   : > { %7112 = vst [vmem:[#allocation25_spill] sm:$0xff] %v5727_v41 }
  0x47   : > { %v5751_v36 = vsel %vm503_vm1, %v630_v51, %v5444_v26  ;;  %v1451_v31 = vsel %vm1448_vm3, %v1449_v45, %v1450_v1  ;;  %v1453_v26 = vsel %vm1448_vm3, %v1450_v1, %v1452_v22  ;;  %v5796_v51 = vsel %vm1448_vm3, %v1454_v30, %v1456_v2 }
  0x48   : > { %7115 = vst [vmem:[#allocation28_spill] sm:$0xff] %v5751_v36  ;;  %v1460_v45 = vrot.slane %v5508_v63, 1  ;;  %v1462_v1 = vrot.slane %v5535_v20, 1  ;;  %v1466_v22 = vrot.slane %v5563_v48, 1 }
  0x4a   : > { %v5812_v60 = vsel %vm1448_vm3, %v1458_v33, %v1460_v45 }
  0x4b   : > { %4659 = vmatmul.mubr.msk.bf16.gmra.mxu0 %vm764_vm2, %v5723_v35 }
  0x4c   : > { %4662 = vmatprep.mubr.msk.bf16.mxu0 %vm764_vm2, %v5727_v41  ;;  %4691 = vmatmul.mubr.msk.bf16.gmra.mxu1 %vm764_vm2, %v5730_v59 }
  0x4d   : > { %4694 = vmatprep.mubr.msk.bf16.mxu1 %vm764_vm2, %v5737_v23 }
  0x53   : > { %4663 = vmatmul.mubr.msk.bf16.gmra.mxu0 %vm764_vm2, %v5751_v36 }
  0x54   : > { %4766 = vmatprep.mubr.msk.bf16.mxu0 %vm764_vm2, %v1451_v31  ;;  %4695 = vmatmul.mubr.msk.bf16.gmra.mxu1 %vm764_vm2, %v763_v13  ;;  %v5815_v31 = vsel %vm1448_vm3, %v1460_v45, %v1462_v1  ;;  %v1464_v13 = vrot.slane %v5549_v32, 1  ;;  %v1472_v45 = vrot.slane %v5630_v57, 1 }
  0x55   : > { %4700 = vmatprep.mubr.msk.bf16.mxu1 %vm764_vm2, %v5415_v4  ;;  %v5779_v4 = vld [vmem:[%s6991_s1 + $0xa] sm:$0x3] }
  0x56   : > { %v5828_v30 = vsel %vm1448_vm3, %v1462_v1, %v1464_v13  ;;  %v1474_v1 = vrot.slane %v5640_v12, 1 }
  0x5b   : > { %4767 = vmatmul.mubr.msk.bf16.vlgmr.msra.gmra.mxu0 %vm764_vm2, %v1453_v26  ;;  %v5831_v26 = vsel %vm1448_vm3, %v1464_v13, %v1466_v22 }
  0x5c   : > { %4897 = vmatpush3.bf16.msra.mxu0 %v2244_v46  ;;  %4770 = vmatprep.mubr.msk.bf16.mxu0 %vm764_vm2, %v5768_v58  ;;  %v1468_v46 = vrot.slane %v5583_v62, 1 }
  0x5d   : > { %4701 = vmatmul.mubr.msk.bf16.vlgmr.msra.gmra.mxu1 %vm764_vm2, %v5418_v5  ;;  %5235 = vmatprep.subr.msk.bf16.mxu0 %vm861_vm0, %v5789_v44  ;;  %v5799_v5 = vsel %vm1448_vm3, %v1456_v2, %v1458_v33 }
  0x5e   : > { %4831 = vmatpush3.bf16.msra.mxu1 %v1919_v25  ;;  %4704 = vmatprep.mubr.msk.bf16.mxu1 %vm764_vm2, %v5433_v16  ;;  %v1470_v25 = vrot.slane %v5600_v19, 1  ;;  %v5844_v2 = vsel %vm1448_vm3, %v1466_v22, %v1468_v46  ;;  %v5863_v22 = vsel %vm1448_vm3, %v1472_v45, %v1474_v1 }
  0x5f   : > { %5234 = vmatprep.subr.msk.bf16.mxu1 %vm861_vm0, %v5779_v4  ;;  %7118 = vst [vmem:[#allocation31_spill] sm:$0xff] %v5863_v22 }
  0x60   : > { %v5847_v33 = vsel %vm1448_vm3, %v1468_v46, %v1470_v25  ;;  %v5860_v13 = vsel %vm1448_vm3, %v1470_v25, %v1472_v45  ;;  %v1476_v46 = vrot.slane %v5664_v56, 1 }
  0x61   : > { %7116 = vst [vmem:[#allocation29_spill] sm:$0xff] %v5847_v33  ;;  %7117 = vst [vmem:[#allocation30_spill] sm:$0xff] %v5860_v13 }
  0x62   : > { %v5876_v25 = vsel %vm1448_vm3, %v1474_v1, %v1476_v46 }
  0x63   : > { %4771 = vmatmul.mubr.msk.bf16.gmra.mxu0 %vm764_vm2, %v5796_v51  ;;  %7119 = vst [vmem:[#allocation32_spill] sm:$0xff] %v5876_v25 }
  0x64   : > { %4774 = vmatprep.mubr.msk.bf16.mxu0 %vm764_vm2, %v5799_v5 }
  0x65   : > { %4705 = vmatmul.mubr.msk.bf16.gmra.mxu1 %vm764_vm2, %v5447_v28 }
  0x66   : > { %4708 = vmatprep.mubr.msk.bf16.mxu1 %vm764_vm2, %v5464_v39 }
  0x6b   : > { %4775 = vmatmul.mubr.msk.bf16.gmra.mxu0 %vm764_vm2, %v5812_v60 }
  0x6c   : > { %4778 = vmatprep.mubr.msk.bf16.mxu0 %vm764_vm2, %v5815_v31 }
  0x6d   : > { %4709 = vmatmul.mubr.msk.bf16.gmra.mxu1 %vm764_vm2, %v5484_v49 }
  0x6e   : > { %4712 = vmatprep.mubr.msk.bf16.mxu1 %vm764_vm2, %v5508_v63 }
  0x73   : > { %4779 = vmatmul.mubr.msk.bf16.gmra.mxu0 %vm764_vm2, %v5828_v30 }
  0x74   : > { %4782 = vmatprep.mubr.msk.bf16.mxu0 %vm764_vm2, %v5831_v26 }
  0x75   : > { %4713 = vmatmul.mubr.msk.bf16.gmra.mxu1 %vm764_vm2, %v5535_v20 }
  0x76   : > { %4716 = vmatprep.mubr.msk.bf16.mxu1 %vm764_vm2, %v5549_v32 }
  0x7b   : > { %4783 = vmatmul.mubr.msk.bf16.gmra.mxu0 %vm764_vm2, %v5844_v2 }
  0x7c   : > { %4786 = vmatprep.mubr.msk.bf16.mxu0 %vm764_vm2, %v5847_v33  ;;  %v1478_v33 = vrot.slane %v5680_v14, 1 }
  0x7d   : > { %4717 = vmatmul.mubr.msk.bf16.gmra.mxu1 %vm764_vm2, %v5563_v48 }
  0x7e   : > { %4720 = vmatprep.mubr.msk.bf16.mxu1 %vm764_vm2, %v5583_v62  ;;  %v5879_v45 = vsel %vm1448_vm3, %v1476_v46, %v1478_v33 }
  0x7f   : > { %7120 = vst [vmem:[#allocation33_spill] sm:$0xff] %v5879_v45 }
  0x83   : > { %4787 = vmatmul.mubr.msk.bf16.gmra.mxu0 %vm764_vm2, %v5860_v13  ;;  %v1482_v13 = vrot.slane %v5428_v11, 1 }
  0x84   : > { %4790 = vmatprep.mubr.msk.bf16.mxu0 %vm764_vm2, %v5863_v22  ;;  %v1480_v22 = vrot.slane %v5425_v10, 1 }
  0x85   : > { %4721 = vmatmul.mubr.msk.bf16.gmra.mxu1 %vm764_vm2, %v5600_v19 }
  0x86   : > { %4724 = vmatprep.mubr.msk.bf16.mxu1 %vm764_vm2, %v5630_v57  ;;  %v5892_v1 = vsel %vm1448_vm3, %v1478_v33, %v1480_v22  ;;  %v5895_v46 = vsel %vm1448_vm3, %v1480_v22, %v1482_v13 }
  0x87   : > { %7121 = vst [vmem:[#allocation34_spill] sm:$0xff] %v5892_v1  ;;  %7122 = vst [vmem:[#allocation35_spill] sm:$0xff] %v5895_v46 }
  0x8b   : > { %4791 = vmatmul.mubr.msk.bf16.gmra.mxu0 %vm764_vm2, %v5876_v25  ;;  %v1486_v25 = vrot.slane %v5460_v37, 1 }
  0x8c   : > { %4794 = vmatprep.mubr.msk.bf16.mxu0 %vm764_vm2, %v5879_v45  ;;  %v1484_v45 = vrot.slane %v5436_v17, 1 }
  0x8d   : > { %4725 = vmatmul.mubr.msk.bf16.gmra.mxu1 %vm764_vm2, %v5640_v12 }
  0x8e   : > { %4728 = vmatprep.mubr.msk.bf16.mxu1 %vm764_vm2, %v5664_v56  ;;  %v5908_v33 = vsel %vm1448_vm3, %v1482_v13, %v1484_v45  ;;  %v5911_v22 = vsel %vm1448_vm3, %v1484_v45, %v1486_v25  ;;  %v1492_v45 = vrot.slane %v5520_v8, 1 }
  0x8f   : > { %7123 = vst [vmem:[#allocation36_spill] sm:$0xff] %v5908_v33  ;;  %7124 = vst [vmem:[#allocation37_spill] sm:$0xff] %v5911_v22 }
  0x93   : > { %4795 = vmatmul.mubr.msk.bf16.gmra.mxu0 %vm764_vm2, %v5892_v1  ;;  %v1490_v1 = vrot.slane %v5504_v61, 1 }
  0x94   : > { %4798 = vmatprep.mubr.msk.bf16.mxu0 %vm764_vm2, %v5895_v46  ;;  %v1488_v46 = vrot.slane %v5469_v43, 1 }
  0x95   : > { %4729 = vmatmul.mubr.msk.bf16.gmra.mxu1 %vm764_vm2, %v5680_v14 }
  0x96   : > { %4732 = vmatprep.mubr.msk.bf16.mxu1 %vm764_vm2, %v5425_v10  ;;  %v5924_v10 = vsel %vm1448_vm3, %v1486_v25, %v1488_v46  ;;  %v5927_v13 = vsel %vm1448_vm3, %v1488_v46, %v1490_v1  ;;  %v1496_v46 = vrot.slane %v5559_v40, 1 }
  0x97   : > { %7125 = vst [vmem:[#allocation38_spill] sm:$0xff] %v5924_v10  ;;  %7126 = vst [vmem:[#allocation39_spill] sm:$0xff] %v5927_v13 }
  0x9b   : > { %4799 = vmatmul.mubr.msk.bf16.gmra.mxu0 %vm764_vm2, %v5908_v33 }
  0x9c   : > { %4802 = vmatprep.mubr.msk.bf16.mxu0 %vm764_vm2, %v5911_v22 }
  0x9d   : > { %4733 = vmatmul.mubr.msk.bf16.gmra.mxu1 %vm764_vm2, %v5428_v11  ;;  %v1494_v11 = vrot.slane %v5538_v21, 1 }
  0x9e   : > { %4736 = vmatprep.mubr.msk.bf16.mxu1 %vm764_vm2, %v5436_v17  ;;  %v5940_v17 = vsel %vm1448_vm3, %v1490_v1, %v1492_v45 }
  0x9f   : > { %7127 = vst [vmem:[#allocation40_spill] sm:$0xff] %v5940_v17  ;;  %v5943_v25 = vsel %vm1448_vm3, %v1492_v45, %v1494_v11  ;;  %v5956_v1 = vsel %vm1448_vm3, %v1494_v11, %v1496_v46 }
  0xa0   : > { %7128 = vst [vmem:[#allocation41_spill] sm:$0xff] %v5943_v25  ;;  %7129 = vst [vmem:[#allocation42_spill] sm:$0xff] %v5956_v1 }
  0xa3   : > { %4803 = vmatmul.mubr.msk.bf16.gmra.mxu0 %vm764_vm2, %v5924_v10  ;;  %v7142_v10 = vld [vmem:[#allocation20_spill] sm:$0xff] }
  0xa4   : > { %4806 = vmatprep.mubr.msk.bf16.mxu0 %vm764_vm2, %v5927_v13  ;;  %v1498_v13 = vrot.slane %v5570_v52, 1 }
  0xa5   : > { %4737 = vmatmul.mubr.msk.bf16.gmra.mxu1 %vm764_vm2, %v5460_v37 }
  0xa6   : > { %4740 = vmatprep.mubr.msk.bf16.mxu1 %vm764_vm2, %v5469_v43  ;;  %v5959_v45 = vsel %vm1448_vm3, %v1496_v46, %v1498_v13 }
  0xa7   : > { %7130 = vst [vmem:[#allocation43_spill] sm:$0xff] %v5959_v45 }
  0xab   : > { %4807 = vmatmul.mubr.msk.bf16.gmra.mxu0 %vm764_vm2, %v5940_v17  ;;  %v1502_v17 = vrot.slane %v5606_v27, 1 }
  0xac   : > { %4810 = vmatprep.mubr.msk.bf16.mxu0 %vm764_vm2, %v5943_v25  ;;  %v1500_v25 = vrot.slane %v5595_v9, 1 }
  0xad   : > { %4741 = vmatmul.mubr.msk.bf16.gmra.mxu1 %vm764_vm2, %v5504_v61 }
  0xae   : > { %4744 = vmatprep.mubr.msk.bf16.mxu1 %vm764_vm2, %v5520_v8  ;;  %v5972_v11 = vsel %vm1448_vm3, %v1498_v13, %v1500_v25  ;;  %v5975_v46 = vsel %vm1448_vm3, %v1500_v25, %v1502_v17 }
  0xaf   : > { %7131 = vst [vmem:[#allocation44_spill] sm:$0xff] %v5972_v11  ;;  %7132 = vst [vmem:[#allocation45_spill] sm:$0xff] %v5975_v46 }
  0xb3   : > { %4811 = vmatmul.mubr.msk.bf16.gmra.mxu0 %vm764_vm2, %v5956_v1  ;;  %v1506_v1 = vrot.slane %v5646_v18, 1 }
  0xb4   : > { %4814 = vmatprep.mubr.msk.bf16.mxu0 %vm764_vm2, %v5959_v45  ;;  %v1504_v45 = vrot.slane %v5637_v7, 1 }
  0xb5   : > { %4745 = vmatmul.mubr.msk.bf16.gmra.mxu1 %vm764_vm2, %v5538_v21 }
  0xb6   : > { %4748 = vmatprep.mubr.msk.bf16.mxu1 %vm764_vm2, %v5559_v40  ;;  %v5988_v13 = vsel %vm1448_vm3, %v1502_v17, %v1504_v45  ;;  %v5991_v25 = vsel %vm1448_vm3, %v1504_v45, %v1506_v1 }
  0xb7   : > { %7133 = vst [vmem:[#allocation46_spill] sm:$0xff] %v5988_v13  ;;  %7134 = vst [vmem:[#allocation47_spill] sm:$0xff] %v5991_v25 }
  0xbb   : > { %4815 = vmatmul.mubr.msk.bf16.gmra.mxu0 %vm764_vm2, %v5972_v11  ;;  %v6001_v11 = vrot.slane %v5686_v6, 1 }
  0xbc   : > { %4818 = vmatprep.mubr.msk.bf16.mxu0 %vm764_vm2, %v5975_v46  ;;  %v1508_v46 = vrot.slane %v5677_v34, 1 }
  0xbd   : > { %4749 = vmatmul.mubr.msk.bf16.gmra.mxu1 %vm764_vm2, %v5570_v52  ;;  %7135 = vst [vmem:[#allocation48_spill] sm:$0xff] %v6001_v11 }
  0xbe   : > { %4752 = vmatprep.mubr.msk.bf16.mxu1 %vm764_vm2, %v5595_v9  ;;  %v6006_v17 = vsel %vm1448_vm3, %v1506_v1, %v1508_v46  ;;  %v6010_v45 = vsel %vm1448_vm3, %v1508_v46, %v6001_v11 }
  0xbf   : > { %7136 = vst [vmem:[#allocation49_spill] sm:$0xff] %v6006_v17  ;;  %7137 = vst [vmem:[#allocation50_spill] sm:$0xff] %v6010_v45 }
  0xc3   : > { %4819 = vmatmul.mubr.msk.bf16.gmra.mxu0 %vm764_vm2, %v5988_v13 }
  0xc4   : > { %4822 = vmatprep.mubr.msk.bf16.mxu0 %vm764_vm2, %v5991_v25  ;;  %v1512_v25 = vrot.slane %v5720_v24, 1  ;;  %v2861_v24 = vsel %vm861_vm0, %v5789_v44, 0 }
  0xc5   : > { %4753 = vmatmul.mubr.msk.bf16.gmra.mxu1 %vm764_vm2, %v5606_v27 }
  0xc6   : > { %4756 = vmatprep.mubr.msk.bf16.mxu1 %vm764_vm2, %v5637_v7  ;;  %v1513_v1 = vsel %vm1448_vm3, %v6001_v11, %v1512_v25  ;;  %v2553_v25 = vsel %vm861_vm0, %v5779_v4, 0 }
  0xcb   : > { %4823 = vmatmul.mubr.msk.bf16.gmra.mxu0 %vm764_vm2, %v6006_v17  ;;  %v7139_v17 = vld [vmem:[#allocation16_spill] sm:$0xff] }
  0xcc   : > { %4826 = vmatprep.mubr.msk.bf16.mxu0 %vm764_vm2, %v6010_v45 }
  0xcd   : > { %4757 = vmatmul.mubr.msk.bf16.gmra.mxu1 %vm764_vm2, %v5646_v18 }
  0xce   : > { %4760 = vmatprep.mubr.msk.bf16.mxu1 %vm764_vm2, %v5677_v34 }
  0xd3   : > { %4827 = vmatmul.mubr.msk.bf16.gmra.mxu0 %vm764_vm2, %v1513_v1 }
  0xd4   : > { %4898 = vmatprep.mubr.msk.bf16.mxu0 %vm764_vm2, %v5495_v54 }
  0xd5   : > { %4761 = vmatmul.mubr.msk.bf16.gmra.mxu1 %vm764_vm2, %v5686_v6 }
  0xd6   : > { %4832 = vmatprep.mubr.msk.bf16.mxu1 %vm764_vm2, %v5433_v16  ;;  %v6047_v16 = vld [vmem:[%s6991_s1 + $0xe] sm:$0x3] }
  0xdb   : > { %v4636_v46 = vpop.f32.mrf.mxu0  ;;  %4899 = vmatmul.mubr.msk.bf16.vlgmr.msra.gmra.mxu0 %vm764_vm2, %v5517_v3  ;;  %v6052_v3 = vld [vmem:[%s6991_s1 + $0x10] sm:$0x3] }
  0xdc   : > { %5029 = vmatpush3.bf16.msra.mxu0 %v2861_v24  ;;  %4902 = vmatprep.mubr.msk.bf16.mxu0 %vm764_vm2, %v5530_v15  ;;  %v4668_v54 = vpop.f32.mrf.mxu1 }
  0xdd   : > { %4833 = vmatmul.mubr.msk.bf16.vlgmr.msra.gmra.mxu1 %vm764_vm2, %v5447_v28  ;;  %v6040_v1 = vpop.f32.mrf.mxu0  ;;  %5237 = vmatprep.subr.msk.bf16.mxu0 %vm861_vm0, %v6052_v3 }
  0xde   : > { %4963 = vmatpush3.bf16.msra.mxu1 %v2553_v25  ;;  %4836 = vmatprep.mubr.msk.bf16.mxu1 %vm764_vm2, %v5464_v39  ;;  %v6054_v4 = vpop.f32.mrf.mxu1 }
  0xdf   : > { %v4637_v44 = vpop.f32.mrf.mxu0  ;;  %5236 = vmatprep.subr.msk.bf16.mxu1 %vm861_vm0, %v6047_v16 }
  0xe0   : > { %v4669_v28 = vpop.f32.mrf.mxu1 }
  0xe1   : > { %v6060_v39 = vpop.f32.mrf.mxu0 }
  0xe2   : > { %v6062_v24 = vpop.f32.mrf.mxu1 }
  0xe3   : > { %v4640_v46 = vpop.f32.mrf.mxu0  ;;  %4903 = vmatmul.mubr.msk.bf16.gmra.mxu0 %vm764_vm2, %v5566_v50 }
  0xe4   : > { %4906 = vmatprep.mubr.msk.bf16.mxu0 %vm764_vm2, %v5573_v53  ;;  %v4672_v25 = vpop.f32.mrf.mxu1 }
  0xe5   : > { %4837 = vmatmul.mubr.msk.bf16.gmra.mxu1 %vm764_vm2, %v5484_v49  ;;  %v6070_v54 = vpop.f32.mrf.mxu0  ;;  %v7138_v25 = vld [vmem:[#allocation13_spill] sm:$0xff] }
  0xe6   : > { %4840 = vmatprep.mubr.msk.bf16.mxu1 %vm764_vm2, %v5508_v63  ;;  %v6074_v44 = vpop.f32.mrf.mxu1 }
  0xe7   : > { %v4641_v28 = vpop.f32.mrf.mxu0 }
  0xe8   : > { %v4673_v15 = vpop.f32.mrf.mxu1 }
  0xe9   : > { %v6076_v46 = vpop.f32.mrf.mxu0 }
  0xea   : > { %v6078_v11 = vpop.f32.mrf.mxu1 }
  0xeb   : > { %v4644_v50 = vpop.f32.mrf.mxu0  ;;  %4907 = vmatmul.mubr.msk.bf16.gmra.mxu0 %vm764_vm2, %v5609_v29 }
  0xec   : > { %4910 = vmatprep.mubr.msk.bf16.mxu0 %vm764_vm2, %v7138_v25  ;;  %v4676_v49 = vpop.f32.mrf.mxu1 }
  0xed   : > { %4841 = vmatmul.mubr.msk.bf16.gmra.mxu1 %vm764_vm2, %v5535_v20  ;;  %v6086_v63 = vpop.f32.mrf.mxu0  ;;  %v7140_v49 = vld [vmem:[#allocation17_spill] sm:$0xff] }
  0xee   : > { %4844 = vmatprep.mubr.msk.bf16.mxu1 %vm764_vm2, %v5549_v32  ;;  %v6090_v15 = vpop.f32.mrf.mxu1 }
  0xef   : > { %v4645_v28 = vpop.f32.mrf.mxu0 }
  0xf0   : > { %v4677_v53 = vpop.f32.mrf.mxu1 }
  0xf1   : > { %v6092_v50 = vpop.f32.mrf.mxu0 }
  0xf2   : > { %v6094_v45 = vpop.f32.mrf.mxu1 }
  0xf3   : > { %v4648_v29 = vpop.f32.mrf.mxu0  ;;  %4911 = vmatmul.mubr.msk.bf16.gmra.mxu0 %vm764_vm2, %v7139_v17 }
  0xf4   : > { %4914 = vmatprep.mubr.msk.bf16.mxu0 %vm764_vm2, %v7140_v49  ;;  %v4680_v20 = vpop.f32.mrf.mxu1 }
  0xf5   : > { %4845 = vmatmul.mubr.msk.bf16.gmra.mxu1 %vm764_vm2, %v5563_v48  ;;  %v6102_v32 = vpop.f32.mrf.mxu0 }
  0xf6   : > { %4848 = vmatprep.mubr.msk.bf16.mxu1 %vm764_vm2, %v5583_v62  ;;  %v6106_v53 = vpop.f32.mrf.mxu1 }
  0xf7   : > { %v4649_v28 = vpop.f32.mrf.mxu0 }
  0xf8   : > { %v4681_v25 = vpop.f32.mrf.mxu1 }
  0xf9   : > { %v6108_v29 = vpop.f32.mrf.mxu0 }
  0xfa   : > { %v6110_v13 = vpop.f32.mrf.mxu1 }
  0xfb   : > { %7141 = vst [vmem:[#allocation51_spill] sm:$0xff] %v6110_v13  ;;  %v4652_v17 = vpop.f32.mrf.mxu0  ;;  %4915 = vmatmul.mubr.msk.bf16.gmra.mxu0 %vm764_vm2, %v7142_v10  ;;  %v7159_v13 = vld [vmem:[#allocation10_spill] sm:$0xff] }
  0xfc   : > { %4918 = vmatprep.mubr.msk.bf16.mxu0 %vm764_vm2, %v5693_v38  ;;  %v4684_v48 = vpop.f32.mrf.mxu1 }
  0xfd   : > { %4849 = vmatmul.mubr.msk.bf16.gmra.mxu1 %vm764_vm2, %v5600_v19  ;;  %v6118_v62 = vpop.f32.mrf.mxu0 }
  0xfe   : > { %4852 = vmatprep.mubr.msk.bf16.mxu1 %vm764_vm2, %v5630_v57  ;;  %v6122_v25 = vpop.f32.mrf.mxu1 }
  0xff   : > { %7143 = vst [vmem:[#allocation52_spill] sm:$0xff] %v6122_v25  ;;  %v4653_v20 = vpop.f32.mrf.mxu0 }
 0x100   : > { %v4685_v28 = vpop.f32.mrf.mxu1 }
 0x101   : > { %v6124_v17 = vpop.f32.mrf.mxu0 }
 0x102   : > { %v6126_v49 = vpop.f32.mrf.mxu1 }
 0x103   : > { %7144 = vst [vmem:[#allocation53_spill] sm:$0xff] %v6126_v49  ;;  %v4656_v10 = vpop.f32.mrf.mxu0  ;;  %4919 = vmatmul.mubr.msk.bf16.gmra.mxu0 %vm764_vm2, %v5723_v35 }
 0x104   : > { %4922 = vmatprep.mubr.msk.bf16.mxu0 %vm764_vm2, %v5727_v41  ;;  %v4688_v19 = vpop.f32.mrf.mxu1 }
 0x105   : > { %4853 = vmatmul.mubr.msk.bf16.gmra.mxu1 %vm764_vm2, %v5640_v12  ;;  %v6134_v57 = vpop.f32.mrf.mxu0  ;;  %v7147_v19 = vld [vmem:[#allocation2_spill] sm:$0xff] }
 0x106   : > { %4856 = vmatprep.mubr.msk.bf16.mxu1 %vm764_vm2, %v5664_v56  ;;  %v6138_v48 = vpop.f32.mrf.mxu1 }
 0x107   : > { %7145 = vst [vmem:[#allocation54_spill] sm:$0xff] %v6138_v48  ;;  %v4657_v20 = vpop.f32.mrf.mxu0  ;;  %v7157_v48 = vld [vmem:[#allocation5_spill] sm:$0xff] }
 0x108   : > { %v4689_v10 = vpop.f32.mrf.mxu1  ;;  %v6153_v20 = vld [vmem:[%s5412_s25 + $0x80] sm:$0xff]  }
 0x109   : > { %v6140_v28 = vpop.f32.mrf.mxu0  ;;  %7148 = vst [vmem:[#allocation56_spill] sm:$0xff] %v6153_v20 }
 0x10a   : > { %v6142_v35 = vpop.f32.mrf.mxu1 }
 0x10b   : > { %7146 = vst [vmem:[#allocation55_spill] sm:$0xff] %v6142_v35  ;;  %v4660_v38 = vpop.f32.mrf.mxu0  ;;  %4923 = vmatmul.mubr.msk.bf16.gmra.mxu0 %vm764_vm2, %v5751_v36  ;;  %v6168_v35 = vld [vmem:[%s5412_s25 + $0x88] sm:$0xff]  }
 0x10c   : > { %4926 = vmatprep.mubr.msk.bf16.mxu0 %vm764_vm2, %v7147_v19  ;;  %v4692_v12 = vpop.f32.mrf.mxu1  ;;  %v7151_v19 = vld [vmem:[#allocation3_spill] sm:$0xff]  ;;  %7153 = vst [vmem:[#allocation59_spill] sm:$0xff] %v6168_v35 }
 0x10d   : > { %4857 = vmatmul.mubr.msk.bf16.gmra.mxu1 %vm764_vm2, %v5680_v14  ;;  %v6150_v56 = vpop.f32.mrf.mxu0  ;;  %v7152_v14 = vld [vmem:[#allocation4_spill] sm:$0xff] }
 0x10e   : > { %4860 = vmatprep.mubr.msk.bf16.mxu1 %vm764_vm2, %v6153_v20  ;;  %v6157_v38 = vpop.f32.mrf.mxu1 }
 0x10f   : > { %7149 = vst [vmem:[#allocation57_spill] sm:$0xff] %v6157_v38  ;;  %v4661_v10 = vpop.f32.mrf.mxu0 }
 0x110   : > { %v4693_v36 = vpop.f32.mrf.mxu1 }
 0x111   : > { %v6159_v41 = vpop.f32.mrf.mxu0  ;;  %v6175_v36 = vld [vmem:[%s5412_s25 + $0x90] sm:$0xff]  }
 0x112   : > { %v6161_v22 = vpop.f32.mrf.mxu1  ;;  %7154 = vst [vmem:[#allocation60_spill] sm:$0xff] %v6175_v36 }
 0x113   : > { %7150 = vst [vmem:[#allocation58_spill] sm:$0xff] %v6161_v22  ;;  %v4664_v12 = vpop.f32.mrf.mxu0  ;;  %4927 = vmatmul.mubr.msk.bf16.gmra.mxu0 %vm764_vm2, %v7151_v19 }
 0x114   : > { %4930 = vmatprep.mubr.msk.bf16.mxu0 %vm764_vm2, %v7152_v14  ;;  %v4696_v33 = vpop.f32.mrf.mxu1 }
 0x115   : > { %4861 = vmatmul.mubr.msk.bf16.gmra.mxu1 %vm764_vm2, %v6168_v35  ;;  %v6172_v38 = vpop.f32.mrf.mxu0  ;;  %v7158_v35 = vld [vmem:[#allocation7_spill] sm:$0xff] }
 0x116   : > { %4864 = vmatprep.mubr.msk.bf16.mxu1 %vm764_vm2, %v6175_v36  ;;  %v6179_v10 = vpop.f32.mrf.mxu1 }
 0x117   : > { %7155 = vst [vmem:[#allocation61_spill] sm:$0xff] %v6179_v10  ;;  %v4665_v12 = vpop.f32.mrf.mxu0 }
 0x118   : > { %v4697_v19 = vpop.f32.mrf.mxu1 }
 0x119   : > { %v6181_v22 = vpop.f32.mrf.mxu0 }
 0x11a   : > { %v6183_v14 = vpop.f32.mrf.mxu1 }
 0x11b   : > { %7156 = vst [vmem:[#allocation62_spill] sm:$0xff] %v6183_v14  ;;  %v4768_v33 = vpop.f32.mrf.mxu0  ;;  %4931 = vmatmul.mubr.msk.bf16.gmra.mxu0 %vm764_vm2, %v7157_v48 }
 0x11c   : > { %4934 = vmatprep.mubr.msk.bf16.mxu0 %vm764_vm2, %v7158_v35 }
 0x11d   : > { %v4702_v20 = vpop.f32.mrf.mxu1  ;;  %4865 = vmatmul.mubr.msk.bf16.gmra.mxu1 %vm764_vm2, %v5460_v37  ;;  %v1647_v36 = vpop.f32.mrf.mxu0  ;;  %v7160_v37 = vld [vmem:[#allocation11_spill] sm:$0xff] }
 0x11e   : > { %4868 = vmatprep.mubr.msk.bf16.mxu1 %vm764_vm2, %v5469_v43 }
 0x11f   : > { %v1223_v19 = vpop.f32.mrf.mxu1  ;;  %v4769_v12 = vpop.f32.mrf.mxu0 }
 0x120   : > { %v1224_v10 = vadd.f32 %v1223_v19, %v6040_v1 }
 0x121   : > { %v4703_v14 = vpop.f32.mrf.mxu1  ;;  %v1650_v33 = vpop.f32.mrf.mxu0 }
 0x122   : > { %v6194_v49 = vadd.f32 %v1647_v36, %v1224_v10 }
 0x123   : > { %v1226_v48 = vpop.f32.mrf.mxu1  ;;  %v4772_v25 = vpop.f32.mrf.mxu0  ;;  %4935 = vmatmul.mubr.msk.bf16.gmra.mxu0 %vm764_vm2, %v7159_v13 }
 0x124   : > { %v1227_v20 = vadd.f32 %v1226_v48, %v6060_v39  ;;  %4938 = vmatprep.mubr.msk.bf16.mxu0 %vm764_vm2, %v7160_v37  ;;  %v7190_v37 = vld [vmem:[#allocation62_spill] sm:$0xff] }
 0x125   : > { %v4706_v35 = vpop.f32.mrf.mxu1  ;;  %4869 = vmatmul.mubr.msk.bf16.gmra.mxu1 %vm764_vm2, %v5504_v61  ;;  %v1661_v43 = vpop.f32.mrf.mxu0 }
 0x126   : > { %v6203_v1 = vadd.f32 %v1650_v33, %v1227_v20  ;;  %4872 = vmatprep.mubr.msk.bf16.mxu1 %vm764_vm2, %v5520_v8  ;;  %v7161_v35 = vld [vmem:[#allocation14_spill] sm:$0xff]  ;;  %v7162_v33 = vld [vmem:[#allocation15_spill] sm:$0xff] }
 0x127   : > { %v1237_v14 = vpop.f32.mrf.mxu1  ;;  %v4773_v25 = vpop.f32.mrf.mxu0 }
 0x128   : > { %v1238_v36 = vadd.f32 %v1237_v14, %v6070_v54 }
 0x129   : > { %v4707_v10 = vpop.f32.mrf.mxu1  ;;  %v1664_v19 = vpop.f32.mrf.mxu0 }
 0x12a   : > { %v6208_v39 = vadd.f32 %v1661_v43, %v1238_v36 }
 0x12b   : > { %v1240_v48 = vpop.f32.mrf.mxu1  ;;  %v4776_v12 = vpop.f32.mrf.mxu0  ;;  %4939 = vmatmul.mubr.msk.bf16.gmra.mxu0 %vm764_vm2, %v7161_v35  ;;  %v5319_v35 = vld [vmem:[%s5412_s25 + $0xa8] sm:$0xff]  }
 0x12c   : > { %v1241_v61 = vadd.f32 %v1240_v48, %v6076_v46  ;;  %4942 = vmatprep.mubr.msk.bf16.mxu0 %vm764_vm2, %v7162_v33  ;;  %v7185_v33 = vld [vmem:[#allocation36_spill] sm:$0xff] }
 0x12d   : > { %v4710_v20 = vpop.f32.mrf.mxu1  ;;  %4873 = vmatmul.mubr.msk.bf16.gmra.mxu1 %vm764_vm2, %v5538_v21  ;;  %v1675_v8 = vpop.f32.mrf.mxu0 }
 0x12e   : > { %v6217_v54 = vadd.f32 %v1664_v19, %v1241_v61  ;;  %4876 = vmatprep.mubr.msk.bf16.mxu1 %vm764_vm2, %v5559_v40  ;;  %v7163_v20 = vld [vmem:[#allocation18_spill] sm:$0xff]  ;;  %v7164_v19 = vld [vmem:[#allocation19_spill] sm:$0xff] }
 0x12f   : > { %v1251_v43 = vpop.f32.mrf.mxu1  ;;  %v4777_v14 = vpop.f32.mrf.mxu0 }
 0x130   : > { %v1252_v25 = vadd.f32 %v1251_v43, %v6086_v63  ;;  %v322_v14 = vld [vmem:[%s5412_s25 + $0x104] sm:$0xf] }
 0x131   : > { %v4711_v36 = vpop.f32.mrf.mxu1  ;;  %v1678_v46 = vpop.f32.mrf.mxu0 }
 0x132   : > { %v6222_v10 = vadd.f32 %v1675_v8, %v1252_v25 }
 0x133   : > { %v1254_v48 = vpop.f32.mrf.mxu1  ;;  %v4780_v12 = vpop.f32.mrf.mxu0  ;;  %4943 = vmatmul.mubr.msk.bf16.gmra.mxu0 %vm764_vm2, %v7163_v20 }
 0x134   : > { %v1255_v21 = vadd.f32 %v1254_v48, %v6092_v50  ;;  %4946 = vmatprep.mubr.msk.bf16.mxu0 %vm764_vm2, %v7164_v19  ;;  %v6240_v12 = vcombine.low %v5710_v47, %v322_v14  ;;  %v7184_v19 = vld [vmem:[#allocation58_spill] sm:$0xff] }
 0x135   : > { %v4714_v40 = vpop.f32.mrf.mxu1  ;;  %4877 = vmatmul.mubr.msk.bf16.gmra.mxu1 %vm764_vm2, %v5570_v52  ;;  %v1689_v63 = vpop.f32.mrf.mxu0 }
 0x136   : > { %v6231_v61 = vadd.f32 %v1678_v46, %v1255_v21  ;;  %4880 = vmatprep.mubr.msk.bf16.mxu1 %vm764_vm2, %v5595_v9  ;;  %v6250_v21 = vld [vmem:[%s5412_s25 + $0x108] sm:$0xff]  }
 0x137   : > { %v1265_v8 = vpop.f32.mrf.mxu1  ;;  %v4781_v43 = vpop.f32.mrf.mxu0 }
 0x138   : > { %v1266_v25 = vadd.f32 %v1265_v8, %v6102_v32 }
 0x139   : > { %v4715_v50 = vpop.f32.mrf.mxu1  ;;  %v1692_v36 = vpop.f32.mrf.mxu0 }
 0x13a   : > { %v6237_v48 = vadd.f32 %v1689_v63, %v1266_v25  ;;  %v2219_v50 = vshrl.u32 %v6240_v12, 16 }
 0x13b   : > { %v1268_v52 = vpop.f32.mrf.mxu1  ;;  %v4784_v40 = vpop.f32.mrf.mxu0  ;;  %4947 = vmatmul.mubr.msk.bf16.gmra.mxu0 %vm764_vm2, %v5699_v55  ;;  %v5317_v55 = vld [vmem:[%s5412_s25 + $0x98] sm:$0xff]  }
 0x13c   : > { %v1269_v9 = vadd.f32 %v1268_v52, %v6108_v29  ;;  %4950 = vmatprep.mubr.msk.bf16.mxu0 %vm764_vm2, %v5705_v42  ;;  %v2215_v29 = vshll.u32 %v6240_v12, 16  ;;  %v6261_v52 = vld [vmem:[%s5412_s25 + $0x110] sm:$0xf]  ;;  %v7181_v42 = vld [vmem:[#allocation34_spill] sm:$0xff] }
 0x13d   : > { %v4718_v46 = vpop.f32.mrf.mxu1  ;;  %4881 = vmatmul.mubr.msk.bf16.gmra.mxu1 %vm764_vm2, %v5606_v27  ;;  %v1703_v32 = vpop.f32.mrf.mxu0  ;;  %v2222_v27 = vshll.u32 %v6250_v21, 16 }
 0x13e   : > { %v6252_v47 = vadd.f32 %v1692_v36, %v1269_v9  ;;  %4884 = vmatprep.mubr.msk.bf16.mxu1 %vm764_vm2, %v5637_v7  ;;  %v2217_v7 = vrot.slane %v2215_v29, 1 }
 0x13f   : > { %v1279_v63 = vpop.f32.mrf.mxu1  ;;  %v4785_v8 = vpop.f32.mrf.mxu0 }
 0x140   : > { %v1280_v43 = vadd.f32 %v1279_v63, %v6118_v62  ;;  %v6272_v62 = vcombine.low %v6261_v52, %v6261_v52  ;;  %v2221_v8 = vor.u32 %v2219_v50, %v2217_v7 }
 0x141   : > { %v4719_v14 = vpop.f32.mrf.mxu1  ;;  %v1706_v25 = vpop.f32.mrf.mxu0 }
 0x142   : > { %v6263_v40 = vadd.f32 %v1703_v32, %v1280_v43  ;;  %v2224_v43 = vrot.slane %v2222_v27, 1 }
 0x143   : > { %v1282_v36 = vpop.f32.mrf.mxu1  ;;  %v4788_v9 = vpop.f32.mrf.mxu0  ;;  %4951 = vmatmul.mubr.msk.bf16.gmra.mxu0 %vm764_vm2, %v5730_v59 }
 0x144   : > { %v1283_v46 = vadd.f32 %v1282_v36, %v6124_v17  ;;  %4954 = vmatprep.mubr.msk.bf16.mxu0 %vm764_vm2, %v5737_v23  ;;  %v6283_v9 = vsel %vm503_vm1, %v5747_v0, %v2217_v7 }
 0x145   : > { %v4722_v63 = vpop.f32.mrf.mxu1  ;;  %4885 = vmatmul.mubr.msk.bf16.gmra.mxu1 %vm764_vm2, %v5646_v18  ;;  %v1717_v32 = vpop.f32.mrf.mxu0  ;;  %7165 = vst [vmem:[#allocation63_spill] sm:$0xff] %v6283_v9  ;;  %v2230_v18 = vshll.u32 %v6272_v62, 16 }
 0x146   : > { %v6276_v14 = vadd.f32 %v1706_v25, %v1283_v46  ;;  %4888 = vmatprep.mubr.msk.bf16.mxu1 %vm764_vm2, %v5677_v34  ;;  %v2226_v63 = vshrl.u32 %v6250_v21, 16  ;;  %v6288_v25 = vsel %vm503_vm1, %v2221_v8, %v2224_v43 }
 0x147   : > { %v1293_v17 = vpop.f32.mrf.mxu1  ;;  %v4789_v29 = vpop.f32.mrf.mxu0  ;;  %7166 = vst [vmem:[#allocation64_spill] sm:$0xff] %v6288_v25  ;;  %v2232_v7 = vrot.slane %v2230_v18, 1 }
 0x148   : > { %v1294_v36 = vadd.f32 %v1293_v17, %v6134_v57  ;;  %v6295_v0 = vor.u32 %v2226_v63, %v2224_v43 }
 0x149   : > { %v4723_v23 = vpop.f32.mrf.mxu1  ;;  %v1720_v50 = vpop.f32.mrf.mxu0 }
 0x14a   : > { %v6290_v27 = vadd.f32 %v1717_v32, %v1294_v36  ;;  %7167 = vst [vmem:[#allocation65_spill] sm:$0xff] %v6295_v0  ;;  %v2233_v43 = vsel %vm503_vm1, %v6295_v0, %v2232_v7  ;;  %v7175_v0 = vld [vmem:[#allocation32_spill] sm:$0xff] }
 0x14b   : > { %v1296_v34 = vpop.f32.mrf.mxu1  ;;  %v4792_v46 = vpop.f32.mrf.mxu0  ;;  %4955 = vmatmul.mubr.msk.bf16.gmra.mxu0 %vm764_vm2, %v6283_v9  ;;  %v7179_v9 = vld [vmem:[#allocation55_spill] sm:$0xff] }
 0x14c   : > { %v1297_v57 = vadd.f32 %v1296_v34, %v6140_v28  ;;  %4958 = vmatprep.mubr.msk.bf16.mxu0 %vm764_vm2, %v6288_v25 }
 0x14d   : > { %v4726_v23 = vpop.f32.mrf.mxu1  ;;  %4889 = vmatmul.mubr.msk.bf16.gmra.mxu1 %vm764_vm2, %v5686_v6  ;;  %v1731_v32 = vpop.f32.mrf.mxu0 }
 0x14e   : > { %v6301_v8 = vadd.f32 %v1720_v50, %v1297_v57  ;;  %4892 = vmatprep.mubr.msk.bf16.mxu1 %vm764_vm2, %v6240_v12  ;;  %v5305_v50 = vld [vmem:[%s5412_s25 + $0x20] sm:$0xff]  }
 0x14f   : > { %v1307_v17 = vpop.f32.mrf.mxu1  ;;  %v4793_v29 = vpop.f32.mrf.mxu0 }
 0x150   : > { %v1308_v28 = vadd.f32 %v1307_v17, %v6150_v56 }
 0x151   : > { %v4727_v36 = vpop.f32.mrf.mxu1  ;;  %v1734_v63 = vpop.f32.mrf.mxu0 }
 0x152   : > { %v6308_v18 = vadd.f32 %v1731_v32, %v1308_v28  ;;  %v3495_v28 = vsel %vm861_vm0, %v6052_v3, 0 }
 0x153   : > { %v1310_v34 = vpop.f32.mrf.mxu1  ;;  %v4796_v46 = vpop.f32.mrf.mxu0  ;;  %4959 = vmatmul.mubr.msk.bf16.gmra.mxu0 %vm764_vm2, %v2233_v43 }
 0x154   : > { %v1311_v6 = vadd.f32 %v1310_v34, %v6159_v41  ;;  %5030 = vmatprep.mubr.msk.bf16.mxu0 %vm764_vm2, %v5305_v50  ;;  %v5306_v46 = vld [vmem:[%s5412_s25 + $0x28] sm:$0xff]  }
 0x155   : > { %v4730_v57 = vpop.f32.mrf.mxu1  ;;  %4893 = vmatmul.mubr.msk.bf16.gmra.mxu1 %vm764_vm2, %v6250_v21  ;;  %v1745_v56 = vpop.f32.mrf.mxu0 }
 0x156   : > { %v6316_v7 = vadd.f32 %v1734_v63, %v1311_v6  ;;  %4964 = vmatprep.mubr.msk.bf16.mxu1 %vm764_vm2, %v5768_v58  ;;  %v3186_v63 = vsel %vm861_vm0, %v6047_v16, 0  ;;  %v5307_v6 = vld [vmem:[%s5412_s25 + $0x30] sm:$0xff]  }
 0x157   : > { %v1321_v23 = vpop.f32.mrf.mxu1  ;;  %v4797_v32 = vpop.f32.mrf.mxu0 }
 0x158   : > { %v1322_v17 = vadd.f32 %v1321_v23, %v6172_v38 }
 0x159   : > { %v4731_v41 = vpop.f32.mrf.mxu1  ;;  %v1748_v29 = vpop.f32.mrf.mxu0 }
 0x15a   : > { %v6323_v43 = vadd.f32 %v1745_v56, %v1322_v17 }
 0x15b   : > { %v1324_v36 = vpop.f32.mrf.mxu1  ;;  %v4800_v34 = vpop.f32.mrf.mxu0  ;;  %5031 = vmatmul.mubr.msk.bf16.vlgmr.msra.gmra.mxu0 %vm764_vm2, %v5306_v46 }
 0x15c   : > { %v1325_v58 = vadd.f32 %v1324_v36, %v6181_v22  ;;  %5161 = vmatpush3.bf16.msra.mxu0 %v3495_v28  ;;  %5034 = vmatprep.mubr.msk.bf16.mxu0 %vm764_vm2, %v5307_v6  ;;  %v5308_v28 = vld [vmem:[%s5412_s25 + $0x38] sm:$0xff]  }
 0x15d   : > { %v4734_v38 = vpop.f32.mrf.mxu1  ;;  %4965 = vmatmul.mubr.msk.bf16.vlgmr.msra.gmra.mxu1 %vm764_vm2, %v5796_v51  ;;  %v1759_v3 = vpop.f32.mrf.mxu0 }
 0x15e   : > { %v6334_v50 = vadd.f32 %v1748_v29, %v1325_v58  ;;  %5095 = vmatpush3.bf16.msra.mxu1 %v3186_v63  ;;  %4968 = vmatprep.mubr.msk.bf16.mxu1 %vm764_vm2, %v5799_v5  ;;  %v5309_v29 = vld [vmem:[%s5412_s25 + $0x40] sm:$0xff]  }
 0x15f   : > { %v1335_v16 = vpop.f32.mrf.mxu1  ;;  %v4801_v57 = vpop.f32.mrf.mxu0 }
 0x160   : > { %v1336_v22 = vadd.f32 %v1335_v16, %v6054_v4  ;;  %v5310_v57 = vld [vmem:[%s5412_s25 + $0x48] sm:$0xff]  }
 0x161   : > { %v4735_v56 = vpop.f32.mrf.mxu1  ;;  %v1762_v23 = vpop.f32.mrf.mxu0 }
 0x162   : > { %v6339_v32 = vadd.f32 %v1759_v3, %v1336_v22  ;;  %v5311_v56 = vld [vmem:[%s5412_s25 + $0x50] sm:$0xff]  }
 0x163   : > { %v1338_v17 = vpop.f32.mrf.mxu1  ;;  %v4804_v41 = vpop.f32.mrf.mxu0  ;;  %5035 = vmatmul.mubr.msk.bf16.gmra.mxu0 %vm764_vm2, %v5308_v28 }
 0x164   : > { %v1339_v51 = vadd.f32 %v1338_v17, %v6062_v24  ;;  %5038 = vmatprep.mubr.msk.bf16.mxu0 %vm764_vm2, %v5309_v29 }
 0x165   : > { %v4738_v36 = vpop.f32.mrf.mxu1  ;;  %4969 = vmatmul.mubr.msk.bf16.gmra.mxu1 %vm764_vm2, %v5812_v60  ;;  %v1773_v4 = vpop.f32.mrf.mxu0 }
 0x166   : > { %v6348_v34 = vadd.f32 %v1762_v23, %v1339_v51  ;;  %4972 = vmatprep.mubr.msk.bf16.mxu1 %vm764_vm2, %v5815_v31 }
 0x167   : > { %v1349_v46 = vpop.f32.mrf.mxu1  ;;  %v4805_v63 = vpop.f32.mrf.mxu0 }
 0x168   : > { %v1350_v58 = vadd.f32 %v1349_v46, %v6074_v44  ;;  %v5312_v63 = vld [vmem:[%s5412_s25 + $0x58] sm:$0xff]  }
 0x169   : > { %v4739_v24 = vpop.f32.mrf.mxu1  ;;  %v1776_v6 = vpop.f32.mrf.mxu0 }
 0x16a   : > { %v6353_v38 = vadd.f32 %v1773_v4, %v1350_v58  ;;  %v5313_v24 = vld [vmem:[%s5412_s25 + $0x60] sm:$0xff]  }
 0x16b   : > { %v1352_v3 = vpop.f32.mrf.mxu1  ;;  %v4808_v16 = vpop.f32.mrf.mxu0  ;;  %5039 = vmatmul.mubr.msk.bf16.gmra.mxu0 %vm764_vm2, %v5310_v57 }
 0x16c   : > { %v1353_v22 = vadd.f32 %v1352_v3, %v6078_v11  ;;  %5042 = vmatprep.mubr.msk.bf16.mxu0 %vm764_vm2, %v5311_v56  ;;  %v7168_v16 = vld [vmem:[#allocation29_spill] sm:$0xff] }
 0x16d   : > { %v4742_v23 = vpop.f32.mrf.mxu1  ;;  %4973 = vmatmul.mubr.msk.bf16.gmra.mxu1 %vm764_vm2, %v5828_v30  ;;  %v1787_v44 = vpop.f32.mrf.mxu0 }
 0x16e   : > { %v6362_v17 = vadd.f32 %v1776_v6, %v1353_v22  ;;  %4976 = vmatprep.mubr.msk.bf16.mxu1 %vm764_vm2, %v5831_v26 }
 0x16f   : > { %v1363_v41 = vpop.f32.mrf.mxu1  ;;  %v4809_v28 = vpop.f32.mrf.mxu0 }
 0x170   : > { %v1364_v51 = vadd.f32 %v1363_v41, %v6090_v15 }
 0x171   : > { %v4743_v11 = vpop.f32.mrf.mxu1  ;;  %v1790_v29 = vpop.f32.mrf.mxu0 }
 0x172   : > { %v6367_v36 = vadd.f32 %v1787_v44, %v1364_v51  ;;  %v5314_v51 = vld [vmem:[%s5412_s25 + $0x68] sm:$0xff]  }
 0x173   : > { %v1366_v4 = vpop.f32.mrf.mxu1  ;;  %v4812_v46 = vpop.f32.mrf.mxu0  ;;  %5043 = vmatmul.mubr.msk.bf16.gmra.mxu0 %vm764_vm2, %v5312_v63  ;;  %v7169_v11 = vld [vmem:[#allocation51_spill] sm:$0xff]  ;;  %v7170_v63 = vld [vmem:[#allocation30_spill] sm:$0xff] }
 0x174   : > { %v1367_v58 = vadd.f32 %v1366_v4, %v6094_v45  ;;  %5046 = vmatprep.mubr.msk.bf16.mxu0 %vm764_vm2, %v5313_v24  ;;  %v7171_v24 = vld [vmem:[#allocation31_spill] sm:$0xff] }
 0x175   : > { %v4746_v6 = vpop.f32.mrf.mxu1  ;;  %4977 = vmatmul.mubr.msk.bf16.gmra.mxu1 %vm764_vm2, %v5844_v2  ;;  %v1801_v15 = vpop.f32.mrf.mxu0 }
 0x176   : > { %v6376_v3 = vadd.f32 %v1790_v29, %v1367_v58  ;;  %4980 = vmatprep.mubr.msk.bf16.mxu1 %vm764_vm2, %v7168_v16  ;;  %v5315_v29 = vld [vmem:[%s5412_s25 + $0x70] sm:$0xff]  }
 0x177   : > { %v1377_v57 = vpop.f32.mrf.mxu1  ;;  %v4813_v22 = vpop.f32.mrf.mxu0 }
 0x178   : > { %v1378_v56 = vadd.f32 %v1377_v57, %v6106_v53  ;;  %v7172_v57 = vld [vmem:[#allocation52_spill] sm:$0xff] }
 0x179   : > { %v4747_v45 = vpop.f32.mrf.mxu1  ;;  %v1804_v23 = vpop.f32.mrf.mxu0 }
 0x17a   : > { %v6381_v44 = vadd.f32 %v1801_v15, %v1378_v56 }
 0x17b   : > { %v1380_v41 = vpop.f32.mrf.mxu1  ;;  %v4816_v28 = vpop.f32.mrf.mxu0  ;;  %5047 = vmatmul.mubr.msk.bf16.gmra.mxu0 %vm764_vm2, %v5314_v51 }
 0x17c   : > { %v1381_v4 = vadd.f32 %v1380_v41, %v7169_v11  ;;  %5050 = vmatprep.mubr.msk.bf16.mxu0 %vm764_vm2, %v5315_v29  ;;  %v5316_v11 = vld [vmem:[%s5412_s25 + $0x78] sm:$0xff]  }
 0x17d   : > { %v4750_v46 = vpop.f32.mrf.mxu1  ;;  %4981 = vmatmul.mubr.msk.bf16.gmra.mxu1 %vm764_vm2, %v7170_v63  ;;  %v1815_v53 = vpop.f32.mrf.mxu0  ;;  %v7173_v29 = vld [vmem:[#allocation53_spill] sm:$0xff] }
 0x17e   : > { %v6390_v58 = vadd.f32 %v1804_v23, %v1381_v4  ;;  %4984 = vmatprep.mubr.msk.bf16.mxu1 %vm764_vm2, %v7171_v24  ;;  %v7174_v23 = vld [vmem:[#allocation56_spill] sm:$0xff] }
 0x17f   : > { %v1391_v6 = vpop.f32.mrf.mxu1  ;;  %v4817_v15 = vpop.f32.mrf.mxu0 }
 0x180   : > { %v1392_v22 = vadd.f32 %v1391_v6, %v7172_v57  ;;  %v7176_v57 = vld [vmem:[#allocation33_spill] sm:$0xff] }
 0x181   : > { %v4751_v56 = vpop.f32.mrf.mxu1  ;;  %v1818_v45 = vpop.f32.mrf.mxu0 }
 0x182   : > { %v6395_v41 = vadd.f32 %v1815_v53, %v1392_v22  ;;  %v7177_v56 = vld [vmem:[#allocation54_spill] sm:$0xff] }
 0x183   : > { %v1394_v28 = vpop.f32.mrf.mxu1  ;;  %v4820_v51 = vpop.f32.mrf.mxu0  ;;  %5051 = vmatmul.mubr.msk.bf16.gmra.mxu0 %vm764_vm2, %v5316_v11 }
 0x184   : > { %v1395_v46 = vadd.f32 %v1394_v28, %v7173_v29  ;;  %5054 = vmatprep.mubr.msk.bf16.mxu0 %vm764_vm2, %v7174_v23 }
 0x185   : > { %v4754_v4 = vpop.f32.mrf.mxu1  ;;  %4985 = vmatmul.mubr.msk.bf16.gmra.mxu1 %vm764_vm2, %v7175_v0  ;;  %v1829_v15 = vpop.f32.mrf.mxu0 }
 0x186   : > { %v6404_v6 = vadd.f32 %v1818_v45, %v1395_v46  ;;  %4988 = vmatprep.mubr.msk.bf16.mxu1 %vm764_vm2, %v7176_v57  ;;  %v7178_v4 = vld [vmem:[#allocation59_spill] sm:$0xff]  ;;  %v7180_v46 = vld [vmem:[#allocation60_spill] sm:$0xff] }
 0x187   : > { %v1405_v53 = vpop.f32.mrf.mxu1  ;;  %v4821_v22 = vpop.f32.mrf.mxu0 }
 0x188   : > { %v1406_v51 = vadd.f32 %v1405_v53, %v7177_v56 }
 0x189   : > { %v4755_v11 = vpop.f32.mrf.mxu1  ;;  %v1832_v25 = vpop.f32.mrf.mxu0 }
 0x18a   : > { %v6409_v28 = vadd.f32 %v1829_v15, %v1406_v51  ;;  %v7182_v15 = vld [vmem:[#allocation35_spill] sm:$0xff]  ;;  %v7183_v11 = vld [vmem:[#allocation57_spill] sm:$0xff] }
 0x18b   : > { %v1408_v29 = vpop.f32.mrf.mxu1  ;;  %v4824_v23 = vpop.f32.mrf.mxu0  ;;  %5055 = vmatmul.mubr.msk.bf16.gmra.mxu0 %vm764_vm2, %v7178_v4 }
 0x18c   : > { %v1409_v45 = vadd.f32 %v1408_v29, %v7179_v9  ;;  %5058 = vmatprep.mubr.msk.bf16.mxu0 %vm764_vm2, %v7180_v46 }
 0x18d   : > { %v4758_v59 = vpop.f32.mrf.mxu1  ;;  %4989 = vmatmul.mubr.msk.bf16.gmra.mxu1 %vm764_vm2, %v7181_v42  ;;  %v1843_v53 = vpop.f32.mrf.mxu0 }
 0x18e   : > { %v6418_v22 = vadd.f32 %v1832_v25, %v1409_v45  ;;  %4992 = vmatprep.mubr.msk.bf16.mxu1 %vm764_vm2, %v7182_v15  ;;  %v5318_v25 = vld [vmem:[%s5412_s25 + $0xa0] sm:$0xff]  }
 0x18f   : > { %v1419_v56 = vpop.f32.mrf.mxu1  ;;  %v4825_v51 = vpop.f32.mrf.mxu0 }
 0x190   : > { %v1420_v23 = vadd.f32 %v1419_v56, %v7183_v11 }
 0x191   : > { %v4759_v4 = vpop.f32.mrf.mxu1  ;;  %v1846_v9 = vpop.f32.mrf.mxu0 }
 0x192   : > { %v6423_v29 = vadd.f32 %v1843_v53, %v1420_v23  ;;  %v7187_v53 = vld [vmem:[#allocation37_spill] sm:$0xff] }
 0x193   : > { %v1422_v46 = vpop.f32.mrf.mxu1  ;;  %v4828_v59 = vpop.f32.mrf.mxu0  ;;  %5059 = vmatmul.mubr.msk.bf16.gmra.mxu0 %vm764_vm2, %v5317_v55  ;;  %v7188_v55 = vld [vmem:[#allocation61_spill] sm:$0xff] }
 0x194   : > { %v1423_v20 = vadd.f32 %v1422_v46, %v7184_v19  ;;  %5062 = vmatprep.mubr.msk.bf16.mxu0 %vm764_vm2, %v5318_v25 }
 0x195   : > { %v4762_v45 = vpop.f32.mrf.mxu1  ;;  %4993 = vmatmul.mubr.msk.bf16.gmra.mxu1 %vm764_vm2, %v7185_v33  ;;  %v1857_v56 = vpop.f32.mrf.mxu0 }
 0x196   : > { %v6432_v51 = vadd.f32 %v1846_v9, %v1423_v20  ;;  %4996 = vmatprep.mubr.msk.bf16.mxu1 %vm764_vm2, %v7187_v53  ;;  %v5320_v20 = vld [vmem:[%s5412_s25 + $0xb0] sm:$0xff]  }
 0x197   : > { %v1433_v11 = vpop.f32.mrf.mxu1  ;;  %v4829_v23 = vpop.f32.mrf.mxu0 }
 0x198   : > { %7186 = vst [vmem:[#allocation29_spill] sm:$0xff] %v6432_v51  ;;  %v1434_v4 = vadd.f32 %v1433_v11, %v7188_v55  ;;  %v7191_v51 = vld [vmem:[#allocation38_spill] sm:$0xff] }
 0x199   : > { %v4763_v19 = vpop.f32.mrf.mxu1  ;;  %v1860_v46 = vpop.f32.mrf.mxu0 }
 0x19a   : > { %v6437_v59 = vadd.f32 %v1857_v56, %v1434_v4  ;;  %v7193_v56 = vld [vmem:[#allocation39_spill] sm:$0xff] }
 0x19b   : > { %v1436_v25 = vpop.f32.mrf.mxu1  ;;  %v4900_v45 = vpop.f32.mrf.mxu0  ;;  %5063 = vmatmul.mubr.msk.bf16.gmra.mxu0 %vm764_vm2, %v5319_v35 }
 0x19c   : > { %7189 = vst [vmem:[#allocation51_spill] sm:$0xff] %v6437_v59  ;;  %v1437_v13 = vadd.f32 %v1436_v25, %v7190_v37  ;;  %5066 = vmatprep.mubr.msk.bf16.mxu0 %vm764_vm2, %v5320_v20 }
 0x19d   : > { %v4834_v9 = vpop.f32.mrf.mxu1  ;;  %4997 = vmatmul.mubr.msk.bf16.gmra.mxu1 %vm764_vm2, %v7191_v51  ;;  %v2280_v11 = vpop.f32.mrf.mxu0 }
 0x19e   : > { %v6446_v23 = vadd.f32 %v1860_v46, %v1437_v13  ;;  %5000 = vmatprep.mubr.msk.bf16.mxu1 %vm764_vm2, %v7193_v56  ;;  %v5321_v9 = vld [vmem:[%s5412_s25 + $0xb8] sm:$0xff]   ;;  %v5322_v13 = vld [vmem:[%s5412_s25 + $0xc0] sm:$0xff]  }
 0x19f   : > { %v1955_v55 = vpop.f32.mrf.mxu1  ;;  %v4901_v4 = vpop.f32.mrf.mxu0 }
 0x1a0   : > { %7192 = vst [vmem:[#allocation30_spill] sm:$0xff] %v6446_v23  ;;  %v2178_v35 = vadd.f32 %v1955_v55, %v6194_v49  ;;  %v7195_v23 = vld [vmem:[#allocation40_spill] sm:$0xff] }
 0x1a1   : > { %v4835_v37 = vpop.f32.mrf.mxu1  ;;  %v2283_v19 = vpop.f32.mrf.mxu0 }
 0x1a2   : > { %v6451_v25 = vadd.f32 %v2280_v11, %v2178_v35  ;;  %v7197_v11 = vld [vmem:[#allocation41_spill] sm:$0xff] }
 0x1a3   : > { %v1958_v45 = vpop.f32.mrf.mxu1  ;;  %v4904_v20 = vpop.f32.mrf.mxu0  ;;  %5067 = vmatmul.mubr.msk.bf16.gmra.mxu0 %vm764_vm2, %v5321_v9 }
 0x1a4   : > { %7194 = vst [vmem:[#allocation31_spill] sm:$0xff] %v6451_v25  ;;  %v2179_v59 = vadd.f32 %v1958_v45, %v6203_v1  ;;  %5070 = vmatprep.mubr.msk.bf16.mxu0 %vm764_vm2, %v5322_v13 }
 0x1a5   : > { %v4838_v46 = vpop.f32.mrf.mxu1  ;;  %5001 = vmatmul.mubr.msk.bf16.gmra.mxu1 %vm764_vm2, %v7195_v23  ;;  %v2294_v49 = vpop.f32.mrf.mxu0 }
 0x1a6   : > { %v6460_v55 = vadd.f32 %v2283_v19, %v2179_v59  ;;  %5004 = vmatprep.mubr.msk.bf16.mxu1 %vm764_vm2, %v7197_v11  ;;  %v5323_v46 = vld [vmem:[%s5412_s25 + $0xc8] sm:$0xff]   ;;  %v5324_v59 = vld [vmem:[%s5412_s25 + $0xd0] sm:$0xff]  }
 0x1a7   : > { %v1969_v4 = vpop.f32.mrf.mxu1  ;;  %v4905_v35 = vpop.f32.mrf.mxu0 }
 0x1a8   : > { %7196 = vst [vmem:[#allocation52_spill] sm:$0xff] %v6460_v55  ;;  %v2180_v37 = vadd.f32 %v1969_v4, %v6208_v39  ;;  %v7199_v55 = vld [vmem:[#allocation42_spill] sm:$0xff] }
 0x1a9   : > { %v4839_v1 = vpop.f32.mrf.mxu1  ;;  %v2297_v45 = vpop.f32.mrf.mxu0 }
 0x1aa   : > { %v6465_v20 = vadd.f32 %v2294_v49, %v2180_v37  ;;  %v7201_v49 = vld [vmem:[#allocation43_spill] sm:$0xff] }
 0x1ab   : > { %v1972_v9 = vpop.f32.mrf.mxu1  ;;  %v4908_v13 = vpop.f32.mrf.mxu0  ;;  %5071 = vmatmul.mubr.msk.bf16.gmra.mxu0 %vm764_vm2, %v5323_v46 }
 0x1ac   : > { %7198 = vst [vmem:[#allocation53_spill] sm:$0xff] %v6465_v20  ;;  %v2181_v25 = vadd.f32 %v1972_v9, %v6217_v54  ;;  %5074 = vmatprep.mubr.msk.bf16.mxu0 %vm764_vm2, %v5324_v59 }
 0x1ad   : > { %v4842_v19 = vpop.f32.mrf.mxu1  ;;  %5005 = vmatmul.mubr.msk.bf16.gmra.mxu1 %vm764_vm2, %v7199_v55  ;;  %v2308_v39 = vpop.f32.mrf.mxu0 }
 0x1ae   : > { %v6474_v4 = vadd.f32 %v2297_v45, %v2181_v25  ;;  %5008 = vmatprep.mubr.msk.bf16.mxu1 %vm764_vm2, %v7201_v49  ;;  %v5325_v19 = vld [vmem:[%s5412_s25 + $0xd8] sm:$0xff]   ;;  %v5326_v25 = vld [vmem:[%s5412_s25 + $0xe0] sm:$0xff]  }
 0x1af   : > { %v1983_v35 = vpop.f32.mrf.mxu1  ;;  %v4909_v37 = vpop.f32.mrf.mxu0 }
 0x1b0   : > { %7200 = vst [vmem:[#allocation56_spill] sm:$0xff] %v6474_v4  ;;  %v2182_v1 = vadd.f32 %v1983_v35, %v6222_v10  ;;  %v7203_v4 = vld [vmem:[#allocation44_spill] sm:$0xff] }
 0x1b1   : > { %v4843_v54 = vpop.f32.mrf.mxu1  ;;  %v2311_v9 = vpop.f32.mrf.mxu0 }
 0x1b2   : > { %v6479_v13 = vadd.f32 %v2308_v39, %v2182_v1  ;;  %v7205_v39 = vld [vmem:[#allocation45_spill] sm:$0xff] }
 0x1b3   : > { %v1986_v46 = vpop.f32.mrf.mxu1  ;;  %v4912_v59 = vpop.f32.mrf.mxu0  ;;  %5075 = vmatmul.mubr.msk.bf16.gmra.mxu0 %vm764_vm2, %v5325_v19 }
 0x1b4   : > { %7202 = vst [vmem:[#allocation32_spill] sm:$0xff] %v6479_v13  ;;  %v2183_v20 = vadd.f32 %v1986_v46, %v6231_v61  ;;  %5078 = vmatprep.mubr.msk.bf16.mxu0 %vm764_vm2, %v5326_v25 }
 0x1b5   : > { %v4846_v45 = vpop.f32.mrf.mxu1  ;;  %5009 = vmatmul.mubr.msk.bf16.gmra.mxu1 %vm764_vm2, %v7203_v4  ;;  %v2322_v10 = vpop.f32.mrf.mxu0 }
 0x1b6   : > { %v6488_v35 = vadd.f32 %v2311_v9, %v2183_v20  ;;  %5012 = vmatprep.mubr.msk.bf16.mxu1 %vm764_vm2, %v7205_v39  ;;  %v5327_v45 = vld [vmem:[%s5412_s25 + $0xe8] sm:$0xff]   ;;  %v5328_v20 = vld [vmem:[%s5412_s25 + $0xf0] sm:$0xff]  }
 0x1b7   : > { %v1997_v37 = vpop.f32.mrf.mxu1  ;;  %v4913_v1 = vpop.f32.mrf.mxu0 }
 0x1b8   : > { %7204 = vst [vmem:[#allocation33_spill] sm:$0xff] %v6488_v35  ;;  %v2184_v54 = vadd.f32 %v1997_v37, %v6237_v48  ;;  %v7206_v35 = vld [vmem:[#allocation46_spill] sm:$0xff] }
 0x1b9   : > { %v4847_v61 = vpop.f32.mrf.mxu1  ;;  %v2325_v46 = vpop.f32.mrf.mxu0 }
 0x1ba   : > { %v6493_v59 = vadd.f32 %v2322_v10, %v2184_v54  ;;  %v7208_v10 = vld [vmem:[#allocation47_spill] sm:$0xff] }
 0x1bb   : > { %v2000_v19 = vpop.f32.mrf.mxu1  ;;  %v4916_v25 = vpop.f32.mrf.mxu0  ;;  %5079 = vmatmul.mubr.msk.bf16.gmra.mxu0 %vm764_vm2, %v5327_v45 }
 0x1bc   : > { %v2185_v13 = vadd.f32 %v2000_v19, %v6252_v47  ;;  %5082 = vmatprep.mubr.msk.bf16.mxu0 %vm764_vm2, %v5328_v20 }
 0x1bd   : > { %v4850_v9 = vpop.f32.mrf.mxu1  ;;  %5013 = vmatmul.mubr.msk.bf16.gmra.mxu1 %vm764_vm2, %v7206_v35  ;;  %v2336_v48 = vpop.f32.mrf.mxu0 }
 0x1be   : > { %v6502_v37 = vadd.f32 %v2325_v46, %v2185_v13  ;;  %5016 = vmatprep.mubr.msk.bf16.mxu1 %vm764_vm2, %v7208_v10  ;;  %v5329_v9 = vld [vmem:[%s5412_s25 + $0xf8] sm:$0xff]  }
 0x1bf   : > { %v2011_v1 = vpop.f32.mrf.mxu1  ;;  %v4917_v54 = vpop.f32.mrf.mxu0 }
 0x1c0   : > { %7207 = vst [vmem:[#allocation54_spill] sm:$0xff] %v6502_v37  ;;  %v2186_v61 = vadd.f32 %v2011_v1, %v6263_v40  ;;  %v7210_v37 = vld [vmem:[#allocation49_spill] sm:$0xff]  ;;  %v326_v40 = vld [vmem:[%s5412_s25 + $0x114] sm:$0xf] }
 0x1c1   : > { %v4851_v47 = vpop.f32.mrf.mxu1  ;;  %v2339_v19 = vpop.f32.mrf.mxu0 }
 0x1c2   : > { %v6507_v25 = vadd.f32 %v2336_v48, %v2186_v61  ;;  %v7212_v48 = vld [vmem:[#allocation50_spill] sm:$0xff]  ;;  %v2537_v61 = vrot.slane %v6240_v12, 1 }
 0x1c3   : > { %v2014_v45 = vpop.f32.mrf.mxu1  ;;  %v4920_v20 = vpop.f32.mrf.mxu0  ;;  %5083 = vmatmul.mubr.msk.bf16.gmra.mxu0 %vm764_vm2, %v5329_v9  ;;  %v6527_v9 = vcombine.low %v6261_v52, %v326_v40 }
 0x1c4   : > { %7209 = vst [vmem:[#allocation59_spill] sm:$0xff] %v6507_v25  ;;  %v2187_v13 = vadd.f32 %v2014_v45, %v6276_v14  ;;  %5086 = vmatprep.mubr.msk.bf16.mxu0 %vm764_vm2, %v6240_v12  ;;  %v6523_v14 = vrot.slane %v6250_v21, 1 }
 0x1c5   : > { %v4854_v46 = vpop.f32.mrf.mxu1  ;;  %5017 = vmatmul.mubr.msk.bf16.gmra.mxu1 %vm764_vm2, %v7210_v37  ;;  %v2350_v54 = vpop.f32.mrf.mxu0  ;;  %v3157_v52 = vshll.u32 %v6527_v9, 16 }
 0x1c6   : > { %v6517_v1 = vadd.f32 %v2339_v19, %v2187_v13  ;;  %5020 = vmatprep.mubr.msk.bf16.mxu1 %vm764_vm2, %v7212_v48  ;;  %v7214_v13 = vld [vmem:[#allocation48_spill] sm:$0xff] }
 0x1c7   : > { %v2025_v47 = vpop.f32.mrf.mxu1  ;;  %v4921_v20 = vpop.f32.mrf.mxu0 }
 0x1c8   : > { %7211 = vst [vmem:[#allocation55_spill] sm:$0xff] %v6517_v1  ;;  %v2188_v45 = vadd.f32 %v2025_v47, %v6290_v27  ;;  %v6533_v1 = vsel %vm1448_vm3, %v7214_v13, %v2537_v61  ;;  %v6539_v20 = vsel %vm1448_vm3, %v2537_v61, %v6523_v14  ;;  %v3161_v13 = vshrl.u32 %v6527_v9, 16 }
 0x1c9   : > { %v4855_v46 = vpop.f32.mrf.mxu1  ;;  %v2353_v25 = vpop.f32.mrf.mxu0  ;;  %7215 = vst [vmem:[#allocation34_spill] sm:$0xff] %v6533_v1  ;;  %7216 = vst [vmem:[#allocation35_spill] sm:$0xff] %v6539_v20 }
 0x1ca   : > { %v6529_v19 = vadd.f32 %v2350_v54, %v2188_v45  ;;  %v6546_v54 = vld [vmem:[%s5412_s25 + $0x118] sm:$0xff]   ;;  %v6556_v46 = vrot.slane %v3157_v52, 1 }
 0x1cb   : > { %v2028_v12 = vpop.f32.mrf.mxu1  ;;  %v4924_v48 = vpop.f32.mrf.mxu0  ;;  %5087 = vmatmul.mubr.msk.bf16.gmra.mxu0 %vm764_vm2, %v6250_v21  ;;  %v2541_v21 = vrot.slane %v6272_v62, 1  ;;  %v3164_v61 = vshll.u32 %v6546_v54, 16  ;;  %v7087_v62 = vrot.slane %v6546_v54, 1 }
 0x1cc   : > { %7213 = vst [vmem:[#allocation60_spill] sm:$0xff] %v6529_v19  ;;  %v2189_v27 = vadd.f32 %v2028_v12, %v6301_v8  ;;  %5090 = vmatprep.mubr.msk.bf16.mxu0 %vm764_vm2, %v6527_v9 }
 0x1cd   : > { %v4858_v40 = vpop.f32.mrf.mxu1  ;;  %5021 = vmatmul.mubr.msk.bf16.gmra.mxu1 %vm764_vm2, %v6533_v1  ;;  %v2364_v48 = vpop.f32.mrf.mxu0  ;;  %v2542_v52 = vsel %vm1448_vm3, %v6523_v14, %v2541_v21 }
 0x1ce   : > { %v6550_v47 = vadd.f32 %v2353_v25, %v2189_v27  ;;  %5024 = vmatprep.mubr.msk.bf16.mxu1 %vm764_vm2, %v6539_v20  ;;  %v6560_v40 = vrot.slane %v3164_v61, 1  ;;  %v7088_v27 = vrot.slane %v6527_v9, 1 }
 0x1cf   : > { %v2039_v8 = vpop.f32.mrf.mxu1  ;;  %v4925_v45 = vpop.f32.mrf.mxu0 }
 0x1d0   : > { %7217 = vst [vmem:[#allocation57_spill] sm:$0xff] %v6550_v47  ;;  %v2190_v12 = vadd.f32 %v2039_v8, %v6308_v18  ;;  %v3163_v47 = vor.u32 %v3161_v13, %v6556_v46 }
 0x1d1   : > { %v4859_v19 = vpop.f32.mrf.mxu1  ;;  %v2367_v25 = vpop.f32.mrf.mxu0 }
 0x1d2   : > { %v6565_v20 = vadd.f32 %v2364_v48, %v2190_v12  ;;  %v6573_v18 = vsel %vm503_vm1, %v3163_v47, %v6560_v40  ;;  %v6580_v19 = vsel %vm1448_vm3, %v7088_v27, %v7087_v62  ;;  %v7219_v47 = vld [vmem:[#allocation6_spill] sm:$0xff] }
 0x1d3   : > { %v2042_v45 = vpop.f32.mrf.mxu1  ;;  %v4928_v1 = vpop.f32.mrf.mxu0  ;;  %5091 = vmatmul.mubr.msk.bf16.gmra.mxu0 %vm764_vm2, %v6546_v54 }
 0x1d4   : > { %7218 = vst [vmem:[#allocation58_spill] sm:$0xff] %v6565_v20  ;;  %v2191_v48 = vadd.f32 %v2042_v45, %v6316_v7  ;;  %5162 = vmatprep.mubr.msk.bf16.mxu0 %vm764_vm2, %v5799_v5 }
 0x1d5   : > { %v4862_v1 = vpop.f32.mrf.mxu1  ;;  %5025 = vmatmul.mubr.msk.bf16.gmra.mxu1 %vm764_vm2, %v2542_v52  ;;  %v2378_v21 = vpop.f32.mrf.mxu0  ;;  %v7220_v52 = vld [vmem:[#allocation8_spill] sm:$0xff] }
 0x1d6   : > { %v6586_v61 = vadd.f32 %v2367_v25, %v2191_v48  ;;  %5096 = vmatprep.mubr.msk.bf16.mxu1 %vm764_vm2, %v7219_v47 }
 0x1d7   : > { %v2053_v8 = vpop.f32.mrf.mxu1  ;;  %v4929_v13 = vpop.f32.mrf.mxu0 }
 0x1d8   : > { %v2192_v12 = vadd.f32 %v2053_v8, %v6323_v43 }
 0x1d9   : > { %v4863_v62 = vpop.f32.mrf.mxu1  ;;  %v2381_v27 = vpop.f32.mrf.mxu0 }
 0x1da   : > { %v6591_v20 = vadd.f32 %v2378_v21, %v2192_v12  ;;  %v7221_v62 = vld [vmem:[#allocation9_spill] sm:$0xff] }
 0x1db   : > { %v2056_v7 = vpop.f32.mrf.mxu1  ;;  %v4932_v45 = vpop.f32.mrf.mxu0  ;;  %5163 = vmatmul.mubr.msk.bf16.vlgmr.msra.gmra.mxu0 %vm764_vm2, %v5812_v60 }
 0x1dc   : > { %v2193_v5 = vadd.f32 %v2056_v7, %v6334_v50  ;;  %5166 = vmatprep.mubr.msk.bf16.mxu0 %vm764_vm2, %v5815_v31  ;;  %v7222_v7 = vld [vmem:[#allocation12_spill] sm:$0xff] }
 0x1dd   : > { %v4866_v25 = vpop.f32.mrf.mxu1  ;;  %5097 = vmatmul.mubr.msk.bf16.vlgmr.msra.gmra.mxu1 %vm764_vm2, %v7220_v52  ;;  %v2392_v48 = vpop.f32.mrf.mxu0 }
 0x1de   : > { %v6600_v43 = vadd.f32 %v2381_v27, %v2193_v5  ;;  %5100 = vmatprep.mubr.msk.bf16.mxu1 %vm764_vm2, %v7221_v62  ;;  %v7223_v5 = vld [vmem:[#allocation13_spill] sm:$0xff] }
 0x1df   : > { %v2067_v1 = vpop.f32.mrf.mxu1  ;;  %v4933_v21 = vpop.f32.mrf.mxu0 }
 0x1e0   : > { %v2194_v47 = vadd.f32 %v2067_v1, %v6339_v32 }
 0x1e1   : > { %v4867_v60 = vpop.f32.mrf.mxu1  ;;  %v2395_v8 = vpop.f32.mrf.mxu0 }
 0x1e2   : > { %v6605_v50 = vadd.f32 %v2392_v48, %v2194_v47  ;;  %v7224_v60 = vld [vmem:[#allocation16_spill] sm:$0xff] }
 0x1e3   : > { %v2070_v13 = vpop.f32.mrf.mxu1  ;;  %v4936_v31 = vpop.f32.mrf.mxu0  ;;  %5167 = vmatmul.mubr.msk.bf16.gmra.mxu0 %vm764_vm2, %v5828_v30 }
 0x1e4   : > { %v2195_v12 = vadd.f32 %v2070_v13, %v6348_v34  ;;  %5170 = vmatprep.mubr.msk.bf16.mxu0 %vm764_vm2, %v5831_v26  ;;  %v7225_v13 = vld [vmem:[#allocation17_spill] sm:$0xff] }
 0x1e5   : > { %v4870_v27 = vpop.f32.mrf.mxu1  ;;  %5101 = vmatmul.mubr.msk.bf16.gmra.mxu1 %vm764_vm2, %v7222_v7  ;;  %v2406_v45 = vpop.f32.mrf.mxu0 }
 0x1e6   : > { %v6614_v32 = vadd.f32 %v2395_v8, %v2195_v12  ;;  %5104 = vmatprep.mubr.msk.bf16.mxu1 %vm764_vm2, %v7223_v5 }
 0x1e7   : > { %v2081_v25 = vpop.f32.mrf.mxu1  ;;  %v4937_v52 = vpop.f32.mrf.mxu0 }
 0x1e8   : > { %v2196_v48 = vadd.f32 %v2081_v25, %v6353_v38  ;;  %v7226_v52 = vld [vmem:[#allocation20_spill] sm:$0xff] }
 0x1e9   : > { %v4871_v30 = vpop.f32.mrf.mxu1  ;;  %v2409_v62 = vpop.f32.mrf.mxu0 }
 0x1ea   : > { %v6619_v34 = vadd.f32 %v2406_v45, %v2196_v48  ;;  %v7227_v30 = vld [vmem:[#allocation21_spill] sm:$0xff] }
 0x1eb   : > { %v2084_v1 = vpop.f32.mrf.mxu1  ;;  %v4940_v26 = vpop.f32.mrf.mxu0  ;;  %5171 = vmatmul.mubr.msk.bf16.gmra.mxu0 %vm764_vm2, %v5844_v2 }
 0x1ec   : > { %v2197_v21 = vadd.f32 %v2084_v1, %v6362_v17  ;;  %5174 = vmatprep.mubr.msk.bf16.mxu0 %vm764_vm2, %v7168_v16 }
 0x1ed   : > { %v4874_v47 = vpop.f32.mrf.mxu1  ;;  %5105 = vmatmul.mubr.msk.bf16.gmra.mxu1 %vm764_vm2, %v7224_v60  ;;  %v2420_v8 = vpop.f32.mrf.mxu0 }
 0x1ee   : > { %v6628_v38 = vadd.f32 %v2409_v62, %v2197_v21  ;;  %5108 = vmatprep.mubr.msk.bf16.mxu1 %vm764_vm2, %v7225_v13  ;;  %v7228_v13 = vld [vmem:[#allocation24_spill] sm:$0xff] }
 0x1ef   : > { %v2095_v31 = vpop.f32.mrf.mxu1  ;;  %v4941_v12 = vpop.f32.mrf.mxu0 }
 0x1f0   : > { %v2198_v27 = vadd.f32 %v2095_v31, %v6367_v36  ;;  %v7229_v12 = vld [vmem:[#allocation25_spill] sm:$0xff] }
 0x1f1   : > { %v4875_v2 = vpop.f32.mrf.mxu1  ;;  %v2423_v7 = vpop.f32.mrf.mxu0 }
 0x1f2   : > { %v6633_v17 = vadd.f32 %v2420_v8, %v2198_v27 }
 0x1f3   : > { %v2098_v45 = vpop.f32.mrf.mxu1  ;;  %v4944_v16 = vpop.f32.mrf.mxu0  ;;  %5175 = vmatmul.mubr.msk.bf16.gmra.mxu0 %vm764_vm2, %v7170_v63 }
 0x1f4   : > { %v2199_v5 = vadd.f32 %v2098_v45, %v6376_v3  ;;  %5178 = vmatprep.mubr.msk.bf16.mxu0 %vm764_vm2, %v7171_v24 }
 0x1f5   : > { %v4878_v25 = vpop.f32.mrf.mxu1  ;;  %5109 = vmatmul.mubr.msk.bf16.gmra.mxu1 %vm764_vm2, %v7226_v52  ;;  %v2434_v48 = vpop.f32.mrf.mxu0  ;;  %v7230_v52 = vld [vmem:[#allocation28_spill] sm:$0xff] }
 0x1f6   : > { %v6642_v36 = vadd.f32 %v2423_v7, %v2199_v5  ;;  %5112 = vmatprep.mubr.msk.bf16.mxu1 %vm764_vm2, %v7227_v30  ;;  %v7231_v30 = vld [vmem:[#allocation2_spill] sm:$0xff] }
 0x1f7   : > { %v2109_v62 = vpop.f32.mrf.mxu1  ;;  %v4945_v1 = vpop.f32.mrf.mxu0 }
 0x1f8   : > { %v2200_v26 = vadd.f32 %v2109_v62, %v6381_v44 }
 0x1f9   : > { %v4879_v63 = vpop.f32.mrf.mxu1  ;;  %v2437_v21 = vpop.f32.mrf.mxu0 }
 0x1fa   : > { %v6647_v3 = vadd.f32 %v2434_v48, %v2200_v26 }
 0x1fb   : > { %v2112_v47 = vpop.f32.mrf.mxu1  ;;  %v4948_v24 = vpop.f32.mrf.mxu0  ;;  %5179 = vmatmul.mubr.msk.bf16.gmra.mxu0 %vm764_vm2, %v7175_v0 }
 0x1fc   : > { %v2201_v60 = vadd.f32 %v2112_v47, %v6390_v58  ;;  %5182 = vmatprep.mubr.msk.bf16.mxu0 %vm764_vm2, %v7176_v57 }
 0x1fd   : > { %v4882_v8 = vpop.f32.mrf.mxu1  ;;  %5113 = vmatmul.mubr.msk.bf16.gmra.mxu1 %vm764_vm2, %v7228_v13  ;;  %v2448_v31 = vpop.f32.mrf.mxu0  ;;  %v7233_v13 = vld [vmem:[#allocation4_spill] sm:$0xff] }
 0x1fe   : > { %v6656_v44 = vadd.f32 %v2437_v21, %v2201_v60  ;;  %5116 = vmatprep.mubr.msk.bf16.mxu1 %vm764_vm2, %v7229_v12  ;;  %v7232_v60 = vld [vmem:[#allocation3_spill] sm:$0xff] }
 0x1ff   : > { %v2123_v27 = vpop.f32.mrf.mxu1  ;;  %v4949_v2 = vpop.f32.mrf.mxu0 }
 0x200   : > { %v2202_v7 = vadd.f32 %v2123_v27, %v6395_v41 }
 0x201   : > { %v4883_v0 = vpop.f32.mrf.mxu1  ;;  %v2451_v45 = vpop.f32.mrf.mxu0 }
 0x202   : > { %v6661_v58 = vadd.f32 %v2448_v31, %v2202_v7  ;;  %v7234_v0 = vld [vmem:[#allocation29_spill] sm:$0xff] }
 0x203   : > { %v2126_v16 = vpop.f32.mrf.mxu1  ;;  %v4952_v57 = vpop.f32.mrf.mxu0  ;;  %5183 = vmatmul.mubr.msk.bf16.gmra.mxu0 %vm764_vm2, %v7181_v42 }
 0x204   : > { %v2203_v5 = vadd.f32 %v2126_v16, %v6404_v6  ;;  %5186 = vmatprep.mubr.msk.bf16.mxu0 %vm764_vm2, %v7182_v15  ;;  %v7235_v57 = vld [vmem:[#allocation5_spill] sm:$0xff] }
 0x205   : > { %v4886_v25 = vpop.f32.mrf.mxu1  ;;  %5117 = vmatmul.mubr.msk.bf16.gmra.mxu1 %vm764_vm2, %v7230_v52  ;;  %v2462_v48 = vpop.f32.mrf.mxu0 }
 0x206   : > { %v6670_v41 = vadd.f32 %v2451_v45, %v2203_v5  ;;  %5120 = vmatprep.mubr.msk.bf16.mxu1 %vm764_vm2, %v7231_v30  ;;  %v7236_v25 = vld [vmem:[#allocation7_spill] sm:$0xff] }
 0x207   : > { %v2137_v62 = vpop.f32.mrf.mxu1  ;;  %v4953_v1 = vpop.f32.mrf.mxu0  ;;  %v7237_v30 = vld [vmem:[#allocation51_spill] sm:$0xff] }
 0x208   : > { %v2204_v26 = vadd.f32 %v2137_v62, %v6409_v28 }
 0x209   : > { %v4887_v42 = vpop.f32.mrf.mxu1  ;;  %v2465_v63 = vpop.f32.mrf.mxu0 }
 0x20a   : > { %v6675_v6 = vadd.f32 %v2462_v48, %v2204_v26 }
 0x20b   : > { %v2140_v21 = vpop.f32.mrf.mxu1  ;;  %v4956_v15 = vpop.f32.mrf.mxu0  ;;  %5187 = vmatmul.mubr.msk.bf16.gmra.mxu0 %vm764_vm2, %v7185_v33 }
 0x20c   : > { %v2205_v47 = vadd.f32 %v2140_v21, %v6418_v22  ;;  %5190 = vmatprep.mubr.msk.bf16.mxu0 %vm764_vm2, %v7187_v53 }
 0x20d   : > { %v4890_v24 = vpop.f32.mrf.mxu1  ;;  %5121 = vmatmul.mubr.msk.bf16.gmra.mxu1 %vm764_vm2, %v7232_v60  ;;  %v2476_v8 = vpop.f32.mrf.mxu0 }
 0x20e   : > { %v6684_v28 = vadd.f32 %v2465_v63, %v2205_v47  ;;  %5124 = vmatprep.mubr.msk.bf16.mxu1 %vm764_vm2, %v7233_v13  ;;  %v7238_v63 = vld [vmem:[#allocation30_spill] sm:$0xff] }
 0x20f   : > { %v2151_v31 = vpop.f32.mrf.mxu1  ;;  %v4957_v12 = vpop.f32.mrf.mxu0  ;;  %v7239_v47 = vld [vmem:[#allocation10_spill] sm:$0xff] }
 0x210   : > { %v2206_v27 = vadd.f32 %v2151_v31, %v6423_v29  ;;  %v7241_v12 = vld [vmem:[#allocation31_spill] sm:$0xff] }
 0x211   : > { %v4891_v33 = vpop.f32.mrf.mxu1  ;;  %v2479_v2 = vpop.f32.mrf.mxu0 }
 0x212   : > { %v6689_v22 = vadd.f32 %v2476_v8, %v2206_v27  ;;  %v7240_v8 = vld [vmem:[#allocation11_spill] sm:$0xff] }
 0x213   : > { %v2154_v7 = vpop.f32.mrf.mxu1  ;;  %v4960_v53 = vpop.f32.mrf.mxu0  ;;  %5191 = vmatmul.mubr.msk.bf16.gmra.mxu0 %vm764_vm2, %v7191_v51 }
 0x214   : > { %v2207_v45 = vadd.f32 %v2154_v7, %v7234_v0  ;;  %5194 = vmatprep.mubr.msk.bf16.mxu0 %vm764_vm2, %v7193_v56  ;;  %v7242_v53 = vld [vmem:[#allocation52_spill] sm:$0xff] }
 0x215   : > { %v4894_v16 = vpop.f32.mrf.mxu1  ;;  %5125 = vmatmul.mubr.msk.bf16.gmra.mxu1 %vm764_vm2, %v7235_v57  ;;  %v2490_v5 = vpop.f32.mrf.mxu0 }
 0x216   : > { %v6698_v29 = vadd.f32 %v2479_v2, %v2207_v45  ;;  %5128 = vmatprep.mubr.msk.bf16.mxu1 %vm764_vm2, %v7236_v25  ;;  %v7243_v16 = vld [vmem:[#allocation14_spill] sm:$0xff]  ;;  %v7244_v25 = vld [vmem:[#allocation15_spill] sm:$0xff] }
 0x217   : > { %v2165_v52 = vpop.f32.mrf.mxu1  ;;  %v4961_v48 = vpop.f32.mrf.mxu0 }
 0x218   : > { %v2208_v62 = vadd.f32 %v2165_v52, %v7237_v30  ;;  %v7245_v30 = vld [vmem:[#allocation53_spill] sm:$0xff] }
 0x219   : > { %v4895_v51 = vpop.f32.mrf.mxu1  ;;  %v2493_v1 = vpop.f32.mrf.mxu0 }
 0x21a   : > { %v6703_v26 = vadd.f32 %v2490_v5, %v2208_v62 }
 0x21b   : > { %v2168_v42 = vpop.f32.mrf.mxu1  ;;  %v5032_v56 = vpop.f32.mrf.mxu0  ;;  %5195 = vmatmul.mubr.msk.bf16.gmra.mxu0 %vm764_vm2, %v7195_v23 }
 0x21c   : > { %v2209_v21 = vadd.f32 %v2168_v42, %v7238_v63  ;;  %5198 = vmatprep.mubr.msk.bf16.mxu0 %vm764_vm2, %v7197_v11  ;;  %v7246_v56 = vld [vmem:[#allocation56_spill] sm:$0xff] }
 0x21d   : > { %v4966_v15 = vpop.f32.mrf.mxu1  ;;  %5129 = vmatmul.mubr.msk.bf16.gmra.mxu1 %vm764_vm2, %v7239_v47  ;;  %v2897_v24 = vpop.f32.mrf.mxu0 }
 0x21e   : > { %v6712_v60 = vadd.f32 %v2493_v1, %v2209_v21  ;;  %5132 = vmatprep.mubr.msk.bf16.mxu1 %vm764_vm2, %v7240_v8  ;;  %v7247_v15 = vld [vmem:[#allocation18_spill] sm:$0xff]  ;;  %v7248_v8 = vld [vmem:[#allocation19_spill] sm:$0xff] }
 0x21f   : > { %v2589_v13 = vpop.f32.mrf.mxu1  ;;  %v5033_v31 = vpop.f32.mrf.mxu0 }
 0x220   : > { %v2812_v27 = vadd.f32 %v2589_v13, %v7241_v12  ;;  %v7249_v12 = vld [vmem:[#allocation32_spill] sm:$0xff] }
 0x221   : > { %v4967_v23 = vpop.f32.mrf.mxu1  ;;  %v2900_v33 = vpop.f32.mrf.mxu0 }
 0x222   : > { %v6717_v2 = vadd.f32 %v2897_v24, %v2812_v27 }
 0x223   : > { %v2592_v7 = vpop.f32.mrf.mxu1  ;;  %v5036_v11 = vpop.f32.mrf.mxu0  ;;  %5199 = vmatmul.mubr.msk.bf16.gmra.mxu0 %vm764_vm2, %v7199_v55 }
 0x224   : > { %v2813_v0 = vadd.f32 %v2592_v7, %v7242_v53  ;;  %5202 = vmatprep.mubr.msk.bf16.mxu0 %vm764_vm2, %v7201_v49  ;;  %v7250_v11 = vld [vmem:[#allocation33_spill] sm:$0xff] }
 0x225   : > { %v4970_v45 = vpop.f32.mrf.mxu1  ;;  %5133 = vmatmul.mubr.msk.bf16.gmra.mxu1 %vm764_vm2, %v7243_v16  ;;  %v2911_v57 = vpop.f32.mrf.mxu0 }
 0x226   : > { %v6726_v5 = vadd.f32 %v2900_v33, %v2813_v0  ;;  %5136 = vmatprep.mubr.msk.bf16.mxu1 %vm764_vm2, %v7244_v25  ;;  %v7251_v45 = vld [vmem:[#allocation22_spill] sm:$0xff]  ;;  %v7252_v25 = vld [vmem:[#allocation23_spill] sm:$0xff] }
 0x227   : > { %v2603_v52 = vpop.f32.mrf.mxu1  ;;  %v5037_v48 = vpop.f32.mrf.mxu0 }
 0x228   : > { %v2814_v62 = vadd.f32 %v2603_v52, %v7245_v30 }
 0x229   : > { %v4971_v55 = vpop.f32.mrf.mxu1  ;;  %v2914_v51 = vpop.f32.mrf.mxu0 }
 0x22a   : > { %v6731_v1 = vadd.f32 %v2911_v57, %v2814_v62 }
 0x22b   : > { %v2606_v42 = vpop.f32.mrf.mxu1  ;;  %v5040_v49 = vpop.f32.mrf.mxu0  ;;  %5203 = vmatmul.mubr.msk.bf16.gmra.mxu0 %vm764_vm2, %v7203_v4 }
 0x22c   : > { %v2815_v63 = vadd.f32 %v2606_v42, %v7246_v56  ;;  %5206 = vmatprep.mubr.msk.bf16.mxu0 %vm764_vm2, %v7205_v39  ;;  %v7253_v42 = vld [vmem:[#allocation54_spill] sm:$0xff] }
 0x22d   : > { %v4974_v21 = vpop.f32.mrf.mxu1  ;;  %5137 = vmatmul.mubr.msk.bf16.gmra.mxu1 %vm764_vm2, %v7247_v15  ;;  %v2925_v47 = vpop.f32.mrf.mxu0  ;;  %v7254_v56 = vld [vmem:[#allocation50_spill] sm:$0xff] }
 0x22e   : > { %v6740_v24 = vadd.f32 %v2914_v51, %v2815_v63  ;;  %5140 = vmatprep.mubr.msk.bf16.mxu1 %vm764_vm2, %v7248_v8  ;;  %v7255_v21 = vld [vmem:[#allocation26_spill] sm:$0xff] }
 0x22f   : > { %v2617_v13 = vpop.f32.mrf.mxu1  ;;  %v5041_v31 = vpop.f32.mrf.mxu0 }
 0x230   : > { %v2816_v27 = vadd.f32 %v2617_v13, %v7249_v12  ;;  %v7257_v31 = vld [vmem:[#allocation59_spill] sm:$0xff] }
 0x231   : > { %v4975_v4 = vpop.f32.mrf.mxu1  ;;  %v2928_v23 = vpop.f32.mrf.mxu0 }
 0x232   : > { %v6745_v33 = vadd.f32 %v2925_v47, %v2816_v27  ;;  %v7256_v47 = vld [vmem:[#allocation27_spill] sm:$0xff] }
 0x233   : > { %v2620_v7 = vpop.f32.mrf.mxu1  ;;  %v5044_v39 = vpop.f32.mrf.mxu0  ;;  %5207 = vmatmul.mubr.msk.bf16.gmra.mxu0 %vm764_vm2, %v7206_v35 }
 0x234   : > { %v2817_v53 = vadd.f32 %v2620_v7, %v7250_v11  ;;  %5210 = vmatprep.mubr.msk.bf16.mxu0 %vm764_vm2, %v7208_v10  ;;  %v7258_v39 = vld [vmem:[#allocation34_spill] sm:$0xff]  ;;  %v7259_v11 = vld [vmem:[#allocation55_spill] sm:$0xff] }
 0x235   : > { %v4978_v0 = vpop.f32.mrf.mxu1  ;;  %5141 = vmatmul.mubr.msk.bf16.gmra.mxu1 %vm764_vm2, %v7251_v45  ;;  %v2939_v16 = vpop.f32.mrf.mxu0 }
 0x236   : > { %v6754_v57 = vadd.f32 %v2928_v23, %v2817_v53  ;;  %5144 = vmatprep.mubr.msk.bf16.mxu1 %vm764_vm2, %v7252_v25  ;;  %v7260_v0 = vld [vmem:[#allocation35_spill] sm:$0xff] }
 0x237   : > { %v2631_v52 = vpop.f32.mrf.mxu1  ;;  %v5045_v48 = vpop.f32.mrf.mxu0 }
 0x238   : > { %v2818_v30 = vadd.f32 %v2631_v52, %v6493_v59  ;;  %v7262_v48 = vld [vmem:[#allocation64_spill] sm:$0xff] }
 0x239   : > { %v4979_v35 = vpop.f32.mrf.mxu1  ;;  %v2942_v62 = vpop.f32.mrf.mxu0 }
 0x23a   : > { %v6759_v55 = vadd.f32 %v2939_v16, %v2818_v30  ;;  %v7261_v16 = vld [vmem:[#allocation63_spill] sm:$0xff]  ;;  %v5301_v30 = vld [vmem:[%s5412_s25 + $0x120] ss:$0 sps:$4 sm:$0xff]  }
 0x23b   : > { %v2634_v51 = vpop.f32.mrf.mxu1  ;;  %v5048_v10 = vpop.f32.mrf.mxu0  ;;  %5211 = vmatmul.mubr.msk.bf16.gmra.mxu0 %vm764_vm2, %v7210_v37 }
 0x23c   : > { %v2819_v49 = vadd.f32 %v2634_v51, %v7253_v42  ;;  %5214 = vmatprep.mubr.msk.bf16.mxu0 %vm764_vm2, %v7254_v56  ;;  %v7263_v51 = vld [vmem:[#allocation60_spill] sm:$0xff]  ;;  %v7264_v42 = vrot.slane %v6527_v9, 1 }
 0x23d   : > { %v4982_v63 = vpop.f32.mrf.mxu1  ;;  %5145 = vmatmul.mubr.msk.bf16.gmra.mxu1 %vm764_vm2, %v7255_v21  ;;  %v2953_v15 = vpop.f32.mrf.mxu0 }
 0x23e   : > { %v6768_v59 = vadd.f32 %v2942_v62, %v2819_v49  ;;  %5148 = vmatprep.mubr.msk.bf16.mxu1 %vm764_vm2, %v7256_v47  ;;  %v3480_v49 = vsel %vm1448_vm3, %v6523_v14, %v7264_v42  ;;  %v3483_v14 = vrot.slane %v5301_v30, 1 }
 0x23f   : > { %v2645_v8 = vpop.f32.mrf.mxu1  ;;  %v5049_v13 = vpop.f32.mrf.mxu0 }
 0x240   : > { %v2820_v37 = vadd.f32 %v2645_v8, %v7257_v31  ;;  %v3168_v8 = vshrl.u32 %v6546_v54, 16  ;;  %v3172_v13 = vshll.u32 %v5301_v30, 16 }
 0x241   : > { %v4983_v12 = vpop.f32.mrf.mxu1  ;;  %v2956_v27 = vpop.f32.mrf.mxu0 }
 0x242   : > { %v6773_v4 = vadd.f32 %v2953_v15, %v2820_v37  ;;  %v7265_v15 = vld [vmem:[#allocation65_spill] sm:$0xff] }
 0x243   : > { %v2648_v23 = vpop.f32.mrf.mxu1  ;;  %v5052_v7 = vpop.f32.mrf.mxu0  ;;  %5215 = vmatmul.mubr.msk.bf16.gmra.mxu0 %vm764_vm2, %v7258_v39  ;;  %v3160_v47 = vsel %vm503_vm1, %v7265_v15, %v6556_v46  ;;  %v7266_v12 = vld [vmem:[#allocation57_spill] sm:$0xff]  ;;  %v3170_v46 = vor.u32 %v3168_v8, %v6560_v40  ;;  %v3174_v39 = vrot.slane %v3172_v13, 1 }
 0x244   : > { %v2821_v53 = vadd.f32 %v2648_v23, %v7259_v11  ;;  %5218 = vmatprep.mubr.msk.bf16.mxu0 %vm764_vm2, %v7260_v0  ;;  %v7267_v0 = vld [vmem:[#allocation58_spill] sm:$0xff] }
 0x245   : > { %v4986_v45 = vpop.f32.mrf.mxu1  ;;  %5149 = vmatmul.mubr.msk.bf16.gmra.mxu1 %vm764_vm2, %v7261_v16  ;;  %v2967_v25 = vpop.f32.mrf.mxu0  ;;  %v7268_v16 = vrot.slane %v6546_v54, 1 }
 0x246   : > { %v6782_v52 = vadd.f32 %v2956_v27, %v2821_v53  ;;  %5152 = vmatprep.mubr.msk.bf16.mxu1 %vm764_vm2, %v7262_v48 }
 0x247   : > { %v2659_v35 = vpop.f32.mrf.mxu1  ;;  %v5053_v62 = vpop.f32.mrf.mxu0 }
 0x248   : > { %v2822_v10 = vadd.f32 %v2659_v35, %v7263_v51  ;;  %v3175_v35 = vsel %vm503_vm1, %v3170_v46, %v3174_v39 }
 0x249   : > { %v4987_v56 = vpop.f32.mrf.mxu1  ;;  %v2970_v63 = vpop.f32.mrf.mxu0 }
 0x24a   : > { %v6792_v21 = vadd.f32 %v2967_v25, %v2822_v10 }
 0x24b   : > { %v2662_v31 = vpop.f32.mrf.mxu1  ;;  %v5056_v37 = vpop.f32.mrf.mxu0  ;;  %5219 = vmatmul.mubr.msk.bf16.gmra.mxu0 %vm764_vm2, %v3480_v49 }
 0x24c   : > { %v2823_v9 = vadd.f32 %v2662_v31, %v7266_v12  ;;  %5222 = vmatprep.mubr.msk.bf16.mxu0 %vm764_vm2, %v6580_v19  ;;  %v3484_v19 = vsel %vm1448_vm3, %v7268_v16, %v3483_v14 }
 0x24d   : > { %v4990_v27 = vpop.f32.mrf.mxu1  ;;  %5153 = vmatmul.mubr.msk.bf16.gmra.mxu1 %vm764_vm2, %v3160_v47  ;;  %v2981_v23 = vpop.f32.mrf.mxu0 }
 0x24e   : > { %v6803_v7 = vadd.f32 %v2970_v63, %v2823_v9  ;;  %5156 = vmatprep.mubr.msk.bf16.mxu1 %vm764_vm2, %v6573_v18 }
 0x24f   : > { %v2673_v11 = vpop.f32.mrf.mxu1  ;;  %v5057_v53 = vpop.f32.mrf.mxu0 }
 0x250   : > { %v2824_v45 = vadd.f32 %v2673_v11, %v7267_v0 }
 0x251   : > { %v4991_v25 = vpop.f32.mrf.mxu1  ;;  %v2984_v48 = vpop.f32.mrf.mxu0 }
 0x252   : > { %v6812_v30 = vadd.f32 %v2981_v23, %v2824_v45 }
 0x253   : > { %v2676_v62 = vpop.f32.mrf.mxu1  ;;  %v5060_v40 = vpop.f32.mrf.mxu0  ;;  %5223 = vmatmul.mubr.msk.bf16.gmra.mxu0 %vm764_vm2, %v3484_v19 }
 0x254   : > { %v2825_v18 = vadd.f32 %v2676_v62, %v6586_v61 }
 0x255   : > { %v4994_v51 = vpop.f32.mrf.mxu1  ;;  %5157 = vmatmul.mubr.msk.bf16.gmra.mxu1 %vm764_vm2, %v3175_v35  ;;  %v2995_v10 = vpop.f32.mrf.mxu0 }
 0x256   : > { %v6818_v42 = vadd.f32 %v2984_v48, %v2825_v18 }
 0x257   : > { %v2687_v54 = vpop.f32.mrf.mxu1  ;;  %v5061_v49 = vpop.f32.mrf.mxu0 }
 0x258   : > { %v2826_v56 = vadd.f32 %v2687_v54, %v6591_v20 }
 0x259   : > { %v4995_v63 = vpop.f32.mrf.mxu1  ;;  %v2998_v15 = vpop.f32.mrf.mxu0 }
 0x25a   : > { %v6821_v47 = vadd.f32 %v2995_v10, %v2826_v56 }
 0x25b   : > { %v2690_v8 = vpop.f32.mrf.mxu1  ;;  %v5064_v13 = vpop.f32.mrf.mxu0 }
 0x25c   : > { %v2827_v31 = vadd.f32 %v2690_v8, %v6600_v43 }
 0x25d   : > { %v4998_v37 = vpop.f32.mrf.mxu1  ;;  %v3009_v61 = vpop.f32.mrf.mxu0 }
 0x25e   : > { %v6824_v12 = vadd.f32 %v2998_v15, %v2827_v31 }
 0x25f   : > { %v2701_v9 = vpop.f32.mrf.mxu1  ;;  %v5065_v14 = vpop.f32.mrf.mxu0 }
 0x260   : > { %v2828_v27 = vadd.f32 %v2701_v9, %v6605_v50 }
 0x261   : > { %v4999_v23 = vpop.f32.mrf.mxu1  ;;  %v3012_v46 = vpop.f32.mrf.mxu0 }
 0x262   : > { %v6827_v39 = vadd.f32 %v3009_v61, %v2828_v27 }
 0x263   : > { %v2704_v20 = vpop.f32.mrf.mxu1  ;;  %v5068_v11 = vpop.f32.mrf.mxu0 }
 0x264   : > { %v2829_v53 = vadd.f32 %v2704_v20, %v6614_v32 }
 0x265   : > { %v5002_v0 = vpop.f32.mrf.mxu1  ;;  %v3023_v45 = vpop.f32.mrf.mxu0 }
 0x266   : > { %v6830_v16 = vadd.f32 %v3012_v46, %v2829_v53 }
 0x267   : > { %v2715_v43 = vpop.f32.mrf.mxu1  ;;  %v5069_v19 = vpop.f32.mrf.mxu0 }
 0x268   : > { %v2830_v25 = vadd.f32 %v2715_v43, %v6619_v34 }
 0x269   : > { %v5003_v48 = vpop.f32.mrf.mxu1  ;;  %v3026_v35 = vpop.f32.mrf.mxu0 }
 0x26a   : > { %v6833_v62 = vadd.f32 %v3023_v45, %v2830_v25 }
 0x26b   : > { %v2718_v50 = vpop.f32.mrf.mxu1  ;;  %v5072_v40 = vpop.f32.mrf.mxu0 }
 0x26c   : > { %v2831_v18 = vadd.f32 %v2718_v50, %v6628_v38 }
 0x26d   : > { %v5006_v51 = vpop.f32.mrf.mxu1  ;;  %v3037_v10 = vpop.f32.mrf.mxu0 }
 0x26e   : > { %v6836_v54 = vadd.f32 %v3026_v35, %v2831_v18 }
 0x26f   : > { %v2729_v32 = vpop.f32.mrf.mxu1  ;;  %v5073_v49 = vpop.f32.mrf.mxu0 }
 0x270   : > { %v2832_v56 = vadd.f32 %v2729_v32, %v6633_v17 }
 0x271   : > { %v5007_v63 = vpop.f32.mrf.mxu1  ;;  %v3040_v15 = vpop.f32.mrf.mxu0 }
 0x272   : > { %v6839_v8 = vadd.f32 %v3037_v10, %v2832_v56 }
 0x273   : > { %v2732_v34 = vpop.f32.mrf.mxu1  ;;  %v5076_v13 = vpop.f32.mrf.mxu0 }
 0x274   : > { %v2833_v31 = vadd.f32 %v2732_v34, %v6642_v36 }
 0x275   : > { %v5010_v37 = vpop.f32.mrf.mxu1  ;;  %v3051_v61 = vpop.f32.mrf.mxu0 }
 0x276   : > { %v6842_v9 = vadd.f32 %v3040_v15, %v2833_v31 }
 0x277   : > { %v2743_v38 = vpop.f32.mrf.mxu1  ;;  %v5077_v14 = vpop.f32.mrf.mxu0 }
 0x278   : > { %v2834_v27 = vadd.f32 %v2743_v38, %v6647_v3 }
 0x279   : > { %v5011_v23 = vpop.f32.mrf.mxu1  ;;  %v3054_v46 = vpop.f32.mrf.mxu0 }
 0x27a   : > { %v6845_v20 = vadd.f32 %v3051_v61, %v2834_v27 }
 0x27b   : > { %v2746_v17 = vpop.f32.mrf.mxu1  ;;  %v5080_v11 = vpop.f32.mrf.mxu0 }
 0x27c   : > { %v2835_v53 = vadd.f32 %v2746_v17, %v6656_v44 }
 0x27d   : > { %v5014_v0 = vpop.f32.mrf.mxu1  ;;  %v3065_v45 = vpop.f32.mrf.mxu0 }
 0x27e   : > { %v6848_v43 = vadd.f32 %v3054_v46, %v2835_v53 }
 0x27f   : > { %v2757_v36 = vpop.f32.mrf.mxu1  ;;  %v5081_v19 = vpop.f32.mrf.mxu0 }
 0x280   : > { %v2836_v25 = vadd.f32 %v2757_v36, %v6661_v58 }
 0x281   : > { %v5015_v48 = vpop.f32.mrf.mxu1  ;;  %v3068_v35 = vpop.f32.mrf.mxu0 }
 0x282   : > { %v6851_v50 = vadd.f32 %v3065_v45, %v2836_v25 }
 0x283   : > { %v2760_v3 = vpop.f32.mrf.mxu1  ;;  %v5084_v40 = vpop.f32.mrf.mxu0 }
 0x284   : > { %v2837_v18 = vadd.f32 %v2760_v3, %v6670_v41 }
 0x285   : > { %v5018_v51 = vpop.f32.mrf.mxu1  ;;  %v3079_v10 = vpop.f32.mrf.mxu0 }
 0x286   : > { %v6854_v32 = vadd.f32 %v3068_v35, %v2837_v18 }
 0x287   : > { %v2771_v44 = vpop.f32.mrf.mxu1  ;;  %v5085_v49 = vpop.f32.mrf.mxu0 }
 0x288   : > { %v2838_v56 = vadd.f32 %v2771_v44, %v6675_v6 }
 0x289   : > { %v5019_v63 = vpop.f32.mrf.mxu1  ;;  %v3082_v15 = vpop.f32.mrf.mxu0 }
 0x28a   : > { %v6857_v34 = vadd.f32 %v3079_v10, %v2838_v56 }
 0x28b   : > { %v2774_v58 = vpop.f32.mrf.mxu1  ;;  %v5088_v13 = vpop.f32.mrf.mxu0 }
 0x28c   : > { %v2839_v31 = vadd.f32 %v2774_v58, %v6684_v28 }
 0x28d   : > { %v5022_v37 = vpop.f32.mrf.mxu1  ;;  %v3093_v61 = vpop.f32.mrf.mxu0 }
 0x28e   : > { %v6860_v38 = vadd.f32 %v3082_v15, %v2839_v31 }
 0x28f   : > { %v2785_v41 = vpop.f32.mrf.mxu1  ;;  %v5089_v14 = vpop.f32.mrf.mxu0 }
 0x290   : > { %v2840_v27 = vadd.f32 %v2785_v41, %v6689_v22 }
 0x291   : > { %v5023_v23 = vpop.f32.mrf.mxu1  ;;  %v3096_v46 = vpop.f32.mrf.mxu0 }
 0x292   : > { %v6863_v17 = vadd.f32 %v3093_v61, %v2840_v27 }
 0x293   : > { %v2788_v6 = vpop.f32.mrf.mxu1  ;;  %v5092_v11 = vpop.f32.mrf.mxu0 }
 0x294   : > { %v2841_v53 = vadd.f32 %v2788_v6, %v6698_v29 }
 0x295   : > { %v5026_v0 = vpop.f32.mrf.mxu1  ;;  %v3107_v45 = vpop.f32.mrf.mxu0 }
 0x296   : > { %v6866_v36 = vadd.f32 %v3096_v46, %v2841_v53 }
 0x297   : > { %v2799_v28 = vpop.f32.mrf.mxu1  ;;  %v5093_v19 = vpop.f32.mrf.mxu0 }
 0x298   : > { %v2842_v25 = vadd.f32 %v2799_v28, %v6703_v26  ;;  %v6879_v26 = vld [vmem:[%s6992_s2] ss:$0 sm:$0xff] }
 0x299   : > { %v5027_v48 = vpop.f32.mrf.mxu1  ;;  %v3110_v35 = vpop.f32.mrf.mxu0 }
 0x29a   : > { %v6869_v22 = vadd.f32 %v3107_v45, %v2842_v25 }
 0x29b   : > { %v2802_v3 = vpop.f32.mrf.mxu1  ;;  %v5164_v40 = vpop.f32.mrf.mxu0 }
 0x29c   : > { %v2843_v18 = vadd.f32 %v2802_v3, %v6712_v60 }
 0x29d   : > { %v5098_v51 = vpop.f32.mrf.mxu1  ;;  %v3531_v10 = vpop.f32.mrf.mxu0 }
 0x29e   : > { %v6872_v29 = vadd.f32 %v3110_v35, %v2843_v18 }
 0x29f   : > { %v3222_v44 = vpop.f32.mrf.mxu1  ;;  %v5165_v49 = vpop.f32.mrf.mxu0 }
 0x2a0   : > { %v3445_v56 = vadd.f32 %v3222_v44, %v6717_v2 }
 0x2a1   : > { %v5099_v63 = vpop.f32.mrf.mxu1  ;;  %v3534_v15 = vpop.f32.mrf.mxu0 }
 0x2a2   : > { %v3754_v58 = vadd.f32 %v3531_v10, %v3445_v56 }
 0x2a3   : > { %v3225_v60 = vpop.f32.mrf.mxu1  ;;  %v5168_v13 = vpop.f32.mrf.mxu0 }
 0x2a4   : > { %v3786_v2 = vadd.f32 %v6879_v26, %v3754_v58  ;;  %v3446_v31 = vadd.f32 %v3225_v60, %v6726_v5 }
 0x2a5   : > { %v5102_v37 = vpop.f32.mrf.mxu1  ;;  %v3545_v61 = vpop.f32.mrf.mxu0 }
 0x2a6   : > { %3818 = vst [vmem:[%s6884_s20] sm:$0xff] %v3786_v2  ;;  %v3755_v41 = vadd.f32 %v3534_v15, %v3446_v31 }
 0x2a7   : > { %v3236_v14 = vpop.f32.mrf.mxu1  ;;  %v5169_v27 = vpop.f32.mrf.mxu0 }
 0x2a8   : > { %v3787_v23 = vadd.f32 %v6879_v26, %v3755_v41  ;;  %v3447_v46 = vadd.f32 %v3236_v14, %v6731_v1 }
 0x2a9   : > { %v5103_v6 = vpop.f32.mrf.mxu1  ;;  %v3548_v11 = vpop.f32.mrf.mxu0 }
 0x2aa   : > { %3819 = vst [vmem:[%s6884_s20 + $0x8] sm:$0xff] %v3787_v23  ;;  %v3756_v53 = vadd.f32 %v3545_v61, %v3447_v46 }
 0x2ab   : > { %v3239_v0 = vpop.f32.mrf.mxu1  ;;  %v5172_v45 = vpop.f32.mrf.mxu0 }
 0x2ac   : > { %v3788_v5 = vadd.f32 %v6879_v26, %v3756_v53  ;;  %v3448_v28 = vadd.f32 %v3239_v0, %v6740_v24 }
 0x2ad   : > { %v5106_v19 = vpop.f32.mrf.mxu1  ;;  %v3559_v25 = vpop.f32.mrf.mxu0 }
 0x2ae   : > { %3820 = vst [vmem:[%s6884_s20 + $0x10] sm:$0xff] %v3788_v5  ;;  %v3757_v48 = vadd.f32 %v3548_v11, %v3448_v28 }
 0x2af   : > { %v3250_v35 = vpop.f32.mrf.mxu1  ;;  %v5173_v3 = vpop.f32.mrf.mxu0 }
 0x2b0   : > { %v3789_v1 = vadd.f32 %v6879_v26, %v3757_v48  ;;  %v3449_v40 = vadd.f32 %v3250_v35, %v6745_v33 }
 0x2b1   : > { %v5107_v18 = vpop.f32.mrf.mxu1  ;;  %v3562_v51 = vpop.f32.mrf.mxu0 }
 0x2b2   : > { %3821 = vst [vmem:[%s6884_s20 + $0x18] sm:$0xff] %v3789_v1  ;;  %v3758_v10 = vadd.f32 %v3559_v25, %v3449_v40 }
 0x2b3   : > { %v3253_v44 = vpop.f32.mrf.mxu1  ;;  %v5176_v49 = vpop.f32.mrf.mxu0 }
 0x2b4   : > { %v3790_v24 = vadd.f32 %v6879_v26, %v3758_v10  ;;  %v3450_v56 = vadd.f32 %v3253_v44, %v6754_v57 }
 0x2b5   : > { %v5110_v63 = vpop.f32.mrf.mxu1  ;;  %v3573_v15 = vpop.f32.mrf.mxu0 }
 0x2b6   : > { %3822 = vst [vmem:[%s6884_s20 + $0x20] sm:$0xff] %v3790_v24  ;;  %v3759_v58 = vadd.f32 %v3562_v51, %v3450_v56 }
 0x2b7   : > { %v3264_v60 = vpop.f32.mrf.mxu1  ;;  %v5177_v13 = vpop.f32.mrf.mxu0 }
 0x2b8   : > { %v3791_v33 = vadd.f32 %v6879_v26, %v3759_v58  ;;  %v3451_v2 = vadd.f32 %v3264_v60, %v6759_v55 }
 0x2b9   : > { %v5111_v31 = vpop.f32.mrf.mxu1  ;;  %v3576_v37 = vpop.f32.mrf.mxu0 }
 0x2ba   : > { %3823 = vst [vmem:[%s6884_s20 + $0x28] sm:$0xff] %v3791_v33  ;;  %v3760_v61 = vadd.f32 %v3573_v15, %v3451_v2 }
 0x2bb   : > { %v3267_v41 = vpop.f32.mrf.mxu1  ;;  %v5180_v14 = vpop.f32.mrf.mxu0 }
 0x2bc   : > { %v3792_v57 = vadd.f32 %v6879_v26, %v3760_v61  ;;  %v3452_v27 = vadd.f32 %v3267_v41, %v6768_v59 }
 0x2bd   : > { %v5114_v23 = vpop.f32.mrf.mxu1  ;;  %v3587_v46 = vpop.f32.mrf.mxu0 }
 0x2be   : > { %3824 = vst [vmem:[%s6884_s20 + $0x30] sm:$0xff] %v3792_v57  ;;  %v3761_v6 = vadd.f32 %v3576_v37, %v3452_v27 }
 0x2bf   : > { %v3278_v11 = vpop.f32.mrf.mxu1  ;;  %v5181_v53 = vpop.f32.mrf.mxu0 }
 0x2c0   : > { %v3793_v55 = vadd.f32 %v6879_v26, %v3761_v6  ;;  %v3453_v0 = vadd.f32 %v3278_v11, %v6773_v4 }
 0x2c1   : > { %v5115_v45 = vpop.f32.mrf.mxu1  ;;  %v3590_v5 = vpop.f32.mrf.mxu0 }
 0x2c2   : > { %3825 = vst [vmem:[%s6884_s20 + $0x38] sm:$0xff] %v3793_v55  ;;  %v3762_v28 = vadd.f32 %v3587_v46, %v3453_v0 }
 0x2c3   : > { %v3281_v19 = vpop.f32.mrf.mxu1  ;;  %v5184_v25 = vpop.f32.mrf.mxu0 }
 0x2c4   : > { %v3794_v59 = vadd.f32 %v6879_v26, %v3762_v28  ;;  %v3454_v48 = vadd.f32 %v3281_v19, %v6782_v52 }
 0x2c5   : > { %v5118_v35 = vpop.f32.mrf.mxu1  ;;  %v3601_v3 = vpop.f32.mrf.mxu0 }
 0x2c6   : > { %3826 = vst [vmem:[%s6884_s20 + $0x40] sm:$0xff] %v3794_v59  ;;  %v3763_v1 = vadd.f32 %v3590_v5, %v3454_v48 }
 0x2c7   : > { %v3292_v40 = vpop.f32.mrf.mxu1  ;;  %v5185_v18 = vpop.f32.mrf.mxu0 }
 0x2c8   : > { %v3795_v4 = vadd.f32 %v6879_v26, %v3763_v1  ;;  %v3455_v51 = vadd.f32 %v3292_v40, %v6792_v21 }
 0x2c9   : > { %v5119_v10 = vpop.f32.mrf.mxu1  ;;  %v3604_v44 = vpop.f32.mrf.mxu0 }
 0x2ca   : > { %3827 = vst [vmem:[%s6884_s20 + $0x48] sm:$0xff] %v3795_v4  ;;  %v3764_v49 = vadd.f32 %v3601_v3, %v3455_v51 }
 0x2cb   : > { %v3295_v24 = vpop.f32.mrf.mxu1  ;;  %v5188_v56 = vpop.f32.mrf.mxu0 }
 0x2cc   : > { %v3796_v52 = vadd.f32 %v6879_v26, %v3764_v49  ;;  %v3456_v63 = vadd.f32 %v3295_v24, %v6803_v7 }
 0x2cd   : > { %v5122_v15 = vpop.f32.mrf.mxu1  ;;  %v3615_v58 = vpop.f32.mrf.mxu0 }
 0x2ce   : > { %3828 = vst [vmem:[%s6884_s20 + $0x50] sm:$0xff] %v3796_v52  ;;  %v3765_v60 = vadd.f32 %v3604_v44, %v3456_v63 }
 0x2cf   : > { %v3306_v13 = vpop.f32.mrf.mxu1  ;;  %v5189_v33 = vpop.f32.mrf.mxu0 }
 0x2d0   : > { %v3797_v21 = vadd.f32 %v6879_v26, %v3765_v60  ;;  %v3457_v2 = vadd.f32 %v3306_v13, %v6812_v30 }
 0x2d1   : > { %v5123_v31 = vpop.f32.mrf.mxu1  ;;  %v3618_v37 = vpop.f32.mrf.mxu0 }
 0x2d2   : > { %3829 = vst [vmem:[%s6884_s20 + $0x58] sm:$0xff] %v3797_v21  ;;  %v3766_v61 = vadd.f32 %v3615_v58, %v3457_v2 }
 0x2d3   : > { %v3309_v41 = vpop.f32.mrf.mxu1  ;;  %v5192_v14 = vpop.f32.mrf.mxu0 }
 0x2d4   : > { %v3798_v7 = vadd.f32 %v6879_v26, %v3766_v61  ;;  %v3458_v57 = vadd.f32 %v3309_v41, %v6818_v42 }
 0x2d5   : > { %v5126_v27 = vpop.f32.mrf.mxu1  ;;  %v3629_v23 = vpop.f32.mrf.mxu0 }
 0x2d6   : > { %3830 = vst [vmem:[%s6884_s20 + $0x60] sm:$0xff] %v3798_v7  ;;  %v3767_v46 = vadd.f32 %v3618_v37, %v3458_v57 }
 0x2d7   : > { %v3320_v6 = vpop.f32.mrf.mxu1  ;;  %v5193_v11 = vpop.f32.mrf.mxu0 }
 0x2d8   : > { %v3799_v30 = vadd.f32 %v6879_v26, %v3767_v46  ;;  %v3459_v53 = vadd.f32 %v3320_v6, %v6821_v47 }
 0x2d9   : > { %v5127_v55 = vpop.f32.mrf.mxu1  ;;  %v3632_v0 = vpop.f32.mrf.mxu0 }
 0x2da   : > { %3831 = vst [vmem:[%s6884_s20 + $0x68] sm:$0xff] %v3799_v30  ;;  %v3768_v45 = vadd.f32 %v3629_v23, %v3459_v53 }
 0x2db   : > { %v3323_v5 = vpop.f32.mrf.mxu1  ;;  %v5196_v28 = vpop.f32.mrf.mxu0 }
 0x2dc   : > { %v3800_v42 = vadd.f32 %v6879_v26, %v3768_v45  ;;  %v3460_v19 = vadd.f32 %v3323_v5, %v6824_v12 }
 0x2dd   : > { %v5130_v25 = vpop.f32.mrf.mxu1  ;;  %v3643_v59 = vpop.f32.mrf.mxu0 }
 0x2de   : > { %3832 = vst [vmem:[%s6884_s20 + $0x70] sm:$0xff] %v3800_v42  ;;  %v3769_v48 = vadd.f32 %v3632_v0, %v3460_v19 }
 0x2df   : > { %v3334_v35 = vpop.f32.mrf.mxu1  ;;  %v5197_v3 = vpop.f32.mrf.mxu0 }
 0x2e0   : > { %v3801_v47 = vadd.f32 %v6879_v26, %v3769_v48  ;;  %v3461_v1 = vadd.f32 %v3334_v35, %v6827_v39 }
 0x2e1   : > { %v5131_v40 = vpop.f32.mrf.mxu1  ;;  %v3646_v18 = vpop.f32.mrf.mxu0 }
 0x2e2   : > { %3833 = vst [vmem:[%s6884_s20 + $0x78] sm:$0xff] %v3801_v47  ;;  %v3770_v4 = vadd.f32 %v3643_v59, %v3461_v1 }
 0x2e3   : > { %v3337_v51 = vpop.f32.mrf.mxu1  ;;  %v5200_v10 = vpop.f32.mrf.mxu0 }
 0x2e4   : > { %v3802_v12 = vadd.f32 %v6879_v26, %v3770_v4  ;;  %v3462_v44 = vadd.f32 %v3337_v51, %v6830_v16 }
 0x2e5   : > { %v5134_v49 = vpop.f32.mrf.mxu1  ;;  %v3657_v24 = vpop.f32.mrf.mxu0 }
 0x2e6   : > { %3834 = vst [vmem:[%s6884_s20 + $0x80] sm:$0xff] %v3802_v12  ;;  %v3771_v56 = vadd.f32 %v3646_v18, %v3462_v44 }
 0x2e7   : > { %v3348_v52 = vpop.f32.mrf.mxu1  ;;  %v5201_v63 = vpop.f32.mrf.mxu0 }
 0x2e8   : > { %v3803_v39 = vadd.f32 %v6879_v26, %v3771_v56  ;;  %v3463_v15 = vadd.f32 %v3348_v52, %v6833_v62 }
 0x2e9   : > { %v5135_v58 = vpop.f32.mrf.mxu1  ;;  %v3660_v60 = vpop.f32.mrf.mxu0 }
 0x2ea   : > { %3835 = vst [vmem:[%s6884_s20 + $0x88] sm:$0xff] %v3803_v39  ;;  %v3772_v13 = vadd.f32 %v3657_v24, %v3463_v15 }
 0x2eb   : > { %v3351_v33 = vpop.f32.mrf.mxu1  ;;  %v5204_v21 = vpop.f32.mrf.mxu0 }
 0x2ec   : > { %v3804_v16 = vadd.f32 %v6879_v26, %v3772_v13  ;;  %v3464_v2 = vadd.f32 %v3351_v33, %v6836_v54 }
 0x2ed   : > { %v5138_v31 = vpop.f32.mrf.mxu1  ;;  %v3671_v37 = vpop.f32.mrf.mxu0 }
 0x2ee   : > { %3836 = vst [vmem:[%s6884_s20 + $0x90] sm:$0xff] %v3804_v16  ;;  %v3773_v61 = vadd.f32 %v3660_v60, %v3464_v2 }
 0x2ef   : > { %v3362_v41 = vpop.f32.mrf.mxu1  ;;  %v5205_v14 = vpop.f32.mrf.mxu0 }
 0x2f0   : > { %v3805_v62 = vadd.f32 %v6879_v26, %v3773_v61  ;;  %v3465_v7 = vadd.f32 %v3362_v41, %v6839_v8 }
 0x2f1   : > { %v5139_v57 = vpop.f32.mrf.mxu1  ;;  %v3674_v27 = vpop.f32.mrf.mxu0 }
 0x2f2   : > { %3837 = vst [vmem:[%s6884_s20 + $0x98] sm:$0xff] %v3805_v62  ;;  %v3774_v23 = vadd.f32 %v3671_v37, %v3465_v7 }
 0x2f3   : > { %v3365_v46 = vpop.f32.mrf.mxu1  ;;  %v5208_v6 = vpop.f32.mrf.mxu0 }
 0x2f4   : > { %v3806_v54 = vadd.f32 %v6879_v26, %v3774_v23  ;;  %v3466_v11 = vadd.f32 %v3365_v46, %v6842_v9 }
 0x2f5   : > { %v5142_v30 = vpop.f32.mrf.mxu1  ;;  %v3685_v53 = vpop.f32.mrf.mxu0 }
 0x2f6   : > { %3838 = vst [vmem:[%s6884_s20 + $0xa0] sm:$0xff] %v3806_v54  ;;  %v3775_v55 = vadd.f32 %v3674_v27, %v3466_v11 }
 0x2f7   : > { %v3376_v0 = vpop.f32.mrf.mxu1  ;;  %v5209_v45 = vpop.f32.mrf.mxu0 }
 0x2f8   : > { %v3807_v8 = vadd.f32 %v6879_v26, %v3775_v55  ;;  %v3467_v5 = vadd.f32 %v3376_v0, %v6845_v20 }
 0x2f9   : > { %v5143_v28 = vpop.f32.mrf.mxu1  ;;  %v3688_v42 = vpop.f32.mrf.mxu0 }
 0x2fa   : > { %3839 = vst [vmem:[%s6884_s20 + $0xa8] sm:$0xff] %v3807_v8  ;;  %v3776_v19 = vadd.f32 %v3685_v53, %v3467_v5 }
 0x2fb   : > { %v3379_v25 = vpop.f32.mrf.mxu1  ;;  %v5212_v59 = vpop.f32.mrf.mxu0 }
 0x2fc   : > { %v3808_v9 = vadd.f32 %v6879_v26, %v3776_v19  ;;  %v3468_v48 = vadd.f32 %v3379_v25, %v6848_v43 }
 0x2fd   : > { %v5146_v35 = vpop.f32.mrf.mxu1  ;;  %v3699_v3 = vpop.f32.mrf.mxu0 }
 0x2fe   : > { %3840 = vst [vmem:[%s6884_s20 + $0xb0] sm:$0xff] %v3808_v9  ;;  %v3777_v47 = vadd.f32 %v3688_v42, %v3468_v48 }
 0x2ff   : > { %v3390_v1 = vpop.f32.mrf.mxu1  ;;  %v5213_v40 = vpop.f32.mrf.mxu0 }
 0x300   : > { %v3809_v20 = vadd.f32 %v6879_v26, %v3777_v47  ;;  %v3469_v18 = vadd.f32 %v3390_v1, %v6851_v50 }
 0x301   : > { %v5147_v4 = vpop.f32.mrf.mxu1  ;;  %v3702_v51 = vpop.f32.mrf.mxu0 }
 0x302   : > { %3841 = vst [vmem:[%s6884_s20 + $0xb8] sm:$0xff] %v3809_v20  ;;  %v3778_v10 = vadd.f32 %v3699_v3, %v3469_v18 }
 0x303   : > { %v3393_v12 = vpop.f32.mrf.mxu1  ;;  %v5216_v44 = vpop.f32.mrf.mxu0 }
 0x304   : > { %v3810_v43 = vadd.f32 %v6879_v26, %v3778_v10  ;;  %v3470_v49 = vadd.f32 %v3393_v12, %v6854_v32 }
 0x305   : > { %v5150_v24 = vpop.f32.mrf.mxu1  ;;  %v3713_v56 = vpop.f32.mrf.mxu0 }
 0x306   : > { %3842 = vst [vmem:[%s6884_s20 + $0xc0] sm:$0xff] %v3810_v43  ;;  %v3779_v52 = vadd.f32 %v3702_v51, %v3470_v49 }
 0x307   : > { %v3404_v63 = vpop.f32.mrf.mxu1  ;;  %v5217_v39 = vpop.f32.mrf.mxu0 }
 0x308   : > { %v3811_v50 = vadd.f32 %v6879_v26, %v3779_v52  ;;  %v3471_v15 = vadd.f32 %v3404_v63, %v6857_v34 }
 0x309   : > { %v5151_v58 = vpop.f32.mrf.mxu1  ;;  %v3716_v60 = vpop.f32.mrf.mxu0 }
 0x30a   : > { %3843 = vst [vmem:[%s6884_s20 + $0xc8] sm:$0xff] %v3811_v50  ;;  %v3780_v13 = vadd.f32 %v3713_v56, %v3471_v15 }
 0x30b   : > { %v3407_v33 = vpop.f32.mrf.mxu1  ;;  %v5220_v21 = vpop.f32.mrf.mxu0 }
 0x30c   : > { %v3812_v32 = vadd.f32 %v6879_v26, %v3780_v13  ;;  %v3472_v16 = vadd.f32 %v3407_v33, %v6860_v38 }
 0x30d   : > { %v5154_v2 = vpop.f32.mrf.mxu1  ;;  %v3727_v31 = vpop.f32.mrf.mxu0 }
 0x30e   : > { %3844 = vst [vmem:[%s6884_s20 + $0xd0] sm:$0xff] %v3812_v32  ;;  %v3781_v37 = vadd.f32 %v3716_v60, %v3472_v16 }
 0x30f   : > { %v3418_v61 = vpop.f32.mrf.mxu1  ;;  %v5221_v41 = vpop.f32.mrf.mxu0 }
 0x310   : > { %v3813_v34 = vadd.f32 %v6879_v26, %v3781_v37  ;;  %v3473_v14 = vadd.f32 %v3418_v61, %v6863_v17 }
 0x311   : > { %v5155_v62 = vpop.f32.mrf.mxu1  ;;  %v3730_v7 = vpop.f32.mrf.mxu0 }
 0x312   : > { %3845 = vst [vmem:[%s6884_s20 + $0xd8] sm:$0xff] %v3813_v34  ;;  %v3782_v57 = vadd.f32 %v3727_v31, %v3473_v14 }
 0x313   : > { %v3421_v27 = vpop.f32.mrf.mxu1  ;;  %v5224_v23 = vpop.f32.mrf.mxu0 }
 0x314   : > { %v3814_v38 = vadd.f32 %v6879_v26, %v3782_v57  ;;  %v3474_v46 = vadd.f32 %v3421_v27, %v6866_v36 }
 0x315   : > { %v5158_v6 = vpop.f32.mrf.mxu1  ;;  %v3741_v54 = vpop.f32.mrf.mxu0 }
 0x316   : > { %3846 = vst [vmem:[%s6884_s20 + $0xe0] sm:$0xff] %v3814_v38  ;;  %v3783_v11 = vadd.f32 %v3730_v7, %v3474_v46 }
 0x317   : > { %v3432_v30 = vpop.f32.mrf.mxu1  ;;  %v5225_v53 = vpop.f32.mrf.mxu0 }
 0x318   : > { %v3815_v17 = vadd.f32 %v6879_v26, %v3783_v11  ;;  %v3475_v55 = vadd.f32 %v3432_v30, %v6869_v22 }
 0x319   : > { %v5159_v0 = vpop.f32.mrf.mxu1  ;;  %v3744_v28 = vpop.f32.mrf.mxu0 }
 0x31a   : > { %3847 = vst [vmem:[%s6884_s20 + $0xe8] sm:$0xff] %v3815_v17  ;;  %v3784_v45 = vadd.f32 %v3741_v54, %v3475_v55 }
 0x31b   : > { %v3435_v8 = vpop.f32.mrf.mxu1 }
 0x31c   : > { %v3816_v5 = vadd.f32 %v6879_v26, %v3784_v45  ;;  %v3476_v36 = vadd.f32 %v3435_v8, %v6872_v29 }
 0x31e   : > { %3848 = vst [vmem:[%s6884_s20 + $0xf0] sm:$0xff] %v3816_v5  ;;  %v3785_v42 = vadd.f32 %v3744_v28, %v3476_v36 }
 0x320   : > { %v3817_v19 = vadd.f32 %v6879_v26, %v3785_v42 }
 0x322   : > { %3849 = vst [vmem:[%s6884_s20 + $0xf8] sm:$0xff] %v3817_v19 }
 0x323 PF: > { %s13_s14 = sadd.s32 1, %s5352_s14   ;;  %s7269_s12 = smov %s5348_s13 }
 0x324   : > { %p10_p5 = scmp.ge.s32.totalorder %s13_s14, 4   ;;  %s7270_s13 = smov %s7272_s15 }
 0x326   :  { %12 = sbr.rel (!%p10_p5) target bundleno = 2 (0x2), region = 76 }

</bundles_post_ra>
